<compile_context>
chip_gen: v5e
topology: v5e:2x2
jax: 0.10.0
libtpu: 0.0.40
codegen_flags: <defaults>
</compile_context>

<pallas_src>
import jax
import jax.numpy as jnp
from jax import lax
from jax.experimental import pallas as pl
from jax.experimental.pallas import tpu as pltpu


# -------------------- Pallas kernel: fused patches @ banded-weight + bias + ReLU ----------

def _mm_bias_relu_kernel(p_ref, w_ref, b_ref, o_ref):
    acc = jnp.dot(p_ref[...], w_ref[...], preferred_element_type=jnp.float32)
    o_ref[...] = jnp.maximum(acc + b_ref[...], 0.0).astype(o_ref.dtype)


def _pick_tile(m, cap=512):
    """Largest tile <= cap that divides m and is sublane-aligned (or the full dim)."""
    for t in range(min(m, cap), 0, -1):
        if m % t == 0 and (t % 8 == 0 or t == m):
            return t
    return m


def _conv_rows_call(patches, bweight, bias, out_dtype):
    """patches: (M, K) bf16, bweight: (K, L) bf16, bias: (1, L) f32 -> (M, L)."""
    m, k = patches.shape
    l = bweight.shape[1]
    tile_m = _pick_tile(m)
    return pl.pallas_call(
        _mm_bias_relu_kernel,
        out_shape=jax.ShapeDtypeStruct((m, l), out_dtype),
        grid=(m // tile_m,),
        in_specs=[
            pl.BlockSpec((tile_m, k), lambda i: (i, 0)),
            pl.BlockSpec((k, l), lambda i: (0, 0)),
            pl.BlockSpec((1, l), lambda i: (0, 0)),
        ],
        out_specs=pl.BlockSpec((tile_m, l), lambda i: (i, 0)),
        compiler_params=pltpu.CompilerParams(dimension_semantics=("parallel",)),
    )(patches, bweight, bias)


# -------------------- host-side (XLA) prep: tap slabs + banded weights --------------------

def _tap_slabs(x, kd_n, kh_n, od, oh):
    """x: (N, D, H, W*C) -> (N*od*oh, kd_n*kh_n*W*C [+pad to mult of 8]) bf16.

    Column block t = kd*kh_n + kh holds x[n, d+kd, h+kh, :]."""
    n, _, _, wc = x.shape
    slabs = [x[:, kd:kd + od, kh:kh + oh, :]
             for kd in range(kd_n) for kh in range(kh_n)]
    k = kd_n * kh_n * wc
    pad = (-k) % 8
    if pad:
        slabs.append(jnp.zeros((n, od, oh, pad), x.dtype))
    p = jnp.concatenate(slabs, axis=-1)
    return p.reshape(n * od * oh, k + pad)


def _banded_weight_and_bias(w, b, s, lanes):
    """w: (CO, CI, KD, KH, KW) torch Conv3d layout, s: input width.

    Returns B (KD*KH*s*CI [+pad], lanes) bf16 with
      B[((kd*KH+kh)*s + w_in)*CI + ci, w_out*CO + co] = w[co, ci, kd, kh, w_in - w_out]
    (zero outside the 0 <= w_in - w_out < KW band / padding), and bias_row (1, lanes) f32
    with bias_row[0, w_out*CO + co] = b[co]."""
    co_n, ci_n, kd_n, kh_n, kw_n = w.shape
    ow = s - kw_n + 1
    w_in = jnp.arange(s)[:, None]
    w_out = jnp.arange(ow)[None, :]
    diff = w_in - w_out                                    # (s, ow)
    valid = (diff >= 0) & (diff < kw_n)
    kw_idx = jnp.clip(diff, 0, kw_n - 1)
    wk = jnp.transpose(w, (2, 3, 4, 1, 0))                 # (KD, KH, KW, CI, CO)
    band = wk[:, :, kw_idx, :, :]                          # (KD, KH, s, ow, CI, CO)
    band = band * valid[None, None, :, :, None, None].astype(w.dtype)
    band = jnp.transpose(band, (0, 1, 2, 4, 3, 5))         # (KD, KH, s, CI, ow, CO)
    rows = kd_n * kh_n * s * ci_n
    bmat = band.reshape(rows, ow * co_n)
    row_pad = (-rows) % 8
    bmat = jnp.pad(bmat, ((0, row_pad), (0, lanes - ow * co_n))).astype(jnp.bfloat16)
    bias_row = jnp.pad(jnp.tile(b, ow), (0, lanes - ow * co_n)).astype(jnp.float32)
    return bmat, bias_row[None, :]


# -------------------- forward --------------------

def net3d4_forward(x, params):
    """x: (N, 1, D, H, W) float32 -> (N, 2) float32."""
    w1, b1, w2, b2, wf, bf = params
    n = x.shape[0]
    k = 5

    # ---- conv1 (1->6, k=5) + ReLU ----
    s1 = x.shape[2]                                   # 32
    od1 = s1 - k + 1                                  # 28
    co1 = w1.shape[0]                                 # 6
    l1 = ((od1 * co1 + 127) // 128) * 128             # 256 lanes
    x0 = x.reshape(n, s1, s1, s1).astype(jnp.bfloat16)        # C_in = 1
    p1 = _tap_slabs(x0, k, k, od1, od1)               # (N*784, 800) bf16
    bmat1, bias1 = _banded_weight_and_bias(w1, b1, s1, l1)
    y1 = _conv_rows_call(p1, bmat1, bias1, jnp.bfloat16)      # (N*784, 256)
    y1 = y1[:, :od1 * co1].reshape(n, od1, od1, od1, co1)     # (N,28,28,28,6)

    # MaxPool3d(2, 2) on the small conv output (XLA reshape-max, <1 MB).
    pd1 = od1 // 2                                    # 14
    y1p = y1.reshape(n, pd1, 2, pd1, 2, pd1, 2, co1).max(axis=(2, 4, 6))

    # ---- conv2 (6->16, k=5) + ReLU ----
    s2 = pd1                                          # 14
    od2 = s2 - k + 1                                  # 10
    co2, ci2 = w2.shape[0], w2.shape[1]               # 16, 6
    l2 = ((od2 * co2 + 127) // 128) * 128             # 256
    pd2 = od2 // 2                                    # 5
    assert od2 == 2 * pd2 and co2 * pd2 ** 3 == 2000, \
        "input size must yield the 2000-d embedding"
    h1 = y1p.reshape(n, s2, s2, s2 * ci2)             # (N,14,14,84) bf16
    p2 = _tap_slabs(h1, k, k, od2, od2)               # (N*100, 2104) bf16
    bmat2, bias2 = _banded_weight_and_bias(w2, b2, s2, l2)
    y2 = _conv_rows_call(p2, bmat2, bias2, jnp.float32)       # (N*100, 256)
    y2 = y2[:, :od2 * co2].reshape(n, od2, od2, od2, co2)     # (N,10,10,10,16) f32

    # ---- AdaptiveAvgPool3d((5,5,5)) + flatten (torch C,D,H,W order) + fc1, folded
    #      into one (N, 16000) @ (16000, 2) matmul with a pre-permuted fc weight. ----
    dd = jnp.arange(od2)
    cc = jnp.arange(co2)
    lin = (cc[None, None, None, :] * pd2 ** 3
           + (dd[:, None, None, None] // 2) * pd2 ** 2
           + (dd[None, :, None, None] // 2) * pd2
           + (dd[None, None, :, None] // 2))          # (10,10,10,16) -> fc input index
    g = wf.T[lin.reshape(-1)] * (1.0 / 8.0)           # (16000, 2), pool scale folded in
    out = y2.reshape(n, -1) @ g + bf
    # TODO(synk): nn.Dropout(0.5) is identity in eval mode; train-mode masking omitted.
    return out


# -------------------- params + pure-JAX reference --------------------

def init_params(key):
    ks = jax.random.split(key, 6)

    def u(kk, shape, fan_in):
        bound = 1.0 / jnp.sqrt(jnp.float32(fan_in))
        return jax.random.uniform(kk, shape, jnp.float32, -bound, bound)

    w1 = u(ks[0], (6, 1, 5, 5, 5), 125)      # torch Conv3d layout (O, I, kD, kH, kW)
    b1 = u(ks[1], (6,), 125)
    w2 = u(ks[2], (16, 6, 5, 5, 5), 750)
    b2 = u(ks[3], (16,), 750)
    wf = u(ks[4], (2, 2000), 2000)           # torch Linear layout (out, in)
    bf = u(ks[5], (2,), 2000)
    return (w1, b1, w2, b2, wf, bf)


def reference_forward(x, params):
    w1, b1, w2, b2, wf, bf = params
    n = x.shape[0]
    dn = ("NCDHW", "OIDHW", "NCDHW")
    y = lax.conv_general_dilated(x, w1, (1, 1, 1), "VALID", dimension_numbers=dn)
    y = jnp.maximum(y + b1.reshape(1, 6, 1, 1, 1), 0.0)
    d = y.shape[2] // 2
    y = y.reshape(n, 6, d, 2, d, 2, d, 2).max(axis=(3, 5, 7))
    y = lax.conv_general_dilated(y, w2, (1, 1, 1), "VALID", dimension_numbers=dn)
    y = jnp.maximum(y + b2.reshape(1, 16, 1, 1, 1), 0.0)
    d2 = y.shape[2] // 2
    y = y.reshape(n, 16, d2, 2, d2, 2, d2, 2).mean(axis=(3, 5, 7))
    return y.reshape(n, -1) @ wf.T + bf


# -------------------- main --------------------

if __name__ == "__main__":
    key = jax.random.PRNGKey(0)
    kx, kp = jax.random.split(key)
    # Smallest spatial size compatible with lin_dim=2000: 32 -> conv 28 -> pool 14
    # -> conv 10 -> adaptive avg 5; 16*5*5*5 = 2000.
    x = jax.random.normal(kx, (2, 1, 32, 32, 32), jnp.float32)
    params = init_params(kp)

    out = jax.jit(net3d4_forward)(x, params)
    out = jax.block_until_ready(out)

    ref = reference_forward(x, params)
    assert out.shape == (2, 2), out.shape
    if not jnp.allclose(out, ref, atol=2e-2, rtol=2e-2):
        raise AssertionError(
            f"mismatch vs reference, max abs diff = {float(jnp.max(jnp.abs(out - ref)))}")

    print("KERNEL_OK")
</pallas_src>

<mosaic_0001>
module attributes {stable_mosaic.version = 11 : i64} {
  func.func @_mm_bias_relu_kernel(%arg0: i32, %arg1: memref<392x800xbf16, #tpu.memory_space<vmem>>, %arg2: memref<800x256xbf16, #tpu.memory_space<vmem>>, %arg3: memref<1x256xf32, #tpu.memory_space<vmem>>, %arg4: memref<392x256xbf16, #tpu.memory_space<vmem>>) attributes {dimension_semantics = [#tpu.dimension_semantics<parallel>], iteration_bounds = array<i64: 4>, scalar_prefetch = 0 : i64, scratch_operands = 0 : i64, tpu.core_type = #tpu.core_type<tc>, window_params = [{transform_indices = @transform_0, window_bounds = array<i64: 392, 800>}, {pipeline_mode = #tpu.pipeline_mode<synchronous>, transform_indices = @transform_1, window_bounds = array<i64: 800, 256>}, {pipeline_mode = #tpu.pipeline_mode<synchronous>, transform_indices = @transform_2, window_bounds = array<i64: 1, 256>}, {transform_indices = @transform_3, window_bounds = array<i64: 392, 256>}]} {
    %c0 = arith.constant 0 : index
    %c0_0 = arith.constant 0 : index
    %0 = vector.load %arg1[%c0, %c0_0] : memref<392x800xbf16, #tpu.memory_space<vmem>>, vector<392x800xbf16>
    %c0_1 = arith.constant 0 : index
    %c0_2 = arith.constant 0 : index
    %1 = vector.load %arg2[%c0_1, %c0_2] : memref<800x256xbf16, #tpu.memory_space<vmem>>, vector<800x256xbf16>
    %cst = arith.constant dense<0.000000e+00> : vector<392x256xf32>
    %2 = tpu.matmul %0, %1, %cst {dimension_numbers = #tpu.dot_dimension_numbers<[1], [0], [0], [1], [0, 0, 1, 1], [], []>} : vector<392x800xbf16>, vector<800x256xbf16>, vector<392x256xf32> -> vector<392x256xf32>
    %c0_3 = arith.constant 0 : index
    %c0_4 = arith.constant 0 : index
    %3 = vector.load %arg3[%c0_3, %c0_4] : memref<1x256xf32, #tpu.memory_space<vmem>>, vector<1x256xf32>
    %4 = vector.broadcast %3 : vector<1x256xf32> to vector<392x256xf32>
    %5 = arith.addf %2, %4 : vector<392x256xf32>
    %cst_5 = arith.constant 0.000000e+00 : f32
    %6 = vector.broadcast %cst_5 : f32 to vector<392x256xf32>
    %7 = arith.maximumf %5, %6 : vector<392x256xf32>
    %8 = arith.truncf %7 : vector<392x256xf32> to vector<392x256xbf16>
    %c0_6 = arith.constant 0 : index
    %c0_7 = arith.constant 0 : index
    %9 = vector.load %arg4[%c0_6, %c0_7] : memref<392x256xbf16, #tpu.memory_space<vmem>>, vector<392x256xbf16>
    tpu.vector_store %arg4[%c0_6, %c0_7], %8 {strides = array<i32>} : memref<392x256xbf16, #tpu.memory_space<vmem>>, vector<392x256xbf16>,
    return
  }
  func.func @transform_0(%arg0: i32) -> (i32, i32) {
    %c0_i32 = arith.constant 0 : i32
    %c0_i32_0 = arith.constant 0 : i32
    return %arg0, %c0_i32 : i32, i32
  }
  func.func @transform_1(%arg0: i32) -> (i32, i32) {
    %c0_i32 = arith.constant 0 : i32
    %c0_i32_0 = arith.constant 0 : i32
    %c0_i32_1 = arith.constant 0 : i32
    return %c0_i32, %c0_i32_0 : i32, i32
  }
  func.func @transform_2(%arg0: i32) -> (i32, i32) {
    %c0_i32 = arith.constant 0 : i32
    %c0_i32_0 = arith.constant 0 : i32
    %c0_i32_1 = arith.constant 0 : i32
    return %c0_i32, %c0_i32_0 : i32, i32
  }
  func.func @transform_3(%arg0: i32) -> (i32, i32) {
    %c0_i32 = arith.constant 0 : i32
    %c0_i32_0 = arith.constant 0 : i32
    return %arg0, %c0_i32 : i32, i32
  }
}

module attributes {stable_mosaic.version = 11 : i64} {
  func.func @_mm_bias_relu_kernel(%arg0: i32, %arg1: memref<200x2104xbf16, #tpu.memory_space<vmem>>, %arg2: memref<2104x256xbf16, #tpu.memory_space<vmem>>, %arg3: memref<1x256xf32, #tpu.memory_space<vmem>>, %arg4: memref<200x256xf32, #tpu.memory_space<vmem>>) attributes {dimension_semantics = [#tpu.dimension_semantics<parallel>], iteration_bounds = array<i64: 1>, scalar_prefetch = 0 : i64, scratch_operands = 0 : i64, tpu.core_type = #tpu.core_type<tc>, window_params = [{transform_indices = @transform_0, window_bounds = array<i64: 200, 2104>}, {pipeline_mode = #tpu.pipeline_mode<synchronous>, transform_indices = @transform_1, window_bounds = array<i64: 2104, 256>}, {pipeline_mode = #tpu.pipeline_mode<synchronous>, transform_indices = @transform_2, window_bounds = array<i64: 1, 256>}, {transform_indices = @transform_3, window_bounds = array<i64: 200, 256>}]} {
    %c0 = arith.constant 0 : index
    %c0_0 = arith.constant 0 : index
    %0 = vector.load %arg1[%c0, %c0_0] : memref<200x2104xbf16, #tpu.memory_space<vmem>>, vector<200x2104xbf16>
    %c0_1 = arith.constant 0 : index
    %c0_2 = arith.constant 0 : index
    %1 = vector.load %arg2[%c0_1, %c0_2] : memref<2104x256xbf16, #tpu.memory_space<vmem>>, vector<2104x256xbf16>
    %cst = arith.constant dense<0.000000e+00> : vector<200x256xf32>
    %2 = tpu.matmul %0, %1, %cst {dimension_numbers = #tpu.dot_dimension_numbers<[1], [0], [0], [1], [0, 0, 1, 1], [], []>} : vector<200x2104xbf16>, vector<2104x256xbf16>, vector<200x256xf32> -> vector<200x256xf32>
    %c0_3 = arith.constant 0 : index
    %c0_4 = arith.constant 0 : index
    %3 = vector.load %arg3[%c0_3, %c0_4] : memref<1x256xf32, #tpu.memory_space<vmem>>, vector<1x256xf32>
    %4 = vector.broadcast %3 : vector<1x256xf32> to vector<200x256xf32>
    %5 = arith.addf %2, %4 : vector<200x256xf32>
    %cst_5 = arith.constant 0.000000e+00 : f32
    %6 = vector.broadcast %cst_5 : f32 to vector<200x256xf32>
    %7 = arith.maximumf %5, %6 : vector<200x256xf32>
    %c0_6 = arith.constant 0 : index
    %c0_7 = arith.constant 0 : index
    %8 = vector.load %arg4[%c0_6, %c0_7] : memref<200x256xf32, #tpu.memory_space<vmem>>, vector<200x256xf32>
    tpu.vector_store %arg4[%c0_6, %c0_7], %7 {strides = array<i32>} : memref<200x256xf32, #tpu.memory_space<vmem>>, vector<200x256xf32>,
    return
  }
  func.func @transform_0(%arg0: i32) -> (i32, i32) {
    %c0_i32 = arith.constant 0 : i32
    %c0_i32_0 = arith.constant 0 : i32
    return %arg0, %c0_i32 : i32, i32
  }
  func.func @transform_1(%arg0: i32) -> (i32, i32) {
    %c0_i32 = arith.constant 0 : i32
    %c0_i32_0 = arith.constant 0 : i32
    %c0_i32_1 = arith.constant 0 : i32
    return %c0_i32, %c0_i32_0 : i32, i32
  }
  func.func @transform_2(%arg0: i32) -> (i32, i32) {
    %c0_i32 = arith.constant 0 : i32
    %c0_i32_0 = arith.constant 0 : i32
    %c0_i32_1 = arith.constant 0 : i32
    return %c0_i32, %c0_i32_0 : i32, i32
  }
  func.func @transform_3(%arg0: i32) -> (i32, i32) {
    %c0_i32 = arith.constant 0 : i32
    %c0_i32_0 = arith.constant 0 : i32
    return %arg0, %c0_i32 : i32, i32
  }
}

</mosaic_0001>

<bundles_post_ra>
// kernel: tile.13
= control target key start
LH: loop header
LB: loop body
LE: loop exit
PB: predicated region body
PF: predicated region fallthrough
CT: control target
= control target key end

     0   :  { %s40_s0 = inlined_call_operand.vmem [shape: f32[6], index: 0, kind: input, shape index: {}]   ;;  %s41_s1 = inlined_call_operand.vmem [shape: f32[28,6], index: 1, kind: output, shape index: {}]  }
   0x1   :  { %v4_v0 = vld [vmem:[%s40_s0] ss:$0 sm:$0xff] }
   0x2   :  { %5 = vst [vmem:[%s41_s1] sm:$0xff] %v4_v0 }
   0x3   :  { %12 = vst [vmem:[%s41_s1 + $0x8] sm:$0xff] %v4_v0 }
   0x4   :  { %13 = vst [vmem:[%s41_s1 + $0x10] sm:$0xff] %v4_v0 }
   0x5   :  { %14 = vst [vmem:[%s41_s1 + $0x18] sm:$0xff] %v4_v0 }

// kernel: tile.14
= control target key start
LH: loop header
LB: loop body
LE: loop exit
PB: predicated region body
PF: predicated region fallthrough
CT: control target
= control target key end

     0   :  { %vm9_vm0 = vcmask 15360   ;;  %s241_s12 = smov 126   ;;  %s242_s13 = smov 114   ;;  %vm3_vm1 = vcmask 48128   ;;  %vm13_vm2 = vcmask 31744   ;;  %vm16_vm3 = vcmask 1048560   ;;  %s368_s0 = inlined_call_operand.vmem [shape: f32[28,6], index: 0, kind: input, shape index: {}]   ;;  %s369_s1 = inlined_call_operand.vmem [shape: f32[168], index: 1, kind: output, shape index: {}]  }
   0x1   :  { %v186_v0 = vld [vmem:[%s368_s0 + $0x15] sm:$0x1]   ;;  %v189_v3 = vld [vmem:[%s368_s0 + $0x13] sm:$0x1]   ;;  %v191_v4 = vld [vmem:[%s368_s0 + $0x11] sm:$0x1]  }
   0x2   :  { %v187_v1 = vld [vmem:[%s368_s0 + $0x15] sm:$0x1]   ;;  %26 = vrot.lane.b32.xlu1 %v189_v3, %s242_s13  ;;  %s243_s16 = smov 102   ;;  %v188_v5 = vld [vmem:[%s368_s0 + $0x14] sm:$0x1]   ;;  %s244_s21 = smov 120  }
   0x3   :  { %v10_v2 = vsel %vm9_vm0, %v187_v1, %v186_v0  ;;  %38 = vrot.lane.b32.xlu2 %v191_v4, %s243_s16  ;;  %v190_v6 = vld [vmem:[%s368_s0 + $0x12] sm:$0x1]   ;;  %s245_s22 = smov 108   ;;  %v192_v7 = vld [vmem:[%s368_s0 + $0x10] sm:$0x1]   ;;  %s246_s25 = smov 96  }
   0x4   :  { %11 = vrot.lane.b32.xlu0 %v10_v2, %s241_s12  ;;  %v193_v8 = vld [vmem:[%s368_s0 + $0xf] sm:$0x1]   ;;  %v194_v9 = vld [vmem:[%s368_s0 + $0xe] sm:$0x1]   ;;  %s247_s30 = smov 90   ;;  %s248_s2 = smov 84  }
   0x5   :  { %v195_v10 = vld [vmem:[%s368_s0 + $0xd] sm:$0x1]   ;;  %s249_s5 = smov 78   ;;  %v196_v11 = vld [vmem:[%s368_s0 + $0xc] sm:$0x1]   ;;  %s250_s10 = smov 72  }
   0x6   :  { %v197_v12 = vld [vmem:[%s368_s0 + $0xb] sm:$0x1]   ;;  %s251_s11 = smov 66   ;;  %v198_v13 = vld [vmem:[%s368_s0 + $0xa] sm:$0x1]   ;;  %s252_s14 = smov 60  }
   0x7   :  { %v199_v14 = vld [vmem:[%s368_s0 + $0x9] sm:$0x1]   ;;  %v200_v15 = vld [vmem:[%s368_s0 + $0x8] sm:$0x1]   ;;  %s253_s19 = smov 54   ;;  %s254_s20 = smov 48  }
   0x8   :  { %v201_v16 = vld [vmem:[%s368_s0 + $0x7] sm:$0x1]   ;;  %s255_s23 = smov 42   ;;  %v202_v17 = vld [vmem:[%s368_s0 + $0x6] sm:$0x1]   ;;  %s256_s28 = smov 36  }
   0x9   :  { %v203_v18 = vld [vmem:[%s368_s0 + $0x1b] sm:$0x1]   ;;  %s257_s29 = smov 34   ;;  %v204_v19 = vld [vmem:[%s368_s0 + $0x5] sm:$0x1]   ;;  %s258_s3 = smov 30  }
   0xa   :  { %32 = vrot.lane.b32.xlu1 %v190_v6, %s245_s22  ;;  %v205_v20 = vld [vmem:[%s368_s0 + $0x1a] sm:$0x1]   ;;  %v206_v21 = vld [vmem:[%s368_s0 + $0x4] sm:$0x1]   ;;  %s259_s8 = smov 28   ;;  %s260_s9 = smov 24  }
   0xb   :  { %44 = vrot.lane.b32.xlu2 %v192_v7, %s246_s25  ;;  %v207_v22 = vld [vmem:[%s368_s0 + $0x19] sm:$0x1]   ;;  %s261_s12 = smov 22   ;;  %v208_v23 = vld [vmem:[%s368_s0 + $0x3] sm:$0x1]   ;;  %s262_s17 = smov 18  }
   0xc   :  { %20 = vrot.lane.b32.xlu0 %v188_v5, %s244_s21  ;;  %v209_v24 = vld [vmem:[%s368_s0 + $0x18] sm:$0x1]   ;;  %s263_s18 = smov 16   ;;  %v210_v25 = vld [vmem:[%s368_s0 + $0x2] sm:$0x1]   ;;  %s264_s21 = smov 12  }
   0xd   :  { %v211_v26 = vld [vmem:[%s368_s0 + $0x17] sm:$0x1]   ;;  %v212_v27 = vld [vmem:[%s368_s0 + $0x1] sm:$0x1]   ;;  %s265_s26 = smov 10   ;;  %s266_s27 = smov 6  }
   0xe   :  { %v213_v28 = vld [vmem:[%s368_s0 + $0x16] sm:$0x1]   ;;  %v2_v29 = vld [vmem:[%s368_s0] sm:$0x1]   ;;  %vm22_vm4 = vcmask 1032128   ;;  %vm28_vm5 = vcmask 982928  }
   0xf   :  { %4 = vst.msk [vmem:[#allocation0] sm:$0x1] %vm3_vm1, %v2_v29   ;;  %vm34_vm6 = vcmask 933728   ;;  %vm40_vm7 = vcmask 884528   ;;  %vm46_vm8 = vcmask 835328   ;;  %vm52_vm9 = vcmask 786128  }
  0x10   :  { %vm58_vm10 = vcmask 736928   ;;  %vm64_vm11 = vcmask 687728   ;;  %vm70_vm12 = vcmask 638528   ;;  %vm76_vm13 = vcmask 589328  }
  0x11   :  { %vm82_vm14 = vcmask 540128   ;;  %vm88_vm15 = vcmask 490928   ;;  %vm94_vm0 = vcmask 441728   ;;  %vm100_vm1 = vcmask 392528  }
  0x12   :  { %56 = vrot.lane.b32.xlu1 %v194_v9, %s248_s2 }
  0x13   :  { %62 = vrot.lane.b32.xlu2 %v195_v10, %s249_s5 }
  0x14   :  { %50 = vrot.lane.b32.xlu0 %v193_v8, %s247_s30  ;;  %s267_s30 = smov 4  }
  0x1a   :  { %74 = vrot.lane.b32.xlu1 %v197_v12, %s251_s11 }
  0x1b   :  { %80 = vrot.lane.b32.xlu2 %v198_v13, %s252_s14 }
  0x1c   :  { %68 = vrot.lane.b32.xlu0 %v196_v11, %s250_s10 }
  0x22   :  { %92 = vrot.lane.b32.xlu1 %v200_v15, %s254_s20 }
  0x23   :  { %98 = vrot.lane.b32.xlu2 %v201_v16, %s255_s23 }
  0x24   :  { %86 = vrot.lane.b32.xlu0 %v199_v14, %s253_s19 }
  0x2a   :  { %110 = vrot.lane.b32.xlu1 %v203_v18, %s257_s29 }
  0x2b   :  { %117 = vrot.lane.b32.xlu2 %v204_v19, %s258_s3 }
  0x2c   :  { %104 = vrot.lane.b32.xlu0 %v202_v17, %s256_s28 }
  0x32   :  { %130 = vrot.lane.b32.xlu1 %v206_v21, %s260_s9 }
  0x33   :  { %136 = vrot.lane.b32.xlu2 %v207_v22, %s261_s12 }
  0x34   :  { %123 = vrot.lane.b32.xlu0 %v205_v20, %s259_s8 }
  0x3a   :  { %149 = vrot.lane.b32.xlu1 %v209_v24, %s263_s18 }
  0x3b   :  { %156 = vrot.lane.b32.xlu2 %v210_v25, %s264_s21 }
  0x3c   :  { %143 = vrot.lane.b32.xlu0 %v208_v23, %s262_s17 }
  0x42   :  { %169 = vrot.lane.b32.xlu1 %v212_v27, %s266_s27 }
  0x43   :  { %175 = vrot.lane.b32.xlu2 %v213_v28, %s267_s30 }
  0x44   :  { %162 = vrot.lane.b32.xlu0 %v211_v26, %s265_s26 }
  0x5d   :  { %v39_v30 = vpop.permute.xlu2 %38  }
  0x65   :  { %v45_v31 = vpop.permute.xlu2 %44  }
  0x6d   :  { %v63_v32 = vpop.permute.xlu2 %62  }
  0x74   :  { %v27_v34 = vpop.permute.xlu1 %26  }
  0x75   :  { %v81_v35 = vpop.permute.xlu2 %80  }
  0x76   :  { %v12_v33 = vpop.permute.xlu0 %11  }
  0x77   :  { %15 = vst.msk [vmem:[#allocation0 + $0x1] sm:$0x1] %vm13_vm2, %v12_v33   ;;  %vm106_vm2 = vcmask 343328  }
  0x78   :  { %17 = vst.msk [vmem:[#allocation0] sm:$0x1] %vm16_vm3, %v12_v33   ;;  %vm119_vm3 = vcmask 294128  }
  0x7c   :  { %v33_v37 = vpop.permute.xlu1 %32  }
  0x7d   :  { %v99_v38 = vpop.permute.xlu2 %98  }
  0x7e   :  { %v21_v36 = vpop.permute.xlu0 %20  }
  0x7f   :  { %23 = vst.msk [vmem:[#allocation0] sm:$0x1] %vm22_vm4, %v21_v36   ;;  %vm112_vm4 = vcmask 326928  }
  0x80   :  { %29 = vst.msk [vmem:[#allocation0] sm:$0x1] %vm28_vm5, %v27_v34   ;;  %vm125_vm5 = vcmask 277728  }
  0x81   :  { %35 = vst.msk [vmem:[#allocation0] sm:$0x1] %vm34_vm6, %v33_v37   ;;  %vm138_vm6 = vcmask 228528  }
  0x82   :  { %41 = vst.msk [vmem:[#allocation0] sm:$0x1] %vm40_vm7, %v39_v30   ;;  %vm132_vm7 = vcmask 244928  }
  0x83   :  { %47 = vst.msk [vmem:[#allocation0] sm:$0x1] %vm46_vm8, %v45_v31   ;;  %vm145_vm8 = vcmask 195728  }
  0x84   :  { %v57_v40 = vpop.permute.xlu1 %56  }
  0x85   :  { %v118_v41 = vpop.permute.xlu2 %117  }
  0x86   :  { %v51_v39 = vpop.permute.xlu0 %50  }
  0x87   :  { %53 = vst.msk [vmem:[#allocation0] sm:$0x1] %vm52_vm9, %v51_v39   ;;  %vm158_vm9 = vcmask 146528  }
  0x88   :  { %59 = vst.msk [vmem:[#allocation0] sm:$0x1] %vm58_vm10, %v57_v40   ;;  %vm151_vm10 = vcmask 179328  }
  0x89   :  { %65 = vst.msk [vmem:[#allocation0] sm:$0x1] %vm64_vm11, %v63_v32   ;;  %vm164_vm11 = vcmask 130128  }
  0x8c   :  { %v75_v43 = vpop.permute.xlu1 %74  }
  0x8d   :  { %v137_v44 = vpop.permute.xlu2 %136  }
  0x8e   :  { %v69_v42 = vpop.permute.xlu0 %68  }
  0x8f   :  { %71 = vst.msk [vmem:[#allocation0] sm:$0x1] %vm70_vm12, %v69_v42   ;;  %vm177_vm12 = vcmask 80928  }
  0x90   :  { %77 = vst.msk [vmem:[#allocation0] sm:$0x1] %vm76_vm13, %v75_v43   ;;  %vm171_vm13 = vcmask 97328  }
  0x91   :  { %83 = vst.msk [vmem:[#allocation0] sm:$0x1] %vm82_vm14, %v81_v35  }
  0x94   :  { %v93_v46 = vpop.permute.xlu1 %92  }
  0x95   :  { %v157_v47 = vpop.permute.xlu2 %156  }
  0x96   :  { %v87_v45 = vpop.permute.xlu0 %86  }
  0x97   :  { %89 = vst.msk [vmem:[#allocation0] sm:$0x1] %vm88_vm15, %v87_v45  }
  0x98   :  { %95 = vst.msk [vmem:[#allocation0] sm:$0x1] %vm94_vm0, %v93_v46  }
  0x99   :  { %101 = vst.msk [vmem:[#allocation0] sm:$0x1] %vm100_vm1, %v99_v38  }
  0x9c   :  { %v111_v49 = vpop.permute.xlu1 %110  }
  0x9d   :  { %114 = vst.msk [vmem:[#allocation0 + $0x1] sm:$0x1] %vm112_vm4, %v111_v49   ;;  %v176_v50 = vpop.permute.xlu2 %175  }
  0x9e   :  { %v105_v48 = vpop.permute.xlu0 %104  }
  0x9f   :  { %107 = vst.msk [vmem:[#allocation0] sm:$0x1] %vm106_vm2, %v105_v48  }
  0xa0   :  { %120 = vst.msk [vmem:[#allocation0] sm:$0x1] %vm119_vm3, %v118_v41  }
  0xa4   :  { %v131_v52 = vpop.permute.xlu1 %130  }
  0xa5   :  { %133 = vst.msk [vmem:[#allocation0] sm:$0x1] %vm132_vm7, %v131_v52  }
  0xa6   :  { %v124_v51 = vpop.permute.xlu0 %123  }
  0xa7   :  { %127 = vst.msk [vmem:[#allocation0 + $0x1] sm:$0x1] %vm125_vm5, %v124_v51  }
  0xa8   :  { %140 = vst.msk [vmem:[#allocation0 + $0x1] sm:$0x1] %vm138_vm6, %v137_v44  }
  0xac   :  { %v150_v54 = vpop.permute.xlu1 %149  }
  0xad   :  { %153 = vst.msk [vmem:[#allocation0 + $0x1] sm:$0x1] %vm151_vm10, %v150_v54  }
  0xae   :  { %v144_v53 = vpop.permute.xlu0 %143  }
  0xaf   :  { %146 = vst.msk [vmem:[#allocation0] sm:$0x1] %vm145_vm8, %v144_v53  }
  0xb0   :  { %159 = vst.msk [vmem:[#allocation0] sm:$0x1] %vm158_vm9, %v157_v47  }
  0xb4   :  { %v170_v56 = vpop.permute.xlu1 %169  }
  0xb5   :  { %172 = vst.msk [vmem:[#allocation0] sm:$0x1] %vm171_vm13, %v170_v56  }
  0xb6   :  { %v163_v55 = vpop.permute.xlu0 %162  }
  0xb7   :  { %166 = vst.msk [vmem:[#allocation0 + $0x1] sm:$0x1] %vm164_vm11, %v163_v55  }
  0xb8   :  { %179 = vst.msk [vmem:[#allocation0 + $0x1] sm:$0x1] %vm177_vm12, %v176_v50  }
  0xbf   :  { %v182_v57 = vld [vmem:[#allocation0] sm:$0x3] }
  0xc0   :  { %185 = vst [vmem:[%s369_s1] sm:$0x3] %v182_v57 }

// kernel: net3d4_forward.2
= control target key start
LH: loop header
LB: loop body
LE: loop exit
PB: predicated region body
PF: predicated region fallthrough
CT: control target
= control target key end

     0   :  { %s5493_s12 = smov 0   ;;  %s7955_s0 = inlined_call_operand.vmem [shape: bf16[1568,800], index: 0, kind: input, shape index: {}]   ;;  %s7956_s1 = inlined_call_operand.vmem [shape: bf16[800,256], index: 1, kind: input, shape index: {}]   ;;  %s7957_s2 = inlined_call_operand.vmem [shape: f32[1,256], index: 2, kind: input, shape index: {}]   ;;  %s7958_s3 = inlined_call_operand.vmem [shape: bf16[1568,256], index: 3, kind: output, shape index: {}]  }
   0x1 LB: > { %s4038_s13 = sadd.s32 4294967295, %s5471_s12   ;;  %p4042_p0 = scmp.ge.s32.totalorder %s5471_s12, 1  ;;  %s5471_s12 = sphi %s5493_s12, %s13_s12  }
   0x2   : > { %p139_p1 = scmp.lt.s32.totalorder %s5471_s12, 5 }
   0x4   : > { %p140_p2 = pnand %p4042_p0, %p139_p1 }
   0x6   : > { %143 = sbr.rel (%p140_p2) target bundleno = 1572 (0x624), region = 32 }
   0xb   : > { %v4776_v0 = vld [vmem:[%s7956_s1 + $0x70] sm:$0xf]  ;;  %v5354_v1 = vld [vmem:[%s7956_s1 + $0x74] sm:$0xf0]  ;;  %v4768_v5 = vld [vmem:[%s7956_s1 + $0x60] sm:$0xf] }
   0xc   : > { %v4840_v2 = vld [vmem:[%s7956_s1 + $0xf0] sm:$0xf]  ;;  %v4777_v3 = vor.u32 %v5354_v1, %v4776_v0  ;;  %v5370_v4 = vld [vmem:[%s7956_s1 + $0xf4] sm:$0xf0]  ;;  %v5352_v6 = vld [vmem:[%s7956_s1 + $0x64] sm:$0xf0] }
   0xd   : > { %v4841_v7 = vor.u32 %v5370_v4, %v4840_v2  ;;  %v4832_v8 = vld [vmem:[%s7956_s1 + $0xe0] sm:$0xf]  ;;  %v5368_v9 = vld [vmem:[%s7956_s1 + $0xe4] sm:$0xf0]  ;;  %v4769_v10 = vor.u32 %v5352_v6, %v4768_v5  ;;  %v4760_v12 = vld [vmem:[%s7956_s1 + $0x50] sm:$0xf] }
   0xe   : > { %1922 = vmatpush.bf16.msra.mxu0 %v4777_v3  ;;  %5439 = vmatpush.bf16.msra.mxu2 %v4777_v3  ;;  %v4833_v11 = vor.u32 %v5368_v9, %v4832_v8  ;;  %v5350_v13 = vld [vmem:[%s7956_s1 + $0x54] sm:$0xf0]  ;;  %v4824_v14 = vld [vmem:[%s7956_s1 + $0xd0] sm:$0xf]  ;;  %v4752_v18 = vld [vmem:[%s7956_s1 + $0x40] sm:$0xf] }
   0xf   : > { %2055 = vmatpush.bf16.msra.mxu1 %v4841_v7  ;;  %5447 = vmatpush.bf16.msra.mxu3 %v4841_v7  ;;  %v5366_v15 = vld [vmem:[%s7956_s1 + $0xd4] sm:$0xf0]  ;;  %v4761_v16 = vor.u32 %v5350_v13, %v4760_v12  ;;  %v5348_v19 = vld [vmem:[%s7956_s1 + $0x44] sm:$0xf0]  ;;  %v4816_v20 = vld [vmem:[%s7956_s1 + $0xc0] sm:$0xf] }
  0x10   : > { %v4825_v17 = vor.u32 %v5366_v15, %v4824_v14  ;;  %v5364_v21 = vld [vmem:[%s7956_s1 + $0xc4] sm:$0xf0]  ;;  %s165_s21 = smul.u32 49, %s4038_s13  ;;  %v4753_v22 = vor.u32 %v5348_v19, %v4752_v18  ;;  %v4744_v24 = vld [vmem:[%s7956_s1 + $0x30] sm:$0xf]  ;;  %vm1846_vm0 = vcmask 261120  }
  0x11   : > { %v4817_v23 = vor.u32 %v5364_v21, %v4816_v20  ;;  %v5346_v25 = vld [vmem:[%s7956_s1 + $0x34] sm:$0xf0]  ;;  %v4808_v26 = vld [vmem:[%s7956_s1 + $0xb0] sm:$0xf]  ;;  %v4736_v30 = vld [vmem:[%s7956_s1 + $0x20] sm:$0xf] }
  0x12   : > { %1923 = vmatpush.bf16.msra.mxu0 %v4769_v10  ;;  %5440 = vmatpush.bf16.msra.mxu2 %v4769_v10  ;;  %p166_p3 = scmp.lt.s32.totalorder %s165_s21, 195  ;;  %v5362_v27 = vld [vmem:[%s7956_s1 + $0xb4] sm:$0xf0]  ;;  %v4745_v28 = vor.u32 %v5346_v25, %v4744_v24  ;;  %v5344_v31 = vld [vmem:[%s7956_s1 + $0x24] sm:$0xf0] }
  0x13   : > { %2056 = vmatpush.bf16.msra.mxu1 %v4833_v11  ;;  %5448 = vmatpush.bf16.msra.mxu3 %v4833_v11  ;;  %v4809_v29 = vor.u32 %v5362_v27, %v4808_v26  ;;  %v4800_v32 = vld [vmem:[%s7956_s1 + $0xa0] sm:$0xf]  ;;  %v5360_v33 = vld [vmem:[%s7956_s1 + $0xa4] sm:$0xf0]  ;;  %v4737_v34 = vor.u32 %v5344_v31, %v4736_v30  ;;  %v4728_v36 = vld [vmem:[%s7956_s1 + $0x10] sm:$0xf] }
  0x14   : > { %s8594_s21 = smov (!%p166_p3, %s165_s21), 195  ;;  %v4801_v35 = vor.u32 %v5360_v33, %v4800_v32  ;;  %v5342_v37 = vld [vmem:[%s7956_s1 + $0x14] sm:$0xf0]  ;;  %v4792_v38 = vld [vmem:[%s7956_s1 + $0x90] sm:$0xf] }
  0x15   : > { %s5455_s10 = smul.u32 28, %s8594_s21  ;;  %v5358_v39 = vld [vmem:[%s7956_s1 + $0x94] sm:$0xf0]  ;;  %v4729_v40 = vor.u32 %v5342_v37, %v4728_v36  ;;  %v4720_v41 = vld [vmem:[%s7956_s1] sm:$0xf] }
  0x16   : > { %1924 = vmatpush.bf16.msra.mxu0 %v4761_v16  ;;  %5441 = vmatpush.bf16.msra.mxu2 %v4761_v16  ;;  %v4793_v42 = vor.u32 %v5358_v39, %v4792_v38  ;;  %v5340_v43 = vld [vmem:[%s7956_s1 + $0x4] sm:$0xf0]  ;;  %v4784_v44 = vld [vmem:[%s7956_s1 + $0x80] sm:$0xf]  ;;  %v5032_v46 = vld [vmem:[%s7956_s1 + $0x270] sm:$0xf] }
  0x17   : > { %2057 = vmatpush.bf16.msra.mxu1 %v4825_v17  ;;  %5449 = vmatpush.bf16.msra.mxu3 %v4825_v17  ;;  %s5596_s26 = scalar_lea.vmem %s7955_s0, %s5455_s10  ;;  %v5356_v45 = vld [vmem:[%s7956_s1 + $0x84] sm:$0xf0]  ;;  %v5418_v47 = vld [vmem:[%s7956_s1 + $0x274] sm:$0xf0]  ;;  %v5096_v48 = vld [vmem:[%s7956_s1 + $0x2f0] sm:$0xf]  ;;  %v4721_v52 = vor.u32 %v5340_v43, %v4720_v41 }
  0x18   : > { %v4048_v49 = vld [vmem:[%s5596_s26] sm:$0xf]  ;;  %v5174_v50 = vld [vmem:[%s5596_s26 + $0x18] sm:$0xf0]  ;;  %v5434_v51 = vld [vmem:[%s7956_s1 + $0x2f4] sm:$0xf0]  ;;  %v4785_v58 = vor.u32 %v5356_v45, %v4784_v44  ;;  %v5033_v62 = vor.u32 %v5418_v47, %v5032_v46 }
  0x19   : > { %v4412_v53 = vld [vmem:[%s5596_s26 + $0x2d8] sm:$0xf]  ;;  %v5265_v54 = vld [vmem:[%s5596_s26 + $0x2f0] sm:$0xf0]  ;;  %v5171_v55 = vld [vmem:[%s5596_s26 + $0x4] sm:$0xf]  ;;  %v5097_v63 = vor.u32 %v5434_v51, %v5096_v48  ;;  %v5642_v3 = vor.u32 %v5174_v50, %v4048_v49 }
  0x1a   : > { %1925 = vmatpush.bf16.msra.mxu0 %v4753_v22  ;;  %5442 = vmatpush.bf16.msra.mxu2 %v4753_v22  ;;  %v4904_v56 = vld [vmem:[%s7956_s1 + $0x170] sm:$0xf]  ;;  %v5386_v57 = vld [vmem:[%s7956_s1 + $0x174] sm:$0xf0]  ;;  %v4050_v59 = vld [vmem:[%s5596_s26 + $0x1c] sm:$0xf0]  ;;  %v5644_v4 = vor.u32 %v5265_v54, %v4412_v53 }
  0x1b   : > { %2058 = vmatpush.bf16.msra.mxu1 %v4817_v23  ;;  %5450 = vmatpush.bf16.msra.mxu3 %v4817_v23  ;;  %v5262_v60 = vld [vmem:[%s5596_s26 + $0x2dc] sm:$0xf]  ;;  %v4414_v61 = vld [vmem:[%s5596_s26 + $0x2f4] sm:$0xf0]  ;;  %v4968_v0 = vld [vmem:[%s7956_s1 + $0x1f0] sm:$0xf]  ;;  %v5655_v8 = vor.u32 %v5171_v55, %v4050_v59  ;;  %v4905_v10 = vor.u32 %v5386_v57, %v4904_v56 }
  0x1c   : > { %v5402_v1 = vld [vmem:[%s7956_s1 + $0x1f4] sm:$0xf0]  ;;  %v5024_v2 = vld [vmem:[%s7956_s1 + $0x260] sm:$0xf]  ;;  %8121 = vst [vmem:[#allocation2_spill] sm:$0xff] %v5644_v4  ;;  %v5657_v9 = vor.u32 %v5262_v60, %v4414_v61 }
  0x1d   : > { %v5416_v5 = vld [vmem:[%s7956_s1 + $0x264] sm:$0xf0]  ;;  %v5088_v6 = vld [vmem:[%s7956_s1 + $0x2e0] sm:$0xf]  ;;  %v4969_v11 = vor.u32 %v5402_v1, %v4968_v0  ;;  %v4076_v20 = vld [vmem:[%s5596_s26 + $0x38] sm:$0xf] }
  0x1e   : > { %1926 = vmatpush.bf16.msra.mxu0 %v4745_v28  ;;  %5443 = vmatpush.bf16.msra.mxu2 %v4745_v28  ;;  %v5432_v7 = vld [vmem:[%s7956_s1 + $0x2e4] sm:$0xf0]  ;;  %8122 = vst [vmem:[#allocation3_spill] sm:$0xff] %v5657_v9  ;;  %v5025_v12 = vor.u32 %v5416_v5, %v5024_v2  ;;  %v4896_v14 = vld [vmem:[%s7956_s1 + $0x160] sm:$0xf] }
  0x1f   : > { %2059 = vmatpush.bf16.msra.mxu1 %v4809_v29  ;;  %5451 = vmatpush.bf16.msra.mxu3 %v4809_v29  ;;  %v5089_v13 = vor.u32 %v5432_v7, %v5088_v6  ;;  %v5384_v15 = vld [vmem:[%s7956_s1 + $0x164] sm:$0xf0]  ;;  %v4960_v16 = vld [vmem:[%s7956_s1 + $0x1e0] sm:$0xf]  ;;  %v5181_v21 = vld [vmem:[%s5596_s26 + $0x50] sm:$0xf0] }
  0x20   : > { %v5400_v17 = vld [vmem:[%s7956_s1 + $0x1e4] sm:$0xf0]  ;;  %v4897_v18 = vor.u32 %v5384_v15, %v4896_v14  ;;  %v4440_v22 = vld [vmem:[%s5596_s26 + $0x310] sm:$0xf]  ;;  %v5272_v23 = vld [vmem:[%s5596_s26 + $0x328] sm:$0xf0]  ;;  %v5683_v28 = vor.u32 %v5181_v21, %v4076_v20 }
  0x21   : > { %v4961_v19 = vor.u32 %v5400_v17, %v4960_v16  ;;  %v5178_v24 = vld [vmem:[%s5596_s26 + $0x3c] sm:$0xf]  ;;  %v4078_v25 = vld [vmem:[%s5596_s26 + $0x54] sm:$0xf0]  ;;  %v5269_v26 = vld [vmem:[%s5596_s26 + $0x314] sm:$0xf]  ;;  %v5685_v29 = vor.u32 %v5272_v23, %v4440_v22 }
  0x22   : > { %1927 = vmatpush.bf16.msra.mxu0 %v4737_v34  ;;  %5444 = vmatpush.bf16.msra.mxu2 %v4737_v34  ;;  %v4442_v27 = vld [vmem:[%s5596_s26 + $0x32c] sm:$0xf0]  ;;  %v5687_v30 = vor.u32 %v5178_v24, %v4078_v25  ;;  %v5414_v33 = vld [vmem:[%s7956_s1 + $0x254] sm:$0xf0]  ;;  %v5188_v45 = vld [vmem:[%s5596_s26 + $0x88] sm:$0xf0] }
  0x23   : > { %2060 = vmatpush.bf16.msra.mxu1 %v4801_v35  ;;  %5452 = vmatpush.bf16.msra.mxu3 %v4801_v35  ;;  %8123 = vst [vmem:[#allocation4_spill] sm:$0xff] %v5685_v29  ;;  %v5689_v31 = vor.u32 %v5269_v26, %v4442_v27  ;;  %v5016_v32 = vld [vmem:[%s7956_s1 + $0x250] sm:$0xf]  ;;  %v5430_v36 = vld [vmem:[%s7956_s1 + $0x2d4] sm:$0xf0] }
  0x24   : > { %8124 = vst [vmem:[#allocation5_spill] sm:$0xff] %v5687_v30  ;;  %v5080_v34 = vld [vmem:[%s7956_s1 + $0x2d0] sm:$0xf]  ;;  %v5017_v35 = vor.u32 %v5414_v33, %v5016_v32  ;;  %v5382_v38 = vld [vmem:[%s7956_s1 + $0x154] sm:$0xf0] }
  0x25   : > { %8125 = vst [vmem:[#allocation6_spill] sm:$0xff] %v5689_v31  ;;  %v4888_v37 = vld [vmem:[%s7956_s1 + $0x150] sm:$0xf]  ;;  %v5081_v39 = vor.u32 %v5430_v36, %v5080_v34  ;;  %v4468_v46 = vld [vmem:[%s5596_s26 + $0x348] sm:$0xf] }
  0x26   : > { %1928 = vmatpush.bf16.msra.mxu0 %v4729_v40  ;;  %5445 = vmatpush.bf16.msra.mxu2 %v4729_v40  ;;  %v4889_v40 = vor.u32 %v5382_v38, %v4888_v37  ;;  %v4952_v41 = vld [vmem:[%s7956_s1 + $0x1d0] sm:$0xf]  ;;  %v5279_v47 = vld [vmem:[%s5596_s26 + $0x360] sm:$0xf0]  ;;  %v5185_v48 = vld [vmem:[%s5596_s26 + $0x74] sm:$0xf] }
  0x27   : > { %2061 = vmatpush.bf16.msra.mxu1 %v4793_v42  ;;  %5453 = vmatpush.bf16.msra.mxu3 %v4793_v42  ;;  %v5398_v42 = vld [vmem:[%s7956_s1 + $0x1d4] sm:$0xf0]  ;;  %v4104_v44 = vld [vmem:[%s5596_s26 + $0x70] sm:$0xf]  ;;  %v5276_v50 = vld [vmem:[%s5596_s26 + $0x34c] sm:$0xf]  ;;  %v5729_v53 = vor.u32 %v5279_v47, %v4468_v46 }
  0x28   : > { %v4953_v43 = vor.u32 %v5398_v42, %v4952_v41  ;;  %v4106_v49 = vld [vmem:[%s5596_s26 + $0x8c] sm:$0xf0]  ;;  %v4470_v51 = vld [vmem:[%s5596_s26 + $0x364] sm:$0xf0]  ;;  %v4880_v56 = vld [vmem:[%s7956_s1 + $0x140] sm:$0xf] }
  0x29   : > { %8127 = vst [vmem:[#allocation8_spill] sm:$0xff] %v5729_v53  ;;  %v5731_v54 = vor.u32 %v5185_v48, %v4106_v49  ;;  %v5733_v55 = vor.u32 %v5276_v50, %v4470_v51  ;;  %v5380_v57 = vld [vmem:[%s7956_s1 + $0x144] sm:$0xf0]  ;;  %v5072_v61 = vld [vmem:[%s7956_s1 + $0x2c0] sm:$0xf] }
  0x2a   : > { %1929 = vmatpush.bf16.msra.mxu0 %v4721_v52  ;;  %5446 = vmatpush.bf16.msra.mxu2 %v4721_v52  ;;  %v5727_v52 = vor.u32 %v5188_v45, %v4104_v44  ;;  %v4881_v59 = vor.u32 %v5380_v57, %v4880_v56  ;;  %v5412_v60 = vld [vmem:[%s7956_s1 + $0x244] sm:$0xf0]  ;;  %v5195_v2 = vld [vmem:[%s5596_s26 + $0xc0] sm:$0xf0]  ;;  %v4496_v5 = vld [vmem:[%s5596_s26 + $0x380] sm:$0xf] }
  0x2b   : > { %2062 = vmatpush.bf16.msra.mxu1 %v4785_v58  ;;  %5454 = vmatpush.bf16.msra.mxu3 %v4785_v58  ;;  %8128 = vst [vmem:[#allocation9_spill] sm:$0xff] %v5731_v54  ;;  %v5008_v58 = vld [vmem:[%s7956_s1 + $0x240] sm:$0xf]  ;;  %v4132_v1 = vld [vmem:[%s5596_s26 + $0xa8] sm:$0xf] }
  0x2c   : > { %8126 = vst [vmem:[#allocation7_spill] sm:$0xff] %v5727_v52  ;;  %v5286_v6 = vld [vmem:[%s5596_s26 + $0x398] sm:$0xf0]  ;;  %v5192_v7 = vld [vmem:[%s5596_s26 + $0xac] sm:$0xf] }
  0x2d   : > { %1930 = vmatmul.bf16.vlgmr.msra.gmra.mxu0 %v5642_v3  ;;  %1995 = vmatmul.bf16.vlgmr.msra.gmra.mxu2 %v5644_v4  ;;  %8129 = vst [vmem:[#allocation10_spill] sm:$0xff] %v5733_v55  ;;  %v5767_v14 = vor.u32 %v5286_v6, %v4496_v5  ;;  %v4944_v17 = vld [vmem:[%s7956_s1 + $0x1c0] sm:$0xf]  ;;  %v5202_v21 = vld [vmem:[%s5596_s26 + $0xf8] sm:$0xf0] }
  0x2e   : > { %2454 = vmatpush.bf16.msrb.mxu0 %v5033_v62  ;;  %2063 = vmatmul.bf16.vlgmr.msra.gmra.mxu1 %v5655_v8  ;;  %v5428_v62 = vld [vmem:[%s7956_s1 + $0x2c4] sm:$0xf0]  ;;  %v4160_v20 = vld [vmem:[%s5596_s26 + $0xe0] sm:$0xf]  ;;  %v4524_v22 = vld [vmem:[%s5596_s26 + $0x3b8] sm:$0xf] }
  0x2f   : > { %2587 = vmatpush.bf16.msrb.mxu1 %v5097_v63  ;;  %2128 = vmatmul.bf16.vlgmr.msra.gmra.mxu3 %v5657_v9  ;;  %v5009_v63 = vor.u32 %v5412_v60, %v5008_v58  ;;  %v5073_v0 = vor.u32 %v5428_v62, %v5072_v61  ;;  %8131 = vst [vmem:[#allocation12_spill] sm:$0xff] %v5767_v14  ;;  %v5293_v23 = vld [vmem:[%s5596_s26 + $0x3d0] sm:$0xf0]  ;;  %v5199_v24 = vld [vmem:[%s5596_s26 + $0xe4] sm:$0xf] }
  0x30   : > { %2188 = vmatpush.bf16.msrb.mxu2 %v4905_v10  ;;  %2321 = vmatpush.bf16.msrb.mxu3 %v4969_v11  ;;  %v4134_v10 = vld [vmem:[%s5596_s26 + $0xc4] sm:$0xf0]  ;;  %v5283_v11 = vld [vmem:[%s5596_s26 + $0x384] sm:$0xf]  ;;  %v4162_v25 = vld [vmem:[%s5596_s26 + $0xfc] sm:$0xf0]  ;;  %v5791_v32 = vor.u32 %v5202_v21, %v4160_v20  ;;  %v5793_v33 = vor.u32 %v5293_v23, %v4524_v22 }
  0x31   : > { %v5769_v15 = vor.u32 %v5192_v7, %v4134_v10  ;;  %v5290_v26 = vld [vmem:[%s5596_s26 + $0x3bc] sm:$0xf]  ;;  %v4526_v27 = vld [vmem:[%s5596_s26 + $0x3d4] sm:$0xf0]  ;;  %v5795_v34 = vor.u32 %v5199_v24, %v4162_v25  ;;  %v4872_v36 = vld [vmem:[%s7956_s1 + $0x130] sm:$0xf] }
  0x32   : > { %2455 = vmatpush.bf16.msrb.mxu0 %v5025_v12  ;;  %v4498_v12 = vld [vmem:[%s5596_s26 + $0x39c] sm:$0xf0]  ;;  %8134 = vst [vmem:[#allocation15_spill] sm:$0xff] %v5791_v32  ;;  %v5378_v37 = vld [vmem:[%s7956_s1 + $0x134] sm:$0xf0] }
  0x33   : > { %2588 = vmatpush.bf16.msrb.mxu1 %v5089_v13  ;;  %v5765_v13 = vor.u32 %v5195_v2, %v4132_v1  ;;  %8132 = vst [vmem:[#allocation13_spill] sm:$0xff] %v5769_v15  ;;  %v5771_v16 = vor.u32 %v5283_v11, %v4498_v12  ;;  %v4936_v38 = vld [vmem:[%s7956_s1 + $0x1b0] sm:$0xf]  ;;  %v5410_v42 = vld [vmem:[%s7956_s1 + $0x234] sm:$0xf0] }
  0x34   : > { %2189 = vmatpush.bf16.msrb.mxu2 %v4897_v18  ;;  %2322 = vmatpush.bf16.msrb.mxu3 %v4961_v19  ;;  %v5396_v18 = vld [vmem:[%s7956_s1 + $0x1c4] sm:$0xf0]  ;;  %8135 = vst [vmem:[#allocation16_spill] sm:$0xff] %v5793_v33  ;;  %v5000_v41 = vld [vmem:[%s7956_s1 + $0x230] sm:$0xf] }
  0x35   : > { %8130 = vst [vmem:[#allocation11_spill] sm:$0xff] %v5765_v13  ;;  %v4945_v19 = vor.u32 %v5396_v18, %v4944_v17  ;;  %v5001_v44 = vor.u32 %v5410_v42, %v5000_v41  ;;  %v5064_v45 = vld [vmem:[%s7956_s1 + $0x2b0] sm:$0xf]  ;;  %v5426_v46 = vld [vmem:[%s7956_s1 + $0x2b4] sm:$0xf0] }
  0x36   : > { %2456 = vmatpush.bf16.msrb.mxu0 %v5017_v35  ;;  %8133 = vst [vmem:[#allocation14_spill] sm:$0xff] %v5771_v16  ;;  %v5797_v35 = vor.u32 %v5290_v26, %v4526_v27  ;;  %v5065_v47 = vor.u32 %v5426_v46, %v5064_v45  ;;  %v4188_v48 = vld [vmem:[%s5596_s26 + $0x118] sm:$0xf]  ;;  %v5209_v49 = vld [vmem:[%s5596_s26 + $0x130] sm:$0xf0] }
  0x37   : > { %2589 = vmatpush.bf16.msrb.mxu1 %v5081_v39  ;;  %8136 = vst [vmem:[#allocation17_spill] sm:$0xff] %v5795_v34  ;;  %v4873_v39 = vor.u32 %v5378_v37, %v4872_v36  ;;  %v4552_v50 = vld [vmem:[%s5596_s26 + $0x3f0] sm:$0xf]  ;;  %v5300_v51 = vld [vmem:[%s5596_s26 + $0x408] sm:$0xf0]  ;;  %v5835_v60 = vor.u32 %v5209_v49, %v4188_v48 }
  0x38   : > { %2190 = vmatpush.bf16.msrb.mxu2 %v4889_v40  ;;  %2323 = vmatpush.bf16.msrb.mxu3 %v4953_v43  ;;  %8137 = vst [vmem:[#allocation18_spill] sm:$0xff] %v5797_v35  ;;  %v5394_v40 = vld [vmem:[%s7956_s1 + $0x1b4] sm:$0xf0]  ;;  %v5206_v56 = vld [vmem:[%s5596_s26 + $0x11c] sm:$0xf]  ;;  %v5837_v61 = vor.u32 %v5300_v51, %v4552_v50 }
  0x39   : > { %v4937_v43 = vor.u32 %v5394_v40, %v4936_v38  ;;  %v4190_v57 = vld [vmem:[%s5596_s26 + $0x134] sm:$0xf0]  ;;  %v5297_v58 = vld [vmem:[%s5596_s26 + $0x3f4] sm:$0xf]  ;;  %8138 = vst [vmem:[#allocation19_spill] sm:$0xff] %v5835_v60 }
  0x3a   : > { %2457 = vmatpush.bf16.msrb.mxu0 %v5009_v63  ;;  %8139 = vst [vmem:[#allocation20_spill] sm:$0xff] %v5837_v61  ;;  %v5839_v62 = vor.u32 %v5206_v56, %v4190_v57  ;;  %v5216_v1 = vld [vmem:[%s5596_s26 + $0x168] sm:$0xf0]  ;;  %v4580_v2 = vld [vmem:[%s5596_s26 + $0x428] sm:$0xf] }
  0x3b   : > { %2590 = vmatpush.bf16.msrb.mxu1 %v5073_v0  ;;  %v4216_v0 = vld [vmem:[%s5596_s26 + $0x150] sm:$0xf]  ;;  %v5307_v5 = vld [vmem:[%s5596_s26 + $0x440] sm:$0xf0]  ;;  %v5213_v6 = vld [vmem:[%s5596_s26 + $0x154] sm:$0xf] }
  0x3c   : > { %2191 = vmatpush.bf16.msrb.mxu2 %v4881_v59  ;;  %2324 = vmatpush.bf16.msrb.mxu3 %v4945_v19  ;;  %v4554_v59 = vld [vmem:[%s5596_s26 + $0x40c] sm:$0xf0]  ;;  %8140 = vst [vmem:[#allocation21_spill] sm:$0xff] %v5839_v62  ;;  %v5304_v10 = vld [vmem:[%s5596_s26 + $0x42c] sm:$0xf]  ;;  %v5855_v12 = vor.u32 %v5216_v1, %v4216_v0  ;;  %v5857_v17 = vor.u32 %v5307_v5, %v4580_v2 }
  0x3d   : > { %1935 = vmatmul.bf16.gmra.mxu0 %v5683_v28  ;;  %2000 = vmatmul.bf16.gmra.mxu2 %v5685_v29  ;;  %v5841_v63 = vor.u32 %v5297_v58, %v4554_v59  ;;  %v4218_v7 = vld [vmem:[%s5596_s26 + $0x16c] sm:$0xf0]  ;;  %v4582_v11 = vld [vmem:[%s5596_s26 + $0x444] sm:$0xf0]  ;;  %v4864_v20 = vld [vmem:[%s7956_s1 + $0x120] sm:$0xf] }
  0x3e   : > { %2068 = vmatmul.bf16.gmra.mxu1 %v5687_v30  ;;  %2458 = vmatpush.bf16.msrb.mxu0 %v5001_v44  ;;  %8142 = vst [vmem:[#allocation23_spill] sm:$0xff] %v5855_v12  ;;  %v5859_v18 = vor.u32 %v5213_v6, %v4218_v7  ;;  %v5861_v19 = vor.u32 %v5304_v10, %v4582_v11  ;;  %v5376_v21 = vld [vmem:[%s7956_s1 + $0x124] sm:$0xf0]  ;;  %v4928_v23 = vld [vmem:[%s7956_s1 + $0x1a0] sm:$0xf] }
  0x3f   : > { %2133 = vmatmul.bf16.gmra.mxu3 %v5689_v31  ;;  %2591 = vmatpush.bf16.msrb.mxu1 %v5065_v47  ;;  %8141 = vst [vmem:[#allocation22_spill] sm:$0xff] %v5841_v63  ;;  %v4865_v22 = vor.u32 %v5376_v21, %v4864_v20  ;;  %v5392_v24 = vld [vmem:[%s7956_s1 + $0x1a4] sm:$0xf0]  ;;  %v4992_v26 = vld [vmem:[%s7956_s1 + $0x220] sm:$0xf] }
  0x40   : > { %2192 = vmatpush.bf16.msrb.mxu2 %v4873_v39  ;;  %2325 = vmatpush.bf16.msrb.mxu3 %v4937_v43  ;;  %8143 = vst [vmem:[#allocation24_spill] sm:$0xff] %v5857_v17  ;;  %v4929_v25 = vor.u32 %v5392_v24, %v4928_v23  ;;  %v5408_v27 = vld [vmem:[%s7956_s1 + $0x224] sm:$0xf0]  ;;  %v5056_v37 = vld [vmem:[%s7956_s1 + $0x2a0] sm:$0xf] }
  0x41   : > { %8144 = vst [vmem:[#allocation25_spill] sm:$0xff] %v5859_v18  ;;  %v4993_v36 = vor.u32 %v5408_v27, %v4992_v26  ;;  %v5424_v38 = vld [vmem:[%s7956_s1 + $0x2a4] sm:$0xf0]  ;;  %v5223_v41 = vld [vmem:[%s5596_s26 + $0x1a0] sm:$0xf0] }
  0x42   : > { %8145 = vst [vmem:[#allocation26_spill] sm:$0xff] %v5861_v19  ;;  %v5057_v39 = vor.u32 %v5424_v38, %v5056_v37  ;;  %v4244_v40 = vld [vmem:[%s5596_s26 + $0x188] sm:$0xf]  ;;  %v4608_v42 = vld [vmem:[%s5596_s26 + $0x460] sm:$0xf] }
  0x43   : > { %2459 = vmatpush.bf16.msrb.mxu0 %v4993_v36  ;;  %v5314_v43 = vld [vmem:[%s5596_s26 + $0x478] sm:$0xf0]  ;;  %v5220_v44 = vld [vmem:[%s5596_s26 + $0x18c] sm:$0xf]  ;;  %v4246_v45 = vld [vmem:[%s5596_s26 + $0x1a4] sm:$0xf0]  ;;  %v5899_v48 = vor.u32 %v5223_v41, %v4244_v40 }
  0x44   : > { %2193 = vmatpush.bf16.msrb.mxu2 %v4865_v22  ;;  %2326 = vmatpush.bf16.msrb.mxu3 %v4929_v25  ;;  %v5311_v46 = vld [vmem:[%s5596_s26 + $0x464] sm:$0xf]  ;;  %v4610_v47 = vld [vmem:[%s5596_s26 + $0x47c] sm:$0xf0]  ;;  %v5901_v49 = vor.u32 %v5314_v43, %v4608_v42  ;;  %v5903_v50 = vor.u32 %v5220_v44, %v4246_v45  ;;  %v5230_v59 = vld [vmem:[%s5596_s26 + $0x1d8] sm:$0xf0] }
  0x45   : > { %2592 = vmatpush.bf16.msrb.mxu1 %v5057_v39  ;;  %8146 = vst [vmem:[#allocation27_spill] sm:$0xff] %v5899_v48  ;;  %v5905_v51 = vor.u32 %v5311_v46, %v4610_v47  ;;  %v476_v56 = vld [vmem:[%s7957_s2] sm:$0x3]  ;;  %v4636_v0 = vld [vmem:[%s5596_s26 + $0x498] sm:$0xf] }
  0x46   : > { %8147 = vst [vmem:[#allocation28_spill] sm:$0xff] %v5901_v49  ;;  %v5914_v57 = vperm.slane %v476_v56, 0  ;;  %v4272_v58 = vld [vmem:[%s5596_s26 + $0x1c0] sm:$0xf]  ;;  %v4856_v1 = vld [vmem:[%s7956_s1 + $0x110] sm:$0xf] }
  0x47   : > { %8148 = vst [vmem:[#allocation29_spill] sm:$0xff] %v5903_v50  ;;  %v5374_v2 = vld [vmem:[%s7956_s1 + $0x114] sm:$0xf0]  ;;  %v4920_v5 = vld [vmem:[%s7956_s1 + $0x190] sm:$0xf]  ;;  %v5936_v24 = vor.u32 %v5230_v59, %v4272_v58 }
  0x48   : > { %8149 = vst [vmem:[#allocation30_spill] sm:$0xff] %v5905_v51  ;;  %v5321_v6 = vld [vmem:[%s5596_s26 + $0x4b0] sm:$0xf0]  ;;  %v5227_v7 = vld [vmem:[%s5596_s26 + $0x1c4] sm:$0xf]  ;;  %v4857_v10 = vor.u32 %v5374_v2, %v4856_v1 }
  0x49   : > { %v5390_v11 = vld [vmem:[%s7956_s1 + $0x194] sm:$0xf0]  ;;  %v4274_v20 = vld [vmem:[%s5596_s26 + $0x1dc] sm:$0xf0]  ;;  %v5318_v21 = vld [vmem:[%s5596_s26 + $0x49c] sm:$0xf]  ;;  %v5938_v25 = vor.u32 %v5321_v6, %v4636_v0 }
  0x4a   : > { %v4638_v22 = vld [vmem:[%s5596_s26 + $0x4b4] sm:$0xf0]  ;;  %v4921_v23 = vor.u32 %v5390_v11, %v4920_v5  ;;  %2194 = vmatpush.bf16.msrb.mxu2 %v4857_v10  ;;  %8150 = vst [vmem:[#allocation31_spill] sm:$0xff] %v5936_v24  ;;  %v5940_v27 = vor.u32 %v5227_v7, %v4274_v20  ;;  %v4984_v39 = vld [vmem:[%s7956_s1 + $0x210] sm:$0xf] }
  0x4b   : > { %8151 = vst [vmem:[#allocation32_spill] sm:$0xff] %v5938_v25  ;;  %v5942_v36 = vor.u32 %v5318_v21, %v4638_v22  ;;  %v5406_v40 = vld [vmem:[%s7956_s1 + $0x214] sm:$0xf0]  ;;  %v5048_v43 = vld [vmem:[%s7956_s1 + $0x290] sm:$0xf] }
  0x4c   : > { %2327 = vmatpush.bf16.msrb.mxu3 %v4921_v23  ;;  %8152 = vst [vmem:[#allocation33_spill] sm:$0xff] %v5940_v27  ;;  %v4985_v41 = vor.u32 %v5406_v40, %v4984_v39  ;;  %v5422_v44 = vld [vmem:[%s7956_s1 + $0x294] sm:$0xf0]  ;;  %v5237_v6 = vld [vmem:[%s5596_s26 + $0x210] sm:$0xf0] }
  0x4d   : > { %1940 = vmatmul.bf16.gmra.mxu0 %v5727_v52  ;;  %2005 = vmatmul.bf16.gmra.mxu2 %v5729_v53  ;;  %8153 = vst [vmem:[#allocation34_spill] sm:$0xff] %v5942_v36  ;;  %v5049_v45 = vor.u32 %v5422_v44, %v5048_v43  ;;  %v4300_v5 = vld [vmem:[%s5596_s26 + $0x1f8] sm:$0xf]  ;;  %v4664_v7 = vld [vmem:[%s5596_s26 + $0x4d0] sm:$0xf] }
  0x4e   : > { %2073 = vmatmul.bf16.gmra.mxu1 %v5731_v54  ;;  %2460 = vmatpush.bf16.msrb.mxu0 %v4985_v41  ;;  %v5328_v10 = vld [vmem:[%s5596_s26 + $0x4e8] sm:$0xf0]  ;;  %v5234_v11 = vld [vmem:[%s5596_s26 + $0x1fc] sm:$0xf]  ;;  %v4302_v20 = vld [vmem:[%s5596_s26 + $0x214] sm:$0xf0] }
  0x4f   : > { %2138 = vmatmul.bf16.gmra.mxu3 %v5733_v55  ;;  %2593 = vmatpush.bf16.msrb.mxu1 %v5049_v45  ;;  %v5325_v21 = vld [vmem:[%s5596_s26 + $0x4d4] sm:$0xf]  ;;  %v4666_v22 = vld [vmem:[%s5596_s26 + $0x4ec] sm:$0xf0]  ;;  %v5980_v39 = vor.u32 %v5328_v10, %v4664_v7  ;;  %v5982_v41 = vor.u32 %v5234_v11, %v4302_v20 }
  0x50   : > { %v5984_v43 = vor.u32 %v5325_v21, %v4666_v22  ;;  %v4066_v31 = vld [vmem:[%s5596_s26 + $0x2c] sm:$0xf0] }
  0x51   : > { %8155 = vst [vmem:[#allocation36_spill] sm:$0xff] %v5980_v39 }
  0x52   : > { %8156 = vst [vmem:[#allocation37_spill] sm:$0xff] %v5982_v41 }
  0x53   : > { %8157 = vst [vmem:[#allocation38_spill] sm:$0xff] %v5984_v43 }
  0x5d   : > { %1945 = vmatmul.bf16.gmra.mxu0 %v5765_v13  ;;  %2010 = vmatmul.bf16.gmra.mxu2 %v5767_v14 }
  0x5e   : > { %2078 = vmatmul.bf16.gmra.mxu1 %v5769_v15 }
  0x5f   : > { %2143 = vmatmul.bf16.gmra.mxu3 %v5771_v16 }
  0x6d   : > { %1950 = vmatmul.bf16.gmra.mxu0 %v5791_v32  ;;  %2015 = vmatmul.bf16.gmra.mxu2 %v5793_v33 }
  0x6e   : > { %2083 = vmatmul.bf16.gmra.mxu1 %v5795_v34 }
  0x6f   : > { %2148 = vmatmul.bf16.gmra.mxu3 %v5797_v35  ;;  %v5172_v35 = vld [vmem:[%s5596_s26 + $0xc] sm:$0xf] }
  0x7d   : > { %1955 = vmatmul.bf16.gmra.mxu0 %v5835_v60  ;;  %2020 = vmatmul.bf16.gmra.mxu2 %v5837_v61 }
  0x7e   : > { %2088 = vmatmul.bf16.gmra.mxu1 %v5839_v62 }
  0x7f   : > { %2153 = vmatmul.bf16.gmra.mxu3 %v5841_v63 }
  0x8d   : > { %1960 = vmatmul.bf16.gmra.mxu0 %v5855_v12  ;;  %2025 = vmatmul.bf16.gmra.mxu2 %v5857_v17 }
  0x8e   : > { %2093 = vmatmul.bf16.gmra.mxu1 %v5859_v18 }
  0x8f   : > { %2158 = vmatmul.bf16.gmra.mxu3 %v5861_v19 }
  0x9d   : > { %1965 = vmatmul.bf16.gmra.mxu0 %v5899_v48  ;;  %2030 = vmatmul.bf16.gmra.mxu2 %v5901_v49 }
  0x9e   : > { %2098 = vmatmul.bf16.gmra.mxu1 %v5903_v50 }
  0x9f   : > { %2163 = vmatmul.bf16.gmra.mxu3 %v5905_v51 }
  0xaa   : > { %v1931_v26 = vpop.f32.mrf.mxu0 }
  0xab   : > { %v1932_v37 = vadd.f32 %v1931_v26, %v5914_v57  ;;  %v2064_v38 = vpop.f32.mrf.mxu1 }
  0xad   : > { %v5951_v42 = vadd.f32 %v2064_v38, %v1932_v37  ;;  %1970 = vmatmul.bf16.gmra.mxu0 %v5936_v24  ;;  %2035 = vmatmul.bf16.gmra.mxu2 %v5938_v25  ;;  %v5978_v38 = vor.u32 %v5237_v6, %v4300_v5  ;;  %v5388_v5 = vld [vmem:[%s7956_s1 + $0x184] sm:$0xf0] }
  0xae   : > { %2103 = vmatmul.bf16.gmra.mxu1 %v5940_v27 }
  0xaf   : > { %2168 = vmatmul.bf16.gmra.mxu3 %v5942_v36  ;;  %8154 = vst [vmem:[#allocation35_spill] sm:$0xff] %v5978_v38 }
  0xb0   : > { %v1996_v46 = vpop.f32.mrf.mxu2 }
  0xb1   : > { %v1997_v47 = vadd.f32 %v1996_v46, %v5914_v57 }
  0xb2   : > { %v2129_v56 = vpop.f32.mrf.mxu3  ;;  %v1933_v58 = vpop.f32.mrf.mxu0 }
  0xb3   : > { %v5964_v59 = vadd.f32 %v2129_v56, %v1997_v47  ;;  %v1934_v0 = vadd.f32 %v1933_v58, %v5914_v57  ;;  %v2066_v1 = vpop.f32.mrf.mxu1  ;;  %v4848_v56 = vld [vmem:[%s7956_s1 + $0x100] sm:$0xf]  ;;  %v5372_v58 = vld [vmem:[%s7956_s1 + $0x104] sm:$0xf0] }
  0xb5   : > { %v5967_v2 = vadd.f32 %v2066_v1, %v1934_v0  ;;  %v4849_v0 = vor.u32 %v5372_v58, %v4848_v56  ;;  %v4912_v1 = vld [vmem:[%s7956_s1 + $0x180] sm:$0xf]  ;;  %v5404_v56 = vld [vmem:[%s7956_s1 + $0x204] sm:$0xf0] }
  0xb6   : > { %v4913_v6 = vor.u32 %v5388_v5, %v4912_v1  ;;  %v5040_v58 = vld [vmem:[%s7956_s1 + $0x280] sm:$0xf]  ;;  %v5241_v1 = vld [vmem:[%s5596_s26 + $0x234] sm:$0xf] }
  0xb7   : > { %2195 = vmatpush.bf16.msrb.mxu2 %v4849_v0  ;;  %v5335_v0 = vld [vmem:[%s5596_s26 + $0x520] sm:$0xf0] }
  0xb8   : > { %v1998_v23 = vpop.f32.mrf.mxu2  ;;  %2328 = vmatpush.bf16.msrb.mxu3 %v4913_v6  ;;  %v5420_v6 = vld [vmem:[%s7956_s1 + $0x284] sm:$0xf0] }
  0xb9   : > { %v1999_v26 = vadd.f32 %v1998_v23, %v5914_v57 }
  0xba   : > { %v2131_v37 = vpop.f32.mrf.mxu3  ;;  %v1936_v40 = vpop.f32.mrf.mxu0 }
  0xbb   : > { %v5986_v44 = vadd.f32 %v2131_v37, %v1999_v26  ;;  %v1937_v45 = vadd.f32 %v1936_v40, %v5914_v57  ;;  %v2069_v46 = vpop.f32.mrf.mxu1  ;;  %v4328_v26 = vld [vmem:[%s5596_s26 + $0x230] sm:$0xf]  ;;  %v5244_v37 = vld [vmem:[%s5596_s26 + $0x248] sm:$0xf0]  ;;  %v4692_v40 = vld [vmem:[%s5596_s26 + $0x508] sm:$0xf] }
  0xbc   : > { %v6036_v36 = vor.u32 %v5335_v0, %v4692_v40  ;;  %v372_v0 = vld [vmem:[%s5596_s26 + $0x540] sm:$0xff] }
  0xbd   : > { %v5989_v47 = vadd.f32 %v2069_v46, %v1937_v45  ;;  %1975 = vmatmul.bf16.gmra.mxu0 %v5978_v38  ;;  %2040 = vmatmul.bf16.gmra.mxu2 %v5980_v39  ;;  %v4976_v46 = vld [vmem:[%s7956_s1 + $0x200] sm:$0xf]  ;;  %v6034_v39 = vor.u32 %v5244_v37, %v4328_v26 }
  0xbe   : > { %2108 = vmatmul.bf16.gmra.mxu1 %v5982_v41  ;;  %v4977_v5 = vor.u32 %v5404_v56, %v4976_v46  ;;  %8159 = vst [vmem:[#allocation40_spill] sm:$0xff] %v6036_v36 }
  0xbf   : > { %2173 = vmatmul.bf16.gmra.mxu3 %v5984_v43  ;;  %8158 = vst [vmem:[#allocation39_spill] sm:$0xff] %v6034_v39 }
  0xc0   : > { %v2001_v7 = vpop.f32.mrf.mxu2  ;;  %2461 = vmatpush.bf16.msrb.mxu0 %v4977_v5 }
  0xc1   : > { %v2002_v10 = vadd.f32 %v2001_v7, %v5914_v57  ;;  %v4330_v7 = vld [vmem:[%s5596_s26 + $0x24c] sm:$0xf0] }
  0xc2   : > { %v2134_v11 = vpop.f32.mrf.mxu3  ;;  %v1938_v20 = vpop.f32.mrf.mxu0  ;;  %v6038_v56 = vor.u32 %v5241_v1, %v4330_v7 }
  0xc3   : > { %v6008_v21 = vadd.f32 %v2134_v11, %v2002_v10  ;;  %v1939_v22 = vadd.f32 %v1938_v20, %v5914_v57  ;;  %v2071_v23 = vpop.f32.mrf.mxu1  ;;  %v5332_v10 = vld [vmem:[%s5596_s26 + $0x50c] sm:$0xf]  ;;  %v4694_v11 = vld [vmem:[%s5596_s26 + $0x524] sm:$0xf0]  ;;  %v5041_v20 = vor.u32 %v5420_v6, %v5040_v58 }
  0xc4   : > { %8160 = vst [vmem:[#allocation41_spill] sm:$0xff] %v6038_v56  ;;  %v6040_v25 = vor.u32 %v5332_v10, %v4694_v11 }
  0xc5   : > { %v6014_v45 = vadd.f32 %v2071_v23, %v1939_v22  ;;  %2594 = vmatpush.bf16.msrb.mxu1 %v5041_v20  ;;  %v1014_v20 = vunpack.c.l.b16 %v372_v0 }
  0xc6   : > { %8161 = vst [vmem:[#allocation42_spill] sm:$0xff] %v6040_v25 }
  0xc7   : > { %v6077_v17 = vpack.c.b16 %v1014_v20, %v1014_v20 }
  0xc8   : > { %v2003_v22 = vpop.f32.mrf.mxu2 }
  0xc9   : > { %v2004_v23 = vadd.f32 %v2003_v22, %v5914_v57  ;;  %v5112_v22 = vld [vmem:[%s7956_s1 + $0x310] sm:$0xf]  ;;  %8163 = vst [vmem:[#allocation44_spill] sm:$0xff] %v6077_v17 }
  0xca   : > { %v2136_v43 = vpop.f32.mrf.mxu3  ;;  %v1941_v46 = vpop.f32.mrf.mxu0 }
  0xcb   : > { %v6042_v51 = vadd.f32 %v2136_v43, %v2004_v23  ;;  %v1942_v58 = vadd.f32 %v1941_v46, %v5914_v57  ;;  %v2074_v6 = vpop.f32.mrf.mxu1  ;;  %v5438_v23 = vld [vmem:[%s7956_s1 + $0x314] sm:$0xf0]  ;;  %v5353_v46 = vld [vmem:[%s7956_s1 + $0x74] sm:$0xf] }
  0xcd   : > { %v6045_v5 = vadd.f32 %v2074_v6, %v1942_v58  ;;  %1980 = vmatmul.bf16.gmra.mxu0 %v6034_v39  ;;  %2045 = vmatmul.bf16.gmra.mxu2 %v6036_v36  ;;  %v4356_v58 = vld [vmem:[%s5596_s26 + $0x268] sm:$0xf]  ;;  %v5251_v6 = vld [vmem:[%s5596_s26 + $0x280] sm:$0xf0] }
  0xce   : > { %2113 = vmatmul.bf16.gmra.mxu1 %v6038_v56  ;;  %v6075_v19 = vor.u32 %v5251_v6, %v4356_v58 }
  0xcf   : > { %2178 = vmatmul.bf16.gmra.mxu3 %v6040_v25 }
  0xd0   : > { %v2006_v26 = vpop.f32.mrf.mxu2  ;;  %8162 = vst [vmem:[#allocation43_spill] sm:$0xff] %v6075_v19 }
  0xd1   : > { %v2007_v37 = vadd.f32 %v2006_v26, %v5914_v57  ;;  %v1015_v26 = vunpack.c.h.b16 %v372_v0 }
  0xd2   : > { %v2139_v43 = vpop.f32.mrf.mxu3  ;;  %v1943_v40 = vpop.f32.mrf.mxu0 }
  0xd3   : > { %v6053_v1 = vadd.f32 %v2139_v43, %v2007_v37  ;;  %v1944_v7 = vadd.f32 %v1943_v40, %v5914_v57  ;;  %v2076_v10 = vpop.f32.mrf.mxu1  ;;  %v5113_v37 = vor.u32 %v5438_v23, %v5112_v22  ;;  %v4778_v43 = vld [vmem:[%s7956_s1 + $0x78] sm:$0xf0]  ;;  %v5248_v40 = vld [vmem:[%s5596_s26 + $0x26c] sm:$0xf]  ;;  %v6081_v22 = vpack.c.b16 %v1015_v26, %v1015_v26 }
  0xd5   : > { %v6056_v11 = vadd.f32 %v2076_v10, %v1944_v7  ;;  %v4358_v7 = vld [vmem:[%s5596_s26 + $0x284] sm:$0xf0]  ;;  %v4781_v10 = vor.u32 %v5353_v46, %v4778_v43  ;;  %2726 = vmatpush.bf16.msra.mxu2 %v5113_v37  ;;  %8165 = vst [vmem:[#allocation46_spill] sm:$0xff] %v6081_v22 }
  0xd6   : > { %v6079_v0 = vor.u32 %v5248_v40, %v4358_v7 }
  0xd7   : > { %2853 = vmatpush.bf16.msra.mxu3 %v4781_v10 }
  0xd8   : > { %v2008_v25 = vpop.f32.mrf.mxu2  ;;  %8164 = vst [vmem:[#allocation45_spill] sm:$0xff] %v6079_v0 }
  0xd9   : > { %v2009_v36 = vadd.f32 %v2008_v25, %v5914_v57  ;;  %v5369_v25 = vld [vmem:[%s7956_s1 + $0xf4] sm:$0xf] }
  0xda   : > { %v2141_v49 = vpop.f32.mrf.mxu3  ;;  %v1946_v63 = vpop.f32.mrf.mxu0 }
  0xdb   : > { %v6083_v23 = vadd.f32 %v2141_v49, %v2009_v36  ;;  %v1947_v61 = vadd.f32 %v1946_v63, %v5914_v57  ;;  %v2079_v46 = vpop.f32.mrf.mxu1  ;;  %v4842_v63 = vld [vmem:[%s7956_s1 + $0xf8] sm:$0xf0] }
  0xdc   : > { %v4845_v49 = vor.u32 %v5369_v25, %v4842_v63  ;;  %v4906_v36 = vld [vmem:[%s7956_s1 + $0x178] sm:$0xf0]  ;;  %v4384_v25 = vld [vmem:[%s5596_s26 + $0x2a0] sm:$0xf] }
  0xdd   : > { %v6086_v43 = vadd.f32 %v2079_v46, %v1947_v61  ;;  %1985 = vmatmul.bf16.gmra.mxu0 %v6075_v19  ;;  %2050 = vmatmul.bf16.gmra.mxu2 %v6077_v17  ;;  %v5385_v61 = vld [vmem:[%s7956_s1 + $0x174] sm:$0xf]  ;;  %v5258_v63 = vld [vmem:[%s5596_s26 + $0x2b8] sm:$0xf0]  ;;  %v4056_v17 = vld [vmem:[%s5596_s26 + $0x8] sm:$0xf] }
  0xde   : > { %2118 = vmatmul.bf16.gmra.mxu1 %v6079_v0  ;;  %v4909_v58 = vor.u32 %v5385_v61, %v4906_v36  ;;  %2986 = vmatpush.bf16.msra.mxu0 %v4845_v49  ;;  %v5175_v61 = vld [vmem:[%s5596_s26 + $0x20] sm:$0xf0]  ;;  %v4386_v36 = vld [vmem:[%s5596_s26 + $0x2bc] sm:$0xf0] }
  0xdf   : > { %2183 = vmatmul.bf16.gmra.mxu3 %v6081_v22  ;;  %v5255_v22 = vld [vmem:[%s5596_s26 + $0x2a4] sm:$0xf] }
  0xe0   : > { %v2011_v20 = vpop.f32.mrf.mxu2  ;;  %3119 = vmatpush.bf16.msra.mxu1 %v4909_v58  ;;  %v6119_v58 = vor.u32 %v5258_v63, %v4384_v25  ;;  %v4084_v63 = vld [vmem:[%s5596_s26 + $0x40] sm:$0xf] }
  0xe1   : > { %v2012_v6 = vadd.f32 %v2011_v20, %v5914_v57  ;;  %v4058_v20 = vld [vmem:[%s5596_s26 + $0x24] sm:$0xf0] }
  0xe2   : > { %v2144_v26 = vpop.f32.mrf.mxu3  ;;  %v1948_v37 = vpop.f32.mrf.mxu0  ;;  %8166 = vst [vmem:[#allocation47_spill] sm:$0xff] %v6119_v58 }
  0xe3   : > { %v6105_v40 = vadd.f32 %v2144_v26, %v2012_v6  ;;  %v1949_v7 = vadd.f32 %v1948_v37, %v5914_v57  ;;  %v2081_v10 = vpop.f32.mrf.mxu1  ;;  %v6121_v6 = vor.u32 %v5175_v61, %v4056_v17  ;;  %v6123_v37 = vor.u32 %v5255_v22, %v4386_v36  ;;  %v5182_v61 = vld [vmem:[%s5596_s26 + $0x58] sm:$0xf0]  ;;  %v5179_v36 = vld [vmem:[%s5596_s26 + $0x44] sm:$0xf] }
  0xe4   : > { %v6151_v4 = vor.u32 %v5182_v61, %v4084_v63  ;;  %v4112_v61 = vld [vmem:[%s5596_s26 + $0x78] sm:$0xf] }
  0xe5   : > { %v6108_v46 = vadd.f32 %v2081_v10, %v1949_v7  ;;  %8167 = vst [vmem:[#allocation48_spill] sm:$0xff] %v6123_v37  ;;  %v6125_v7 = vor.u32 %v5172_v35, %v4058_v20  ;;  %v4064_v20 = vld [vmem:[%s5596_s26 + $0x10] sm:$0xf] }
  0xe6   : > { %8169 = vst [vmem:[#allocation50_spill] sm:$0xff] %v6151_v4 }
  0xe7   : > { %8168 = vst [vmem:[#allocation49_spill] sm:$0xff] %v6125_v7 }
  0xe8   : > { %v2013_v33 = vpop.f32.mrf.mxu2 }
  0xe9   : > { %v2014_v49 = vadd.f32 %v2013_v33, %v5914_v57 }
  0xea   : > { %v2146_v16 = vpop.f32.mrf.mxu3  ;;  %v1951_v26 = vpop.f32.mrf.mxu0 }
  0xeb   : > { %v6127_v10 = vadd.f32 %v2146_v16, %v2014_v49  ;;  %v1952_v14 = vadd.f32 %v1951_v26, %v5914_v57  ;;  %v2084_v55 = vpop.f32.mrf.mxu1  ;;  %v5176_v49 = vld [vmem:[%s5596_s26 + $0x28] sm:$0xf0]  ;;  %v4086_v26 = vld [vmem:[%s5596_s26 + $0x5c] sm:$0xf0] }
  0xed   : > { %v6130_v53 = vadd.f32 %v2084_v55, %v1952_v14  ;;  %1990 = vmatmul.bf16.gmra.mxu0 %v6119_v58  ;;  %2196 = vmatmul.bf16.vlgmr.msrb.gmra.mxu2 %v6121_v6 }
  0xee   : > { %2123 = vmatmul.bf16.gmra.mxu1 %v6123_v37 }
  0xef   : > { %2329 = vmatmul.bf16.vlgmr.msrb.gmra.mxu3 %v6125_v7  ;;  %v5173_v7 = vld [vmem:[%s5596_s26 + $0x14] sm:$0xf] }
  0xf0   : > { %v2016_v16 = vpop.f32.mrf.mxu2 }
  0xf1   : > { %v2017_v33 = vadd.f32 %v2016_v16, %v5914_v57 }
  0xf2   : > { %v2149_v35 = vpop.f32.mrf.mxu3  ;;  %v1953_v17 = vpop.f32.mrf.mxu0 }
  0xf3   : > { %v6137_v55 = vadd.f32 %v2149_v35, %v2017_v33  ;;  %v1954_v14 = vadd.f32 %v1953_v17, %v5914_v57  ;;  %v2086_v22 = vpop.f32.mrf.mxu1  ;;  %v6153_v33 = vor.u32 %v5176_v49, %v4064_v20  ;;  %v6155_v17 = vor.u32 %v5179_v36, %v4086_v26  ;;  %v5189_v20 = vld [vmem:[%s5596_s26 + $0x90] sm:$0xf0]  ;;  %v5351_v49 = vld [vmem:[%s7956_s1 + $0x64] sm:$0xf]  ;;  %v4770_v26 = vld [vmem:[%s7956_s1 + $0x68] sm:$0xf0] }
  0xf5   : > { %v6140_v25 = vadd.f32 %v2086_v22, %v1954_v14  ;;  %8170 = vst [vmem:[#allocation51_spill] sm:$0xff] %v6153_v33  ;;  %v6157_v14 = vor.u32 %v5173_v7, %v4066_v31 }
  0xf6   : > { %8171 = vst [vmem:[#allocation52_spill] sm:$0xff] %v6155_v17 }
  0xf7   : > { %8172 = vst [vmem:[#allocation53_spill] sm:$0xff] %v6157_v14 }
  0xf8   : > { %v2018_v29 = vpop.f32.mrf.mxu2 }
  0xf9   : > { %v2019_v16 = vadd.f32 %v2018_v29, %v5914_v57 }
  0xfa   : > { %v2151_v9 = vpop.f32.mrf.mxu3  ;;  %v1956_v35 = vpop.f32.mrf.mxu0 }
  0xfb   : > { %v6159_v22 = vadd.f32 %v2151_v9, %v2019_v16  ;;  %v1957_v37 = vadd.f32 %v1956_v35, %v5914_v57  ;;  %v2089_v58 = vpop.f32.mrf.mxu1  ;;  %v5186_v16 = vld [vmem:[%s5596_s26 + $0x7c] sm:$0xf]  ;;  %v4092_v35 = vld [vmem:[%s5596_s26 + $0x48] sm:$0xf] }
  0xfd   : > { %v6162_v0 = vadd.f32 %v2089_v58, %v1957_v37  ;;  %2201 = vmatmul.bf16.gmra.mxu2 %v6151_v4  ;;  %2462 = vmatmul.bf16.vlgmr.msrb.gmra.mxu0 %v6153_v33  ;;  %v6189_v33 = vor.u32 %v5189_v20, %v4112_v61 }
  0xfe   : > { %2595 = vmatmul.bf16.vlgmr.msrb.gmra.mxu1 %v6157_v14  ;;  %v5180_v14 = vld [vmem:[%s5596_s26 + $0x4c] sm:$0xf] }
  0xff   : > { %2334 = vmatmul.bf16.gmra.mxu3 %v6155_v17  ;;  %8173 = vst [vmem:[#allocation54_spill] sm:$0xff] %v6189_v33 }
 0x100   : > { %v2021_v29 = vpop.f32.mrf.mxu2 }
 0x101   : > { %v2022_v9 = vadd.f32 %v2021_v29, %v5914_v57  ;;  %v5183_v29 = vld [vmem:[%s5596_s26 + $0x60] sm:$0xf0] }
 0x102   : > { %v2154_v31 = vpop.f32.mrf.mxu3  ;;  %v1958_v58 = vpop.f32.mrf.mxu0  ;;  %v6191_v19 = vor.u32 %v5183_v29, %v4092_v35 }
 0x103   : > { %v6169_v37 = vadd.f32 %v2154_v31, %v2022_v9  ;;  %v1959_v7 = vadd.f32 %v1958_v58, %v5914_v57  ;;  %v2091_v63 = vpop.f32.mrf.mxu1  ;;  %v4773_v9 = vor.u32 %v5351_v49, %v4770_v26  ;;  %v4114_v31 = vld [vmem:[%s5596_s26 + $0x94] sm:$0xf0]  ;;  %v4094_v58 = vld [vmem:[%s5596_s26 + $0x64] sm:$0xf0] }
 0x104   : > { %8174 = vst [vmem:[#allocation55_spill] sm:$0xff] %v6191_v19  ;;  %v6193_v39 = vor.u32 %v5186_v16, %v4114_v31  ;;  %v6195_v41 = vor.u32 %v5180_v14, %v4094_v58  ;;  %v5383_v58 = vld [vmem:[%s7956_s1 + $0x164] sm:$0xf] }
 0x105   : > { %v6173_v36 = vadd.f32 %v2091_v63, %v1959_v7  ;;  %2854 = vmatpush.bf16.msra.mxu3 %v4773_v9 }
 0x106   : > { %8175 = vst [vmem:[#allocation56_spill] sm:$0xff] %v6193_v39 }
 0x107   : > { %8176 = vst [vmem:[#allocation57_spill] sm:$0xff] %v6195_v41 }
 0x108   : > { %v2023_v17 = vpop.f32.mrf.mxu2 }
 0x109   : > { %v2024_v7 = vadd.f32 %v2023_v17, %v5914_v57  ;;  %v5367_v17 = vld [vmem:[%s7956_s1 + $0xe4] sm:$0xf] }
 0x10a   : > { %v2156_v63 = vpop.f32.mrf.mxu3  ;;  %v1961_v56 = vpop.f32.mrf.mxu0 }
 0x10b   : > { %v6197_v38 = vadd.f32 %v2156_v63, %v2024_v7  ;;  %v1962_v49 = vadd.f32 %v1961_v56, %v5914_v57  ;;  %v2094_v26 = vpop.f32.mrf.mxu1  ;;  %v4834_v56 = vld [vmem:[%s7956_s1 + $0xe8] sm:$0xf0] }
 0x10c   : > { %v4837_v14 = vor.u32 %v5367_v17, %v4834_v56  ;;  %v4898_v7 = vld [vmem:[%s7956_s1 + $0x168] sm:$0xf0]  ;;  %v5193_v56 = vld [vmem:[%s5596_s26 + $0xb4] sm:$0xf] }
 0x10d   : > { %v6200_v27 = vadd.f32 %v2094_v26, %v1962_v49  ;;  %2206 = vmatmul.bf16.gmra.mxu2 %v6189_v33  ;;  %2467 = vmatmul.bf16.gmra.mxu0 %v6191_v19  ;;  %v4901_v63 = vor.u32 %v5383_v58, %v4898_v7  ;;  %v4140_v26 = vld [vmem:[%s5596_s26 + $0xb0] sm:$0xf]  ;;  %v5196_v17 = vld [vmem:[%s5596_s26 + $0xc8] sm:$0xf0] }
 0x10e   : > { %2600 = vmatmul.bf16.gmra.mxu1 %v6195_v41  ;;  %2987 = vmatpush.bf16.msra.mxu0 %v4837_v14  ;;  %v4120_v14 = vld [vmem:[%s5596_s26 + $0x80] sm:$0xf]  ;;  %v6233_v24 = vor.u32 %v5196_v17, %v4140_v26 }
 0x10f   : > { %2339 = vmatmul.bf16.gmra.mxu3 %v6193_v39  ;;  %3120 = vmatpush.bf16.msra.mxu1 %v4901_v63 }
 0x110   : > { %v2026_v61 = vpop.f32.mrf.mxu2  ;;  %8178 = vst [vmem:[#allocation59_spill] sm:$0xff] %v6233_v24 }
 0x111   : > { %v2027_v20 = vadd.f32 %v2026_v61, %v5914_v57  ;;  %v5190_v61 = vld [vmem:[%s5596_s26 + $0x98] sm:$0xf0] }
 0x112   : > { %v2159_v16 = vpop.f32.mrf.mxu3  ;;  %v1963_v35 = vpop.f32.mrf.mxu0  ;;  %v6235_v50 = vor.u32 %v5190_v61, %v4120_v14  ;;  %v4168_v61 = vld [vmem:[%s5596_s26 + $0xe8] sm:$0xf] }
 0x113   : > { %v6213_v29 = vadd.f32 %v2159_v16, %v2027_v20  ;;  %v1964_v9 = vadd.f32 %v1963_v35, %v5914_v57  ;;  %v2096_v31 = vpop.f32.mrf.mxu1  ;;  %v4142_v20 = vld [vmem:[%s5596_s26 + $0xcc] sm:$0xf0]  ;;  %v5187_v16 = vld [vmem:[%s5596_s26 + $0x84] sm:$0xf]  ;;  %v4122_v35 = vld [vmem:[%s5596_s26 + $0x9c] sm:$0xf0] }
 0x114   : > { %8179 = vst [vmem:[#allocation60_spill] sm:$0xff] %v6235_v50 }
 0x115   : > { %8177 = vst [vmem:[#allocation58_spill] sm:$0xff] %v6213_v29  ;;  %v6222_v49 = vadd.f32 %v2096_v31, %v1964_v9  ;;  %v6237_v9 = vor.u32 %v5193_v56, %v4142_v20  ;;  %v6239_v31 = vor.u32 %v5187_v16, %v4122_v35  ;;  %v5203_v20 = vld [vmem:[%s5596_s26 + $0x100] sm:$0xf0]  ;;  %v5200_v16 = vld [vmem:[%s5596_s26 + $0xec] sm:$0xf] }
 0x116   : > { %v4148_v35 = vld [vmem:[%s5596_s26 + $0xb8] sm:$0xf]  ;;  %v6265_v62 = vor.u32 %v5203_v20, %v4168_v61 }
 0x117   : > { %8180 = vst [vmem:[#allocation61_spill] sm:$0xff] %v6237_v9 }
 0x118   : > { %v2028_v41 = vpop.f32.mrf.mxu2  ;;  %8181 = vst [vmem:[#allocation62_spill] sm:$0xff] %v6239_v31 }
 0x119   : > { %v2029_v39 = vadd.f32 %v2028_v41, %v5914_v57  ;;  %8184 = vst [vmem:[#allocation65_spill] sm:$0xff] %v6265_v62 }
 0x11a   : > { %v2161_v19 = vpop.f32.mrf.mxu3  ;;  %v1966_v58 = vpop.f32.mrf.mxu0 }
 0x11b   : > { %v6241_v7 = vadd.f32 %v2161_v19, %v2029_v39  ;;  %v1967_v63 = vadd.f32 %v1966_v58, %v5914_v57  ;;  %v2099_v48 = vpop.f32.mrf.mxu1  ;;  %v5197_v58 = vld [vmem:[%s5596_s26 + $0xd0] sm:$0xf0] }
 0x11d   : > { %8182 = vst [vmem:[#allocation63_spill] sm:$0xff] %v6241_v7  ;;  %v6244_v18 = vadd.f32 %v2099_v48, %v1967_v63  ;;  %2211 = vmatmul.bf16.gmra.mxu2 %v6233_v24  ;;  %2472 = vmatmul.bf16.gmra.mxu0 %v6235_v50  ;;  %v4170_v63 = vld [vmem:[%s5596_s26 + $0x104] sm:$0xf0] }
 0x11e   : > { %2605 = vmatmul.bf16.gmra.mxu1 %v6239_v31  ;;  %v5194_v31 = vld [vmem:[%s5596_s26 + $0xbc] sm:$0xf] }
 0x11f   : > { %2344 = vmatmul.bf16.gmra.mxu3 %v6237_v9  ;;  %v4150_v9 = vld [vmem:[%s5596_s26 + $0xd4] sm:$0xf0] }
 0x120   : > { %v2031_v19 = vpop.f32.mrf.mxu2 }
 0x121   : > { %v2032_v39 = vadd.f32 %v2031_v19, %v5914_v57 }
 0x122   : > { %v2164_v41 = vpop.f32.mrf.mxu3  ;;  %v1968_v26 = vpop.f32.mrf.mxu0 }
 0x123   : > { %v6251_v48 = vadd.f32 %v2164_v41, %v2032_v39  ;;  %v1969_v17 = vadd.f32 %v1968_v26, %v5914_v57  ;;  %v2101_v56 = vpop.f32.mrf.mxu1  ;;  %v6267_v39 = vor.u32 %v5197_v58, %v4148_v35  ;;  %v6269_v26 = vor.u32 %v5200_v16, %v4170_v63  ;;  %v4196_v16 = vld [vmem:[%s5596_s26 + $0x120] sm:$0xf]  ;;  %v5210_v35 = vld [vmem:[%s5596_s26 + $0x138] sm:$0xf0]  ;;  %v5207_v58 = vld [vmem:[%s5596_s26 + $0x124] sm:$0xf] }
 0x124   : > { %v4176_v63 = vld [vmem:[%s5596_s26 + $0xf0] sm:$0xf]  ;;  %v6297_v32 = vor.u32 %v5210_v35, %v4196_v16 }
 0x125   : > { %8183 = vst [vmem:[#allocation64_spill] sm:$0xff] %v6251_v48  ;;  %v6254_v14 = vadd.f32 %v2101_v56, %v1969_v17  ;;  %v6271_v17 = vor.u32 %v5194_v31, %v4150_v9 }
 0x126   : > { %8185 = vst [vmem:[#allocation66_spill] sm:$0xff] %v6267_v39 }
 0x127   : > { %8186 = vst [vmem:[#allocation67_spill] sm:$0xff] %v6269_v26 }
 0x128   : > { %v2033_v50 = vpop.f32.mrf.mxu2  ;;  %8187 = vst [vmem:[#allocation68_spill] sm:$0xff] %v6271_v17 }
 0x129   : > { %v2034_v19 = vadd.f32 %v2033_v50, %v5914_v57  ;;  %8190 = vst [vmem:[#allocation71_spill] sm:$0xff] %v6297_v32 }
 0x12a   : > { %v2166_v12 = vpop.f32.mrf.mxu3  ;;  %v1971_v41 = vpop.f32.mrf.mxu0 }
 0x12b   : > { %v6273_v56 = vadd.f32 %v2166_v12, %v2034_v19  ;;  %v1972_v60 = vadd.f32 %v1971_v41, %v5914_v57  ;;  %v2104_v34 = vpop.f32.mrf.mxu1  ;;  %v5204_v19 = vld [vmem:[%s5596_s26 + $0x108] sm:$0xf0]  ;;  %v4198_v41 = vld [vmem:[%s5596_s26 + $0x13c] sm:$0xf0] }
 0x12d   : > { %8188 = vst [vmem:[#allocation69_spill] sm:$0xff] %v6273_v56  ;;  %v6276_v24 = vadd.f32 %v2104_v34, %v1972_v60  ;;  %2216 = vmatmul.bf16.gmra.mxu2 %v6265_v62  ;;  %2477 = vmatmul.bf16.gmra.mxu0 %v6267_v39  ;;  %v5349_v56 = vld [vmem:[%s7956_s1 + $0x54] sm:$0xf] }
 0x12e   : > { %2610 = vmatmul.bf16.gmra.mxu1 %v6271_v17  ;;  %v5201_v17 = vld [vmem:[%s5596_s26 + $0xf4] sm:$0xf] }
 0x12f   : > { %2349 = vmatmul.bf16.gmra.mxu3 %v6269_v26  ;;  %v4178_v26 = vld [vmem:[%s5596_s26 + $0x10c] sm:$0xf0] }
 0x130   : > { %v2036_v12 = vpop.f32.mrf.mxu2 }
 0x131   : > { %v2037_v50 = vadd.f32 %v2036_v12, %v5914_v57 }
 0x132   : > { %v2169_v9 = vpop.f32.mrf.mxu3  ;;  %v1973_v31 = vpop.f32.mrf.mxu0 }
 0x133   : > { %v6283_v34 = vadd.f32 %v2169_v9, %v2037_v50  ;;  %v1974_v60 = vadd.f32 %v1973_v31, %v5914_v57  ;;  %v2106_v61 = vpop.f32.mrf.mxu1  ;;  %v6299_v50 = vor.u32 %v5204_v19, %v4176_v63  ;;  %v6301_v31 = vor.u32 %v5207_v58, %v4198_v41  ;;  %v5365_v63 = vld [vmem:[%s7956_s1 + $0xd4] sm:$0xf]  ;;  %v4826_v19 = vld [vmem:[%s7956_s1 + $0xd8] sm:$0xf0]  ;;  %v4224_v41 = vld [vmem:[%s5596_s26 + $0x158] sm:$0xf] }
 0x135   : > { %8189 = vst [vmem:[#allocation70_spill] sm:$0xff] %v6283_v34  ;;  %v6286_v20 = vadd.f32 %v2106_v61, %v1974_v60  ;;  %v6303_v60 = vor.u32 %v5201_v17, %v4178_v26 }
 0x136   : > { %8191 = vst [vmem:[#allocation72_spill] sm:$0xff] %v6299_v50 }
 0x137   : > { %8192 = vst [vmem:[#allocation73_spill] sm:$0xff] %v6301_v31 }
 0x138   : > { %v2038_v39 = vpop.f32.mrf.mxu2  ;;  %8193 = vst [vmem:[#allocation74_spill] sm:$0xff] %v6303_v60 }
 0x139   : > { %v2039_v12 = vadd.f32 %v2038_v39, %v5914_v57  ;;  %v4762_v39 = vld [vmem:[%s7956_s1 + $0x58] sm:$0xf0] }
 0x13a   : > { %v2171_v62 = vpop.f32.mrf.mxu3  ;;  %v1976_v9 = vpop.f32.mrf.mxu0  ;;  %v4765_v16 = vor.u32 %v5349_v56, %v4762_v39  ;;  %v5217_v39 = vld [vmem:[%s5596_s26 + $0x170] sm:$0xf0] }
 0x13b   : > { %v6305_v61 = vadd.f32 %v2171_v62, %v2039_v12  ;;  %v1977_v34 = vadd.f32 %v1976_v9, %v5914_v57  ;;  %v2109_v15 = vpop.f32.mrf.mxu1  ;;  %v4829_v12 = vor.u32 %v5365_v63, %v4826_v19  ;;  %v6347_v19 = vor.u32 %v5217_v39, %v4224_v41 }
 0x13c   : > { %2855 = vmatpush.bf16.msra.mxu3 %v4765_v16  ;;  %v5381_v16 = vld [vmem:[%s7956_s1 + $0x154] sm:$0xf] }
 0x13d   : > { %8194 = vst [vmem:[#allocation75_spill] sm:$0xff] %v6305_v61  ;;  %v6314_v35 = vadd.f32 %v2109_v15, %v1977_v34  ;;  %2221 = vmatmul.bf16.gmra.mxu2 %v6297_v32  ;;  %2482 = vmatmul.bf16.gmra.mxu0 %v6299_v50  ;;  %v5208_v50 = vld [vmem:[%s5596_s26 + $0x12c] sm:$0xf]  ;;  %v4206_v32 = vld [vmem:[%s5596_s26 + $0x144] sm:$0xf0] }
 0x13e   : > { %2615 = vmatmul.bf16.gmra.mxu1 %v6303_v60  ;;  %2988 = vmatpush.bf16.msra.mxu0 %v4829_v12  ;;  %8196 = vst [vmem:[#allocation77_spill] sm:$0xff] %v6347_v19  ;;  %v6353_v33 = vor.u32 %v5208_v50, %v4206_v32 }
 0x13f   : > { %2354 = vmatmul.bf16.gmra.mxu3 %v6301_v31  ;;  %v4226_v31 = vld [vmem:[%s5596_s26 + $0x174] sm:$0xf0] }
 0x140   : > { %v2041_v62 = vpop.f32.mrf.mxu2  ;;  %8199 = vst [vmem:[#allocation80_spill] sm:$0xff] %v6353_v33 }
 0x141   : > { %v2042_v26 = vadd.f32 %v2041_v62, %v5914_v57  ;;  %v4890_v62 = vld [vmem:[%s7956_s1 + $0x158] sm:$0xf0] }
 0x142   : > { %v2174_v17 = vpop.f32.mrf.mxu3  ;;  %v1978_v56 = vpop.f32.mrf.mxu0  ;;  %v4893_v60 = vor.u32 %v5381_v16, %v4890_v62 }
 0x143   : > { %v6321_v15 = vadd.f32 %v2174_v17, %v2042_v26  ;;  %v1979_v34 = vadd.f32 %v1978_v56, %v5914_v57  ;;  %v2111_v58 = vpop.f32.mrf.mxu1  ;;  %v5214_v26 = vld [vmem:[%s5596_s26 + $0x15c] sm:$0xf]  ;;  %v4204_v17 = vld [vmem:[%s5596_s26 + $0x128] sm:$0xf]  ;;  %v5211_v56 = vld [vmem:[%s5596_s26 + $0x140] sm:$0xf0] }
 0x144   : > { %3121 = vmatpush.bf16.msra.mxu1 %v4893_v60  ;;  %v6351_v48 = vor.u32 %v5214_v26, %v4226_v31 }
 0x145   : > { %8195 = vst [vmem:[#allocation76_spill] sm:$0xff] %v6321_v15  ;;  %v6331_v9 = vadd.f32 %v2111_v58, %v1979_v34  ;;  %v6349_v15 = vor.u32 %v5211_v56, %v4204_v17  ;;  %v4252_v17 = vld [vmem:[%s5596_s26 + $0x190] sm:$0xf]  ;;  %v5224_v56 = vld [vmem:[%s5596_s26 + $0x1a8] sm:$0xf0] }
 0x146   : > { %8198 = vst [vmem:[#allocation79_spill] sm:$0xff] %v6351_v48 }
 0x147   : > { %8197 = vst [vmem:[#allocation78_spill] sm:$0xff] %v6349_v15 }
 0x148   : > { %v2043_v63 = vpop.f32.mrf.mxu2 }
 0x149   : > { %v2044_v34 = vadd.f32 %v2043_v63, %v5914_v57  ;;  %v5221_v63 = vld [vmem:[%s5596_s26 + $0x194] sm:$0xf] }
 0x14a   : > { %v2176_v58 = vpop.f32.mrf.mxu3  ;;  %v1981_v61 = vpop.f32.mrf.mxu0 }
 0x14b   : > { %v6355_v13 = vadd.f32 %v2176_v58, %v2044_v34  ;;  %v1982_v12 = vadd.f32 %v1981_v61, %v5914_v57  ;;  %v2114_v16 = vpop.f32.mrf.mxu1  ;;  %v4232_v34 = vld [vmem:[%s5596_s26 + $0x160] sm:$0xf]  ;;  %v5218_v58 = vld [vmem:[%s5596_s26 + $0x178] sm:$0xf0] }
 0x14d   : > { %8200 = vst [vmem:[#allocation81_spill] sm:$0xff] %v6355_v13  ;;  %v6358_v60 = vadd.f32 %v2114_v16, %v1982_v12  ;;  %2226 = vmatmul.bf16.gmra.mxu2 %v6347_v19  ;;  %2487 = vmatmul.bf16.gmra.mxu0 %v6349_v15  ;;  %v4254_v12 = vld [vmem:[%s5596_s26 + $0x1ac] sm:$0xf0]  ;;  %v5215_v16 = vld [vmem:[%s5596_s26 + $0x164] sm:$0xf]  ;;  %v6379_v19 = vor.u32 %v5224_v56, %v4252_v17 }
 0x14e   : > { %2620 = vmatmul.bf16.gmra.mxu1 %v6353_v33  ;;  %v4234_v33 = vld [vmem:[%s5596_s26 + $0x17c] sm:$0xf0] }
 0x14f   : > { %2359 = vmatmul.bf16.gmra.mxu3 %v6351_v48  ;;  %8202 = vst [vmem:[#allocation83_spill] sm:$0xff] %v6379_v19 }
 0x150   : > { %v2046_v32 = vpop.f32.mrf.mxu2 }
 0x151   : > { %v2047_v50 = vadd.f32 %v2046_v32, %v5914_v57 }
 0x152   : > { %v2179_v31 = vpop.f32.mrf.mxu3  ;;  %v1983_v61 = vpop.f32.mrf.mxu0 }
 0x153   : > { %v6365_v41 = vadd.f32 %v2179_v31, %v2047_v50  ;;  %v1984_v39 = vadd.f32 %v1983_v61, %v5914_v57  ;;  %v2116_v62 = vpop.f32.mrf.mxu1  ;;  %v6381_v50 = vor.u32 %v5218_v58, %v4232_v34  ;;  %v6383_v61 = vor.u32 %v5221_v63, %v4254_v12  ;;  %v4280_v34 = vld [vmem:[%s5596_s26 + $0x1c8] sm:$0xf]  ;;  %v5231_v58 = vld [vmem:[%s5596_s26 + $0x1e0] sm:$0xf0]  ;;  %v5228_v12 = vld [vmem:[%s5596_s26 + $0x1cc] sm:$0xf] }
 0x155   : > { %8201 = vst [vmem:[#allocation82_spill] sm:$0xff] %v6365_v41  ;;  %v6368_v26 = vadd.f32 %v2116_v62, %v1984_v39  ;;  %v6385_v39 = vor.u32 %v5215_v16, %v4234_v33  ;;  %v4260_v16 = vld [vmem:[%s5596_s26 + $0x198] sm:$0xf] }
 0x156   : > { %8203 = vst [vmem:[#allocation84_spill] sm:$0xff] %v6381_v50 }
 0x157   : > { %8204 = vst [vmem:[#allocation85_spill] sm:$0xff] %v6383_v61 }
 0x158   : > { %v2048_v48 = vpop.f32.mrf.mxu2  ;;  %8205 = vst [vmem:[#allocation86_spill] sm:$0xff] %v6385_v39 }
 0x159   : > { %v2049_v32 = vadd.f32 %v2048_v48, %v5914_v57 }
 0x15a   : > { %v2181_v15 = vpop.f32.mrf.mxu3  ;;  %v1986_v31 = vpop.f32.mrf.mxu0 }
 0x15b   : > { %v6387_v62 = vadd.f32 %v2181_v15, %v2049_v32  ;;  %v1987_v41 = vadd.f32 %v1986_v31, %v5914_v57  ;;  %v2119_v13 = vpop.f32.mrf.mxu1  ;;  %v5225_v32 = vld [vmem:[%s5596_s26 + $0x1b0] sm:$0xf0]  ;;  %v4282_v31 = vld [vmem:[%s5596_s26 + $0x1e4] sm:$0xf0] }
 0x15d   : > { %8206 = vst [vmem:[#allocation87_spill] sm:$0xff] %v6387_v62  ;;  %v6390_v54 = vadd.f32 %v2119_v13, %v1987_v41  ;;  %2231 = vmatmul.bf16.gmra.mxu2 %v6379_v19  ;;  %2492 = vmatmul.bf16.gmra.mxu0 %v6381_v50  ;;  %v6412_v62 = vor.u32 %v5225_v32, %v4260_v16 }
 0x15e   : > { %2625 = vmatmul.bf16.gmra.mxu1 %v6385_v39  ;;  %v5222_v39 = vld [vmem:[%s5596_s26 + $0x19c] sm:$0xf] }
 0x15f   : > { %2364 = vmatmul.bf16.gmra.mxu3 %v6383_v61  ;;  %v4262_v61 = vld [vmem:[%s5596_s26 + $0x1b4] sm:$0xf0]  ;;  %8209 = vst [vmem:[#allocation90_spill] sm:$0xff] %v6412_v62 }
 0x160   : > { %v2051_v33 = vpop.f32.mrf.mxu2 }
 0x161   : > { %v2052_v48 = vadd.f32 %v2051_v33, %v5914_v57  ;;  %v6410_v33 = vor.u32 %v5231_v58, %v4280_v34 }
 0x162   : > { %v2184_v15 = vpop.f32.mrf.mxu3  ;;  %v1988_v17 = vpop.f32.mrf.mxu0 }
 0x163   : > { %v6397_v13 = vadd.f32 %v2184_v15, %v2052_v48  ;;  %v1989_v41 = vadd.f32 %v1988_v17, %v5914_v57  ;;  %v2121_v56 = vpop.f32.mrf.mxu1  ;;  %8208 = vst [vmem:[#allocation89_spill] sm:$0xff] %v6410_v33  ;;  %v6414_v15 = vor.u32 %v5228_v12, %v4282_v31  ;;  %v6416_v17 = vor.u32 %v5222_v39, %v4262_v61 }
 0x165   : > { %8207 = vst [vmem:[#allocation88_spill] sm:$0xff] %v6397_v13  ;;  %v6400_v63 = vadd.f32 %v2121_v56, %v1989_v41 }
 0x166   : > { %8210 = vst [vmem:[#allocation91_spill] sm:$0xff] %v6414_v15 }
 0x167   : > { %8211 = vst [vmem:[#allocation92_spill] sm:$0xff] %v6416_v17 }
 0x168   : > { %v2053_v50 = vpop.f32.mrf.mxu2 }
 0x169   : > { %v4754_v50 = vld [vmem:[%s7956_s1 + $0x48] sm:$0xf0] }
 0x16a   : > { %v2186_v19 = vpop.f32.mrf.mxu3  ;;  %v1991_v48 = vpop.f32.mrf.mxu0 }
 0x16b   : > { %v1992_v41 = vadd.f32 %v1991_v48, %v5914_v57  ;;  %v2124_v56 = vpop.f32.mrf.mxu1  ;;  %v5347_v19 = vld [vmem:[%s7956_s1 + $0x44] sm:$0xf]  ;;  %v4308_v48 = vld [vmem:[%s5596_s26 + $0x200] sm:$0xf] }
 0x16c   : > { %v4757_v61 = vor.u32 %v5347_v19, %v4754_v50  ;;  %v5235_v19 = vld [vmem:[%s5596_s26 + $0x204] sm:$0xf] }
 0x16d   : > { %v6419_v13 = vadd.f32 %v2124_v56, %v1992_v41  ;;  %2236 = vmatmul.bf16.gmra.mxu2 %v6410_v33  ;;  %2497 = vmatmul.bf16.gmra.mxu0 %v6412_v62  ;;  %v5238_v41 = vld [vmem:[%s5596_s26 + $0x218] sm:$0xf0]  ;;  %v5363_v50 = vld [vmem:[%s7956_s1 + $0xc4] sm:$0xf] }
 0x16e   : > { %2630 = vmatmul.bf16.gmra.mxu1 %v6416_v17  ;;  %2856 = vmatpush.bf16.msra.mxu3 %v4757_v61  ;;  %v5379_v61 = vld [vmem:[%s7956_s1 + $0x144] sm:$0xf]  ;;  %v6456_v7 = vor.u32 %v5238_v41, %v4308_v48  ;;  %v4336_v48 = vld [vmem:[%s5596_s26 + $0x238] sm:$0xf]  ;;  %v5245_v41 = vld [vmem:[%s5596_s26 + $0x250] sm:$0xf0] }
 0x16f   : > { %2369 = vmatmul.bf16.gmra.mxu3 %v6414_v15 }
 0x170   : > { %v2197_v39 = vpop.f32.mrf.mxu2 }
 0x171   : > { %v2198_v34 = vadd.f32 %v2197_v39, %v5951_v42  ;;  %v4818_v42 = vld [vmem:[%s7956_s1 + $0xc8] sm:$0xf0]  ;;  %v4288_v39 = vld [vmem:[%s5596_s26 + $0x1d0] sm:$0xf] }
 0x172   : > { %v2330_v58 = vpop.f32.mrf.mxu3  ;;  %v1993_v12 = vpop.f32.mrf.mxu0 }
 0x173   : > { %v2331_v16 = vadd.f32 %v2330_v58, %v2198_v34  ;;  %v1994_v32 = vadd.f32 %v1993_v12, %v5914_v57  ;;  %v2126_v31 = vpop.f32.mrf.mxu1  ;;  %v5232_v57 = vld [vmem:[%s5596_s26 + $0x1e8] sm:$0xf0]  ;;  %v4821_v34 = vor.u32 %v5363_v50, %v4818_v42  ;;  %v4310_v12 = vld [vmem:[%s5596_s26 + $0x21c] sm:$0xf0] }
 0x174   : > { %v4882_v58 = vld [vmem:[%s7956_s1 + $0x148] sm:$0xf0]  ;;  %v6458_v29 = vor.u32 %v5232_v57, %v4288_v39  ;;  %v6460_v50 = vor.u32 %v5235_v19, %v4310_v12  ;;  %v5242_v19 = vld [vmem:[%s5596_s26 + $0x23c] sm:$0xf]  ;;  %v4316_v39 = vld [vmem:[%s5596_s26 + $0x208] sm:$0xf] }
 0x175   : > { %v6435_v56 = vadd.f32 %v2126_v31, %v1994_v32  ;;  %v5229_v32 = vld [vmem:[%s5596_s26 + $0x1d4] sm:$0xf]  ;;  %v4290_v31 = vld [vmem:[%s5596_s26 + $0x1ec] sm:$0xf0]  ;;  %v4885_v17 = vor.u32 %v5379_v61, %v4882_v58  ;;  %2989 = vmatpush.bf16.msra.mxu0 %v4821_v34  ;;  %v5239_v57 = vld [vmem:[%s5596_s26 + $0x220] sm:$0xf0] }
 0x176   : > { %8212 = vst [vmem:[#allocation93_spill] sm:$0xff] %v6458_v29  ;;  %v6462_v42 = vor.u32 %v5229_v32, %v4290_v31  ;;  %v4338_v58 = vld [vmem:[%s5596_s26 + $0x254] sm:$0xf0]  ;;  %v5236_v12 = vld [vmem:[%s5596_s26 + $0x20c] sm:$0xf] }
 0x177   : > { %3122 = vmatpush.bf16.msra.mxu1 %v4885_v17  ;;  %8213 = vst [vmem:[#allocation94_spill] sm:$0xff] %v6460_v50  ;;  %v4318_v32 = vld [vmem:[%s5596_s26 + $0x224] sm:$0xf0] }
 0x178   : > { %v2199_v15 = vpop.f32.mrf.mxu2  ;;  %8214 = vst [vmem:[#allocation95_spill] sm:$0xff] %v6462_v42 }
 0x179   : > { %v2200_v62 = vadd.f32 %v2199_v15, %v5967_v2 }
 0x17a   : > { %v2332_v33 = vpop.f32.mrf.mxu3  ;;  %v2463_v4 = vpop.f32.mrf.mxu0 }
 0x17b   : > { %v2333_v52 = vadd.f32 %v2332_v33, %v2200_v62  ;;  %v2464_v30 = vadd.f32 %v2463_v4, %v2331_v16  ;;  %v2596_v61 = vpop.f32.mrf.mxu1 }
 0x17d   : > { %v6464_v34 = vadd.f32 %v2596_v61, %v2464_v30  ;;  %2241 = vmatmul.bf16.gmra.mxu2 %v6456_v7  ;;  %2502 = vmatmul.bf16.gmra.mxu0 %v6458_v29 }
 0x17e   : > { %2635 = vmatmul.bf16.gmra.mxu1 %v6462_v42 }
 0x17f   : > { %2374 = vmatmul.bf16.gmra.mxu3 %v6460_v50 }
 0x180   : > { %v2202_v2 = vpop.f32.mrf.mxu2 }
 0x181   : > { %v2203_v4 = vadd.f32 %v2202_v2, %v5989_v47  ;;  %v6482_v47 = vor.u32 %v5245_v41, %v4336_v48  ;;  %v6484_v2 = vor.u32 %v5239_v57, %v4316_v39 }
 0x182   : > { %v2335_v62 = vpop.f32.mrf.mxu3  ;;  %v2465_v33 = vpop.f32.mrf.mxu0 }
 0x183   : > { %v2336_v30 = vadd.f32 %v2335_v62, %v2203_v4  ;;  %v2466_v15 = vadd.f32 %v2465_v33, %v2333_v52  ;;  %v2598_v17 = vpop.f32.mrf.mxu1  ;;  %8215 = vst [vmem:[#allocation96_spill] sm:$0xff] %v6482_v47  ;;  %v6486_v4 = vor.u32 %v5242_v19, %v4338_v58  ;;  %v6488_v62 = vor.u32 %v5236_v12, %v4318_v32  ;;  %v4364_v58 = vld [vmem:[%s5596_s26 + $0x270] sm:$0xf]  ;;  %v5252_v12 = vld [vmem:[%s5596_s26 + $0x288] sm:$0xf0] }
 0x184   : > { %8216 = vst [vmem:[#allocation97_spill] sm:$0xff] %v6484_v2  ;;  %v5249_v32 = vld [vmem:[%s5596_s26 + $0x274] sm:$0xf] }
 0x185   : > { %v6471_v16 = vadd.f32 %v2598_v17, %v2466_v15  ;;  %8217 = vst [vmem:[#allocation98_spill] sm:$0xff] %v6486_v4 }
 0x186   : > { %8218 = vst [vmem:[#allocation99_spill] sm:$0xff] %v6488_v62 }
 0x188   : > { %v2204_v31 = vpop.f32.mrf.mxu2 }
 0x189   : > { %v2205_v61 = vadd.f32 %v2204_v31, %v6014_v45  ;;  %v4344_v31 = vld [vmem:[%s5596_s26 + $0x240] sm:$0xf] }
 0x18a   : > { %v2337_v42 = vpop.f32.mrf.mxu3  ;;  %v2468_v52 = vpop.f32.mrf.mxu0 }
 0x18b   : > { %v2338_v33 = vadd.f32 %v2337_v42, %v2205_v61  ;;  %v2469_v15 = vadd.f32 %v2468_v52, %v2336_v30  ;;  %v2601_v17 = vpop.f32.mrf.mxu1  ;;  %v5246_v61 = vld [vmem:[%s5596_s26 + $0x258] sm:$0xf0]  ;;  %v4366_v52 = vld [vmem:[%s5596_s26 + $0x28c] sm:$0xf0] }
 0x18d   : > { %v6490_v50 = vadd.f32 %v2601_v17, %v2469_v15  ;;  %2246 = vmatmul.bf16.gmra.mxu2 %v6482_v47  ;;  %2507 = vmatmul.bf16.gmra.mxu0 %v6484_v2  ;;  %v5243_v15 = vld [vmem:[%s5596_s26 + $0x244] sm:$0xf]  ;;  %v4346_v17 = vld [vmem:[%s5596_s26 + $0x25c] sm:$0xf0] }
 0x18e   : > { %2640 = vmatmul.bf16.gmra.mxu1 %v6488_v62 }
 0x18f   : > { %2379 = vmatmul.bf16.gmra.mxu3 %v6486_v4 }
 0x190   : > { %v2207_v45 = vpop.f32.mrf.mxu2 }
 0x191   : > { %v2208_v42 = vadd.f32 %v2207_v45, %v6045_v5  ;;  %v6508_v5 = vor.u32 %v5252_v12, %v4364_v58  ;;  %v6510_v45 = vor.u32 %v5246_v61, %v4344_v31 }
 0x192   : > { %v2340_v30 = vpop.f32.mrf.mxu3  ;;  %v2470_v48 = vpop.f32.mrf.mxu0 }
 0x193   : > { %v2341_v41 = vadd.f32 %v2340_v30, %v2208_v42  ;;  %v2471_v19 = vadd.f32 %v2470_v48, %v2338_v33  ;;  %v2603_v39 = vpop.f32.mrf.mxu1  ;;  %8219 = vst [vmem:[#allocation100_spill] sm:$0xff] %v6508_v5  ;;  %v6512_v42 = vor.u32 %v5249_v32, %v4366_v52  ;;  %v6514_v30 = vor.u32 %v5243_v15, %v4346_v17 }
 0x194   : > { %8220 = vst [vmem:[#allocation101_spill] sm:$0xff] %v6510_v45 }
 0x195   : > { %v6497_v57 = vadd.f32 %v2603_v39, %v2471_v19  ;;  %8221 = vst [vmem:[#allocation102_spill] sm:$0xff] %v6512_v42 }
 0x196   : > { %8222 = vst [vmem:[#allocation103_spill] sm:$0xff] %v6514_v30 }
 0x198   : > { %v2209_v62 = vpop.f32.mrf.mxu2 }
 0x199   : > { %v2210_v4 = vadd.f32 %v2209_v62, %v6056_v11  ;;  %v5104_v11 = vld [vmem:[%s7956_s1 + $0x300] sm:$0xf]  ;;  %v5436_v62 = vld [vmem:[%s7956_s1 + $0x304] sm:$0xf0] }
 0x19a   : > { %v2342_v2 = vpop.f32.mrf.mxu3  ;;  %v2473_v33 = vpop.f32.mrf.mxu0 }
 0x19b   : > { %v2343_v48 = vadd.f32 %v2342_v2, %v2210_v4  ;;  %v2474_v19 = vadd.f32 %v2473_v33, %v2341_v41  ;;  %v2606_v39 = vpop.f32.mrf.mxu1  ;;  %v5105_v2 = vor.u32 %v5436_v62, %v5104_v11  ;;  %v5345_v4 = vld [vmem:[%s7956_s1 + $0x34] sm:$0xf]  ;;  %v4746_v41 = vld [vmem:[%s7956_s1 + $0x38] sm:$0xf0]  ;;  %v4392_v33 = vld [vmem:[%s5596_s26 + $0x2a8] sm:$0xf] }
 0x19c   : > { %v4749_v58 = vor.u32 %v5345_v4, %v4746_v41  ;;  %v5256_v11 = vld [vmem:[%s5596_s26 + $0x2ac] sm:$0xf]  ;;  %v5361_v62 = vld [vmem:[%s7956_s1 + $0xb4] sm:$0xf]  ;;  %v4372_v4 = vld [vmem:[%s5596_s26 + $0x278] sm:$0xf] }
 0x19d   : > { %v6516_v29 = vadd.f32 %v2606_v39, %v2474_v19  ;;  %2251 = vmatmul.bf16.gmra.mxu2 %v6508_v5  ;;  %2512 = vmatmul.bf16.gmra.mxu0 %v6510_v45  ;;  %v5259_v19 = vld [vmem:[%s5596_s26 + $0x2c0] sm:$0xf0] }
 0x19e   : > { %2645 = vmatmul.bf16.gmra.mxu1 %v6514_v30  ;;  %2727 = vmatpush.bf16.msra.mxu2 %v5105_v2  ;;  %v5377_v2 = vld [vmem:[%s7956_s1 + $0x134] sm:$0xf] }
 0x19f   : > { %2384 = vmatmul.bf16.gmra.mxu3 %v6512_v42  ;;  %v6558_v42 = vor.u32 %v5259_v19, %v4392_v33 }
 0x1a0   : > { %v2212_v12 = vpop.f32.mrf.mxu2  ;;  %2857 = vmatpush.bf16.msra.mxu3 %v4749_v58  ;;  %v4874_v58 = vld [vmem:[%s7956_s1 + $0x138] sm:$0xf0] }
 0x1a1   : > { %v2213_v32 = vadd.f32 %v2212_v12, %v6086_v43  ;;  %v4810_v43 = vld [vmem:[%s7956_s1 + $0xb8] sm:$0xf0]  ;;  %v4394_v12 = vld [vmem:[%s5596_s26 + $0x2c4] sm:$0xf0] }
 0x1a2   : > { %v2345_v31 = vpop.f32.mrf.mxu3  ;;  %v2475_v61 = vpop.f32.mrf.mxu0  ;;  %v4813_v41 = vor.u32 %v5361_v62, %v4810_v43  ;;  %v6562_v62 = vor.u32 %v5256_v11, %v4394_v12  ;;  %v4400_v12 = vld [vmem:[%s5596_s26 + $0x2b0] sm:$0xf] }
 0x1a3   : > { %v2346_v52 = vadd.f32 %v2345_v31, %v2213_v32  ;;  %v2476_v15 = vadd.f32 %v2475_v61, %v2343_v48  ;;  %v2608_v17 = vpop.f32.mrf.mxu1  ;;  %v5253_v48 = vld [vmem:[%s5596_s26 + $0x290] sm:$0xf0]  ;;  %v5250_v32 = vld [vmem:[%s5596_s26 + $0x27c] sm:$0xf]  ;;  %v4374_v31 = vld [vmem:[%s5596_s26 + $0x294] sm:$0xf0]  ;;  %v4877_v61 = vor.u32 %v5377_v2, %v4874_v58 }
 0x1a4   : > { %2990 = vmatpush.bf16.msra.mxu0 %v4813_v41  ;;  %v6560_v45 = vor.u32 %v5253_v48, %v4372_v4  ;;  %8225 = vst [vmem:[#allocation106_spill] sm:$0xff] %v6562_v62  ;;  %v6564_v43 = vor.u32 %v5250_v32, %v4374_v31  ;;  %v4420_v4 = vld [vmem:[%s5596_s26 + $0x2e0] sm:$0xf]  ;;  %v5266_v48 = vld [vmem:[%s5596_s26 + $0x2f8] sm:$0xf0] }
 0x1a5   : > { %v6537_v39 = vadd.f32 %v2608_v17, %v2476_v15  ;;  %3123 = vmatpush.bf16.msra.mxu1 %v4877_v61  ;;  %v5263_v58 = vld [vmem:[%s5596_s26 + $0x2e4] sm:$0xf]  ;;  %v5260_v32 = vld [vmem:[%s5596_s26 + $0x2c8] sm:$0xf0]  ;;  %v4422_v31 = vld [vmem:[%s5596_s26 + $0x2fc] sm:$0xf0] }
 0x1a6   : > { %8224 = vst [vmem:[#allocation105_spill] sm:$0xff] %v6560_v45  ;;  %v5257_v61 = vld [vmem:[%s5596_s26 + $0x2b4] sm:$0xf] }
 0x1a7   : > { %8223 = vst [vmem:[#allocation104_spill] sm:$0xff] %v6537_v39 }
 0x1a8   : > { %v2214_v15 = vpop.f32.mrf.mxu2  ;;  %8226 = vst [vmem:[#allocation107_spill] sm:$0xff] %v6564_v43 }
 0x1a9   : > { %v2215_v17 = vadd.f32 %v2214_v15, %v6108_v46  ;;  %v4402_v15 = vld [vmem:[%s5596_s26 + $0x2cc] sm:$0xf0] }
 0x1aa   : > { %v2347_v30 = vpop.f32.mrf.mxu3  ;;  %v2478_v5 = vpop.f32.mrf.mxu0 }
 0x1ab   : > { %v2348_v47 = vadd.f32 %v2347_v30, %v2215_v17  ;;  %v2479_v39 = vadd.f32 %v2478_v5, %v2346_v52  ;;  %v2611_v2 = vpop.f32.mrf.mxu1 }
 0x1ad   : > { %v6566_v41 = vadd.f32 %v2611_v2, %v2479_v39  ;;  %2256 = vmatmul.bf16.gmra.mxu2 %v6558_v42  ;;  %2517 = vmatmul.bf16.gmra.mxu0 %v6560_v45 }
 0x1ae   : > { %2650 = vmatmul.bf16.gmra.mxu1 %v6564_v43 }
 0x1af   : > { %2389 = vmatmul.bf16.gmra.mxu3 %v6562_v62 }
 0x1b0   : > { %v2217_v46 = vpop.f32.mrf.mxu2 }
 0x1b1   : > { %v2218_v5 = vadd.f32 %v2217_v46, %v6130_v53  ;;  %v6584_v53 = vor.u32 %v5266_v48, %v4420_v4  ;;  %v6586_v46 = vor.u32 %v5260_v32, %v4400_v12 }
 0x1b2   : > { %v2350_v30 = vpop.f32.mrf.mxu3  ;;  %v2480_v52 = vpop.f32.mrf.mxu0 }
 0x1b3   : > { %v2351_v33 = vadd.f32 %v2350_v30, %v2218_v5  ;;  %v2481_v19 = vadd.f32 %v2480_v52, %v2348_v47  ;;  %v2613_v39 = vpop.f32.mrf.mxu1  ;;  %8227 = vst [vmem:[#allocation108_spill] sm:$0xff] %v6584_v53  ;;  %v6588_v5 = vor.u32 %v5263_v58, %v4422_v31  ;;  %v6590_v30 = vor.u32 %v5257_v61, %v4402_v15  ;;  %v4448_v31 = vld [vmem:[%s5596_s26 + $0x318] sm:$0xf]  ;;  %v5273_v61 = vld [vmem:[%s5596_s26 + $0x330] sm:$0xf0] }
 0x1b4   : > { %8228 = vst [vmem:[#allocation109_spill] sm:$0xff] %v6586_v46  ;;  %v5270_v15 = vld [vmem:[%s5596_s26 + $0x31c] sm:$0xf] }
 0x1b5   : > { %v6573_v11 = vadd.f32 %v2613_v39, %v2481_v19  ;;  %8229 = vst [vmem:[#allocation110_spill] sm:$0xff] %v6588_v5 }
 0x1b6   : > { %8230 = vst [vmem:[#allocation111_spill] sm:$0xff] %v6590_v30 }
 0x1b8   : > { %v2219_v17 = vpop.f32.mrf.mxu2 }
 0x1b9   : > { %v2220_v2 = vadd.f32 %v2219_v17, %v6140_v25  ;;  %v4428_v17 = vld [vmem:[%s5596_s26 + $0x2e8] sm:$0xf] }
 0x1ba   : > { %v2352_v43 = vpop.f32.mrf.mxu3  ;;  %v2483_v47 = vpop.f32.mrf.mxu0 }
 0x1bb   : > { %v2353_v52 = vadd.f32 %v2352_v43, %v2220_v2  ;;  %v2484_v19 = vadd.f32 %v2483_v47, %v2351_v33  ;;  %v2616_v39 = vpop.f32.mrf.mxu1  ;;  %v5267_v2 = vld [vmem:[%s5596_s26 + $0x300] sm:$0xf0]  ;;  %v4450_v47 = vld [vmem:[%s5596_s26 + $0x334] sm:$0xf0] }
 0x1bd   : > { %v6592_v62 = vadd.f32 %v2616_v39, %v2484_v19  ;;  %2261 = vmatmul.bf16.gmra.mxu2 %v6584_v53  ;;  %2522 = vmatmul.bf16.gmra.mxu0 %v6586_v46  ;;  %v5264_v19 = vld [vmem:[%s5596_s26 + $0x2ec] sm:$0xf]  ;;  %v4430_v39 = vld [vmem:[%s5596_s26 + $0x304] sm:$0xf0] }
 0x1be   : > { %2655 = vmatmul.bf16.gmra.mxu1 %v6590_v30 }
 0x1bf   : > { %2394 = vmatmul.bf16.gmra.mxu3 %v6588_v5 }
 0x1c0   : > { %v2222_v25 = vpop.f32.mrf.mxu2 }
 0x1c1   : > { %v2223_v43 = vadd.f32 %v2222_v25, %v6162_v0  ;;  %v6610_v0 = vor.u32 %v5273_v61, %v4448_v31  ;;  %v6612_v25 = vor.u32 %v5267_v2, %v4428_v17 }
 0x1c2   : > { %v2355_v33 = vpop.f32.mrf.mxu3  ;;  %v2485_v4 = vpop.f32.mrf.mxu0 }
 0x1c3   : > { %v2356_v48 = vadd.f32 %v2355_v33, %v2223_v43  ;;  %v2486_v58 = vadd.f32 %v2485_v4, %v2353_v52  ;;  %v2618_v12 = vpop.f32.mrf.mxu1  ;;  %8231 = vst [vmem:[#allocation112_spill] sm:$0xff] %v6610_v0  ;;  %v6614_v43 = vor.u32 %v5270_v15, %v4450_v47  ;;  %v6616_v33 = vor.u32 %v5264_v19, %v4430_v39  ;;  %v4476_v47 = vld [vmem:[%s5596_s26 + $0x350] sm:$0xf]  ;;  %v5280_v39 = vld [vmem:[%s5596_s26 + $0x368] sm:$0xf0] }
 0x1c4   : > { %8232 = vst [vmem:[#allocation113_spill] sm:$0xff] %v6612_v25 }
 0x1c5   : > { %v6599_v32 = vadd.f32 %v2618_v12, %v2486_v58  ;;  %8233 = vst [vmem:[#allocation114_spill] sm:$0xff] %v6614_v43 }
 0x1c6   : > { %8234 = vst [vmem:[#allocation115_spill] sm:$0xff] %v6616_v33 }
 0x1c8   : > { %v2224_v30 = vpop.f32.mrf.mxu2 }
 0x1c9   : > { %v2225_v5 = vadd.f32 %v2224_v30, %v6173_v36  ;;  %v5343_v36 = vld [vmem:[%s7956_s1 + $0x24] sm:$0xf] }
 0x1ca   : > { %v2357_v46 = vpop.f32.mrf.mxu3  ;;  %v2488_v52 = vpop.f32.mrf.mxu0 }
 0x1cb   : > { %v2358_v4 = vadd.f32 %v2357_v46, %v2225_v5  ;;  %v2489_v58 = vadd.f32 %v2488_v52, %v2356_v48  ;;  %v2621_v12 = vpop.f32.mrf.mxu1  ;;  %v4738_v46 = vld [vmem:[%s7956_s1 + $0x28] sm:$0xf0]  ;;  %v5359_v52 = vld [vmem:[%s7956_s1 + $0xa4] sm:$0xf] }
 0x1cc   : > { %v4741_v5 = vor.u32 %v5343_v36, %v4738_v46  ;;  %v5274_v36 = vld [vmem:[%s5596_s26 + $0x338] sm:$0xf0] }
 0x1cd   : > { %v6618_v45 = vadd.f32 %v2621_v12, %v2489_v58  ;;  %2266 = vmatmul.bf16.gmra.mxu2 %v6610_v0  ;;  %2527 = vmatmul.bf16.gmra.mxu0 %v6612_v25  ;;  %v5277_v58 = vld [vmem:[%s5596_s26 + $0x354] sm:$0xf]  ;;  %v4456_v12 = vld [vmem:[%s5596_s26 + $0x320] sm:$0xf] }
 0x1ce   : > { %2660 = vmatmul.bf16.gmra.mxu1 %v6616_v33  ;;  %2858 = vmatpush.bf16.msra.mxu3 %v4741_v5  ;;  %v4478_v5 = vld [vmem:[%s5596_s26 + $0x36c] sm:$0xf0] }
 0x1cf   : > { %2399 = vmatmul.bf16.gmra.mxu3 %v6614_v43  ;;  %v6652_v43 = vor.u32 %v5277_v58, %v4478_v5 }
 0x1d0   : > { %v2227_v30 = vpop.f32.mrf.mxu2 }
 0x1d1   : > { %v2228_v48 = vadd.f32 %v2227_v30, %v6200_v27  ;;  %v4802_v27 = vld [vmem:[%s7956_s1 + $0xa8] sm:$0xf0]  ;;  %v5271_v30 = vld [vmem:[%s5596_s26 + $0x324] sm:$0xf]  ;;  %8236 = vst [vmem:[#allocation117_spill] sm:$0xff] %v6652_v43 }
 0x1d2   : > { %v2360_v31 = vpop.f32.mrf.mxu3  ;;  %v2490_v61 = vpop.f32.mrf.mxu0  ;;  %v4805_v46 = vor.u32 %v5359_v52, %v4802_v27  ;;  %v5375_v27 = vld [vmem:[%s7956_s1 + $0x124] sm:$0xf] }
 0x1d3   : > { %v2361_v15 = vadd.f32 %v2360_v31, %v2228_v48  ;;  %v2491_v17 = vadd.f32 %v2490_v61, %v2358_v4  ;;  %v2623_v2 = vpop.f32.mrf.mxu1  ;;  %v4458_v4 = vld [vmem:[%s5596_s26 + $0x33c] sm:$0xf0] }
 0x1d4   : > { %2991 = vmatpush.bf16.msra.mxu0 %v4805_v46  ;;  %v6654_v25 = vor.u32 %v5271_v30, %v4458_v4  ;;  %v4504_v30 = vld [vmem:[%s5596_s26 + $0x388] sm:$0xf]  ;;  %v5287_v4 = vld [vmem:[%s5596_s26 + $0x3a0] sm:$0xf0] }
 0x1d5   : > { %v6632_v19 = vadd.f32 %v2623_v2, %v2491_v17  ;;  %v6648_v17 = vor.u32 %v5280_v39, %v4476_v47  ;;  %v6650_v2 = vor.u32 %v5274_v36, %v4456_v12 }
 0x1d6   : > { %8237 = vst [vmem:[#allocation118_spill] sm:$0xff] %v6654_v25 }
 0x1d7   : > { %8235 = vst [vmem:[#allocation116_spill] sm:$0xff] %v6650_v2 }
 0x1d8   : > { %v2229_v48 = vpop.f32.mrf.mxu2 }
 0x1d9   : > { %v2230_v31 = vadd.f32 %v2229_v48, %v6222_v49  ;;  %v4866_v49 = vld [vmem:[%s7956_s1 + $0x128] sm:$0xf0] }
 0x1da   : > { %v2362_v61 = vpop.f32.mrf.mxu3  ;;  %v2493_v33 = vpop.f32.mrf.mxu0  ;;  %v4869_v47 = vor.u32 %v5375_v27, %v4866_v49  ;;  %v5284_v48 = vld [vmem:[%s5596_s26 + $0x38c] sm:$0xf]  ;;  %v5278_v27 = vld [vmem:[%s5596_s26 + $0x35c] sm:$0xf]  ;;  %v4486_v49 = vld [vmem:[%s5596_s26 + $0x374] sm:$0xf0] }
 0x1db   : > { %v2363_v0 = vadd.f32 %v2362_v61, %v2230_v31  ;;  %v2494_v53 = vadd.f32 %v2493_v33, %v2361_v15  ;;  %v2626_v52 = vpop.f32.mrf.mxu1  ;;  %v4484_v31 = vld [vmem:[%s5596_s26 + $0x358] sm:$0xf]  ;;  %v5281_v61 = vld [vmem:[%s5596_s26 + $0x370] sm:$0xf0] }
 0x1dc   : > { %3124 = vmatpush.bf16.msra.mxu1 %v4869_v47 }
 0x1dd   : > { %v6662_v39 = vadd.f32 %v2626_v52, %v2494_v53  ;;  %2271 = vmatmul.bf16.gmra.mxu2 %v6648_v17  ;;  %2532 = vmatmul.bf16.gmra.mxu0 %v6650_v2  ;;  %v4506_v52 = vld [vmem:[%s5596_s26 + $0x3a4] sm:$0xf0] }
 0x1de   : > { %2665 = vmatmul.bf16.gmra.mxu1 %v6654_v25 }
 0x1df   : > { %2404 = vmatmul.bf16.gmra.mxu3 %v6652_v43 }
 0x1e0   : > { %v2232_v33 = vpop.f32.mrf.mxu2 }
 0x1e1   : > { %v2233_v15 = vadd.f32 %v2232_v33, %v6244_v18  ;;  %v6680_v18 = vor.u32 %v5287_v4, %v4504_v30  ;;  %v6682_v33 = vor.u32 %v5281_v61, %v4484_v31  ;;  %v4532_v61 = vld [vmem:[%s5596_s26 + $0x3c0] sm:$0xf] }
 0x1e2   : > { %v2365_v53 = vpop.f32.mrf.mxu3  ;;  %v2495_v58 = vpop.f32.mrf.mxu0 }
 0x1e3   : > { %v2366_v12 = vadd.f32 %v2365_v53, %v2233_v15  ;;  %v2496_v36 = vadd.f32 %v2495_v58, %v2363_v0  ;;  %v2628_v46 = vpop.f32.mrf.mxu1  ;;  %8238 = vst [vmem:[#allocation119_spill] sm:$0xff] %v6680_v18  ;;  %v6684_v15 = vor.u32 %v5284_v48, %v4506_v52  ;;  %v6686_v53 = vor.u32 %v5278_v27, %v4486_v49  ;;  %v5294_v52 = vld [vmem:[%s5596_s26 + $0x3d8] sm:$0xf0]  ;;  %v5291_v27 = vld [vmem:[%s5596_s26 + $0x3c4] sm:$0xf] }
 0x1e4   : > { %8239 = vst [vmem:[#allocation120_spill] sm:$0xff] %v6682_v33  ;;  %v4512_v49 = vld [vmem:[%s5596_s26 + $0x390] sm:$0xf] }
 0x1e5   : > { %v6669_v5 = vadd.f32 %v2628_v46, %v2496_v36  ;;  %8240 = vst [vmem:[#allocation121_spill] sm:$0xff] %v6684_v15 }
 0x1e6   : > { %8241 = vst [vmem:[#allocation122_spill] sm:$0xff] %v6686_v53 }
 0x1e8   : > { %v2234_v47 = vpop.f32.mrf.mxu2 }
 0x1e9   : > { %v2235_v25 = vadd.f32 %v2234_v47, %v6254_v14  ;;  %v5288_v47 = vld [vmem:[%s5596_s26 + $0x3a8] sm:$0xf0] }
 0x1ea   : > { %v2367_v43 = vpop.f32.mrf.mxu3  ;;  %v2498_v0 = vpop.f32.mrf.mxu0 }
 0x1eb   : > { %v2368_v58 = vadd.f32 %v2367_v43, %v2235_v25  ;;  %v2499_v36 = vadd.f32 %v2498_v0, %v2366_v12  ;;  %v2631_v46 = vpop.f32.mrf.mxu1  ;;  %v4534_v0 = vld [vmem:[%s5596_s26 + $0x3dc] sm:$0xf0] }
 0x1ed   : > { %v6688_v2 = vadd.f32 %v2631_v46, %v2499_v36  ;;  %2276 = vmatmul.bf16.gmra.mxu2 %v6680_v18  ;;  %2537 = vmatmul.bf16.gmra.mxu0 %v6682_v33  ;;  %v5285_v36 = vld [vmem:[%s5596_s26 + $0x394] sm:$0xf]  ;;  %v4514_v46 = vld [vmem:[%s5596_s26 + $0x3ac] sm:$0xf0] }
 0x1ee   : > { %2670 = vmatmul.bf16.gmra.mxu1 %v6686_v53 }
 0x1ef   : > { %2409 = vmatmul.bf16.gmra.mxu3 %v6684_v15 }
 0x1f0   : > { %v2237_v14 = vpop.f32.mrf.mxu2 }
 0x1f1   : > { %v2238_v25 = vadd.f32 %v2237_v14, %v6276_v24  ;;  %v6706_v24 = vor.u32 %v5294_v52, %v4532_v61  ;;  %v6708_v14 = vor.u32 %v5288_v47, %v4512_v49  ;;  %v4730_v49 = vld [vmem:[%s7956_s1 + $0x18] sm:$0xf0] }
 0x1f2   : > { %v2370_v43 = vpop.f32.mrf.mxu3  ;;  %v2500_v12 = vpop.f32.mrf.mxu0 }
 0x1f3   : > { %v2371_v30 = vadd.f32 %v2370_v43, %v2238_v25  ;;  %v2501_v4 = vadd.f32 %v2500_v12, %v2368_v58  ;;  %v2633_v48 = vpop.f32.mrf.mxu1  ;;  %8242 = vst [vmem:[#allocation123_spill] sm:$0xff] %v6706_v24  ;;  %v6710_v25 = vor.u32 %v5291_v27, %v4534_v0  ;;  %v6712_v43 = vor.u32 %v5285_v36, %v4514_v46  ;;  %v5341_v27 = vld [vmem:[%s7956_s1 + $0x14] sm:$0xf]  ;;  %v5298_v46 = vld [vmem:[%s5596_s26 + $0x3fc] sm:$0xf] }
 0x1f4   : > { %8243 = vst [vmem:[#allocation124_spill] sm:$0xff] %v6708_v14  ;;  %v4733_v47 = vor.u32 %v5341_v27, %v4730_v49  ;;  %v5301_v36 = vld [vmem:[%s5596_s26 + $0x410] sm:$0xf0] }
 0x1f5   : > { %v6695_v31 = vadd.f32 %v2633_v48, %v2501_v4  ;;  %8244 = vst [vmem:[#allocation125_spill] sm:$0xff] %v6710_v25 }
 0x1f6   : > { %8245 = vst [vmem:[#allocation126_spill] sm:$0xff] %v6712_v43  ;;  %2859 = vmatpush.bf16.msra.mxu3 %v4733_v47  ;;  %v5357_v47 = vld [vmem:[%s7956_s1 + $0x94] sm:$0xf] }
 0x1f8   : > { %v2239_v53 = vpop.f32.mrf.mxu2 }
 0x1f9   : > { %v2240_v15 = vadd.f32 %v2239_v53, %v6286_v20 }
 0x1fa   : > { %v2372_v33 = vpop.f32.mrf.mxu3  ;;  %v2503_v58 = vpop.f32.mrf.mxu0 }
 0x1fb   : > { %v2373_v12 = vadd.f32 %v2372_v33, %v2240_v15  ;;  %v2504_v4 = vadd.f32 %v2503_v58, %v2371_v30  ;;  %v2636_v48 = vpop.f32.mrf.mxu1  ;;  %v4540_v58 = vld [vmem:[%s5596_s26 + $0x3c8] sm:$0xf] }
 0x1fd   : > { %v6714_v18 = vadd.f32 %v2636_v48, %v2504_v4  ;;  %2281 = vmatmul.bf16.gmra.mxu2 %v6706_v24  ;;  %2542 = vmatmul.bf16.gmra.mxu0 %v6708_v14  ;;  %v5295_v4 = vld [vmem:[%s5596_s26 + $0x3e0] sm:$0xf0]  ;;  %v4562_v48 = vld [vmem:[%s5596_s26 + $0x414] sm:$0xf0] }
 0x1fe   : > { %2675 = vmatmul.bf16.gmra.mxu1 %v6712_v43 }
 0x1ff   : > { %2414 = vmatmul.bf16.gmra.mxu3 %v6710_v25  ;;  %v6740_v25 = vor.u32 %v5295_v4, %v4540_v58 }
 0x200   : > { %v2242_v20 = vpop.f32.mrf.mxu2 }
 0x201   : > { %v2243_v33 = vadd.f32 %v2242_v20, %v6314_v35  ;;  %v4560_v35 = vld [vmem:[%s5596_s26 + $0x3f8] sm:$0xf]  ;;  %v4542_v20 = vld [vmem:[%s5596_s26 + $0x3e4] sm:$0xf0]  ;;  %8247 = vst [vmem:[#allocation128_spill] sm:$0xff] %v6740_v25 }
 0x202   : > { %v2375_v15 = vpop.f32.mrf.mxu3  ;;  %v2505_v53 = vpop.f32.mrf.mxu0  ;;  %v6738_v43 = vor.u32 %v5301_v36, %v4560_v35 }
 0x203   : > { %v2376_v30 = vadd.f32 %v2375_v15, %v2243_v33  ;;  %v2506_v61 = vadd.f32 %v2505_v53, %v2373_v12  ;;  %v2638_v52 = vpop.f32.mrf.mxu1  ;;  %v5292_v12 = vld [vmem:[%s5596_s26 + $0x3cc] sm:$0xf] }
 0x204   : > { %8246 = vst [vmem:[#allocation127_spill] sm:$0xff] %v6738_v43 }
 0x205   : > { %v6727_v0 = vadd.f32 %v2638_v52, %v2506_v61  ;;  %v6742_v61 = vor.u32 %v5298_v46, %v4562_v48  ;;  %v6744_v52 = vor.u32 %v5292_v12, %v4542_v20  ;;  %v4858_v46 = vld [vmem:[%s7956_s1 + $0x118] sm:$0xf0] }
 0x207   : > { %8248 = vst [vmem:[#allocation129_spill] sm:$0xff] %v6742_v61 }
 0x208   : > { %v2244_v33 = vpop.f32.mrf.mxu2  ;;  %8249 = vst [vmem:[#allocation130_spill] sm:$0xff] %v6744_v52 }
 0x209   : > { %v2245_v15 = vadd.f32 %v2244_v33, %v6331_v9  ;;  %v4794_v9 = vld [vmem:[%s7956_s1 + $0x98] sm:$0xf0] }
 0x20a   : > { %v2377_v53 = vpop.f32.mrf.mxu3  ;;  %v2508_v27 = vpop.f32.mrf.mxu0  ;;  %v4797_v35 = vor.u32 %v5357_v47, %v4794_v9  ;;  %v5305_v47 = vld [vmem:[%s5596_s26 + $0x434] sm:$0xf]  ;;  %v4568_v9 = vld [vmem:[%s5596_s26 + $0x400] sm:$0xf] }
 0x20b   : > { %v2378_v49 = vadd.f32 %v2377_v53, %v2245_v15  ;;  %v2509_v14 = vadd.f32 %v2508_v27, %v2376_v30  ;;  %v2641_v24 = vpop.f32.mrf.mxu1  ;;  %v5373_v30 = vld [vmem:[%s7956_s1 + $0x114] sm:$0xf]  ;;  %v4588_v53 = vld [vmem:[%s5596_s26 + $0x430] sm:$0xf]  ;;  %v5308_v27 = vld [vmem:[%s5596_s26 + $0x448] sm:$0xf0] }
 0x20c   : > { %2992 = vmatpush.bf16.msra.mxu0 %v4797_v35  ;;  %v5299_v35 = vld [vmem:[%s5596_s26 + $0x404] sm:$0xf] }
 0x20d   : > { %v6752_v36 = vadd.f32 %v2641_v24, %v2509_v14  ;;  %2286 = vmatmul.bf16.gmra.mxu2 %v6738_v43  ;;  %2547 = vmatmul.bf16.gmra.mxu0 %v6740_v25  ;;  %v4861_v24 = vor.u32 %v5373_v30, %v4858_v46  ;;  %v5302_v30 = vld [vmem:[%s5596_s26 + $0x418] sm:$0xf0]  ;;  %v4590_v46 = vld [vmem:[%s5596_s26 + $0x44c] sm:$0xf0] }
 0x20e   : > { %2680 = vmatmul.bf16.gmra.mxu1 %v6744_v52  ;;  %v4570_v52 = vld [vmem:[%s5596_s26 + $0x41c] sm:$0xf0] }
 0x20f   : > { %2419 = vmatmul.bf16.gmra.mxu3 %v6742_v61  ;;  %3125 = vmatpush.bf16.msra.mxu1 %v4861_v24 }
 0x210   : > { %v2247_v14 = vpop.f32.mrf.mxu2 }
 0x211   : > { %v2248_v58 = vadd.f32 %v2247_v14, %v6358_v60  ;;  %v6776_v60 = vor.u32 %v5308_v27, %v4588_v53  ;;  %v6778_v14 = vor.u32 %v5302_v30, %v4568_v9  ;;  %v4616_v9 = vld [vmem:[%s5596_s26 + $0x468] sm:$0xf]  ;;  %v5315_v30 = vld [vmem:[%s5596_s26 + $0x480] sm:$0xf0] }
 0x212   : > { %v2380_v4 = vpop.f32.mrf.mxu3  ;;  %v2510_v48 = vpop.f32.mrf.mxu0 }
 0x213   : > { %v2381_v12 = vadd.f32 %v2380_v4, %v2248_v58  ;;  %v2511_v20 = vadd.f32 %v2510_v48, %v2378_v49  ;;  %v2643_v33 = vpop.f32.mrf.mxu1  ;;  %8250 = vst [vmem:[#allocation131_spill] sm:$0xff] %v6776_v60  ;;  %v6780_v58 = vor.u32 %v5305_v47, %v4590_v46  ;;  %v6782_v4 = vor.u32 %v5299_v35, %v4570_v52  ;;  %v5312_v46 = vld [vmem:[%s5596_s26 + $0x46c] sm:$0xf]  ;;  %v4596_v35 = vld [vmem:[%s5596_s26 + $0x438] sm:$0xf] }
 0x214   : > { %8251 = vst [vmem:[#allocation132_spill] sm:$0xff] %v6778_v14 }
 0x215   : > { %v6765_v15 = vadd.f32 %v2643_v33, %v2511_v20  ;;  %8252 = vst [vmem:[#allocation133_spill] sm:$0xff] %v6780_v58 }
 0x216   : > { %8253 = vst [vmem:[#allocation134_spill] sm:$0xff] %v6782_v4 }
 0x218   : > { %v2249_v61 = vpop.f32.mrf.mxu2 }
 0x219   : > { %v2250_v24 = vadd.f32 %v2249_v61, %v6368_v26 }
 0x21a   : > { %v2382_v25 = vpop.f32.mrf.mxu3  ;;  %v2513_v49 = vpop.f32.mrf.mxu0 }
 0x21b   : > { %v2383_v48 = vadd.f32 %v2382_v25, %v2250_v24  ;;  %v2514_v20 = vadd.f32 %v2513_v49, %v2381_v12  ;;  %v2646_v33 = vpop.f32.mrf.mxu1  ;;  %v5309_v24 = vld [vmem:[%s5596_s26 + $0x450] sm:$0xf0]  ;;  %v4618_v49 = vld [vmem:[%s5596_s26 + $0x484] sm:$0xf0] }
 0x21d   : > { %v6784_v43 = vadd.f32 %v2646_v33, %v2514_v20  ;;  %2291 = vmatmul.bf16.gmra.mxu2 %v6776_v60  ;;  %2552 = vmatmul.bf16.gmra.mxu0 %v6778_v14  ;;  %v5306_v20 = vld [vmem:[%s5596_s26 + $0x43c] sm:$0xf]  ;;  %v4598_v33 = vld [vmem:[%s5596_s26 + $0x454] sm:$0xf0] }
 0x21e   : > { %2685 = vmatmul.bf16.gmra.mxu1 %v6782_v4 }
 0x21f   : > { %2424 = vmatmul.bf16.gmra.mxu3 %v6780_v58 }
 0x220   : > { %v2252_v26 = vpop.f32.mrf.mxu2 }
 0x221   : > { %v2253_v25 = vadd.f32 %v2252_v26, %v6390_v54  ;;  %v6802_v54 = vor.u32 %v5315_v30, %v4616_v9  ;;  %v6804_v26 = vor.u32 %v5309_v24, %v4596_v35  ;;  %v5322_v24 = vld [vmem:[%s5596_s26 + $0x4b8] sm:$0xf0] }
 0x222   : > { %v2385_v61 = vpop.f32.mrf.mxu3  ;;  %v2515_v52 = vpop.f32.mrf.mxu0 }
 0x223   : > { %v2386_v12 = vadd.f32 %v2385_v61, %v2253_v25  ;;  %v2516_v53 = vadd.f32 %v2515_v52, %v2383_v48  ;;  %v2648_v27 = vpop.f32.mrf.mxu1  ;;  %8254 = vst [vmem:[#allocation135_spill] sm:$0xff] %v6802_v54  ;;  %v6806_v25 = vor.u32 %v5312_v46, %v4618_v49  ;;  %v6808_v61 = vor.u32 %v5306_v20, %v4598_v33  ;;  %v4644_v46 = vld [vmem:[%s5596_s26 + $0x4a0] sm:$0xf]  ;;  %v5339_v49 = vld [vmem:[%s7956_s1 + $0x4] sm:$0xf] }
 0x224   : > { %8255 = vst [vmem:[#allocation136_spill] sm:$0xff] %v6804_v26  ;;  %v4722_v20 = vld [vmem:[%s7956_s1 + $0x8] sm:$0xf0]  ;;  %v4624_v33 = vld [vmem:[%s5596_s26 + $0x470] sm:$0xf] }
 0x225   : > { %v6791_v47 = vadd.f32 %v2648_v27, %v2516_v53  ;;  %8256 = vst [vmem:[#allocation137_spill] sm:$0xff] %v6806_v25 }
 0x226   : > { %8257 = vst [vmem:[#allocation138_spill] sm:$0xff] %v6808_v61 }
 0x228   : > { %v2254_v4 = vpop.f32.mrf.mxu2 }
 0x229   : > { %v2255_v58 = vadd.f32 %v2254_v4, %v6400_v63 }
 0x22a   : > { %v2387_v14 = vpop.f32.mrf.mxu3  ;;  %v2518_v48 = vpop.f32.mrf.mxu0 }
 0x22b   : > { %v2388_v52 = vadd.f32 %v2387_v14, %v2255_v58  ;;  %v2519_v53 = vadd.f32 %v2518_v48, %v2386_v12  ;;  %v2651_v27 = vpop.f32.mrf.mxu1  ;;  %v5316_v48 = vld [vmem:[%s5596_s26 + $0x488] sm:$0xf0] }
 0x22d   : > { %v6810_v60 = vadd.f32 %v2651_v27, %v2519_v53  ;;  %2296 = vmatmul.bf16.gmra.mxu2 %v6802_v54  ;;  %2557 = vmatmul.bf16.gmra.mxu0 %v6804_v26  ;;  %v4725_v53 = vor.u32 %v5339_v49, %v4722_v20  ;;  %v4646_v27 = vld [vmem:[%s5596_s26 + $0x4bc] sm:$0xf0] }
 0x22e   : > { %2690 = vmatmul.bf16.gmra.mxu1 %v6808_v61 }
 0x22f   : > { %2429 = vmatmul.bf16.gmra.mxu3 %v6806_v25 }
 0x230   : > { %v2257_v63 = vpop.f32.mrf.mxu2  ;;  %2860 = vmatpush.bf16.msra.mxu3 %v4725_v53 }
 0x231   : > { %v2258_v14 = vadd.f32 %v2257_v63, %v6419_v13  ;;  %v5319_v13 = vld [vmem:[%s5596_s26 + $0x4a4] sm:$0xf]  ;;  %v5313_v63 = vld [vmem:[%s5596_s26 + $0x474] sm:$0xf] }
 0x232   : > { %v2390_v58 = vpop.f32.mrf.mxu3  ;;  %v2520_v4 = vpop.f32.mrf.mxu0  ;;  %v6838_v25 = vor.u32 %v5319_v13, %v4646_v27 }
 0x233   : > { %v2391_v12 = vadd.f32 %v2390_v58, %v2258_v14  ;;  %v2521_v9 = vadd.f32 %v2520_v4, %v2388_v52  ;;  %v2653_v30 = vpop.f32.mrf.mxu1  ;;  %v4626_v52 = vld [vmem:[%s5596_s26 + $0x48c] sm:$0xf0] }
 0x234   : > { %8260 = vst [vmem:[#allocation141_spill] sm:$0xff] %v6838_v25  ;;  %v6840_v26 = vor.u32 %v5313_v63, %v4626_v52 }
 0x235   : > { %v6818_v35 = vadd.f32 %v2653_v30, %v2521_v9  ;;  %v6834_v9 = vor.u32 %v5322_v24, %v4644_v46  ;;  %v6836_v30 = vor.u32 %v5316_v48, %v4624_v33  ;;  %v4786_v46 = vld [vmem:[%s7956_s1 + $0x88] sm:$0xf0]  ;;  %v5371_v24 = vld [vmem:[%s7956_s1 + $0x104] sm:$0xf] }
 0x236   : > { %8261 = vst [vmem:[#allocation142_spill] sm:$0xff] %v6840_v26 }
 0x237   : > { %8258 = vst [vmem:[#allocation139_spill] sm:$0xff] %v6818_v35 }
 0x238   : > { %v2259_v14 = vpop.f32.mrf.mxu2  ;;  %8259 = vst [vmem:[#allocation140_spill] sm:$0xff] %v6836_v30 }
 0x239   : > { %v2260_v58 = vadd.f32 %v2259_v14, %v6435_v56  ;;  %v5355_v56 = vld [vmem:[%s7956_s1 + $0x84] sm:$0xf] }
 0x23a   : > { %v2392_v4 = vpop.f32.mrf.mxu3  ;;  %v2523_v61 = vpop.f32.mrf.mxu0 }
 0x23b   : > { %v2393_v54 = vadd.f32 %v2392_v4, %v2260_v58  ;;  %v2524_v35 = vadd.f32 %v2523_v61, %v2391_v12  ;;  %v2656_v49 = vpop.f32.mrf.mxu1  ;;  %v4789_v61 = vor.u32 %v5355_v56, %v4786_v46  ;;  %v4850_v12 = vld [vmem:[%s7956_s1 + $0x108] sm:$0xf0]  ;;  %v4672_v58 = vld [vmem:[%s5596_s26 + $0x4d8] sm:$0xf]  ;;  %v5329_v4 = vld [vmem:[%s5596_s26 + $0x4f0] sm:$0xf0] }
 0x23c   : > { %v4652_v56 = vld [vmem:[%s5596_s26 + $0x4a8] sm:$0xf]  ;;  %v5323_v46 = vld [vmem:[%s5596_s26 + $0x4c0] sm:$0xf0] }
 0x23d   : > { %v6842_v20 = vadd.f32 %v2656_v49, %v2524_v35  ;;  %2301 = vmatmul.bf16.gmra.mxu2 %v6834_v9  ;;  %2562 = vmatmul.bf16.gmra.mxu0 %v6836_v30  ;;  %v4853_v35 = vor.u32 %v5371_v24, %v4850_v12  ;;  %v5326_v49 = vld [vmem:[%s5596_s26 + $0x4dc] sm:$0xf]  ;;  %v4674_v24 = vld [vmem:[%s5596_s26 + $0x4f4] sm:$0xf0]  ;;  %v5320_v12 = vld [vmem:[%s5596_s26 + $0x4ac] sm:$0xf] }
 0x23e   : > { %2695 = vmatmul.bf16.gmra.mxu1 %v6840_v26  ;;  %2993 = vmatpush.bf16.msra.mxu0 %v4789_v61  ;;  %v4654_v26 = vld [vmem:[%s5596_s26 + $0x4c4] sm:$0xf0] }
 0x23f   : > { %2434 = vmatmul.bf16.gmra.mxu3 %v6838_v25  ;;  %3126 = vmatpush.bf16.msra.mxu1 %v4853_v35  ;;  %v6874_v35 = vor.u32 %v5323_v46, %v4652_v56  ;;  %v4700_v46 = vld [vmem:[%s5596_s26 + $0x510] sm:$0xf] }
 0x240   : > { %v2262_v13 = vpop.f32.mrf.mxu2 }
 0x241   : > { %v2263_v33 = vadd.f32 %v2262_v13, %v5964_v59  ;;  %v6872_v13 = vor.u32 %v5329_v4, %v4672_v58  ;;  %8263 = vst [vmem:[#allocation144_spill] sm:$0xff] %v6874_v35 }
 0x242   : > { %v2395_v48 = vpop.f32.mrf.mxu3  ;;  %v2525_v53 = vpop.f32.mrf.mxu0 }
 0x243   : > { %v2396_v27 = vadd.f32 %v2395_v48, %v2263_v33  ;;  %v2526_v63 = vadd.f32 %v2525_v53, %v2393_v54  ;;  %v2658_v52 = vpop.f32.mrf.mxu1  ;;  %8262 = vst [vmem:[#allocation143_spill] sm:$0xff] %v6872_v13  ;;  %v6876_v33 = vor.u32 %v5326_v49, %v4674_v24  ;;  %v6878_v48 = vor.u32 %v5320_v12, %v4654_v26  ;;  %v5336_v24 = vld [vmem:[%s5596_s26 + $0x528] sm:$0xf0]  ;;  %v5333_v12 = vld [vmem:[%s5596_s26 + $0x514] sm:$0xf] }
 0x245   : > { %v6861_v14 = vadd.f32 %v2658_v52, %v2526_v63  ;;  %8264 = vst [vmem:[#allocation145_spill] sm:$0xff] %v6876_v33 }
 0x246   : > { %8265 = vst [vmem:[#allocation146_spill] sm:$0xff] %v6878_v48 }
 0x248   : > { %v2264_v61 = vpop.f32.mrf.mxu2 }
 0x249   : > { %v2265_v25 = vadd.f32 %v2264_v61, %v5986_v44  ;;  %v4680_v61 = vld [vmem:[%s5596_s26 + $0x4e0] sm:$0xf] }
 0x24a   : > { %v2397_v59 = vpop.f32.mrf.mxu3  ;;  %v2528_v54 = vpop.f32.mrf.mxu0 }
 0x24b   : > { %v2398_v53 = vadd.f32 %v2397_v59, %v2265_v25  ;;  %v2529_v63 = vadd.f32 %v2528_v54, %v2396_v27  ;;  %v2661_v52 = vpop.f32.mrf.mxu1  ;;  %v5330_v59 = vld [vmem:[%s5596_s26 + $0x4f8] sm:$0xf0]  ;;  %v4702_v54 = vld [vmem:[%s5596_s26 + $0x52c] sm:$0xf0] }
 0x24d   : > { %v6880_v30 = vadd.f32 %v2661_v52, %v2529_v63  ;;  %2306 = vmatmul.bf16.gmra.mxu2 %v6872_v13  ;;  %2567 = vmatmul.bf16.gmra.mxu0 %v6874_v35  ;;  %v5327_v63 = vld [vmem:[%s5596_s26 + $0x4e4] sm:$0xf]  ;;  %v4682_v52 = vld [vmem:[%s5596_s26 + $0x4fc] sm:$0xf0] }
 0x24e   : > { %2700 = vmatmul.bf16.gmra.mxu1 %v6878_v48 }
 0x24f   : > { %2439 = vmatmul.bf16.gmra.mxu3 %v6876_v33 }
 0x250   : > { %v2267_v44 = vpop.f32.mrf.mxu2 }
 0x251   : > { %v2268_v26 = vadd.f32 %v2267_v44, %v6008_v21  ;;  %v6898_v21 = vor.u32 %v5336_v24, %v4700_v46  ;;  %v6900_v44 = vor.u32 %v5330_v59, %v4680_v61 }
 0x252   : > { %v2400_v25 = vpop.f32.mrf.mxu3  ;;  %v2530_v27 = vpop.f32.mrf.mxu0 }
 0x253   : > { %v2401_v58 = vadd.f32 %v2400_v25, %v2268_v26  ;;  %v2531_v4 = vadd.f32 %v2530_v27, %v2398_v53  ;;  %v2663_v49 = vpop.f32.mrf.mxu1  ;;  %8266 = vst [vmem:[#allocation147_spill] sm:$0xff] %v6898_v21  ;;  %v6902_v26 = vor.u32 %v5333_v12, %v4702_v54  ;;  %v6904_v25 = vor.u32 %v5327_v63, %v4682_v52  ;;  %v5401_v54 = vld [vmem:[%s7956_s1 + $0x1f4] sm:$0xf]  ;;  %v4970_v63 = vld [vmem:[%s7956_s1 + $0x1f8] sm:$0xf0] }
 0x254   : > { %8267 = vst [vmem:[#allocation148_spill] sm:$0xff] %v6900_v44 }
 0x255   : > { %v6887_v56 = vadd.f32 %v2663_v49, %v2531_v4  ;;  %8268 = vst [vmem:[#allocation149_spill] sm:$0xff] %v6902_v26 }
 0x256   : > { %8269 = vst [vmem:[#allocation150_spill] sm:$0xff] %v6904_v25 }
 0x258   : > { %v2269_v48 = vpop.f32.mrf.mxu2 }
 0x259   : > { %v2270_v33 = vadd.f32 %v2269_v48, %v6042_v51 }
 0x25a   : > { %v2402_v35 = vpop.f32.mrf.mxu3  ;;  %v2533_v53 = vpop.f32.mrf.mxu0 }
 0x25b   : > { %v2403_v27 = vadd.f32 %v2402_v35, %v2270_v33  ;;  %v2534_v4 = vadd.f32 %v2533_v53, %v2401_v58  ;;  %v2666_v49 = vpop.f32.mrf.mxu1  ;;  %v373_v33 = vld [vmem:[%s5596_s26 + $0x548] sm:$0xff]  ;;  %v4708_v53 = vld [vmem:[%s5596_s26 + $0x518] sm:$0xf] }
 0x25c   : > { %v1016_v59 = vunpack.c.l.b16 %v373_v33  ;;  %v1017_v52 = vunpack.c.h.b16 %v373_v33 }
 0x25d   : > { %v6906_v13 = vadd.f32 %v2666_v49, %v2534_v4  ;;  %2311 = vmatmul.bf16.gmra.mxu2 %v6898_v21  ;;  %2572 = vmatmul.bf16.gmra.mxu0 %v6900_v44  ;;  %v5337_v4 = vld [vmem:[%s5596_s26 + $0x530] sm:$0xf0]  ;;  %v5034_v49 = vld [vmem:[%s7956_s1 + $0x278] sm:$0xf0] }
 0x25e   : > { %2705 = vmatmul.bf16.gmra.mxu1 %v6904_v25  ;;  %v6933_v25 = vpack.c.b16 %v1016_v59, %v1016_v59  ;;  %v6937_v44 = vpack.c.b16 %v1017_v52, %v1017_v52  ;;  %v5114_v59 = vld [vmem:[%s7956_s1 + $0x318] sm:$0xf0] }
 0x25f   : > { %8270 = vst [vmem:[#allocation151_spill] sm:$0xff] %v6906_v13  ;;  %2444 = vmatmul.bf16.gmra.mxu3 %v6902_v26  ;;  %v6935_v26 = vor.u32 %v5337_v4, %v4708_v53 }
 0x260   : > { %v2272_v51 = vpop.f32.mrf.mxu2  ;;  %8273 = vst [vmem:[#allocation154_spill] sm:$0xff] %v6937_v44 }
 0x261   : > { %v2273_v48 = vadd.f32 %v2272_v51, %v6053_v1  ;;  %v5417_v1 = vld [vmem:[%s7956_s1 + $0x274] sm:$0xf]  ;;  %v5334_v51 = vld [vmem:[%s5596_s26 + $0x51c] sm:$0xf]  ;;  %8272 = vst [vmem:[#allocation153_spill] sm:$0xff] %v6935_v26 }
 0x262   : > { %v2405_v46 = vpop.f32.mrf.mxu3  ;;  %v2535_v35 = vpop.f32.mrf.mxu0 }
 0x263   : > { %v2406_v58 = vadd.f32 %v2405_v46, %v2273_v48  ;;  %v2536_v24 = vadd.f32 %v2535_v35, %v2403_v27  ;;  %v2668_v12 = vpop.f32.mrf.mxu1  ;;  %v4973_v27 = vor.u32 %v5401_v54, %v4970_v63  ;;  %v4710_v48 = vld [vmem:[%s5596_s26 + $0x534] sm:$0xf0]  ;;  %v5037_v46 = vor.u32 %v5417_v1, %v5034_v49  ;;  %v374_v49 = vld [vmem:[%s5596_s26 + $0x550] sm:$0xff] }
 0x264   : > { %v6939_v54 = vor.u32 %v5334_v51, %v4710_v48 }
 0x265   : > { %v6914_v61 = vadd.f32 %v2668_v12, %v2536_v24  ;;  %3252 = vmatpush.bf16.msrb.mxu2 %v4973_v27  ;;  %3385 = vmatpush.bf16.msrb.mxu3 %v5037_v46 }
 0x266   : > { %8274 = vst [vmem:[#allocation155_spill] sm:$0xff] %v6939_v54 }
 0x267   : > { %8271 = vst [vmem:[#allocation152_spill] sm:$0xff] %v6914_v61 }
 0x268   : > { %v2274_v35 = vpop.f32.mrf.mxu2 }
 0x269   : > { %v2275_v24 = vadd.f32 %v2274_v35, %v6083_v23  ;;  %v5433_v23 = vld [vmem:[%s7956_s1 + $0x2f4] sm:$0xf] }
 0x26a   : > { %v2407_v12 = vpop.f32.mrf.mxu3  ;;  %v2538_v33 = vpop.f32.mrf.mxu0 }
 0x26b   : > { %v2408_v63 = vadd.f32 %v2407_v12, %v2275_v24  ;;  %v2539_v21 = vadd.f32 %v2538_v33, %v2406_v58  ;;  %v2671_v61 = vpop.f32.mrf.mxu1  ;;  %v5098_v58 = vld [vmem:[%s7956_s1 + $0x2f8] sm:$0xf0]  ;;  %v1018_v24 = vunpack.c.l.b16 %v374_v49  ;;  %v1019_v12 = vunpack.c.h.b16 %v374_v49  ;;  %v4072_v33 = vld [vmem:[%s5596_s26 + $0x18] sm:$0xf] }
 0x26d   : > { %v6941_v13 = vadd.f32 %v2671_v61, %v2539_v21  ;;  %2316 = vmatmul.bf16.gmra.mxu2 %v6933_v25  ;;  %2577 = vmatmul.bf16.gmra.mxu0 %v6935_v26  ;;  %v5437_v21 = vld [vmem:[%s7956_s1 + $0x314] sm:$0xf]  ;;  %v5101_v61 = vor.u32 %v5433_v23, %v5098_v58 }
 0x26e   : > { %2710 = vmatmul.bf16.gmra.mxu1 %v6939_v54  ;;  %v5117_v52 = vor.u32 %v5437_v21, %v5114_v59  ;;  %v5177_v23 = vld [vmem:[%s5596_s26 + $0x30] sm:$0xf0]  ;;  %v6966_v59 = vpack.c.b16 %v1018_v24, %v1018_v24 }
 0x26f   : > { %2449 = vmatmul.bf16.gmra.mxu3 %v6937_v44  ;;  %3518 = vmatpush.bf16.msrb.mxu0 %v5101_v61 }
 0x270   : > { %v2277_v1 = vpop.f32.mrf.mxu2  ;;  %3657 = vmatpush.bf16.msrb.mxu1 %v5117_v52  ;;  %8275 = vst [vmem:[#allocation156_spill] sm:$0xff] %v6966_v59 }
 0x271   : > { %v2278_v53 = vadd.f32 %v2277_v1, %v6105_v40  ;;  %v6968_v40 = vor.u32 %v5177_v23, %v4072_v33  ;;  %v6970_v1 = vpack.c.b16 %v1019_v12, %v1019_v12  ;;  %v4100_v12 = vld [vmem:[%s5596_s26 + $0x50] sm:$0xf]  ;;  %v5184_v33 = vld [vmem:[%s5596_s26 + $0x68] sm:$0xf0] }
 0x272   : > { %v2410_v4 = vpop.f32.mrf.mxu3  ;;  %v2540_v27 = vpop.f32.mrf.mxu0 }
 0x273   : > { %v2411_v51 = vadd.f32 %v2410_v4, %v2278_v53  ;;  %v2541_v48 = vadd.f32 %v2540_v27, %v2408_v63  ;;  %v2673_v46 = vpop.f32.mrf.mxu1  ;;  %8276 = vst [vmem:[#allocation157_spill] sm:$0xff] %v6970_v1 }
 0x275   : > { %v6961_v35 = vadd.f32 %v2673_v46, %v2541_v48 }
 0x278   : > { %v2279_v58 = vpop.f32.mrf.mxu2 }
 0x279   : > { %v2280_v54 = vadd.f32 %v2279_v58, %v6127_v10 }
 0x27a   : > { %v2412_v21 = vpop.f32.mrf.mxu3  ;;  %v2543_v61 = vpop.f32.mrf.mxu0 }
 0x27b   : > { %v2413_v63 = vadd.f32 %v2412_v21, %v2280_v54  ;;  %v2544_v52 = vadd.f32 %v2543_v61, %v2411_v51  ;;  %v2676_v53 = vpop.f32.mrf.mxu1  ;;  %v6985_v61 = vor.u32 %v5184_v33, %v4100_v12  ;;  %v5026_v12 = vld [vmem:[%s7956_s1 + $0x268] sm:$0xf0] }
 0x27d   : > { %v6972_v4 = vadd.f32 %v2676_v53, %v2544_v52  ;;  %2582 = vmatmul.bf16.gmra.mxu0 %v6966_v59  ;;  %5118 = vmatmul.msk.bf16.vlgmr.msra.gmra.mxu2 %vm1846_vm0, %v6968_v40 }
 0x27e   : > { %2715 = vmatmul.bf16.gmra.mxu1 %v6970_v1 }
 0x27f   : > { %2861 = vmatmul.bf16.vlgmr.msra.gmra.mxu3 %v5642_v3 }
 0x280   : > { %v2282_v10 = vpop.f32.mrf.mxu2 }
 0x281   : > { %v2283_v27 = vadd.f32 %v2282_v10, %v6137_v55 }
 0x282   : > { %v2415_v49 = vpop.f32.mrf.mxu3  ;;  %v2545_v54 = vpop.f32.mrf.mxu0 }
 0x283   : > { %v2416_v48 = vadd.f32 %v2415_v49, %v2283_v27  ;;  %v2546_v51 = vadd.f32 %v2545_v54, %v2413_v63  ;;  %v2678_v46 = vpop.f32.mrf.mxu1 }
 0x285   : > { %v6980_v24 = vadd.f32 %v2678_v46, %v2546_v51  ;;  %v5399_v51 = vld [vmem:[%s7956_s1 + $0x1e4] sm:$0xf] }
 0x288   : > { %v2284_v23 = vpop.f32.mrf.mxu2 }
 0x289   : > { %v2285_v58 = vadd.f32 %v2284_v23, %v6159_v22 }
 0x28a   : > { %v2417_v21 = vpop.f32.mrf.mxu3  ;;  %v2548_v52 = vpop.f32.mrf.mxu0 }
 0x28b   : > { %v2418_v3 = vadd.f32 %v2417_v21, %v2285_v58  ;;  %v2549_v53 = vadd.f32 %v2548_v52, %v2416_v48  ;;  %v2681_v1 = vpop.f32.mrf.mxu1 }
 0x28d   : > { %v6987_v55 = vadd.f32 %v2681_v1, %v2549_v53  ;;  %5119 = vmatmul.msk.bf16.gmra.mxu2 %vm1846_vm0, %v6985_v61  ;;  %2994 = vmatmul.bf16.vlgmr.msra.gmra.mxu0 %v5655_v8  ;;  %v4962_v8 = vld [vmem:[%s7956_s1 + $0x1e8] sm:$0xf0] }
 0x28e   : > { %3127 = vmatmul.bf16.vlgmr.msra.gmra.mxu1 %v6121_v6  ;;  %v4128_v6 = vld [vmem:[%s5596_s26 + $0x88] sm:$0xf]  ;;  %v4965_v46 = vor.u32 %v5399_v51, %v4962_v8 }
 0x28f   : > { %2866 = vmatmul.bf16.gmra.mxu3 %v5683_v28  ;;  %v5415_v28 = vld [vmem:[%s7956_s1 + $0x264] sm:$0xf] }
 0x290   : > { %v2287_v22 = vpop.f32.mrf.mxu2  ;;  %v5029_v33 = vor.u32 %v5415_v28, %v5026_v12  ;;  %3253 = vmatpush.bf16.msrb.mxu2 %v4965_v46  ;;  %v8280_v28 = vld [vmem:[#allocation58_spill] sm:$0xff] }
 0x291   : > { %v2288_v63 = vadd.f32 %v2287_v22, %v6169_v37  ;;  %v5191_v37 = vld [vmem:[%s5596_s26 + $0xa0] sm:$0xf0] }
 0x292   : > { %v2420_v10 = vpop.f32.mrf.mxu3  ;;  %v2550_v27 = vpop.f32.mrf.mxu0  ;;  %v7012_v52 = vor.u32 %v5191_v37, %v4128_v6  ;;  %3386 = vmatpush.bf16.msrb.mxu3 %v5029_v33 }
 0x293   : > { %v2421_v49 = vadd.f32 %v2420_v10, %v2288_v63  ;;  %v2551_v54 = vadd.f32 %v2550_v27, %v2418_v3  ;;  %v2683_v1 = vpop.f32.mrf.mxu1  ;;  %v8277_v27 = vld [vmem:[#allocation5_spill] sm:$0xff] }
 0x295   : > { %v6995_v48 = vadd.f32 %v2683_v1, %v2551_v54  ;;  %v8278_v54 = vld [vmem:[#allocation7_spill] sm:$0xff]  ;;  %v5431_v1 = vld [vmem:[%s7956_s1 + $0x2e4] sm:$0xf] }
 0x298   : > { %v2289_v23 = vpop.f32.mrf.mxu2 }
 0x299   : > { %v2290_v58 = vadd.f32 %v2289_v23, %v6197_v38  ;;  %v8279_v38 = vld [vmem:[#allocation50_spill] sm:$0xff] }
 0x29a   : > { %v2422_v21 = vpop.f32.mrf.mxu3  ;;  %v2553_v3 = vpop.f32.mrf.mxu0 }
 0x29b   : > { %v2423_v53 = vadd.f32 %v2422_v21, %v2290_v58  ;;  %v2554_v22 = vadd.f32 %v2553_v3, %v2421_v49  ;;  %v2686_v63 = vpop.f32.mrf.mxu1  ;;  %v5090_v49 = vld [vmem:[%s7956_s1 + $0x2e8] sm:$0xf0]  ;;  %v4156_v21 = vld [vmem:[%s5596_s26 + $0xc0] sm:$0xf]  ;;  %v5198_v3 = vld [vmem:[%s5596_s26 + $0xd8] sm:$0xf0] }
 0x29c   : > { %v5093_v51 = vor.u32 %v5431_v1, %v5090_v49 }
 0x29d   : > { %v7014_v10 = vadd.f32 %v2686_v63, %v2554_v22  ;;  %5120 = vmatmul.msk.bf16.gmra.mxu2 %vm1846_vm0, %v7012_v52  ;;  %2999 = vmatmul.bf16.gmra.mxu0 %v8277_v27  ;;  %v8281_v63 = vld [vmem:[#allocation63_spill] sm:$0xff] }
 0x29e   : > { %3132 = vmatmul.bf16.gmra.mxu1 %v8279_v38  ;;  %3519 = vmatpush.bf16.msrb.mxu0 %v5093_v51  ;;  %v7033_v38 = vor.u32 %v5198_v3, %v4156_v21 }
 0x29f   : > { %2871 = vmatmul.bf16.gmra.mxu3 %v8278_v54 }
 0x2a0   : > { %v2292_v8 = vpop.f32.mrf.mxu2  ;;  %8282 = vst [vmem:[#allocation5_spill] sm:$0xff] %v7033_v38 }
 0x2a1   : > { %v2293_v6 = vadd.f32 %v2292_v8, %v8280_v28 }
 0x2a2   : > { %v2425_v37 = vpop.f32.mrf.mxu3  ;;  %v2555_v46 = vpop.f32.mrf.mxu0 }
 0x2a3   : > { %v2426_v12 = vadd.f32 %v2425_v37, %v2293_v6  ;;  %v2556_v33 = vadd.f32 %v2555_v46, %v2423_v53  ;;  %v2688_v23 = vpop.f32.mrf.mxu1  ;;  %v8283_v53 = vld [vmem:[#allocation9_spill] sm:$0xff]  ;;  %v8284_v6 = vld [vmem:[#allocation11_spill] sm:$0xff]  ;;  %v8285_v37 = vld [vmem:[#allocation54_spill] sm:$0xff] }
 0x2a5   : > { %v7028_v58 = vadd.f32 %v2688_v23, %v2556_v33  ;;  %v8286_v33 = vld [vmem:[#allocation64_spill] sm:$0xff] }
 0x2a8   : > { %v2294_v22 = vpop.f32.mrf.mxu2 }
 0x2a9   : > { %v2295_v27 = vadd.f32 %v2294_v22, %v8281_v63 }
 0x2aa   : > { %v2427_v54 = vpop.f32.mrf.mxu3  ;;  %v2558_v1 = vpop.f32.mrf.mxu0 }
 0x2ab   : > { %v2428_v49 = vadd.f32 %v2427_v54, %v2295_v27  ;;  %v2559_v8 = vadd.f32 %v2558_v1, %v2426_v12  ;;  %v2691_v51 = vpop.f32.mrf.mxu1  ;;  %v4184_v54 = vld [vmem:[%s5596_s26 + $0xf8] sm:$0xf]  ;;  %v5205_v1 = vld [vmem:[%s5596_s26 + $0x110] sm:$0xf0] }
 0x2ac   : > { %v7048_v44 = vor.u32 %v5205_v1, %v4184_v54 }
 0x2ad   : > { %v7035_v28 = vadd.f32 %v2691_v51, %v2559_v8  ;;  %5121 = vmatmul.msk.bf16.gmra.mxu2 %vm1846_vm0, %v7033_v38  ;;  %3004 = vmatmul.bf16.gmra.mxu0 %v8283_v53  ;;  %v8287_v51 = vld [vmem:[#allocation69_spill] sm:$0xff] }
 0x2ae   : > { %3137 = vmatmul.bf16.gmra.mxu1 %v8285_v37  ;;  %8288 = vst [vmem:[#allocation7_spill] sm:$0xff] %v7048_v44 }
 0x2af   : > { %2876 = vmatmul.bf16.gmra.mxu3 %v8284_v6 }
 0x2b0   : > { %v2297_v46 = vpop.f32.mrf.mxu2 }
 0x2b1   : > { %v2298_v23 = vadd.f32 %v2297_v46, %v8286_v33  ;;  %v8291_v33 = vld [vmem:[#allocation15_spill] sm:$0xff] }
 0x2b2   : > { %v2430_v21 = vpop.f32.mrf.mxu3  ;;  %v2560_v3 = vpop.f32.mrf.mxu0 }
 0x2b3   : > { %v2431_v22 = vadd.f32 %v2430_v21, %v2298_v23  ;;  %v2561_v12 = vadd.f32 %v2560_v3, %v2428_v49  ;;  %v2693_v63 = vpop.f32.mrf.mxu1  ;;  %v8290_v49 = vld [vmem:[#allocation13_spill] sm:$0xff]  ;;  %v8292_v23 = vld [vmem:[#allocation59_spill] sm:$0xff]  ;;  %v8293_v3 = vld [vmem:[#allocation70_spill] sm:$0xff] }
 0x2b5   : > { %v7043_v27 = vadd.f32 %v2693_v63, %v2561_v12 }
 0x2b8   : > { %v2299_v8 = vpop.f32.mrf.mxu2 }
 0x2b9   : > { %v2300_v59 = vadd.f32 %v2299_v8, %v8287_v51  ;;  %v4954_v8 = vld [vmem:[%s7956_s1 + $0x1d8] sm:$0xf0]  ;;  %v4212_v51 = vld [vmem:[%s5596_s26 + $0x130] sm:$0xf] }
 0x2ba   : > { %v2432_v53 = vpop.f32.mrf.mxu3  ;;  %v2563_v6 = vpop.f32.mrf.mxu0 }
 0x2bb   : > { %v2433_v37 = vadd.f32 %v2432_v53, %v2300_v59  ;;  %v2564_v26 = vadd.f32 %v2563_v6, %v2431_v22  ;;  %v2696_v38 = vpop.f32.mrf.mxu1  ;;  %v5212_v53 = vld [vmem:[%s5596_s26 + $0x148] sm:$0xf0] }
 0x2bd   : > { %v7050_v46 = vadd.f32 %v2696_v38, %v2564_v26  ;;  %5122 = vmatmul.msk.bf16.gmra.mxu2 %vm1846_vm0, %v7048_v44  ;;  %3009 = vmatmul.bf16.gmra.mxu0 %v8290_v49  ;;  %v5397_v38 = vld [vmem:[%s7956_s1 + $0x1d4] sm:$0xf] }
 0x2be   : > { %3142 = vmatmul.bf16.gmra.mxu1 %v8292_v23  ;;  %v4957_v6 = vor.u32 %v5397_v38, %v4954_v8 }
 0x2bf   : > { %8289 = vst [vmem:[#allocation50_spill] sm:$0xff] %v7050_v46  ;;  %2881 = vmatmul.bf16.gmra.mxu3 %v8291_v33  ;;  %v8295_v33 = vld [vmem:[#allocation75_spill] sm:$0xff] }
 0x2c0   : > { %v2302_v21 = vpop.f32.mrf.mxu2  ;;  %3254 = vmatpush.bf16.msrb.mxu2 %v4957_v6 }
 0x2c1   : > { %v2303_v12 = vadd.f32 %v2302_v21, %v8293_v3 }
 0x2c2   : > { %v2435_v63 = vpop.f32.mrf.mxu3  ;;  %v2565_v59 = vpop.f32.mrf.mxu0 }
 0x2c3   : > { %v2436_v22 = vadd.f32 %v2435_v63, %v2303_v12  ;;  %v2566_v54 = vadd.f32 %v2565_v59, %v2433_v37  ;;  %v2698_v1 = vpop.f32.mrf.mxu1  ;;  %v7069_v37 = vor.u32 %v5212_v53, %v4212_v51  ;;  %v8298_v51 = vld [vmem:[#allocation17_spill] sm:$0xff]  ;;  %v8299_v53 = vld [vmem:[#allocation19_spill] sm:$0xff] }
 0x2c5   : > { %v7058_v26 = vadd.f32 %v2698_v1, %v2566_v54  ;;  %8296 = vst [vmem:[#allocation63_spill] sm:$0xff] %v7069_v37  ;;  %v5413_v54 = vld [vmem:[%s7956_s1 + $0x254] sm:$0xf]  ;;  %v5018_v1 = vld [vmem:[%s7956_s1 + $0x258] sm:$0xf0] }
 0x2c6   : > { %v5021_v38 = vor.u32 %v5413_v54, %v5018_v1  ;;  %v5429_v54 = vld [vmem:[%s7956_s1 + $0x2d4] sm:$0xf]  ;;  %v5082_v1 = vld [vmem:[%s7956_s1 + $0x2d8] sm:$0xf0] }
 0x2c7   : > { %8294 = vst [vmem:[#allocation58_spill] sm:$0xff] %v7058_v26 }
 0x2c8   : > { %v2304_v49 = vpop.f32.mrf.mxu2  ;;  %3387 = vmatpush.bf16.msrb.mxu3 %v5021_v38  ;;  %v4240_v38 = vld [vmem:[%s5596_s26 + $0x168] sm:$0xf] }
 0x2c9   : > { %v2305_v23 = vadd.f32 %v2304_v49, %v8295_v33  ;;  %v8301_v49 = vld [vmem:[#allocation76_spill] sm:$0xff] }
 0x2ca   : > { %v2437_v21 = vpop.f32.mrf.mxu3  ;;  %v2568_v3 = vpop.f32.mrf.mxu0 }
 0x2cb   : > { %v2438_v12 = vadd.f32 %v2437_v21, %v2305_v23  ;;  %v2569_v63 = vadd.f32 %v2568_v3, %v2436_v22  ;;  %v2701_v59 = vpop.f32.mrf.mxu1  ;;  %v8300_v22 = vld [vmem:[#allocation65_spill] sm:$0xff] }
 0x2cd   : > { %v7077_v8 = vadd.f32 %v2701_v59, %v2569_v63  ;;  %5123 = vmatmul.msk.bf16.gmra.mxu2 %vm1846_vm0, %v7069_v37  ;;  %3014 = vmatmul.bf16.gmra.mxu0 %v8298_v51  ;;  %v5085_v51 = vor.u32 %v5429_v54, %v5082_v1  ;;  %v8308_v54 = vld [vmem:[#allocation71_spill] sm:$0xff] }
 0x2ce   : > { %3147 = vmatmul.bf16.gmra.mxu1 %v8300_v22  ;;  %v5219_v22 = vld [vmem:[%s5596_s26 + $0x180] sm:$0xf0] }
 0x2cf   : > { %8297 = vst [vmem:[#allocation9_spill] sm:$0xff] %v7077_v8  ;;  %2886 = vmatmul.bf16.gmra.mxu3 %v8299_v53  ;;  %3520 = vmatpush.bf16.msrb.mxu0 %v5085_v51  ;;  %v8309_v51 = vld [vmem:[#allocation82_spill] sm:$0xff] }
 0x2d0   : > { %v2307_v6 = vpop.f32.mrf.mxu2 }
 0x2d1   : > { %v2308_v33 = vadd.f32 %v2307_v6, %v8301_v49  ;;  %v8303_v49 = vld [vmem:[#allocation81_spill] sm:$0xff] }
 0x2d2   : > { %v2440_v23 = vpop.f32.mrf.mxu3  ;;  %v2570_v21 = vpop.f32.mrf.mxu0 }
 0x2d3   : > { %v2441_v3 = vadd.f32 %v2440_v23, %v2308_v33  ;;  %v2571_v63 = vadd.f32 %v2570_v21, %v2438_v12  ;;  %v2703_v59 = vpop.f32.mrf.mxu1  ;;  %v7096_v12 = vor.u32 %v5219_v22, %v4240_v38 }
 0x2d5   : > { %v7091_v53 = vadd.f32 %v2703_v59, %v2571_v63  ;;  %8304 = vst [vmem:[#allocation54_spill] sm:$0xff] %v7096_v12  ;;  %v8306_v63 = vld [vmem:[#allocation21_spill] sm:$0xff]  ;;  %v8307_v59 = vld [vmem:[#allocation23_spill] sm:$0xff] }
 0x2d7   : > { %8302 = vst [vmem:[#allocation11_spill] sm:$0xff] %v7091_v53 }
 0x2d8   : > { %v2309_v6 = vpop.f32.mrf.mxu2 }
 0x2d9   : > { %v2310_v37 = vadd.f32 %v2309_v6, %v8303_v49 }
 0x2da   : > { %v2442_v33 = vpop.f32.mrf.mxu3  ;;  %v2573_v23 = vpop.f32.mrf.mxu0 }
 0x2db   : > { %v2443_v21 = vadd.f32 %v2442_v33, %v2310_v37  ;;  %v2574_v44 = vadd.f32 %v2573_v23, %v2441_v3  ;;  %v2706_v8 = vpop.f32.mrf.mxu1 }
 0x2dd   : > { %v7098_v26 = vadd.f32 %v2706_v8, %v2574_v44  ;;  %5124 = vmatmul.msk.bf16.gmra.mxu2 %vm1846_vm0, %v7096_v12  ;;  %3019 = vmatmul.bf16.gmra.mxu0 %v8306_v63  ;;  %v4268_v44 = vld [vmem:[%s5596_s26 + $0x1a0] sm:$0xf]  ;;  %v5226_v8 = vld [vmem:[%s5596_s26 + $0x1b8] sm:$0xf0]  ;;  %v8310_v12 = vld [vmem:[#allocation87_spill] sm:$0xff] }
 0x2de   : > { %3152 = vmatmul.bf16.gmra.mxu1 %v8308_v54  ;;  %v7111_v53 = vor.u32 %v5226_v8, %v4268_v44 }
 0x2df   : > { %8305 = vst [vmem:[#allocation64_spill] sm:$0xff] %v7098_v26  ;;  %2891 = vmatmul.bf16.gmra.mxu3 %v8307_v59 }
 0x2e0   : > { %v2312_v1 = vpop.f32.mrf.mxu2  ;;  %8311 = vst [vmem:[#allocation69_spill] sm:$0xff] %v7111_v53 }
 0x2e1   : > { %v2313_v38 = vadd.f32 %v2312_v1, %v8309_v51 }
 0x2e2   : > { %v2445_v22 = vpop.f32.mrf.mxu3  ;;  %v2575_v37 = vpop.f32.mrf.mxu0 }
 0x2e3   : > { %v2446_v6 = vadd.f32 %v2445_v22, %v2313_v38  ;;  %v2576_v3 = vadd.f32 %v2575_v37, %v2443_v21  ;;  %v2708_v49 = vpop.f32.mrf.mxu1  ;;  %v8313_v21 = vld [vmem:[#allocation25_spill] sm:$0xff]  ;;  %v8314_v38 = vld [vmem:[#allocation27_spill] sm:$0xff]  ;;  %v8316_v37 = vld [vmem:[#allocation88_spill] sm:$0xff] }
 0x2e4   : > { %v8315_v22 = vld [vmem:[#allocation77_spill] sm:$0xff] }
 0x2e5   : > { %v7106_v33 = vadd.f32 %v2708_v49, %v2576_v3 }
 0x2e8   : > { %v2314_v23 = vpop.f32.mrf.mxu2 }
 0x2e9   : > { %v2315_v26 = vadd.f32 %v2314_v23, %v8310_v12 }
 0x2ea   : > { %v2447_v63 = vpop.f32.mrf.mxu3  ;;  %v2578_v59 = vpop.f32.mrf.mxu0 }
 0x2eb   : > { %v2448_v54 = vadd.f32 %v2447_v63, %v2315_v26  ;;  %v2579_v46 = vadd.f32 %v2578_v59, %v2446_v6  ;;  %v2711_v1 = vpop.f32.mrf.mxu1  ;;  %v5233_v63 = vld [vmem:[%s5596_s26 + $0x1f0] sm:$0xf0] }
 0x2ed   : > { %v7113_v51 = vadd.f32 %v2711_v1, %v2579_v46  ;;  %5125 = vmatmul.msk.bf16.gmra.mxu2 %vm1846_vm0, %v7111_v53  ;;  %3024 = vmatmul.bf16.gmra.mxu0 %v8313_v21  ;;  %v4296_v46 = vld [vmem:[%s5596_s26 + $0x1d8] sm:$0xf] }
 0x2ee   : > { %3157 = vmatmul.bf16.gmra.mxu1 %v8315_v22  ;;  %v7125_v53 = vor.u32 %v5233_v63, %v4296_v46  ;;  %v5395_v22 = vld [vmem:[%s7956_s1 + $0x1c4] sm:$0xf] }
 0x2ef   : > { %8312 = vst [vmem:[#allocation13_spill] sm:$0xff] %v7113_v51  ;;  %2896 = vmatmul.bf16.gmra.mxu3 %v8314_v38 }
 0x2f0   : > { %v2317_v12 = vpop.f32.mrf.mxu2 }
 0x2f1   : > { %v2318_v3 = vadd.f32 %v2317_v12, %v8316_v37 }
 0x2f2   : > { %v2450_v49 = vpop.f32.mrf.mxu3  ;;  %v2580_v26 = vpop.f32.mrf.mxu0 }
 0x2f3   : > { %v2451_v44 = vadd.f32 %v2450_v49, %v2318_v3  ;;  %v2581_v6 = vadd.f32 %v2580_v26, %v2448_v54  ;;  %v2713_v8 = vpop.f32.mrf.mxu1  ;;  %v4946_v54 = vld [vmem:[%s7956_s1 + $0x1c8] sm:$0xf0]  ;;  %v8317_v3 = vld [vmem:[#allocation29_spill] sm:$0xff]  ;;  %v5411_v49 = vld [vmem:[%s7956_s1 + $0x244] sm:$0xf] }
 0x2f4   : > { %v4949_v12 = vor.u32 %v5395_v22, %v4946_v54  ;;  %v5010_v26 = vld [vmem:[%s7956_s1 + $0x248] sm:$0xf0]  ;;  %v5427_v22 = vld [vmem:[%s7956_s1 + $0x2c4] sm:$0xf] }
 0x2f5   : > { %v7121_v23 = vadd.f32 %v2713_v8, %v2581_v6  ;;  %v8319_v6 = vld [vmem:[#allocation83_spill] sm:$0xff] }
 0x2f6   : > { %3255 = vmatpush.bf16.msrb.mxu2 %v4949_v12  ;;  %v5074_v54 = vld [vmem:[%s7956_s1 + $0x2c8] sm:$0xf0]  ;;  %v4324_v12 = vld [vmem:[%s5596_s26 + $0x210] sm:$0xf] }
 0x2f8   : > { %v2319_v59 = vpop.f32.mrf.mxu2 }
 0x2fa   : > { %v2452_v1 = vpop.f32.mrf.mxu3  ;;  %v2583_v21 = vpop.f32.mrf.mxu0 }
 0x2fb   : > { %v2584_v38 = vadd.f32 %v2583_v21, %v2451_v44  ;;  %v2716_v51 = vpop.f32.mrf.mxu1  ;;  %v8318_v44 = vld [vmem:[#allocation31_spill] sm:$0xff]  ;;  %v5464_v1 = vld [vmem:[%s7957_s2] sm:$0x3] }
 0x2fc   : > { %v7152_v21 = vperm.slane %v5464_v1, 1 }
 0x2fd   : > { %v7133_v37 = vadd.f32 %v2716_v51, %v2584_v38  ;;  %5126 = vmatmul.msk.bf16.gmra.mxu2 %vm1846_vm0, %v7125_v53  ;;  %3029 = vmatmul.bf16.gmra.mxu0 %v8317_v3  ;;  %v5013_v51 = vor.u32 %v5411_v49, %v5010_v26  ;;  %v5077_v3 = vor.u32 %v5427_v22, %v5074_v54  ;;  %v8323_v22 = vld [vmem:[#allocation33_spill] sm:$0xff] }
 0x2fe   : > { %3162 = vmatmul.bf16.gmra.mxu1 %v8319_v6  ;;  %v8325_v54 = vld [vmem:[#allocation89_spill] sm:$0xff] }
 0x2ff   : > { %2901 = vmatmul.bf16.gmra.mxu3 %v8318_v44  ;;  %3521 = vmatpush.bf16.msrb.mxu0 %v5077_v3 }
 0x300   : > { %v2729_v8 = vpop.f32.mrf.mxu2  ;;  %3388 = vmatpush.bf16.msrb.mxu3 %v5013_v51 }
 0x301   : > { %v7147_v46 = vadd.f32 %v2729_v8, %v6464_v34  ;;  %v5240_v34 = vld [vmem:[%s5596_s26 + $0x228] sm:$0xf0] }
 0x302   : > { %v2862_v63 = vpop.f32.mrf.mxu3  ;;  %v2585_v59 = vpop.f32.mrf.mxu0  ;;  %v7166_v51 = vor.u32 %v5240_v34, %v4324_v12 }
 0x303   : > { %8320 = vst [vmem:[#allocation15_spill] sm:$0xff] %v7147_v46  ;;  %v2718_v38 = vpop.f32.mrf.mxu1  ;;  %v2863_v49 = vadd.f32 %v2862_v63, %v7152_v21  ;;  %v8324_v63 = vld [vmem:[#allocation35_spill] sm:$0xff] }
 0x304   : > { %8322 = vst [vmem:[#allocation70_spill] sm:$0xff] %v7166_v51 }
 0x308   : > { %v2731_v26 = vpop.f32.mrf.mxu2 }
 0x309   : > { %v7164_v44 = vadd.f32 %v2731_v26, %v6471_v16 }
 0x30a   : > { %v2864_v6 = vpop.f32.mrf.mxu3  ;;  %v2995_v8 = vpop.f32.mrf.mxu0 }
 0x30b   : > { %8321 = vst [vmem:[#allocation59_spill] sm:$0xff] %v7164_v44  ;;  %v2996_v59 = vadd.f32 %v2995_v8, %v2863_v49  ;;  %v3128_v1 = vpop.f32.mrf.mxu1  ;;  %v2865_v12 = vadd.f32 %v2864_v6, %v7152_v21 }
 0x30d   : > { %v7168_v38 = vadd.f32 %v3128_v1, %v2996_v59  ;;  %5127 = vmatmul.msk.bf16.gmra.mxu2 %vm1846_vm0, %v7166_v51  ;;  %3034 = vmatmul.bf16.gmra.mxu0 %v8323_v22  ;;  %v4352_v1 = vld [vmem:[%s5596_s26 + $0x248] sm:$0xf]  ;;  %v5247_v51 = vld [vmem:[%s5596_s26 + $0x260] sm:$0xf0] }
 0x30e   : > { %3167 = vmatmul.bf16.gmra.mxu1 %v8325_v54  ;;  %v7187_v46 = vor.u32 %v5247_v51, %v4352_v1 }
 0x30f   : > { %2906 = vmatmul.bf16.gmra.mxu3 %v8324_v63 }
 0x310   : > { %v2734_v16 = vpop.f32.mrf.mxu2  ;;  %8328 = vst [vmem:[#allocation19_spill] sm:$0xff] %v7187_v46 }
 0x311   : > { %v7177_v34 = vadd.f32 %v2734_v16, %v6490_v50 }
 0x312   : > { %v2867_v3 = vpop.f32.mrf.mxu3  ;;  %v2997_v49 = vpop.f32.mrf.mxu0 }
 0x313   : > { %8326 = vst [vmem:[#allocation75_spill] sm:$0xff] %v7177_v34  ;;  %v2998_v26 = vadd.f32 %v2997_v49, %v2865_v12  ;;  %v3130_v8 = vpop.f32.mrf.mxu1  ;;  %v2868_v22 = vadd.f32 %v2867_v3, %v7152_v21  ;;  %v8329_v49 = vld [vmem:[#allocation37_spill] sm:$0xff]  ;;  %v8330_v3 = vld [vmem:[#allocation39_spill] sm:$0xff] }
 0x315   : > { %v7179_v59 = vadd.f32 %v3130_v8, %v2998_v26 }
 0x318   : > { %v2736_v44 = vpop.f32.mrf.mxu2 }
 0x319   : > { %v7185_v63 = vadd.f32 %v2736_v44, %v6497_v57 }
 0x31a   : > { %v2869_v54 = vpop.f32.mrf.mxu3  ;;  %v3000_v6 = vpop.f32.mrf.mxu0 }
 0x31b   : > { %8327 = vst [vmem:[#allocation17_spill] sm:$0xff] %v7185_v63  ;;  %v3001_v50 = vadd.f32 %v3000_v6, %v2868_v22  ;;  %v3133_v16 = vpop.f32.mrf.mxu1  ;;  %v2870_v44 = vadd.f32 %v2869_v54, %v7152_v21 }
 0x31d   : > { %v7189_v12 = vadd.f32 %v3133_v16, %v3001_v50  ;;  %5128 = vmatmul.msk.bf16.gmra.mxu2 %vm1846_vm0, %v7187_v46  ;;  %3039 = vmatmul.bf16.gmra.mxu0 %v8329_v49  ;;  %v4380_v50 = vld [vmem:[%s5596_s26 + $0x280] sm:$0xf]  ;;  %v5254_v16 = vld [vmem:[%s5596_s26 + $0x298] sm:$0xf0] }
 0x31e   : > { %3172 = vmatmul.bf16.gmra.mxu1 %v6456_v7  ;;  %v7208_v34 = vor.u32 %v5254_v16, %v4380_v50  ;;  %v5409_v50 = vld [vmem:[%s7956_s1 + $0x234] sm:$0xf]  ;;  %v5002_v16 = vld [vmem:[%s7956_s1 + $0x238] sm:$0xf0] }
 0x31f   : > { %2911 = vmatmul.bf16.gmra.mxu3 %v8330_v3  ;;  %v8332_v3 = vld [vmem:[#allocation104_spill] sm:$0xff] }
 0x320   : > { %v2739_v57 = vpop.f32.mrf.mxu2  ;;  %8334 = vst [vmem:[#allocation81_spill] sm:$0xff] %v7208_v34 }
 0x321   : > { %v7198_v51 = vadd.f32 %v2739_v57, %v6516_v29 }
 0x322   : > { %v2872_v26 = vpop.f32.mrf.mxu3  ;;  %v3002_v8 = vpop.f32.mrf.mxu0 }
 0x323   : > { %8331 = vst [vmem:[#allocation65_spill] sm:$0xff] %v7198_v51  ;;  %v3003_v1 = vadd.f32 %v3002_v8, %v2870_v44  ;;  %v3135_v22 = vpop.f32.mrf.mxu1  ;;  %v2873_v49 = vadd.f32 %v2872_v26, %v7152_v21  ;;  %v8335_v44 = vld [vmem:[#allocation41_spill] sm:$0xff]  ;;  %v5393_v26 = vld [vmem:[%s7956_s1 + $0x1b4] sm:$0xf]  ;;  %v8336_v8 = vld [vmem:[#allocation43_spill] sm:$0xff] }
 0x325   : > { %v7200_v6 = vadd.f32 %v3135_v22, %v3003_v1  ;;  %v8337_v1 = vld [vmem:[#allocation96_spill] sm:$0xff] }
 0x328   : > { %v2741_v46 = vpop.f32.mrf.mxu2 }
 0x329   : > { %v7206_v63 = vadd.f32 %v2741_v46, %v8332_v3  ;;  %v4938_v46 = vld [vmem:[%s7956_s1 + $0x1b8] sm:$0xf0] }
 0x32a   : > { %v2874_v7 = vpop.f32.mrf.mxu3  ;;  %v3005_v54 = vpop.f32.mrf.mxu0  ;;  %v4941_v22 = vor.u32 %v5393_v26, %v4938_v46 }
 0x32b   : > { %8333 = vst [vmem:[#allocation76_spill] sm:$0xff] %v7206_v63  ;;  %v3006_v29 = vadd.f32 %v3005_v54, %v2873_v49  ;;  %v3138_v57 = vpop.f32.mrf.mxu1  ;;  %v5005_v49 = vor.u32 %v5409_v50, %v5002_v16  ;;  %v2875_v54 = vadd.f32 %v2874_v7, %v7152_v21  ;;  %v4408_v7 = vld [vmem:[%s5596_s26 + $0x2b8] sm:$0xf]  ;;  %v5261_v50 = vld [vmem:[%s5596_s26 + $0x2d0] sm:$0xf0] }
 0x32c   : > { %3256 = vmatpush.bf16.msrb.mxu2 %v4941_v22  ;;  %v5066_v22 = vld [vmem:[%s7956_s1 + $0x2b8] sm:$0xf0] }
 0x32d   : > { %v7210_v51 = vadd.f32 %v3138_v57, %v3006_v29  ;;  %5129 = vmatmul.msk.bf16.gmra.mxu2 %vm1846_vm0, %v7208_v34  ;;  %3044 = vmatmul.bf16.gmra.mxu0 %v8335_v44 }
 0x32e   : > { %3177 = vmatmul.bf16.gmra.mxu1 %v8337_v1  ;;  %3389 = vmatpush.bf16.msrb.mxu3 %v5005_v49  ;;  %v5425_v1 = vld [vmem:[%s7956_s1 + $0x2b4] sm:$0xf]  ;;  %v5106_v49 = vld [vmem:[%s7956_s1 + $0x308] sm:$0xf0] }
 0x32f   : > { %2916 = vmatmul.bf16.gmra.mxu3 %v8336_v8  ;;  %v5069_v16 = vor.u32 %v5425_v1, %v5066_v22 }
 0x330   : > { %v2744_v3 = vpop.f32.mrf.mxu2 }
 0x331   : > { %v7231_v29 = vadd.f32 %v2744_v3, %v6566_v41  ;;  %v5435_v41 = vld [vmem:[%s7956_s1 + $0x304] sm:$0xf]  ;;  %3522 = vmatpush.bf16.msrb.mxu0 %v5069_v16 }
 0x332   : > { %v2877_v57 = vpop.f32.mrf.mxu3  ;;  %v3007_v44 = vpop.f32.mrf.mxu0 }
 0x333   : > { %8338 = vst [vmem:[#allocation21_spill] sm:$0xff] %v7231_v29  ;;  %v3008_v26 = vadd.f32 %v3007_v44, %v2875_v54  ;;  %v3140_v46 = vpop.f32.mrf.mxu1  ;;  %v2878_v3 = vadd.f32 %v2877_v57, %v7152_v21  ;;  %v5109_v54 = vor.u32 %v5435_v41, %v5106_v49  ;;  %v7253_v29 = vor.u32 %v5261_v50, %v4408_v7  ;;  %v8341_v57 = vld [vmem:[#allocation45_spill] sm:$0xff]  ;;  %v8342_v41 = vld [vmem:[#allocation47_spill] sm:$0xff] }
 0x335   : > { %v7233_v8 = vadd.f32 %v3140_v46, %v3008_v26  ;;  %8340 = vst [vmem:[#allocation71_spill] sm:$0xff] %v7253_v29  ;;  %3658 = vmatpush.bf16.msrb.mxu1 %v5109_v54 }
 0x338   : > { %v2746_v44 = vpop.f32.mrf.mxu2 }
 0x339   : > { %v7251_v26 = vadd.f32 %v2746_v44, %v6573_v11  ;;  %v8343_v11 = vld [vmem:[#allocation100_spill] sm:$0xff] }
 0x33a   : > { %v2879_v46 = vpop.f32.mrf.mxu3  ;;  %v3010_v34 = vpop.f32.mrf.mxu0  ;;  %v4436_v44 = vld [vmem:[%s5596_s26 + $0x2f0] sm:$0xf] }
 0x33b   : > { %8339 = vst [vmem:[#allocation23_spill] sm:$0xff] %v7251_v26  ;;  %v3011_v63 = vadd.f32 %v3010_v34, %v2878_v3  ;;  %v3143_v1 = vpop.f32.mrf.mxu1  ;;  %v2880_v7 = vadd.f32 %v2879_v46, %v7152_v21 }
 0x33d   : > { %v7255_v22 = vadd.f32 %v3143_v1, %v3011_v63  ;;  %5130 = vmatmul.msk.bf16.gmra.mxu2 %vm1846_vm0, %v7253_v29  ;;  %3049 = vmatmul.bf16.gmra.mxu0 %v8341_v57  ;;  %v5268_v1 = vld [vmem:[%s5596_s26 + $0x308] sm:$0xf0] }
 0x33e   : > { %3182 = vmatmul.bf16.gmra.mxu1 %v8343_v11  ;;  %v7274_v26 = vor.u32 %v5268_v1, %v4436_v44 }
 0x33f   : > { %2921 = vmatmul.bf16.gmra.mxu3 %v8342_v41 }
 0x340   : > { %v2749_v16 = vpop.f32.mrf.mxu2  ;;  %8345 = vst [vmem:[#allocation87_spill] sm:$0xff] %v7274_v26 }
 0x341   : > { %v7264_v50 = vadd.f32 %v2749_v16, %v6592_v62 }
 0x342   : > { %v2882_v34 = vpop.f32.mrf.mxu3  ;;  %v3012_v49 = vpop.f32.mrf.mxu0 }
 0x343   : > { %v3013_v3 = vadd.f32 %v3012_v49, %v2880_v7  ;;  %v3145_v63 = vpop.f32.mrf.mxu1  ;;  %v2883_v57 = vadd.f32 %v2882_v34, %v7152_v21  ;;  %v8346_v49 = vld [vmem:[#allocation48_spill] sm:$0xff]  ;;  %v8347_v34 = vld [vmem:[#allocation2_spill] sm:$0xff] }
 0x345   : > { %v7266_v54 = vadd.f32 %v3145_v63, %v3013_v3 }
 0x348   : > { %v2751_v29 = vpop.f32.mrf.mxu2 }
 0x349   : > { %v7272_v41 = vadd.f32 %v2751_v29, %v6599_v32 }
 0x34a   : > { %v2884_v11 = vpop.f32.mrf.mxu3  ;;  %v3015_v46 = vpop.f32.mrf.mxu0 }
 0x34b   : > { %8344 = vst [vmem:[#allocation82_spill] sm:$0xff] %v7272_v41  ;;  %v3016_v62 = vadd.f32 %v3015_v46, %v2883_v57  ;;  %v3148_v16 = vpop.f32.mrf.mxu1  ;;  %v2885_v29 = vadd.f32 %v2884_v11, %v7152_v21 }
 0x34d   : > { %v7276_v7 = vadd.f32 %v3148_v16, %v3016_v62  ;;  %5131 = vmatmul.msk.bf16.gmra.mxu2 %vm1846_vm0, %v7274_v26  ;;  %3054 = vmatmul.bf16.gmra.mxu0 %v8346_v49  ;;  %v4464_v62 = vld [vmem:[%s5596_s26 + $0x328] sm:$0xf]  ;;  %v5275_v16 = vld [vmem:[%s5596_s26 + $0x340] sm:$0xf0] }
 0x34e   : > { %3187 = vmatmul.bf16.gmra.mxu1 %v6558_v42  ;;  %v7295_v41 = vor.u32 %v5275_v16, %v4464_v62  ;;  %v4994_v62 = vld [vmem:[%s7956_s1 + $0x228] sm:$0xf0] }
 0x34f   : > { %2926 = vmatmul.bf16.gmra.mxu3 %v8347_v34 }
 0x350   : > { %v2754_v32 = vpop.f32.mrf.mxu2  ;;  %8350 = vst [vmem:[#allocation77_spill] sm:$0xff] %v7295_v41 }
 0x351   : > { %v7285_v3 = vadd.f32 %v2754_v32, %v6618_v45 }
 0x352   : > { %v2887_v63 = vpop.f32.mrf.mxu3  ;;  %v3017_v44 = vpop.f32.mrf.mxu0 }
 0x353   : > { %8348 = vst [vmem:[#allocation25_spill] sm:$0xff] %v7285_v3  ;;  %v3018_v1 = vadd.f32 %v3017_v44, %v2885_v29  ;;  %v3150_v57 = vpop.f32.mrf.mxu1  ;;  %v2888_v49 = vadd.f32 %v2887_v63, %v7152_v21  ;;  %v8351_v29 = vld [vmem:[#allocation3_spill] sm:$0xff]  ;;  %v8352_v44 = vld [vmem:[#allocation4_spill] sm:$0xff] }
 0x354   : > { %v8353_v63 = vld [vmem:[#allocation108_spill] sm:$0xff] }
 0x355   : > { %v7287_v46 = vadd.f32 %v3150_v57, %v3018_v1  ;;  %v5407_v1 = vld [vmem:[%s7956_s1 + $0x224] sm:$0xf] }
 0x358   : > { %v2756_v26 = vpop.f32.mrf.mxu2 }
 0x359   : > { %v7293_v34 = vadd.f32 %v2756_v26, %v6632_v19  ;;  %v5391_v19 = vld [vmem:[%s7956_s1 + $0x1a4] sm:$0xf]  ;;  %v4930_v26 = vld [vmem:[%s7956_s1 + $0x1a8] sm:$0xf0] }
 0x35a   : > { %v2889_v42 = vpop.f32.mrf.mxu3  ;;  %v3020_v11 = vpop.f32.mrf.mxu0  ;;  %v4933_v57 = vor.u32 %v5391_v19, %v4930_v26  ;;  %v5423_v19 = vld [vmem:[%s7956_s1 + $0x2a4] sm:$0xf]  ;;  %v5058_v26 = vld [vmem:[%s7956_s1 + $0x2a8] sm:$0xf0] }
 0x35b   : > { %8349 = vst [vmem:[#allocation27_spill] sm:$0xff] %v7293_v34  ;;  %v3021_v45 = vadd.f32 %v3020_v11, %v2888_v49  ;;  %v3153_v32 = vpop.f32.mrf.mxu1  ;;  %v4997_v49 = vor.u32 %v5407_v1, %v4994_v62  ;;  %v2890_v11 = vadd.f32 %v2889_v42, %v7152_v21  ;;  %v4492_v42 = vld [vmem:[%s5596_s26 + $0x360] sm:$0xf]  ;;  %v5282_v1 = vld [vmem:[%s5596_s26 + $0x378] sm:$0xf0] }
 0x35c   : > { %3257 = vmatpush.bf16.msrb.mxu2 %v4933_v57 }
 0x35d   : > { %v7297_v3 = vadd.f32 %v3153_v32, %v3021_v45  ;;  %5132 = vmatmul.msk.bf16.gmra.mxu2 %vm1846_vm0, %v7295_v41  ;;  %3059 = vmatmul.bf16.gmra.mxu0 %v8351_v29 }
 0x35e   : > { %3192 = vmatmul.bf16.gmra.mxu1 %v8353_v63  ;;  %3390 = vmatpush.bf16.msrb.mxu3 %v4997_v49 }
 0x35f   : > { %2931 = vmatmul.bf16.gmra.mxu3 %v8352_v44 }
 0x360   : > { %v2759_v16 = vpop.f32.mrf.mxu2 }
 0x361   : > { %v7318_v45 = vadd.f32 %v2759_v16, %v6662_v39  ;;  %v5061_v39 = vor.u32 %v5423_v19, %v5058_v26  ;;  %v8357_v19 = vld [vmem:[#allocation6_spill] sm:$0xff]  ;;  %v8359_v26 = vld [vmem:[#allocation112_spill] sm:$0xff] }
 0x362   : > { %v2892_v32 = vpop.f32.mrf.mxu3  ;;  %v3022_v29 = vpop.f32.mrf.mxu0 }
 0x363   : > { %8354 = vst [vmem:[#allocation88_spill] sm:$0xff] %v7318_v45  ;;  %v3023_v44 = vadd.f32 %v3022_v29, %v2890_v11  ;;  %v3155_v63 = vpop.f32.mrf.mxu1  ;;  %v2893_v62 = vadd.f32 %v2892_v32, %v7152_v21  ;;  %3523 = vmatpush.bf16.msrb.mxu0 %v5061_v39  ;;  %v7334_v11 = vor.u32 %v5282_v1, %v4492_v42  ;;  %v8358_v32 = vld [vmem:[#allocation8_spill] sm:$0xff] }
 0x365   : > { %v7320_v41 = vadd.f32 %v3155_v63, %v3023_v44  ;;  %8356 = vst [vmem:[#allocation31_spill] sm:$0xff] %v7334_v11 }
 0x368   : > { %v2761_v57 = vpop.f32.mrf.mxu2 }
 0x369   : > { %v7332_v16 = vadd.f32 %v2761_v57, %v6669_v5 }
 0x36a   : > { %v2894_v49 = vpop.f32.mrf.mxu3  ;;  %v3025_v29 = vpop.f32.mrf.mxu0 }
 0x36b   : > { %8355 = vst [vmem:[#allocation29_spill] sm:$0xff] %v7332_v16  ;;  %v3026_v44 = vadd.f32 %v3025_v29, %v2893_v62  ;;  %v3158_v63 = vpop.f32.mrf.mxu1  ;;  %v2895_v42 = vadd.f32 %v2894_v49, %v7152_v21 }
 0x36d   : > { %v7336_v45 = vadd.f32 %v3158_v63, %v3026_v44  ;;  %5133 = vmatmul.msk.bf16.gmra.mxu2 %vm1846_vm0, %v7334_v11  ;;  %3064 = vmatmul.bf16.gmra.mxu0 %v8357_v19  ;;  %v4520_v63 = vld [vmem:[%s5596_s26 + $0x398] sm:$0xf]  ;;  %v5289_v11 = vld [vmem:[%s5596_s26 + $0x3b0] sm:$0xf0] }
 0x36e   : > { %3197 = vmatmul.bf16.gmra.mxu1 %v8359_v26  ;;  %v7355_v34 = vor.u32 %v5289_v11, %v4520_v63 }
 0x36f   : > { %2936 = vmatmul.bf16.gmra.mxu3 %v8358_v32 }
 0x370   : > { %v2764_v5 = vpop.f32.mrf.mxu2  ;;  %8361 = vst [vmem:[#allocation33_spill] sm:$0xff] %v7355_v34 }
 0x371   : > { %v7345_v1 = vadd.f32 %v2764_v5, %v6688_v2 }
 0x372   : > { %v2897_v39 = vpop.f32.mrf.mxu3  ;;  %v3027_v62 = vpop.f32.mrf.mxu0 }
 0x373   : > { %v3028_v57 = vadd.f32 %v3027_v62, %v2895_v42  ;;  %v3160_v29 = vpop.f32.mrf.mxu1  ;;  %v2898_v19 = vadd.f32 %v2897_v39, %v7152_v21  ;;  %v8362_v62 = vld [vmem:[#allocation10_spill] sm:$0xff]  ;;  %v8363_v39 = vld [vmem:[#allocation12_spill] sm:$0xff] }
 0x375   : > { %v7347_v44 = vadd.f32 %v3160_v29, %v3028_v57 }
 0x378   : > { %v2766_v16 = vpop.f32.mrf.mxu2 }
 0x379   : > { %v7353_v32 = vadd.f32 %v2766_v16, %v6695_v31 }
 0x37a   : > { %v2899_v26 = vpop.f32.mrf.mxu3  ;;  %v3030_v49 = vpop.f32.mrf.mxu0 }
 0x37b   : > { %8360 = vst [vmem:[#allocation83_spill] sm:$0xff] %v7353_v32  ;;  %v3031_v2 = vadd.f32 %v3030_v49, %v2898_v19  ;;  %v3163_v5 = vpop.f32.mrf.mxu1  ;;  %v2900_v16 = vadd.f32 %v2899_v26, %v7152_v21 }
 0x37d   : > { %v7357_v42 = vadd.f32 %v3163_v5, %v3031_v2  ;;  %5134 = vmatmul.msk.bf16.gmra.mxu2 %vm1846_vm0, %v7355_v34  ;;  %3069 = vmatmul.bf16.gmra.mxu0 %v8362_v62  ;;  %v4548_v2 = vld [vmem:[%s5596_s26 + $0x3d0] sm:$0xf]  ;;  %v5296_v5 = vld [vmem:[%s5596_s26 + $0x3e8] sm:$0xf0] }
 0x37e   : > { %3202 = vmatmul.bf16.gmra.mxu1 %v6648_v17  ;;  %v7376_v32 = vor.u32 %v5296_v5, %v4548_v2 }
 0x37f   : > { %2941 = vmatmul.bf16.gmra.mxu3 %v8363_v39 }
 0x380   : > { %v2769_v31 = vpop.f32.mrf.mxu2  ;;  %8366 = vst [vmem:[#allocation37_spill] sm:$0xff] %v7376_v32 }
 0x381   : > { %v7366_v11 = vadd.f32 %v2769_v31, %v6714_v18 }
 0x382   : > { %v2902_v57 = vpop.f32.mrf.mxu3  ;;  %v3032_v29 = vpop.f32.mrf.mxu0 }
 0x383   : > { %8364 = vst [vmem:[#allocation35_spill] sm:$0xff] %v7366_v11  ;;  %v3033_v63 = vadd.f32 %v3032_v29, %v2900_v16  ;;  %v3165_v19 = vpop.f32.mrf.mxu1  ;;  %v2903_v62 = vadd.f32 %v2902_v57, %v7152_v21  ;;  %v8367_v16 = vld [vmem:[#allocation14_spill] sm:$0xff]  ;;  %v8368_v29 = vld [vmem:[#allocation16_spill] sm:$0xff]  ;;  %v8369_v57 = vld [vmem:[#allocation119_spill] sm:$0xff] }
 0x385   : > { %v7368_v49 = vadd.f32 %v3165_v19, %v3033_v63 }
 0x388   : > { %v2771_v34 = vpop.f32.mrf.mxu2 }
 0x389   : > { %v7374_v39 = vadd.f32 %v2771_v34, %v6727_v0  ;;  %v5389_v0 = vld [vmem:[%s7956_s1 + $0x194] sm:$0xf]  ;;  %v4922_v34 = vld [vmem:[%s7956_s1 + $0x198] sm:$0xf0] }
 0x38a   : > { %v2904_v17 = vpop.f32.mrf.mxu3  ;;  %v3035_v26 = vpop.f32.mrf.mxu0  ;;  %v4925_v63 = vor.u32 %v5389_v0, %v4922_v34  ;;  %v5303_v34 = vld [vmem:[%s5596_s26 + $0x420] sm:$0xf0] }
 0x38b   : > { %8365 = vst [vmem:[#allocation89_spill] sm:$0xff] %v7374_v39  ;;  %v3036_v18 = vadd.f32 %v3035_v26, %v2903_v62  ;;  %v3168_v31 = vpop.f32.mrf.mxu1  ;;  %v2905_v2 = vadd.f32 %v2904_v17, %v7152_v21  ;;  %v4576_v17 = vld [vmem:[%s5596_s26 + $0x408] sm:$0xf] }
 0x38c   : > { %3258 = vmatpush.bf16.msrb.mxu2 %v4925_v63 }
 0x38d   : > { %v7378_v11 = vadd.f32 %v3168_v31, %v3036_v18  ;;  %5135 = vmatmul.msk.bf16.gmra.mxu2 %vm1846_vm0, %v7376_v32  ;;  %3074 = vmatmul.bf16.gmra.mxu0 %v8367_v16  ;;  %v5405_v16 = vld [vmem:[%s7956_s1 + $0x214] sm:$0xf] }
 0x38e   : > { %3207 = vmatmul.bf16.gmra.mxu1 %v8369_v57 }
 0x38f   : > { %2946 = vmatmul.bf16.gmra.mxu3 %v8368_v29  ;;  %v4986_v29 = vld [vmem:[%s7956_s1 + $0x218] sm:$0xf0] }
 0x390   : > { %v2774_v19 = vpop.f32.mrf.mxu2  ;;  %v4989_v57 = vor.u32 %v5405_v16, %v4986_v29  ;;  %v8375_v29 = vld [vmem:[#allocation123_spill] sm:$0xff] }
 0x391   : > { %v7393_v5 = vadd.f32 %v2774_v19, %v6752_v36 }
 0x392   : > { %v2907_v62 = vpop.f32.mrf.mxu3  ;;  %v3037_v26 = vpop.f32.mrf.mxu0  ;;  %3391 = vmatpush.bf16.msrb.mxu3 %v4989_v57 }
 0x393   : > { %8370 = vst [vmem:[#allocation39_spill] sm:$0xff] %v7393_v5  ;;  %v3038_v18 = vadd.f32 %v3037_v26, %v2905_v2  ;;  %v3170_v31 = vpop.f32.mrf.mxu1  ;;  %v2908_v36 = vadd.f32 %v2907_v62, %v7152_v21  ;;  %v7409_v26 = vor.u32 %v5303_v34, %v4576_v17 }
 0x395   : > { %v7401_v0 = vadd.f32 %v3170_v31, %v3038_v18  ;;  %8372 = vst [vmem:[#allocation41_spill] sm:$0xff] %v7409_v26  ;;  %v5421_v18 = vld [vmem:[%s7956_s1 + $0x294] sm:$0xf]  ;;  %v5050_v31 = vld [vmem:[%s7956_s1 + $0x298] sm:$0xf0] }
 0x396   : > { %v5053_v62 = vor.u32 %v5421_v18, %v5050_v31  ;;  %v4604_v31 = vld [vmem:[%s5596_s26 + $0x440] sm:$0xf] }
 0x398   : > { %v2776_v63 = vpop.f32.mrf.mxu2  ;;  %3524 = vmatpush.bf16.msrb.mxu0 %v5053_v62 }
 0x399   : > { %v7407_v19 = vadd.f32 %v2776_v63, %v6765_v15  ;;  %v8373_v15 = vld [vmem:[#allocation18_spill] sm:$0xff] }
 0x39a   : > { %v2909_v2 = vpop.f32.mrf.mxu3  ;;  %v3040_v5 = vpop.f32.mrf.mxu0 }
 0x39b   : > { %8371 = vst [vmem:[#allocation104_spill] sm:$0xff] %v7407_v19  ;;  %v3041_v32 = vadd.f32 %v3040_v5, %v2908_v36  ;;  %v3173_v39 = vpop.f32.mrf.mxu1  ;;  %v8374_v5 = vld [vmem:[#allocation20_spill] sm:$0xff]  ;;  %v2910_v17 = vadd.f32 %v2909_v2, %v7152_v21 }
 0x39d   : > { %v7417_v16 = vadd.f32 %v3173_v39, %v3041_v32  ;;  %5136 = vmatmul.msk.bf16.gmra.mxu2 %vm1846_vm0, %v7409_v26  ;;  %3079 = vmatmul.bf16.gmra.mxu0 %v8373_v15  ;;  %v5310_v26 = vld [vmem:[%s5596_s26 + $0x458] sm:$0xf0] }
 0x39e   : > { %3212 = vmatmul.bf16.gmra.mxu1 %v8375_v29  ;;  %v7436_v19 = vor.u32 %v5310_v26, %v4604_v31 }
 0x39f   : > { %2951 = vmatmul.bf16.gmra.mxu3 %v8374_v5 }
 0x3a0   : > { %v2779_v57 = vpop.f32.mrf.mxu2  ;;  %8378 = vst [vmem:[#allocation45_spill] sm:$0xff] %v7436_v19 }
 0x3a1   : > { %v7426_v34 = vadd.f32 %v2779_v57, %v6784_v43 }
 0x3a2   : > { %v2912_v36 = vpop.f32.mrf.mxu3  ;;  %v3042_v63 = vpop.f32.mrf.mxu0 }
 0x3a3   : > { %8376 = vst [vmem:[#allocation43_spill] sm:$0xff] %v7426_v34  ;;  %v3043_v32 = vadd.f32 %v3042_v63, %v2910_v17  ;;  %v3175_v39 = vpop.f32.mrf.mxu1  ;;  %v2913_v15 = vadd.f32 %v2912_v36, %v7152_v21  ;;  %v8380_v63 = vld [vmem:[#allocation22_spill] sm:$0xff]  ;;  %v8381_v36 = vld [vmem:[#allocation24_spill] sm:$0xff] }
 0x3a5   : > { %v7428_v18 = vadd.f32 %v3175_v39, %v3043_v32  ;;  %v8382_v32 = vld [vmem:[#allocation127_spill] sm:$0xff] }
 0x3a8   : > { %v2781_v5 = vpop.f32.mrf.mxu2 }
 0x3a9   : > { %v7434_v29 = vadd.f32 %v2781_v5, %v6791_v47 }
 0x3aa   : > { %v2914_v62 = vpop.f32.mrf.mxu3  ;;  %v3045_v2 = vpop.f32.mrf.mxu0 }
 0x3ab   : > { %8377 = vst [vmem:[#allocation96_spill] sm:$0xff] %v7434_v29  ;;  %v3046_v43 = vadd.f32 %v3045_v2, %v2913_v15  ;;  %v3178_v57 = vpop.f32.mrf.mxu1  ;;  %v2915_v26 = vadd.f32 %v2914_v62, %v7152_v21 }
 0x3ad   : > { %v7438_v17 = vadd.f32 %v3178_v57, %v3046_v43  ;;  %5137 = vmatmul.msk.bf16.gmra.mxu2 %vm1846_vm0, %v7436_v19  ;;  %3084 = vmatmul.bf16.gmra.mxu0 %v8380_v63  ;;  %v4632_v57 = vld [vmem:[%s5596_s26 + $0x478] sm:$0xf]  ;;  %v5317_v19 = vld [vmem:[%s5596_s26 + $0x490] sm:$0xf0] }
 0x3ae   : > { %3217 = vmatmul.bf16.gmra.mxu1 %v8382_v32 }
 0x3af   : > { %8379 = vst [vmem:[#allocation47_spill] sm:$0xff] %v7438_v17  ;;  %2956 = vmatmul.bf16.gmra.mxu3 %v8381_v36  ;;  %v8384_v36 = vld [vmem:[#allocation139_spill] sm:$0xff]  ;;  %v7457_v17 = vor.u32 %v5317_v19, %v4632_v57 }
 0x3b0   : > { %v2784_v47 = vpop.f32.mrf.mxu2 }
 0x3b1   : > { %v7447_v39 = vadd.f32 %v2784_v47, %v6810_v60  ;;  %8386 = vst [vmem:[#allocation2_spill] sm:$0xff] %v7457_v17 }
 0x3b2   : > { %v2917_v31 = vpop.f32.mrf.mxu3  ;;  %v3047_v15 = vpop.f32.mrf.mxu0 }
 0x3b3   : > { %8383 = vst [vmem:[#allocation100_spill] sm:$0xff] %v7447_v39  ;;  %v3048_v5 = vadd.f32 %v3047_v15, %v2915_v26  ;;  %v3180_v2 = vpop.f32.mrf.mxu1  ;;  %v2918_v63 = vadd.f32 %v2917_v31, %v7152_v21  ;;  %v8387_v26 = vld [vmem:[#allocation26_spill] sm:$0xff]  ;;  %v8388_v15 = vld [vmem:[#allocation28_spill] sm:$0xff]  ;;  %v8389_v31 = vld [vmem:[#allocation131_spill] sm:$0xff] }
 0x3b5   : > { %v7449_v43 = vadd.f32 %v3180_v2, %v3048_v5 }
 0x3b8   : > { %v2786_v29 = vpop.f32.mrf.mxu2 }
 0x3b9   : > { %v7455_v34 = vadd.f32 %v2786_v29, %v8384_v36 }
 0x3ba   : > { %v2919_v32 = vpop.f32.mrf.mxu3  ;;  %v3050_v62 = vpop.f32.mrf.mxu0 }
 0x3bb   : > { %8385 = vst [vmem:[#allocation48_spill] sm:$0xff] %v7455_v34  ;;  %v3051_v60 = vadd.f32 %v3050_v62, %v2918_v63  ;;  %v3183_v47 = vpop.f32.mrf.mxu1  ;;  %v2920_v19 = vadd.f32 %v2919_v32, %v7152_v21  ;;  %v5387_v62 = vld [vmem:[%s7956_s1 + $0x184] sm:$0xf]  ;;  %v4978_v32 = vld [vmem:[%s7956_s1 + $0x208] sm:$0xf0] }
 0x3bd   : > { %v7459_v39 = vadd.f32 %v3183_v47, %v3051_v60  ;;  %5138 = vmatmul.msk.bf16.gmra.mxu2 %vm1846_vm0, %v7457_v17  ;;  %3089 = vmatmul.bf16.gmra.mxu0 %v8387_v26  ;;  %v4914_v60 = vld [vmem:[%s7956_s1 + $0x188] sm:$0xf0] }
 0x3be   : > { %3222 = vmatmul.bf16.gmra.mxu1 %v8389_v31  ;;  %v4917_v47 = vor.u32 %v5387_v62, %v4914_v60  ;;  %v5324_v31 = vld [vmem:[%s5596_s26 + $0x4c8] sm:$0xf0] }
 0x3bf   : > { %2961 = vmatmul.bf16.gmra.mxu3 %v8388_v15  ;;  %v4660_v15 = vld [vmem:[%s5596_s26 + $0x4b0] sm:$0xf] }
 0x3c0   : > { %v2789_v29 = vpop.f32.mrf.mxu2  ;;  %3259 = vmatpush.bf16.msrb.mxu2 %v4917_v47  ;;  %v8394_v47 = vld [vmem:[#allocation30_spill] sm:$0xff] }
 0x3c1   : > { %v7468_v5 = vadd.f32 %v2789_v29, %v6842_v20  ;;  %v5403_v20 = vld [vmem:[%s7956_s1 + $0x204] sm:$0xf] }
 0x3c2   : > { %v2922_v2 = vpop.f32.mrf.mxu3  ;;  %v3052_v57 = vpop.f32.mrf.mxu0  ;;  %v4981_v29 = vor.u32 %v5403_v20, %v4978_v32  ;;  %v8395_v20 = vld [vmem:[#allocation32_spill] sm:$0xff]  ;;  %v8396_v32 = vld [vmem:[#allocation135_spill] sm:$0xff] }
 0x3c3   : > { %8390 = vst [vmem:[#allocation3_spill] sm:$0xff] %v7468_v5  ;;  %v3053_v63 = vadd.f32 %v3052_v57, %v2920_v19  ;;  %v3185_v36 = vpop.f32.mrf.mxu1  ;;  %v2923_v19 = vadd.f32 %v2922_v2, %v7152_v21  ;;  %v5042_v2 = vld [vmem:[%s7956_s1 + $0x288] sm:$0xf0] }
 0x3c4   : > { %3392 = vmatpush.bf16.msrb.mxu3 %v4981_v29 }
 0x3c5   : > { %v7476_v26 = vadd.f32 %v3185_v36, %v3053_v63  ;;  %v7490_v36 = vor.u32 %v5324_v31, %v4660_v15 }
 0x3c7   : > { %8392 = vst [vmem:[#allocation108_spill] sm:$0xff] %v7490_v36 }
 0x3c8   : > { %v2791_v57 = vpop.f32.mrf.mxu2 }
 0x3c9   : > { %v7488_v62 = vadd.f32 %v2791_v57, %v6861_v14  ;;  %v5419_v14 = vld [vmem:[%s7956_s1 + $0x284] sm:$0xf] }
 0x3ca   : > { %v2924_v63 = vpop.f32.mrf.mxu3  ;;  %v3055_v60 = vpop.f32.mrf.mxu0 }
 0x3cb   : > { %8391 = vst [vmem:[#allocation4_spill] sm:$0xff] %v7488_v62  ;;  %v3056_v5 = vadd.f32 %v3055_v60, %v2923_v19  ;;  %v3188_v17 = vpop.f32.mrf.mxu1  ;;  %v2925_v15 = vadd.f32 %v2924_v63, %v7152_v21  ;;  %v5331_v62 = vld [vmem:[%s5596_s26 + $0x500] sm:$0xf0] }
 0x3cd   : > { %v7492_v34 = vadd.f32 %v3188_v17, %v3056_v5  ;;  %5139 = vmatmul.msk.bf16.gmra.mxu2 %vm1846_vm0, %v7490_v36  ;;  %3094 = vmatmul.bf16.gmra.mxu0 %v8394_v47  ;;  %v5045_v17 = vor.u32 %v5419_v14, %v5042_v2  ;;  %v4688_v36 = vld [vmem:[%s5596_s26 + $0x4e8] sm:$0xf] }
 0x3ce   : > { %3227 = vmatmul.bf16.gmra.mxu1 %v8396_v32  ;;  %v7517_v32 = vor.u32 %v5331_v62, %v4688_v36  ;;  %v8402_v62 = vld [vmem:[#allocation151_spill] sm:$0xff] }
 0x3cf   : > { %8393 = vst [vmem:[#allocation6_spill] sm:$0xff] %v7492_v34  ;;  %2966 = vmatmul.bf16.gmra.mxu3 %v8395_v20  ;;  %3525 = vmatpush.bf16.msrb.mxu0 %v5045_v17 }
 0x3d0   : > { %v2794_v5 = vpop.f32.mrf.mxu2  ;;  %8399 = vst [vmem:[#allocation10_spill] sm:$0xff] %v7517_v32 }
 0x3d1   : > { %v7507_v31 = vadd.f32 %v2794_v5, %v6880_v30 }
 0x3d2   : > { %v2927_v29 = vpop.f32.mrf.mxu3  ;;  %v3057_v19 = vpop.f32.mrf.mxu0 }
 0x3d3   : > { %8397 = vst [vmem:[#allocation8_spill] sm:$0xff] %v7507_v31  ;;  %v3058_v57 = vadd.f32 %v3057_v19, %v2925_v15  ;;  %v3190_v60 = vpop.f32.mrf.mxu1  ;;  %v2928_v20 = vadd.f32 %v2927_v29, %v7152_v21  ;;  %v8400_v15 = vld [vmem:[#allocation34_spill] sm:$0xff]  ;;  %v8401_v29 = vld [vmem:[#allocation36_spill] sm:$0xff] }
 0x3d5   : > { %v7509_v47 = vadd.f32 %v3190_v60, %v3058_v57 }
 0x3d8   : > { %v2796_v34 = vpop.f32.mrf.mxu2 }
 0x3d9   : > { %v7515_v14 = vadd.f32 %v2796_v34, %v6887_v56 }
 0x3da   : > { %v2929_v2 = vpop.f32.mrf.mxu3  ;;  %v3060_v63 = vpop.f32.mrf.mxu0 }
 0x3db   : > { %8398 = vst [vmem:[#allocation112_spill] sm:$0xff] %v7515_v14  ;;  %v3061_v30 = vadd.f32 %v3060_v63, %v2928_v20  ;;  %v3193_v17 = vpop.f32.mrf.mxu1  ;;  %v2930_v34 = vadd.f32 %v2929_v2, %v7152_v21 }
 0x3dd   : > { %v7519_v5 = vadd.f32 %v3193_v17, %v3061_v30  ;;  %5140 = vmatmul.msk.bf16.gmra.mxu2 %vm1846_vm0, %v7517_v32  ;;  %3099 = vmatmul.bf16.gmra.mxu0 %v8400_v15  ;;  %v4716_v30 = vld [vmem:[%s5596_s26 + $0x520] sm:$0xf]  ;;  %v5338_v17 = vld [vmem:[%s5596_s26 + $0x538] sm:$0xf0] }
 0x3de   : > { %3232 = vmatmul.bf16.gmra.mxu1 %v6834_v9  ;;  %v7538_v2 = vor.u32 %v5338_v17, %v4716_v30 }
 0x3df   : > { %2971 = vmatmul.bf16.gmra.mxu3 %v8401_v29  ;;  %v8404_v29 = vld [vmem:[#allocation152_spill] sm:$0xff] }
 0x3e0   : > { %v2799_v56 = vpop.f32.mrf.mxu2  ;;  %8406 = vst [vmem:[#allocation16_spill] sm:$0xff] %v7538_v2 }
 0x3e1   : > { %v7528_v36 = vadd.f32 %v2799_v56, %v8402_v62 }
 0x3e2   : > { %v2932_v19 = vpop.f32.mrf.mxu3  ;;  %v3062_v57 = vpop.f32.mrf.mxu0 }
 0x3e3   : > { %8403 = vst [vmem:[#allocation12_spill] sm:$0xff] %v7528_v36  ;;  %v3063_v60 = vadd.f32 %v3062_v57, %v2930_v34  ;;  %v3195_v20 = vpop.f32.mrf.mxu1  ;;  %v2933_v15 = vadd.f32 %v2932_v19, %v7152_v21  ;;  %v8407_v34 = vld [vmem:[#allocation38_spill] sm:$0xff]  ;;  %v8408_v57 = vld [vmem:[#allocation40_spill] sm:$0xff]  ;;  %v8409_v19 = vld [vmem:[#allocation143_spill] sm:$0xff] }
 0x3e5   : > { %v7530_v63 = vadd.f32 %v3195_v20, %v3063_v60 }
 0x3e8   : > { %v2801_v32 = vpop.f32.mrf.mxu2 }
 0x3e9   : > { %v7536_v14 = vadd.f32 %v2801_v32, %v8404_v29 }
 0x3ea   : > { %v2934_v9 = vpop.f32.mrf.mxu3  ;;  %v3065_v56 = vpop.f32.mrf.mxu0 }
 0x3eb   : > { %8405 = vst [vmem:[#allocation14_spill] sm:$0xff] %v7536_v14  ;;  %v3066_v62 = vadd.f32 %v3065_v56, %v2933_v15  ;;  %v3198_v36 = vpop.f32.mrf.mxu1  ;;  %v2935_v60 = vadd.f32 %v2934_v9, %v7152_v21  ;;  %v375_v15 = vld [vmem:[%s5596_s26 + $0x558] sm:$0xf]  ;;  %s5170_s26 = sshll.u32 %s8594_s21, 3 }
 0x3ec   : > { %s7728_s11 = scalar_lea.vmem %s7958_s3, %s5170_s26 }
 0x3ed   : > { %v7540_v31 = vadd.f32 %v3198_v36, %v3066_v62  ;;  %5141 = vmatmul.msk.bf16.gmra.mxu2 %vm1846_vm0, %v7538_v2  ;;  %3104 = vmatmul.bf16.gmra.mxu0 %v8407_v34  ;;  %v1020_v62 = vunpack.c.l.b16 %v375_v15 }
 0x3ee   : > { %3237 = vmatmul.bf16.gmra.mxu1 %v8409_v19 }
 0x3ef   : > { %2976 = vmatmul.bf16.gmra.mxu3 %v8408_v57  ;;  %v7558_v14 = vpack.c.b16 %v1020_v62, %v1020_v62 }
 0x3f0   : > { %v2804_v32 = vpop.f32.mrf.mxu2 }
 0x3f1   : > { %v7549_v20 = vadd.f32 %v2804_v32, %v6941_v13  ;;  %8412 = vst [vmem:[#allocation20_spill] sm:$0xff] %v7558_v14 }
 0x3f2   : > { %v2937_v30 = vpop.f32.mrf.mxu3  ;;  %v3067_v17 = vpop.f32.mrf.mxu0 }
 0x3f3   : > { %8410 = vst [vmem:[#allocation119_spill] sm:$0xff] %v7549_v20  ;;  %v3068_v36 = vadd.f32 %v3067_v17, %v2935_v60  ;;  %v3200_v29 = vpop.f32.mrf.mxu1  ;;  %v2938_v34 = vadd.f32 %v2937_v30, %v7152_v21  ;;  %v8413_v60 = vld [vmem:[#allocation42_spill] sm:$0xff]  ;;  %v8414_v17 = vld [vmem:[#allocation44_spill] sm:$0xff]  ;;  %v8415_v30 = vld [vmem:[#allocation147_spill] sm:$0xff] }
 0x3f5   : > { %v7552_v56 = vadd.f32 %v3200_v29, %v3068_v36 }
 0x3f8   : > { %v2806_v2 = vpop.f32.mrf.mxu2 }
 0x3f9   : > { %v7556_v57 = vadd.f32 %v2806_v2, %v6961_v35 }
 0x3fa   : > { %v2939_v19 = vpop.f32.mrf.mxu3  ;;  %v3070_v9 = vpop.f32.mrf.mxu0 }
 0x3fb   : > { %8411 = vst [vmem:[#allocation18_spill] sm:$0xff] %v7556_v57  ;;  %v3071_v13 = vadd.f32 %v3070_v9, %v2938_v34  ;;  %v3203_v32 = vpop.f32.mrf.mxu1  ;;  %v2940_v35 = vadd.f32 %v2939_v19, %v7152_v21 }
 0x3fd   : > { %v7560_v20 = vadd.f32 %v3203_v32, %v3071_v13  ;;  %5142 = vmatmul.msk.bf16.gmra.mxu2 %vm1846_vm0, %v7558_v14  ;;  %3109 = vmatmul.bf16.gmra.mxu0 %v8413_v60 }
 0x3fe   : > { %3242 = vmatmul.bf16.gmra.mxu1 %v8415_v30 }
 0x3ff   : > { %2981 = vmatmul.bf16.gmra.mxu3 %v8414_v17 }
 0x400   : > { %v2809_v15 = vpop.f32.mrf.mxu2 }
 0x401   : > { %v7569_v2 = vadd.f32 %v2809_v15, %v6972_v4  ;;  %v8417_v4 = vld [vmem:[#allocation46_spill] sm:$0xff]  ;;  %v8418_v15 = vld [vmem:[#allocation49_spill] sm:$0xff] }
 0x402   : > { %v2942_v36 = vpop.f32.mrf.mxu3  ;;  %v3072_v29 = vpop.f32.mrf.mxu0 }
 0x403   : > { %v3073_v62 = vadd.f32 %v3072_v29, %v2940_v35  ;;  %v3205_v34 = vpop.f32.mrf.mxu1  ;;  %v2943_v13 = vadd.f32 %v2942_v36, %v7152_v21  ;;  %v8419_v35 = vld [vmem:[#allocation51_spill] sm:$0xff] }
 0x405   : > { %v7571_v9 = vadd.f32 %v3205_v34, %v3073_v62 }
 0x408   : > { %v2811_v32 = vpop.f32.mrf.mxu2 }
 0x409   : > { %v7575_v60 = vadd.f32 %v2811_v32, %v6980_v24 }
 0x40a   : > { %v2944_v17 = vpop.f32.mrf.mxu3  ;;  %v3075_v30 = vpop.f32.mrf.mxu0 }
 0x40b   : > { %8416 = vst [vmem:[#allocation123_spill] sm:$0xff] %v7575_v60  ;;  %v3076_v14 = vadd.f32 %v3075_v30, %v2943_v13  ;;  %v3208_v57 = vpop.f32.mrf.mxu1  ;;  %v2945_v36 = vadd.f32 %v2944_v17, %v7152_v21 }
 0x40d   : > { %v7577_v19 = vadd.f32 %v3208_v57, %v3076_v14  ;;  %3114 = vmatmul.bf16.gmra.mxu0 %v8417_v4  ;;  %3260 = vmatmul.bf16.vlgmr.msrb.gmra.mxu2 %v8418_v15 }
 0x40e   : > { %3247 = vmatmul.bf16.gmra.mxu1 %v6933_v25 }
 0x40f   : > { %3393 = vmatmul.bf16.vlgmr.msrb.gmra.mxu3 %v8419_v35 }
 0x410   : > { %v2814_v29 = vpop.f32.mrf.mxu2 }
 0x411   : > { %v7585_v24 = vadd.f32 %v2814_v29, %v6987_v55  ;;  %v8421_v55 = vld [vmem:[#allocation52_spill] sm:$0xff]  ;;  %v8422_v29 = vld [vmem:[#allocation53_spill] sm:$0xff] }
 0x412   : > { %v2947_v62 = vpop.f32.mrf.mxu3  ;;  %v3077_v34 = vpop.f32.mrf.mxu0 }
 0x413   : > { %v3078_v13 = vadd.f32 %v3077_v34, %v2945_v36  ;;  %v3210_v32 = vpop.f32.mrf.mxu1  ;;  %v2948_v57 = vadd.f32 %v2947_v62, %v7152_v21  ;;  %v8423_v36 = vld [vmem:[#allocation55_spill] sm:$0xff] }
 0x415   : > { %v7587_v14 = vadd.f32 %v3210_v32, %v3078_v13 }
 0x418   : > { %v2816_v30 = vpop.f32.mrf.mxu2 }
 0x419   : > { %v7591_v4 = vadd.f32 %v2816_v30, %v6995_v48 }
 0x41a   : > { %v2949_v25 = vpop.f32.mrf.mxu3  ;;  %v3080_v15 = vpop.f32.mrf.mxu0 }
 0x41b   : > { %8420 = vst [vmem:[#allocation22_spill] sm:$0xff] %v7591_v4  ;;  %v3081_v35 = vadd.f32 %v3080_v15, %v2948_v57  ;;  %v3213_v60 = vpop.f32.mrf.mxu1  ;;  %v2950_v34 = vadd.f32 %v2949_v25, %v7152_v21 }
 0x41d   : > { %v7593_v17 = vadd.f32 %v3213_v60, %v3081_v35  ;;  %3265 = vmatmul.bf16.gmra.mxu2 %v8421_v55  ;;  %3526 = vmatmul.bf16.vlgmr.msrb.gmra.mxu0 %v8422_v29 }
 0x41e   : > { %5143 = vmatmul.msk.bf16.vlgmr.msrb.gmra.mxu1 %vm1846_vm0, %v6968_v40 }
 0x41f   : > { %3398 = vmatmul.bf16.gmra.mxu3 %v8423_v36 }
 0x420   : > { %v2819_v62 = vpop.f32.mrf.mxu2 }
 0x421   : > { %v7602_v48 = vadd.f32 %v2819_v62, %v7014_v10  ;;  %v8425_v10 = vld [vmem:[#allocation56_spill] sm:$0xff]  ;;  %v8426_v62 = vld [vmem:[#allocation57_spill] sm:$0xff] }
 0x422   : > { %v2952_v13 = vpop.f32.mrf.mxu3  ;;  %v3082_v32 = vpop.f32.mrf.mxu0 }
 0x423   : > { %v3083_v57 = vadd.f32 %v3082_v32, %v2950_v34  ;;  %v3215_v60 = vpop.f32.mrf.mxu1  ;;  %v2953_v15 = vadd.f32 %v2952_v13, %v7152_v21  ;;  %v8427_v34 = vld [vmem:[#allocation60_spill] sm:$0xff] }
 0x425   : > { %v7604_v30 = vadd.f32 %v3215_v60, %v3083_v57 }
 0x428   : > { %v2821_v35 = vpop.f32.mrf.mxu2 }
 0x429   : > { %v7608_v55 = vadd.f32 %v2821_v35, %v7028_v58 }
 0x42a   : > { %v2954_v29 = vpop.f32.mrf.mxu3  ;;  %v3085_v40 = vpop.f32.mrf.mxu0 }
 0x42b   : > { %8424 = vst [vmem:[#allocation24_spill] sm:$0xff] %v7608_v55  ;;  %v3086_v36 = vadd.f32 %v3085_v40, %v2953_v15  ;;  %v3218_v4 = vpop.f32.mrf.mxu1  ;;  %v2955_v32 = vadd.f32 %v2954_v29, %v7152_v21 }
 0x42d   : > { %v7610_v25 = vadd.f32 %v3218_v4, %v3086_v36  ;;  %3270 = vmatmul.bf16.gmra.mxu2 %v8425_v10  ;;  %3531 = vmatmul.bf16.gmra.mxu0 %v8426_v62 }
 0x42e   : > { %5144 = vmatmul.msk.bf16.gmra.mxu1 %vm1846_vm0, %v6985_v61 }
 0x42f   : > { %3403 = vmatmul.bf16.gmra.mxu3 %v8427_v34 }
 0x430   : > { %v2824_v13 = vpop.f32.mrf.mxu2 }
 0x431   : > { %v7619_v58 = vadd.f32 %v2824_v13, %v7035_v28  ;;  %v8431_v28 = vld [vmem:[#allocation61_spill] sm:$0xff]  ;;  %v8432_v13 = vld [vmem:[#allocation62_spill] sm:$0xff] }
 0x432   : > { %v2957_v57 = vpop.f32.mrf.mxu3  ;;  %v3087_v60 = vpop.f32.mrf.mxu0 }
 0x433   : > { %8428 = vst [vmem:[#allocation127_spill] sm:$0xff] %v7619_v58  ;;  %v3088_v15 = vadd.f32 %v3087_v60, %v2955_v32  ;;  %v3220_v4 = vpop.f32.mrf.mxu1  ;;  %v2958_v40 = vadd.f32 %v2957_v57, %v7152_v21  ;;  %v8433_v32 = vld [vmem:[#allocation66_spill] sm:$0xff] }
 0x435   : > { %v7621_v35 = vadd.f32 %v3220_v4, %v3088_v15 }
 0x438   : > { %v2826_v36 = vpop.f32.mrf.mxu2 }
 0x439   : > { %v7625_v10 = vadd.f32 %v2826_v36, %v7043_v27  ;;  %v8434_v27 = vld [vmem:[#allocation50_spill] sm:$0xff] }
 0x43a   : > { %v2959_v62 = vpop.f32.mrf.mxu3  ;;  %v3090_v61 = vpop.f32.mrf.mxu0 }
 0x43b   : > { %8429 = vst [vmem:[#allocation139_spill] sm:$0xff] %v7625_v10  ;;  %v3091_v34 = vadd.f32 %v3090_v61, %v2958_v40  ;;  %v3223_v55 = vpop.f32.mrf.mxu1  ;;  %v2960_v60 = vadd.f32 %v2959_v62, %v7152_v21 }
 0x43d   : > { %v7627_v29 = vadd.f32 %v3223_v55, %v3091_v34  ;;  %3275 = vmatmul.bf16.gmra.mxu2 %v8431_v28  ;;  %3536 = vmatmul.bf16.gmra.mxu0 %v8432_v13  ;;  %v8437_v13 = vld [vmem:[#allocation58_spill] sm:$0xff] }
 0x43e   : > { %5145 = vmatmul.msk.bf16.gmra.mxu1 %vm1846_vm0, %v7012_v52 }
 0x43f   : > { %8430 = vst [vmem:[#allocation26_spill] sm:$0xff] %v7627_v29  ;;  %3408 = vmatmul.bf16.gmra.mxu3 %v8433_v32 }
 0x440   : > { %v2829_v57 = vpop.f32.mrf.mxu2 }
 0x441   : > { %v7636_v15 = vadd.f32 %v2829_v57, %v8434_v27  ;;  %v8440_v57 = vld [vmem:[#allocation67_spill] sm:$0xff]  ;;  %v8441_v27 = vld [vmem:[#allocation68_spill] sm:$0xff] }
 0x442   : > { %v2962_v4 = vpop.f32.mrf.mxu3  ;;  %v3092_v40 = vpop.f32.mrf.mxu0 }
 0x443   : > { %8435 = vst [vmem:[#allocation28_spill] sm:$0xff] %v7636_v15  ;;  %v3093_v36 = vadd.f32 %v3092_v40, %v2960_v60  ;;  %v3225_v55 = vpop.f32.mrf.mxu1  ;;  %v2963_v34 = vadd.f32 %v2962_v4, %v7152_v21  ;;  %v8442_v60 = vld [vmem:[#allocation72_spill] sm:$0xff]  ;;  %v8443_v40 = vld [vmem:[#allocation5_spill] sm:$0xff] }
 0x445   : > { %v7638_v61 = vadd.f32 %v3225_v55, %v3093_v36  ;;  %v8444_v55 = vld [vmem:[#allocation9_spill] sm:$0xff] }
 0x447   : > { %8436 = vst [vmem:[#allocation131_spill] sm:$0xff] %v7638_v61 }
 0x448   : > { %v2831_v28 = vpop.f32.mrf.mxu2 }
 0x449   : > { %v7642_v32 = vadd.f32 %v2831_v28, %v8437_v13 }
 0x44a   : > { %v2964_v10 = vpop.f32.mrf.mxu3  ;;  %v3095_v52 = vpop.f32.mrf.mxu0 }
 0x44b   : > { %8438 = vst [vmem:[#allocation30_spill] sm:$0xff] %v7642_v32  ;;  %v3096_v58 = vadd.f32 %v3095_v52, %v2963_v34  ;;  %v3228_v29 = vpop.f32.mrf.mxu1  ;;  %v2965_v36 = vadd.f32 %v2964_v10, %v7152_v21  ;;  %v8446_v32 = vld [vmem:[#allocation11_spill] sm:$0xff] }
 0x44d   : > { %v7644_v62 = vadd.f32 %v3228_v29, %v3096_v58  ;;  %3280 = vmatmul.bf16.gmra.mxu2 %v8440_v57  ;;  %3541 = vmatmul.bf16.gmra.mxu0 %v8441_v27 }
 0x44e   : > { %5146 = vmatmul.msk.bf16.gmra.mxu1 %vm1846_vm0, %v8443_v40 }
 0x44f   : > { %8439 = vst [vmem:[#allocation32_spill] sm:$0xff] %v7644_v62  ;;  %3413 = vmatmul.bf16.gmra.mxu3 %v8442_v60 }
 0x450   : > { %v2834_v4 = vpop.f32.mrf.mxu2 }
 0x451   : > { %v7653_v28 = vadd.f32 %v2834_v4, %v8444_v55  ;;  %v8449_v4 = vld [vmem:[#allocation73_spill] sm:$0xff]  ;;  %v8450_v55 = vld [vmem:[#allocation74_spill] sm:$0xff] }
 0x452   : > { %v2967_v13 = vpop.f32.mrf.mxu3  ;;  %v3097_v34 = vpop.f32.mrf.mxu0 }
 0x453   : > { %8445 = vst [vmem:[#allocation135_spill] sm:$0xff] %v7653_v28  ;;  %v3098_v52 = vadd.f32 %v3097_v34, %v2965_v36  ;;  %v3230_v58 = vpop.f32.mrf.mxu1  ;;  %v2968_v57 = vadd.f32 %v2967_v13, %v7152_v21  ;;  %v8451_v36 = vld [vmem:[#allocation78_spill] sm:$0xff]  ;;  %v8452_v34 = vld [vmem:[#allocation7_spill] sm:$0xff] }
 0x455   : > { %v7655_v29 = vadd.f32 %v3230_v58, %v3098_v52 }
 0x458   : > { %v2836_v27 = vpop.f32.mrf.mxu2 }
 0x459   : > { %v7659_v60 = vadd.f32 %v2836_v27, %v8446_v32  ;;  %v8453_v32 = vld [vmem:[#allocation64_spill] sm:$0xff] }
 0x45a   : > { %v2969_v15 = vpop.f32.mrf.mxu3  ;;  %v3100_v40 = vpop.f32.mrf.mxu0 }
 0x45b   : > { %8447 = vst [vmem:[#allocation34_spill] sm:$0xff] %v7659_v60  ;;  %v3101_v62 = vadd.f32 %v3100_v40, %v2968_v57  ;;  %v3233_v61 = vpop.f32.mrf.mxu1  ;;  %v2970_v52 = vadd.f32 %v2969_v15, %v7152_v21 }
 0x45d   : > { %v7661_v10 = vadd.f32 %v3233_v61, %v3101_v62  ;;  %3285 = vmatmul.bf16.gmra.mxu2 %v8449_v4  ;;  %3546 = vmatmul.bf16.gmra.mxu0 %v8450_v55 }
 0x45e   : > { %5147 = vmatmul.msk.bf16.gmra.mxu1 %vm1846_vm0, %v8452_v34 }
 0x45f   : > { %8448 = vst [vmem:[#allocation36_spill] sm:$0xff] %v7661_v10  ;;  %3418 = vmatmul.bf16.gmra.mxu3 %v8451_v36 }
 0x460   : > { %v2839_v13 = vpop.f32.mrf.mxu2 }
 0x461   : > { %v7670_v58 = vadd.f32 %v2839_v13, %v8453_v32  ;;  %v8457_v13 = vld [vmem:[#allocation79_spill] sm:$0xff]  ;;  %v8458_v32 = vld [vmem:[#allocation80_spill] sm:$0xff] }
 0x462   : > { %v2972_v27 = vpop.f32.mrf.mxu3  ;;  %v3102_v57 = vpop.f32.mrf.mxu0 }
 0x463   : > { %8454 = vst [vmem:[#allocation151_spill] sm:$0xff] %v7670_v58  ;;  %v3103_v40 = vadd.f32 %v3102_v57, %v2970_v52  ;;  %v3235_v61 = vpop.f32.mrf.mxu1  ;;  %v2973_v4 = vadd.f32 %v2972_v27, %v7152_v21  ;;  %v8459_v52 = vld [vmem:[#allocation84_spill] sm:$0xff]  ;;  %v8460_v57 = vld [vmem:[#allocation63_spill] sm:$0xff] }
 0x465   : > { %v7672_v62 = vadd.f32 %v3235_v61, %v3103_v40 }
 0x468   : > { %v2841_v55 = vpop.f32.mrf.mxu2 }
 0x469   : > { %v7676_v36 = vadd.f32 %v2841_v55, %v7106_v33  ;;  %v8461_v33 = vld [vmem:[#allocation13_spill] sm:$0xff] }
 0x46a   : > { %v2974_v60 = vpop.f32.mrf.mxu3  ;;  %v3105_v34 = vpop.f32.mrf.mxu0 }
 0x46b   : > { %8455 = vst [vmem:[#allocation152_spill] sm:$0xff] %v7676_v36  ;;  %v3106_v28 = vadd.f32 %v3105_v34, %v2973_v4  ;;  %v3238_v10 = vpop.f32.mrf.mxu1  ;;  %v2975_v40 = vadd.f32 %v2974_v60, %v7152_v21 }
 0x46d   : > { %v7678_v15 = vadd.f32 %v3238_v10, %v3106_v28  ;;  %3290 = vmatmul.bf16.gmra.mxu2 %v8457_v13  ;;  %3551 = vmatmul.bf16.gmra.mxu0 %v8458_v32 }
 0x46e   : > { %5148 = vmatmul.msk.bf16.gmra.mxu1 %vm1846_vm0, %v8460_v57 }
 0x46f   : > { %8456 = vst [vmem:[#allocation38_spill] sm:$0xff] %v7678_v15  ;;  %3423 = vmatmul.bf16.gmra.mxu3 %v8459_v52 }
 0x470   : > { %v2844_v27 = vpop.f32.mrf.mxu2 }
 0x471   : > { %v7687_v61 = vadd.f32 %v2844_v27, %v8461_v33  ;;  %v8465_v27 = vld [vmem:[#allocation85_spill] sm:$0xff]  ;;  %v8466_v33 = vld [vmem:[#allocation86_spill] sm:$0xff] }
 0x472   : > { %v2977_v55 = vpop.f32.mrf.mxu3  ;;  %v3107_v4 = vpop.f32.mrf.mxu0 }
 0x473   : > { %8462 = vst [vmem:[#allocation40_spill] sm:$0xff] %v7687_v61  ;;  %v3108_v34 = vadd.f32 %v3107_v4, %v2975_v40  ;;  %v3240_v28 = vpop.f32.mrf.mxu1  ;;  %v2978_v13 = vadd.f32 %v2977_v55, %v7152_v21  ;;  %v8467_v40 = vld [vmem:[#allocation90_spill] sm:$0xff] }
 0x474   : > { %v8468_v4 = vld [vmem:[#allocation54_spill] sm:$0xff] }
 0x475   : > { %v7689_v10 = vadd.f32 %v3240_v28, %v3108_v34 }
 0x478   : > { %v2846_v32 = vpop.f32.mrf.mxu2 }
 0x479   : > { %v7693_v52 = vadd.f32 %v2846_v32, %v7121_v23 }
 0x47a   : > { %v2979_v36 = vpop.f32.mrf.mxu3  ;;  %v3110_v57 = vpop.f32.mrf.mxu0 }
 0x47b   : > { %8463 = vst [vmem:[#allocation143_spill] sm:$0xff] %v7693_v52  ;;  %v3111_v58 = vadd.f32 %v3110_v57, %v2978_v13  ;;  %v3243_v15 = vpop.f32.mrf.mxu1  ;;  %v2980_v34 = vadd.f32 %v2979_v36, %v7152_v21  ;;  %v8472_v36 = vld [vmem:[#allocation92_spill] sm:$0xff] }
 0x47d   : > { %v7695_v60 = vadd.f32 %v3243_v15, %v3111_v58  ;;  %3295 = vmatmul.bf16.gmra.mxu2 %v8465_v27  ;;  %3556 = vmatmul.bf16.gmra.mxu0 %v8466_v33 }
 0x47e   : > { %5149 = vmatmul.msk.bf16.gmra.mxu1 %vm1846_vm0, %v8468_v4 }
 0x47f   : > { %8464 = vst [vmem:[#allocation42_spill] sm:$0xff] %v7695_v60  ;;  %3428 = vmatmul.bf16.gmra.mxu3 %v8467_v40  ;;  %v8471_v60 = vld [vmem:[#allocation91_spill] sm:$0xff] }
 0x480   : > { %v2849_v55 = vpop.f32.mrf.mxu2 }
 0x481   : > { %v7704_v23 = vadd.f32 %v2849_v55, %v7133_v37  ;;  %v8473_v37 = vld [vmem:[#allocation93_spill] sm:$0xff] }
 0x482   : > { %v2982_v28 = vpop.f32.mrf.mxu3  ;;  %v3112_v13 = vpop.f32.mrf.mxu0  ;;  %v8474_v55 = vld [vmem:[#allocation69_spill] sm:$0xff] }
 0x483   : > { %8469 = vst [vmem:[#allocation44_spill] sm:$0xff] %v7704_v23  ;;  %v3113_v32 = vadd.f32 %v3112_v13, %v2980_v34  ;;  %v3245_v58 = vpop.f32.mrf.mxu1  ;;  %v2983_v57 = vadd.f32 %v2982_v28, %v7152_v21 }
 0x485   : > { %v7706_v15 = vadd.f32 %v3245_v58, %v3113_v32 }
 0x488   : > { %v2851_v27 = vpop.f32.mrf.mxu2 }
 0x48a   : > { %v2984_v33 = vpop.f32.mrf.mxu3  ;;  %v3115_v40 = vpop.f32.mrf.mxu0 }
 0x48b   : > { %v3116_v52 = vadd.f32 %v3115_v40, %v2983_v57  ;;  %v3248_v61 = vpop.f32.mrf.mxu1 }
 0x48d   : > { %v7709_v4 = vadd.f32 %v3248_v61, %v3116_v52  ;;  %3300 = vmatmul.bf16.gmra.mxu2 %v8471_v60  ;;  %3561 = vmatmul.bf16.gmra.mxu0 %v8472_v36  ;;  %v8475_v36 = vld [vmem:[#allocation94_spill] sm:$0xff] }
 0x48e   : > { %5150 = vmatmul.msk.bf16.gmra.mxu1 %vm1846_vm0, %v8474_v55  ;;  %v8477_v55 = vld [vmem:[#allocation97_spill] sm:$0xff] }
 0x48f   : > { %8470 = vst [vmem:[#allocation147_spill] sm:$0xff] %v7709_v4  ;;  %3433 = vmatmul.bf16.gmra.mxu3 %v8473_v37  ;;  %v8476_v37 = vld [vmem:[#allocation95_spill] sm:$0xff] }
 0x490   : > { %v3261_v34 = vpop.f32.mrf.mxu2 }
 0x491   : > { %v3262_v32 = vadd.f32 %v3261_v34, %v7168_v38  ;;  %v8478_v38 = vld [vmem:[#allocation15_spill] sm:$0xff] }
 0x492   : > { %v3394_v13 = vpop.f32.mrf.mxu3  ;;  %v3117_v21 = vpop.f32.mrf.mxu0  ;;  %v3784_v34 = vmax.f32 %v8478_v38, 0.0 }
 0x493   : > { %v3250_v28 = vpop.f32.mrf.mxu1  ;;  %v3395_v57 = vadd.f32 %v3394_v13, %v3262_v32 }
 0x498   : > { %v3263_v58 = vpop.f32.mrf.mxu2 }
 0x499   : > { %v3264_v33 = vadd.f32 %v3263_v58, %v7179_v59 }
 0x49a   : > { %v3396_v61 = vpop.f32.mrf.mxu3  ;;  %v3527_v52 = vpop.f32.mrf.mxu0 }
 0x49b   : > { %v3528_v27 = vadd.f32 %v3527_v52, %v3395_v57  ;;  %v3660_v60 = vpop.f32.mrf.mxu1  ;;  %v3397_v21 = vadd.f32 %v3396_v61, %v3264_v33 }
 0x49d   : > { %v3661_v40 = vadd.f32 %v3660_v60, %v3528_v27  ;;  %3305 = vmatmul.bf16.gmra.mxu2 %v8475_v36  ;;  %3566 = vmatmul.bf16.gmra.mxu0 %v8476_v37  ;;  %v8479_v60 = vld [vmem:[#allocation59_spill] sm:$0xff] }
 0x49e   : > { %5151 = vmatmul.msk.bf16.gmra.mxu1 %vm1846_vm0, %v7125_v53 }
 0x49f   : > { %3438 = vmatmul.bf16.gmra.mxu3 %v8477_v55  ;;  %v3785_v13 = vmax.f32 %v3661_v40, 0.0  ;;  %v3786_v40 = vmax.f32 %v8479_v60, 0.0 }
 0x4a0   : > { %v3266_v59 = vpop.f32.mrf.mxu2 }
 0x4a1   : > { %v3882_v28 = vpack.c.bf16 %v3785_v13, %v3784_v34  ;;  %v3267_v53 = vadd.f32 %v3266_v59, %v7189_v12  ;;  %v8482_v12 = vld [vmem:[#allocation101_spill] sm:$0xff]  ;;  %v8483_v59 = vld [vmem:[#allocation70_spill] sm:$0xff] }
 0x4a2   : > { %v3399_v32 = vpop.f32.mrf.mxu3  ;;  %v3529_v58 = vpop.f32.mrf.mxu0 }
 0x4a3   : > { %3931 = vst [vmem:[%s7728_s11] sm:$0xff] %v3882_v28  ;;  %v3530_v57 = vadd.f32 %v3529_v58, %v3397_v21  ;;  %v3662_v52 = vpop.f32.mrf.mxu1  ;;  %v3400_v55 = vadd.f32 %v3399_v32, %v3267_v53  ;;  %v8480_v21 = vld [vmem:[#allocation98_spill] sm:$0xff]  ;;  %v8481_v28 = vld [vmem:[#allocation99_spill] sm:$0xff] }
 0x4a4   : > { %v8484_v32 = vld [vmem:[#allocation75_spill] sm:$0xff] }
 0x4a5   : > { %v3663_v27 = vadd.f32 %v3662_v52, %v3530_v57  ;;  %v3788_v58 = vmax.f32 %v8484_v32, 0.0 }
 0x4a7   : > { %v3787_v36 = vmax.f32 %v3663_v27, 0.0 }
 0x4a8   : > { %v3268_v37 = vpop.f32.mrf.mxu2 }
 0x4a9   : > { %v3883_v38 = vpack.c.bf16 %v3787_v36, %v3786_v40  ;;  %v3269_v34 = vadd.f32 %v3268_v37, %v7200_v6 }
 0x4aa   : > { %v3401_v23 = vpop.f32.mrf.mxu3  ;;  %v3532_v4 = vpop.f32.mrf.mxu0 }
 0x4ab   : > { %3932 = vst [vmem:[%s7728_s11 + $0x8] sm:$0xff] %v3883_v38  ;;  %v3533_v61 = vadd.f32 %v3532_v4, %v3400_v55  ;;  %v3665_v33 = vpop.f32.mrf.mxu1  ;;  %v3402_v53 = vadd.f32 %v3401_v23, %v3269_v34  ;;  %v8485_v55 = vld [vmem:[#allocation17_spill] sm:$0xff] }
 0x4ac   : > { %v3790_v38 = vmax.f32 %v8485_v55, 0.0 }
 0x4ad   : > { %v3666_v13 = vadd.f32 %v3665_v33, %v3533_v61  ;;  %3310 = vmatmul.bf16.gmra.mxu2 %v8480_v21  ;;  %3571 = vmatmul.bf16.gmra.mxu0 %v8481_v28 }
 0x4ae   : > { %5152 = vmatmul.msk.bf16.gmra.mxu1 %vm1846_vm0, %v8483_v59 }
 0x4af   : > { %3443 = vmatmul.bf16.gmra.mxu3 %v8482_v12  ;;  %v3789_v57 = vmax.f32 %v3666_v13, 0.0 }
 0x4b0   : > { %v3271_v52 = vpop.f32.mrf.mxu2 }
 0x4b1   : > { %v3884_v4 = vpack.c.bf16 %v3789_v57, %v3788_v58  ;;  %v3272_v36 = vadd.f32 %v3271_v52, %v7210_v51  ;;  %v8486_v58 = vld [vmem:[#allocation102_spill] sm:$0xff]  ;;  %v8487_v57 = vld [vmem:[#allocation103_spill] sm:$0xff]  ;;  %v8488_v51 = vld [vmem:[#allocation105_spill] sm:$0xff] }
 0x4b2   : > { %v3404_v27 = vpop.f32.mrf.mxu3  ;;  %v3534_v60 = vpop.f32.mrf.mxu0  ;;  %v8489_v52 = vld [vmem:[#allocation19_spill] sm:$0xff] }
 0x4b3   : > { %3933 = vst [vmem:[%s7728_s11 + $0x10] sm:$0xff] %v3884_v4  ;;  %v3535_v6 = vadd.f32 %v3534_v60, %v3402_v53  ;;  %v3667_v40 = vpop.f32.mrf.mxu1  ;;  %v3405_v21 = vadd.f32 %v3404_v27, %v3272_v36  ;;  %v8490_v53 = vld [vmem:[#allocation65_spill] sm:$0xff] }
 0x4b4   : > { %v3792_v4 = vmax.f32 %v8490_v53, 0.0  ;;  %v8493_v53 = vld [vmem:[#allocation107_spill] sm:$0xff] }
 0x4b5   : > { %v3668_v37 = vadd.f32 %v3667_v40, %v3535_v6 }
 0x4b7   : > { %v3791_v61 = vmax.f32 %v3668_v37, 0.0 }
 0x4b8   : > { %v3273_v33 = vpop.f32.mrf.mxu2 }
 0x4b9   : > { %v3885_v28 = vpack.c.bf16 %v3791_v61, %v3790_v38  ;;  %v3274_v59 = vadd.f32 %v3273_v33, %v7233_v8  ;;  %v8491_v33 = vld [vmem:[#allocation76_spill] sm:$0xff] }
 0x4ba   : > { %v3406_v12 = vpop.f32.mrf.mxu3  ;;  %v3537_v13 = vpop.f32.mrf.mxu0 }
 0x4bb   : > { %3934 = vst [vmem:[%s7728_s11 + $0x18] sm:$0xff] %v3885_v28  ;;  %v3538_v23 = vadd.f32 %v3537_v13, %v3405_v21  ;;  %v3670_v34 = vpop.f32.mrf.mxu1  ;;  %v3407_v6 = vadd.f32 %v3406_v12, %v3274_v59  ;;  %v3794_v21 = vmax.f32 %v8491_v33, 0.0 }
 0x4bd   : > { %v3671_v32 = vadd.f32 %v3670_v34, %v3538_v23  ;;  %3315 = vmatmul.bf16.gmra.mxu2 %v8486_v58  ;;  %3576 = vmatmul.bf16.gmra.mxu0 %v8487_v57 }
 0x4be   : > { %5153 = vmatmul.msk.bf16.gmra.mxu1 %vm1846_vm0, %v8489_v52  ;;  %v8492_v52 = vld [vmem:[#allocation106_spill] sm:$0xff] }
 0x4bf   : > { %3448 = vmatmul.bf16.gmra.mxu3 %v8488_v51  ;;  %v3793_v27 = vmax.f32 %v3671_v32, 0.0 }
 0x4c0   : > { %v3276_v60 = vpop.f32.mrf.mxu2 }
 0x4c1   : > { %v3886_v40 = vpack.c.bf16 %v3793_v27, %v3792_v4  ;;  %v3277_v38 = vadd.f32 %v3276_v60, %v7255_v22  ;;  %v8494_v22 = vld [vmem:[#allocation109_spill] sm:$0xff] }
 0x4c2   : > { %v3409_v36 = vpop.f32.mrf.mxu3  ;;  %v3539_v37 = vpop.f32.mrf.mxu0  ;;  %v8495_v4 = vld [vmem:[#allocation81_spill] sm:$0xff] }
 0x4c3   : > { %3935 = vst [vmem:[%s7728_s11 + $0x20] sm:$0xff] %v3886_v40  ;;  %v3540_v8 = vadd.f32 %v3539_v37, %v3407_v6  ;;  %v3672_v55 = vpop.f32.mrf.mxu1  ;;  %v3410_v23 = vadd.f32 %v3409_v36, %v3277_v38  ;;  %v8496_v27 = vld [vmem:[#allocation21_spill] sm:$0xff] }
 0x4c4   : > { %v3796_v60 = vmax.f32 %v8496_v27, 0.0  ;;  %v3800_v27 = vmax.f32 %v7264_v50, 0.0 }
 0x4c5   : > { %v3673_v61 = vadd.f32 %v3672_v55, %v3540_v8 }
 0x4c7   : > { %v3795_v28 = vmax.f32 %v3673_v61, 0.0 }
 0x4c8   : > { %v3278_v13 = vpop.f32.mrf.mxu2 }
 0x4c9   : > { %v3887_v34 = vpack.c.bf16 %v3795_v28, %v3794_v21  ;;  %v3279_v57 = vadd.f32 %v3278_v13, %v7266_v54  ;;  %v8497_v21 = vld [vmem:[#allocation23_spill] sm:$0xff] }
 0x4ca   : > { %v3411_v58 = vpop.f32.mrf.mxu3  ;;  %v3542_v32 = vpop.f32.mrf.mxu0  ;;  %v3798_v28 = vmax.f32 %v8497_v21, 0.0 }
 0x4cb   : > { %3936 = vst [vmem:[%s7728_s11 + $0x28] sm:$0xff] %v3887_v34  ;;  %v3543_v12 = vadd.f32 %v3542_v32, %v3410_v23  ;;  %v3675_v59 = vpop.f32.mrf.mxu1  ;;  %v3412_v36 = vadd.f32 %v3411_v58, %v3279_v57 }
 0x4cd   : > { %v3676_v51 = vadd.f32 %v3675_v59, %v3543_v12  ;;  %3320 = vmatmul.bf16.gmra.mxu2 %v8492_v52  ;;  %3581 = vmatmul.bf16.gmra.mxu0 %v8493_v53  ;;  %v8498_v53 = vld [vmem:[#allocation110_spill] sm:$0xff] }
 0x4ce   : > { %5154 = vmatmul.msk.bf16.gmra.mxu1 %vm1846_vm0, %v8495_v4  ;;  %v8501_v4 = vld [vmem:[#allocation71_spill] sm:$0xff] }
 0x4cf   : > { %3453 = vmatmul.bf16.gmra.mxu3 %v8494_v22  ;;  %v3797_v6 = vmax.f32 %v3676_v51, 0.0  ;;  %v8499_v22 = vld [vmem:[#allocation111_spill] sm:$0xff] }
 0x4d0   : > { %v3281_v40 = vpop.f32.mrf.mxu2 }
 0x4d1   : > { %v3888_v37 = vpack.c.bf16 %v3797_v6, %v3796_v60  ;;  %v3282_v61 = vadd.f32 %v3281_v40, %v7276_v7  ;;  %v8500_v7 = vld [vmem:[#allocation113_spill] sm:$0xff] }
 0x4d2   : > { %v3414_v8 = vpop.f32.mrf.mxu3  ;;  %v3544_v55 = vpop.f32.mrf.mxu0 }
 0x4d3   : > { %3937 = vst [vmem:[%s7728_s11 + $0x30] sm:$0xff] %v3888_v37  ;;  %v3545_v54 = vadd.f32 %v3544_v55, %v3412_v36  ;;  %v3677_v38 = vpop.f32.mrf.mxu1  ;;  %v3415_v34 = vadd.f32 %v3414_v8, %v3282_v61  ;;  %v8502_v61 = vld [vmem:[#allocation82_spill] sm:$0xff] }
 0x4d5   : > { %v3678_v33 = vadd.f32 %v3677_v38, %v3545_v54 }
 0x4d7   : > { %v3799_v13 = vmax.f32 %v3678_v33, 0.0  ;;  %v3802_v33 = vmax.f32 %v8502_v61, 0.0 }
 0x4d8   : > { %v3283_v23 = vpop.f32.mrf.mxu2 }
 0x4d9   : > { %v3889_v32 = vpack.c.bf16 %v3799_v13, %v3798_v28  ;;  %v3284_v51 = vadd.f32 %v3283_v23, %v7287_v46 }
 0x4da   : > { %v3416_v12 = vpop.f32.mrf.mxu3  ;;  %v3547_v59 = vpop.f32.mrf.mxu0 }
 0x4db   : > { %3938 = vst [vmem:[%s7728_s11 + $0x38] sm:$0xff] %v3889_v32  ;;  %v3548_v58 = vadd.f32 %v3547_v59, %v3415_v34  ;;  %v3680_v57 = vpop.f32.mrf.mxu1  ;;  %v3417_v40 = vadd.f32 %v3416_v12, %v3284_v51  ;;  %v8504_v51 = vld [vmem:[#allocation115_spill] sm:$0xff] }
 0x4dd   : > { %v3681_v52 = vadd.f32 %v3680_v57, %v3548_v58  ;;  %3325 = vmatmul.bf16.gmra.mxu2 %v8498_v53  ;;  %3586 = vmatmul.bf16.gmra.mxu0 %v8499_v22  ;;  %v8503_v57 = vld [vmem:[#allocation114_spill] sm:$0xff]  ;;  %v8507_v53 = vld [vmem:[#allocation25_spill] sm:$0xff] }
 0x4de   : > { %5155 = vmatmul.msk.bf16.gmra.mxu1 %vm1846_vm0, %v8501_v4  ;;  %v3804_v22 = vmax.f32 %v8507_v53, 0.0 }
 0x4df   : > { %3458 = vmatmul.bf16.gmra.mxu3 %v8500_v7  ;;  %v3801_v60 = vmax.f32 %v3681_v52, 0.0  ;;  %v8506_v52 = vld [vmem:[#allocation87_spill] sm:$0xff] }
 0x4e0   : > { %v3286_v6 = vpop.f32.mrf.mxu2 }
 0x4e1   : > { %v3890_v36 = vpack.c.bf16 %v3801_v60, %v3800_v27  ;;  %v3287_v54 = vadd.f32 %v3286_v6, %v7297_v3  ;;  %v8505_v3 = vld [vmem:[#allocation116_spill] sm:$0xff] }
 0x4e2   : > { %v3419_v37 = vpop.f32.mrf.mxu3  ;;  %v3549_v8 = vpop.f32.mrf.mxu0 }
 0x4e3   : > { %3939 = vst [vmem:[%s7728_s11 + $0x40] sm:$0xff] %v3890_v36  ;;  %v3550_v46 = vadd.f32 %v3549_v8, %v3417_v40  ;;  %v3682_v55 = vpop.f32.mrf.mxu1  ;;  %v3420_v13 = vadd.f32 %v3419_v37, %v3287_v54 }
 0x4e5   : > { %v3683_v38 = vadd.f32 %v3682_v55, %v3550_v46  ;;  %v8508_v46 = vld [vmem:[#allocation27_spill] sm:$0xff] }
 0x4e6   : > { %v3806_v55 = vmax.f32 %v8508_v46, 0.0 }
 0x4e7   : > { %v3803_v21 = vmax.f32 %v3683_v38, 0.0 }
 0x4e8   : > { %v3288_v28 = vpop.f32.mrf.mxu2 }
 0x4e9   : > { %v3891_v23 = vpack.c.bf16 %v3803_v21, %v3802_v33  ;;  %v3289_v59 = vadd.f32 %v3288_v28, %v7320_v41 }
 0x4ea   : > { %v3421_v50 = vpop.f32.mrf.mxu3  ;;  %v3552_v34 = vpop.f32.mrf.mxu0 }
 0x4eb   : > { %3940 = vst [vmem:[%s7728_s11 + $0x48] sm:$0xff] %v3891_v23  ;;  %v3553_v32 = vadd.f32 %v3552_v34, %v3420_v13  ;;  %v3685_v12 = vpop.f32.mrf.mxu1  ;;  %v3422_v27 = vadd.f32 %v3421_v50, %v3289_v59  ;;  %v8512_v59 = vld [vmem:[#allocation77_spill] sm:$0xff] }
 0x4ed   : > { %v3686_v58 = vadd.f32 %v3685_v12, %v3553_v32  ;;  %3330 = vmatmul.bf16.gmra.mxu2 %v8503_v57  ;;  %3591 = vmatmul.bf16.gmra.mxu0 %v8504_v51  ;;  %v8509_v32 = vld [vmem:[#allocation117_spill] sm:$0xff]  ;;  %v8510_v12 = vld [vmem:[#allocation118_spill] sm:$0xff] }
 0x4ee   : > { %5156 = vmatmul.msk.bf16.gmra.mxu1 %vm1846_vm0, %v8506_v52 }
 0x4ef   : > { %3463 = vmatmul.bf16.gmra.mxu3 %v8505_v3  ;;  %v3805_v7 = vmax.f32 %v3686_v58, 0.0  ;;  %v8513_v58 = vld [vmem:[#allocation88_spill] sm:$0xff] }
 0x4f0   : > { %v3291_v4 = vpop.f32.mrf.mxu2  ;;  %v3808_v57 = vmax.f32 %v8513_v58, 0.0 }
 0x4f1   : > { %v3892_v60 = vpack.c.bf16 %v3805_v7, %v3804_v22  ;;  %v3292_v37 = vadd.f32 %v3291_v4, %v7336_v45  ;;  %v8511_v45 = vld [vmem:[#allocation120_spill] sm:$0xff] }
 0x4f2   : > { %v3424_v6 = vpop.f32.mrf.mxu3  ;;  %v3554_v40 = vpop.f32.mrf.mxu0 }
 0x4f3   : > { %3941 = vst [vmem:[%s7728_s11 + $0x50] sm:$0xff] %v3892_v60  ;;  %v3555_v41 = vadd.f32 %v3554_v40, %v3422_v27  ;;  %v3687_v36 = vpop.f32.mrf.mxu1  ;;  %v3425_v61 = vadd.f32 %v3424_v6, %v3292_v37  ;;  %v8514_v6 = vld [vmem:[#allocation29_spill] sm:$0xff] }
 0x4f4   : > { %v3810_v40 = vmax.f32 %v8514_v6, 0.0 }
 0x4f5   : > { %v3688_v8 = vadd.f32 %v3687_v36, %v3555_v41 }
 0x4f7   : > { %v3807_v54 = vmax.f32 %v3688_v8, 0.0 }
 0x4f8   : > { %v3293_v38 = vpop.f32.mrf.mxu2 }
 0x4f9   : > { %v3893_v33 = vpack.c.bf16 %v3807_v54, %v3806_v55  ;;  %v3294_v50 = vadd.f32 %v3293_v38, %v7347_v44 }
 0x4fa   : > { %v3426_v21 = vpop.f32.mrf.mxu3  ;;  %v3557_v28 = vpop.f32.mrf.mxu0 }
 0x4fb   : > { %3942 = vst [vmem:[%s7728_s11 + $0x58] sm:$0xff] %v3893_v33  ;;  %v3558_v13 = vadd.f32 %v3557_v28, %v3425_v61  ;;  %v3690_v23 = vpop.f32.mrf.mxu1  ;;  %v3427_v52 = vadd.f32 %v3426_v21, %v3294_v50  ;;  %v8515_v21 = vld [vmem:[#allocation121_spill] sm:$0xff]  ;;  %v8516_v28 = vld [vmem:[#allocation122_spill] sm:$0xff] }
 0x4fd   : > { %v3691_v34 = vadd.f32 %v3690_v23, %v3558_v13  ;;  %3335 = vmatmul.bf16.gmra.mxu2 %v8509_v32  ;;  %3596 = vmatmul.bf16.gmra.mxu0 %v8510_v12  ;;  %v8518_v13 = vld [vmem:[#allocation31_spill] sm:$0xff]  ;;  %v3812_v23 = vmax.f32 %v7345_v1, 0.0 }
 0x4fe   : > { %5157 = vmatmul.msk.bf16.gmra.mxu1 %vm1846_vm0, %v8512_v59 }
 0x4ff   : > { %3468 = vmatmul.bf16.gmra.mxu3 %v8511_v45  ;;  %v3809_v51 = vmax.f32 %v3691_v34, 0.0 }
 0x500   : > { %v3296_v3 = vpop.f32.mrf.mxu2 }
 0x501   : > { %v3894_v53 = vpack.c.bf16 %v3809_v51, %v3808_v57  ;;  %v3297_v27 = vadd.f32 %v3296_v3, %v7357_v42  ;;  %v8517_v42 = vld [vmem:[#allocation124_spill] sm:$0xff]  ;;  %v8519_v3 = vld [vmem:[#allocation83_spill] sm:$0xff] }
 0x502   : > { %v3429_v22 = vpop.f32.mrf.mxu3  ;;  %v3559_v7 = vpop.f32.mrf.mxu0 }
 0x503   : > { %3943 = vst [vmem:[%s7728_s11 + $0x60] sm:$0xff] %v3894_v53  ;;  %v3560_v44 = vadd.f32 %v3559_v7, %v3427_v52  ;;  %v3692_v4 = vpop.f32.mrf.mxu1  ;;  %v3430_v37 = vadd.f32 %v3429_v22, %v3297_v27  ;;  %v3814_v52 = vmax.f32 %v8519_v3, 0.0 }
 0x505   : > { %v3693_v60 = vadd.f32 %v3692_v4, %v3560_v44 }
 0x507   : > { %v3811_v41 = vmax.f32 %v3693_v60, 0.0 }
 0x508   : > { %v3298_v36 = vpop.f32.mrf.mxu2 }
 0x509   : > { %v3895_v8 = vpack.c.bf16 %v3811_v41, %v3810_v40  ;;  %v3299_v61 = vadd.f32 %v3298_v36, %v7368_v49  ;;  %v8520_v41 = vld [vmem:[#allocation125_spill] sm:$0xff]  ;;  %v8521_v36 = vld [vmem:[#allocation126_spill] sm:$0xff] }
 0x50a   : > { %v3431_v46 = vpop.f32.mrf.mxu3  ;;  %v3562_v55 = vpop.f32.mrf.mxu0 }
 0x50b   : > { %3944 = vst [vmem:[%s7728_s11 + $0x68] sm:$0xff] %v3895_v8  ;;  %v3563_v54 = vadd.f32 %v3562_v55, %v3430_v37  ;;  %v3695_v38 = vpop.f32.mrf.mxu1  ;;  %v3432_v32 = vadd.f32 %v3431_v46, %v3299_v61  ;;  %v8523_v37 = vld [vmem:[#allocation33_spill] sm:$0xff]  ;;  %v8524_v8 = vld [vmem:[#allocation35_spill] sm:$0xff] }
 0x50c   : > { %v3816_v46 = vmax.f32 %v8524_v8, 0.0  ;;  %v8532_v8 = vld [vmem:[#allocation104_spill] sm:$0xff] }
 0x50d   : > { %v3696_v33 = vadd.f32 %v3695_v38, %v3563_v54  ;;  %3340 = vmatmul.bf16.gmra.mxu2 %v8515_v21  ;;  %3601 = vmatmul.bf16.gmra.mxu0 %v8516_v28 }
 0x50e   : > { %5158 = vmatmul.msk.bf16.gmra.mxu1 %vm1846_vm0, %v8518_v13 }
 0x50f   : > { %3473 = vmatmul.bf16.gmra.mxu3 %v8517_v42  ;;  %v3813_v50 = vmax.f32 %v3696_v33, 0.0 }
 0x510   : > { %v3301_v34 = vpop.f32.mrf.mxu2 }
 0x511   : > { %v3896_v12 = vpack.c.bf16 %v3813_v50, %v3812_v23  ;;  %v3302_v57 = vadd.f32 %v3301_v34, %v7378_v11  ;;  %v8522_v11 = vld [vmem:[#allocation128_spill] sm:$0xff]  ;;  %v8525_v23 = vld [vmem:[#allocation89_spill] sm:$0xff] }
 0x512   : > { %v3434_v45 = vpop.f32.mrf.mxu3  ;;  %v3564_v59 = vpop.f32.mrf.mxu0  ;;  %v3818_v50 = vmax.f32 %v8525_v23, 0.0  ;;  %v8533_v23 = vld [vmem:[#allocation133_spill] sm:$0xff] }
 0x513   : > { %3945 = vst [vmem:[%s7728_s11 + $0x70] sm:$0xff] %v3896_v12  ;;  %v3565_v49 = vadd.f32 %v3564_v59, %v3432_v32  ;;  %v3697_v58 = vpop.f32.mrf.mxu1  ;;  %v3435_v7 = vadd.f32 %v3434_v45, %v3302_v57 }
 0x515   : > { %v3698_v51 = vadd.f32 %v3697_v58, %v3565_v49 }
 0x517   : > { %v3815_v53 = vmax.f32 %v3698_v51, 0.0 }
 0x518   : > { %v3303_v22 = vpop.f32.mrf.mxu2 }
 0x519   : > { %v3897_v44 = vpack.c.bf16 %v3815_v53, %v3814_v52  ;;  %v3304_v6 = vadd.f32 %v3303_v22, %v7401_v0  ;;  %v8526_v52 = vld [vmem:[#allocation129_spill] sm:$0xff]  ;;  %v8527_v53 = vld [vmem:[#allocation130_spill] sm:$0xff] }
 0x51a   : > { %v3436_v1 = vpop.f32.mrf.mxu3  ;;  %v3567_v4 = vpop.f32.mrf.mxu0  ;;  %v8529_v22 = vld [vmem:[#allocation37_spill] sm:$0xff] }
 0x51b   : > { %3946 = vst [vmem:[%s7728_s11 + $0x78] sm:$0xff] %v3897_v44  ;;  %v3568_v27 = vadd.f32 %v3567_v4, %v3435_v7  ;;  %v3700_v60 = vpop.f32.mrf.mxu1  ;;  %v3437_v38 = vadd.f32 %v3436_v1, %v3304_v6  ;;  %v8530_v7 = vld [vmem:[#allocation39_spill] sm:$0xff] }
 0x51c   : > { %v3820_v44 = vmax.f32 %v8530_v7, 0.0 }
 0x51d   : > { %v3701_v40 = vadd.f32 %v3700_v60, %v3568_v27  ;;  %3345 = vmatmul.bf16.gmra.mxu2 %v8520_v41  ;;  %3606 = vmatmul.bf16.gmra.mxu0 %v8521_v36  ;;  %v8531_v36 = vld [vmem:[#allocation47_spill] sm:$0xff] }
 0x51e   : > { %5159 = vmatmul.msk.bf16.gmra.mxu1 %vm1846_vm0, %v8523_v37 }
 0x51f   : > { %3478 = vmatmul.bf16.gmra.mxu3 %v8522_v11  ;;  %v3817_v55 = vmax.f32 %v3701_v40, 0.0 }
 0x520   : > { %v3306_v54 = vpop.f32.mrf.mxu2 }
 0x521   : > { %v3898_v61 = vpack.c.bf16 %v3817_v55, %v3816_v46  ;;  %v3307_v42 = vadd.f32 %v3306_v54, %v7417_v16  ;;  %v8528_v16 = vld [vmem:[#allocation132_spill] sm:$0xff]  ;;  %v3822_v46 = vmax.f32 %v8532_v8, 0.0  ;;  %v8542_v8 = vld [vmem:[#allocation45_spill] sm:$0xff] }
 0x522   : > { %v3439_v33 = vpop.f32.mrf.mxu3  ;;  %v3569_v21 = vpop.f32.mrf.mxu0 }
 0x523   : > { %3947 = vst [vmem:[%s7728_s11 + $0x80] sm:$0xff] %v3898_v61  ;;  %v3570_v0 = vadd.f32 %v3569_v21, %v3437_v38  ;;  %v3702_v28 = vpop.f32.mrf.mxu1  ;;  %v3440_v12 = vadd.f32 %v3439_v33, %v3307_v42 }
 0x525   : > { %v3703_v13 = vadd.f32 %v3702_v28, %v3570_v0 }
 0x527   : > { %v3819_v34 = vmax.f32 %v3703_v13, 0.0 }
 0x528   : > { %v3308_v32 = vpop.f32.mrf.mxu2 }
 0x529   : > { %v3899_v45 = vpack.c.bf16 %v3819_v34, %v3818_v50  ;;  %v3309_v51 = vadd.f32 %v3308_v32, %v7428_v18  ;;  %v8534_v50 = vld [vmem:[#allocation134_spill] sm:$0xff]  ;;  %v8535_v34 = vld [vmem:[#allocation136_spill] sm:$0xff]  ;;  %v8536_v32 = vld [vmem:[#allocation41_spill] sm:$0xff] }
 0x52a   : > { %v3441_v59 = vpop.f32.mrf.mxu3  ;;  %v3572_v49 = vpop.f32.mrf.mxu0 }
 0x52b   : > { %3948 = vst [vmem:[%s7728_s11 + $0x88] sm:$0xff] %v3899_v45  ;;  %v3573_v58 = vadd.f32 %v3572_v49, %v3440_v12  ;;  %v3705_v57 = vpop.f32.mrf.mxu1  ;;  %v3442_v27 = vadd.f32 %v3441_v59, %v3309_v51  ;;  %v8537_v12 = vld [vmem:[#allocation43_spill] sm:$0xff] }
 0x52c   : > { %v3824_v45 = vmax.f32 %v8537_v12, 0.0 }
 0x52d   : > { %v3706_v3 = vadd.f32 %v3705_v57, %v3573_v58  ;;  %3350 = vmatmul.bf16.gmra.mxu2 %v8526_v52  ;;  %3611 = vmatmul.bf16.gmra.mxu0 %v8527_v53 }
 0x52e   : > { %5160 = vmatmul.msk.bf16.gmra.mxu1 %vm1846_vm0, %v8529_v22  ;;  %v8538_v22 = vld [vmem:[#allocation96_spill] sm:$0xff] }
 0x52f   : > { %3483 = vmatmul.bf16.gmra.mxu3 %v8528_v16  ;;  %v3821_v1 = vmax.f32 %v3706_v3, 0.0  ;;  %v3826_v7 = vmax.f32 %v8538_v22, 0.0  ;;  %v8549_v22 = vld [vmem:[#allocation2_spill] sm:$0xff] }
 0x530   : > { %v3311_v4 = vpop.f32.mrf.mxu2 }
 0x531   : > { %v3900_v60 = vpack.c.bf16 %v3821_v1, %v3820_v44  ;;  %v3312_v11 = vadd.f32 %v3311_v4, %v8531_v36 }
 0x532   : > { %v3444_v6 = vpop.f32.mrf.mxu3  ;;  %v3574_v40 = vpop.f32.mrf.mxu0 }
 0x533   : > { %3949 = vst [vmem:[%s7728_s11 + $0x90] sm:$0xff] %v3900_v60  ;;  %v3575_v18 = vadd.f32 %v3574_v40, %v3442_v27  ;;  %v3707_v41 = vpop.f32.mrf.mxu1  ;;  %v3445_v38 = vadd.f32 %v3444_v6, %v3312_v11  ;;  %v8539_v11 = vld [vmem:[#allocation137_spill] sm:$0xff] }
 0x535   : > { %v3708_v37 = vadd.f32 %v3707_v41, %v3575_v18 }
 0x537   : > { %v3823_v55 = vmax.f32 %v3708_v37, 0.0  ;;  %v8540_v37 = vld [vmem:[#allocation138_spill] sm:$0xff] }
 0x538   : > { %v3313_v54 = vpop.f32.mrf.mxu2 }
 0x539   : > { %v3901_v61 = vpack.c.bf16 %v3823_v55, %v3822_v46  ;;  %v3314_v42 = vadd.f32 %v3313_v54, %v7449_v43  ;;  %v8543_v46 = vld [vmem:[#allocation100_spill] sm:$0xff] }
 0x53a   : > { %v3446_v33 = vpop.f32.mrf.mxu3  ;;  %v3577_v21 = vpop.f32.mrf.mxu0  ;;  %v3828_v55 = vmax.f32 %v8543_v46, 0.0 }
 0x53b   : > { %3950 = vst [vmem:[%s7728_s11 + $0x98] sm:$0xff] %v3901_v61  ;;  %v3578_v0 = vadd.f32 %v3577_v21, %v3445_v38  ;;  %v3710_v28 = vpop.f32.mrf.mxu1  ;;  %v3447_v58 = vadd.f32 %v3446_v33, %v3314_v42  ;;  %v8544_v42 = vld [vmem:[#allocation6_spill] sm:$0xff] }
 0x53d   : > { %v3711_v13 = vadd.f32 %v3710_v28, %v3578_v0  ;;  %3355 = vmatmul.bf16.gmra.mxu2 %v8533_v23  ;;  %3616 = vmatmul.bf16.gmra.mxu0 %v8534_v50  ;;  %v8545_v50 = vld [vmem:[#allocation48_spill] sm:$0xff] }
 0x53e   : > { %5161 = vmatmul.msk.bf16.gmra.mxu1 %vm1846_vm0, %v8536_v32 }
 0x53f   : > { %3488 = vmatmul.bf16.gmra.mxu3 %v8535_v34  ;;  %v3825_v59 = vmax.f32 %v3711_v13, 0.0  ;;  %v3830_v34 = vmax.f32 %v8545_v50, 0.0 }
 0x540   : > { %v3316_v49 = vpop.f32.mrf.mxu2 }
 0x541   : > { %v3902_v57 = vpack.c.bf16 %v3825_v59, %v3824_v45  ;;  %v3317_v53 = vadd.f32 %v3316_v49, %v7459_v39  ;;  %v8541_v39 = vld [vmem:[#allocation140_spill] sm:$0xff] }
 0x542   : > { %v3449_v51 = vpop.f32.mrf.mxu3  ;;  %v3579_v3 = vpop.f32.mrf.mxu0 }
 0x543   : > { %3951 = vst [vmem:[%s7728_s11 + $0xa0] sm:$0xff] %v3902_v57  ;;  %v3580_v43 = vadd.f32 %v3579_v3, %v3447_v58  ;;  %v3712_v52 = vpop.f32.mrf.mxu1  ;;  %v3450_v4 = vadd.f32 %v3449_v51, %v3317_v53  ;;  %v8547_v53 = vld [vmem:[#allocation142_spill] sm:$0xff] }
 0x545   : > { %v3713_v16 = vadd.f32 %v3712_v52, %v3580_v43  ;;  %v8546_v52 = vld [vmem:[#allocation141_spill] sm:$0xff] }
 0x547   : > { %v3827_v44 = vmax.f32 %v3713_v16, 0.0  ;;  %v8548_v16 = vld [vmem:[#allocation144_spill] sm:$0xff] }
 0x548   : > { %v3318_v1 = vpop.f32.mrf.mxu2 }
 0x549   : > { %v3903_v27 = vpack.c.bf16 %v3827_v44, %v3826_v7  ;;  %v3319_v41 = vadd.f32 %v3318_v1, %v7476_v26  ;;  %v8550_v7 = vld [vmem:[#allocation3_spill] sm:$0xff] }
 0x54a   : > { %v3451_v60 = vpop.f32.mrf.mxu3  ;;  %v3582_v6 = vpop.f32.mrf.mxu0  ;;  %v3832_v44 = vmax.f32 %v8550_v7, 0.0 }
 0x54b   : > { %3952 = vst [vmem:[%s7728_s11 + $0xa8] sm:$0xff] %v3903_v27  ;;  %v3583_v40 = vadd.f32 %v3582_v6, %v3450_v4  ;;  %v3715_v18 = vpop.f32.mrf.mxu1  ;;  %v3452_v61 = vadd.f32 %v3451_v60, %v3319_v41 }
 0x54d   : > { %v3716_v36 = vadd.f32 %v3715_v18, %v3583_v40  ;;  %3360 = vmatmul.bf16.gmra.mxu2 %v8539_v11  ;;  %3621 = vmatmul.bf16.gmra.mxu0 %v8540_v37  ;;  %v8551_v11 = vld [vmem:[#allocation4_spill] sm:$0xff] }
 0x54e   : > { %5162 = vmatmul.msk.bf16.gmra.mxu1 %vm1846_vm0, %v8542_v8  ;;  %v3834_v37 = vmax.f32 %v8551_v11, 0.0 }
 0x54f   : > { %3493 = vmatmul.bf16.gmra.mxu3 %v8541_v39  ;;  %v3829_v54 = vmax.f32 %v3716_v36, 0.0 }
 0x550   : > { %v3321_v38 = vpop.f32.mrf.mxu2 }
 0x551   : > { %v3904_v33 = vpack.c.bf16 %v3829_v54, %v3828_v55  ;;  %v3322_v13 = vadd.f32 %v3321_v38, %v8544_v42  ;;  %v8555_v42 = vld [vmem:[#allocation108_spill] sm:$0xff] }
 0x552   : > { %v3454_v21 = vpop.f32.mrf.mxu3  ;;  %v3584_v0 = vpop.f32.mrf.mxu0 }
 0x553   : > { %3953 = vst [vmem:[%s7728_s11 + $0xb0] sm:$0xff] %v3904_v33  ;;  %v3585_v26 = vadd.f32 %v3584_v0, %v3452_v61  ;;  %v3717_v28 = vpop.f32.mrf.mxu1  ;;  %v3455_v45 = vadd.f32 %v3454_v21, %v3322_v13  ;;  %v8556_v13 = vld [vmem:[#allocation8_spill] sm:$0xff] }
 0x555   : > { %v3718_v23 = vadd.f32 %v3717_v28, %v3585_v26  ;;  %v8552_v26 = vld [vmem:[#allocation145_spill] sm:$0xff]  ;;  %v8553_v28 = vld [vmem:[#allocation146_spill] sm:$0xff] }
 0x557   : > { %v3831_v32 = vmax.f32 %v3718_v23, 0.0  ;;  %v3836_v23 = vmax.f32 %v8556_v13, 0.0 }
 0x558   : > { %v3323_v12 = vpop.f32.mrf.mxu2 }
 0x559   : > { %v3905_v59 = vpack.c.bf16 %v3831_v32, %v3830_v34  ;;  %v3324_v3 = vadd.f32 %v3323_v12, %v7509_v47 }
 0x55a   : > { %v3456_v49 = vpop.f32.mrf.mxu3  ;;  %v3587_v58 = vpop.f32.mrf.mxu0 }
 0x55b   : > { %3954 = vst [vmem:[%s7728_s11 + $0xb8] sm:$0xff] %v3905_v59  ;;  %v3588_v57 = vadd.f32 %v3587_v58, %v3455_v45  ;;  %v3720_v51 = vpop.f32.mrf.mxu1  ;;  %v3457_v27 = vadd.f32 %v3456_v49, %v3324_v3 }
 0x55d   : > { %v3721_v43 = vadd.f32 %v3720_v51, %v3588_v57  ;;  %3365 = vmatmul.bf16.gmra.mxu2 %v8546_v52  ;;  %3626 = vmatmul.bf16.gmra.mxu0 %v8547_v53  ;;  %v8557_v51 = vld [vmem:[#allocation112_spill] sm:$0xff] }
 0x55e   : > { %5163 = vmatmul.msk.bf16.gmra.mxu1 %vm1846_vm0, %v8549_v22  ;;  %v3838_v3 = vmax.f32 %v8557_v51, 0.0 }
 0x55f   : > { %3498 = vmatmul.bf16.gmra.mxu3 %v8548_v16  ;;  %v3833_v1 = vmax.f32 %v3721_v43, 0.0 }
 0x560   : > { %v3326_v4 = vpop.f32.mrf.mxu2 }
 0x561   : > { %v3906_v60 = vpack.c.bf16 %v3833_v1, %v3832_v44  ;;  %v3327_v41 = vadd.f32 %v3326_v4, %v7519_v5  ;;  %v8554_v5 = vld [vmem:[#allocation148_spill] sm:$0xff] }
 0x562   : > { %v3459_v6 = vpop.f32.mrf.mxu3  ;;  %v3589_v40 = vpop.f32.mrf.mxu0 }
 0x563   : > { %3955 = vst [vmem:[%s7728_s11 + $0xc0] sm:$0xff] %v3906_v60  ;;  %v3590_v47 = vadd.f32 %v3589_v40, %v3457_v27  ;;  %v3722_v18 = vpop.f32.mrf.mxu1  ;;  %v3460_v46 = vadd.f32 %v3459_v6, %v3327_v41  ;;  %v8558_v60 = vld [vmem:[#allocation149_spill] sm:$0xff]  ;;  %v8559_v6 = vld [vmem:[#allocation150_spill] sm:$0xff] }
 0x564   : > { %v8561_v40 = vld [vmem:[#allocation10_spill] sm:$0xff] }
 0x565   : > { %v3723_v36 = vadd.f32 %v3722_v18, %v3590_v47  ;;  %v8562_v47 = vld [vmem:[#allocation12_spill] sm:$0xff] }
 0x566   : > { %v3840_v18 = vmax.f32 %v8562_v47, 0.0 }
 0x567   : > { %v3835_v39 = vmax.f32 %v3723_v36, 0.0 }
 0x568   : > { %v3328_v8 = vpop.f32.mrf.mxu2 }
 0x569   : > { %v3907_v55 = vpack.c.bf16 %v3835_v39, %v3834_v37  ;;  %v3329_v21 = vadd.f32 %v3328_v8, %v7530_v63 }
 0x56a   : > { %v3461_v54 = vpop.f32.mrf.mxu3  ;;  %v3592_v38 = vpop.f32.mrf.mxu0 }
 0x56b   : > { %3956 = vst [vmem:[%s7728_s11 + $0xc8] sm:$0xff] %v3907_v55  ;;  %v3593_v61 = vadd.f32 %v3592_v38, %v3460_v46  ;;  %v3725_v33 = vpop.f32.mrf.mxu1  ;;  %v3462_v32 = vadd.f32 %v3461_v54, %v3329_v21  ;;  %v8563_v38 = vld [vmem:[#allocation14_spill] sm:$0xff] }
 0x56d   : > { %v3726_v0 = vadd.f32 %v3725_v33, %v3593_v61  ;;  %3370 = vmatmul.bf16.gmra.mxu2 %v8552_v26  ;;  %3631 = vmatmul.bf16.gmra.mxu0 %v8553_v28  ;;  %v3842_v61 = vmax.f32 %v8563_v38, 0.0  ;;  %v8572_v38 = vld [vmem:[#allocation123_spill] sm:$0xff] }
 0x56e   : > { %5164 = vmatmul.msk.bf16.gmra.mxu1 %vm1846_vm0, %v8555_v42 }
 0x56f   : > { %3503 = vmatmul.bf16.gmra.mxu3 %v8554_v5  ;;  %v3837_v50 = vmax.f32 %v3726_v0, 0.0 }
 0x570   : > { %v3331_v34 = vpop.f32.mrf.mxu2 }
 0x571   : > { %v3908_v12 = vpack.c.bf16 %v3837_v50, %v3836_v23  ;;  %v3332_v58 = vadd.f32 %v3331_v34, %v7540_v31  ;;  %v8560_v31 = vld [vmem:[#allocation153_spill] sm:$0xff]  ;;  %v8564_v34 = vld [vmem:[#allocation154_spill] sm:$0xff] }
 0x572   : > { %v3464_v45 = vpop.f32.mrf.mxu3  ;;  %v3594_v59 = vpop.f32.mrf.mxu0 }
 0x573   : > { %3957 = vst [vmem:[%s7728_s11 + $0xd0] sm:$0xff] %v3908_v12  ;;  %v3595_v63 = vadd.f32 %v3594_v59, %v3462_v32  ;;  %v3727_v49 = vpop.f32.mrf.mxu1  ;;  %v3465_v53 = vadd.f32 %v3464_v45, %v3332_v58  ;;  %v8565_v32 = vld [vmem:[#allocation155_spill] sm:$0xff]  ;;  %v8567_v12 = vld [vmem:[#allocation16_spill] sm:$0xff] }
 0x574   : > { %v8568_v45 = vld [vmem:[#allocation119_spill] sm:$0xff] }
 0x575   : > { %v3728_v57 = vadd.f32 %v3727_v49, %v3595_v63  ;;  %v3844_v59 = vmax.f32 %v8568_v45, 0.0 }
 0x577   : > { %v3839_v43 = vmax.f32 %v3728_v57, 0.0 }
 0x578   : > { %v3333_v52 = vpop.f32.mrf.mxu2 }
 0x579   : > { %v3909_v16 = vpack.c.bf16 %v3839_v43, %v3838_v3  ;;  %v3334_v4 = vadd.f32 %v3333_v52, %v7552_v56 }
 0x57a   : > { %v3466_v22 = vpop.f32.mrf.mxu3  ;;  %v3597_v7 = vpop.f32.mrf.mxu0 }
 0x57b   : > { %3958 = vst [vmem:[%s7728_s11 + $0xd8] sm:$0xff] %v3909_v16  ;;  %v3598_v44 = vadd.f32 %v3597_v7, %v3465_v53  ;;  %v3730_v1 = vpop.f32.mrf.mxu1  ;;  %v3467_v11 = vadd.f32 %v3466_v22, %v3334_v4  ;;  %v8569_v16 = vld [vmem:[#allocation18_spill] sm:$0xff] }
 0x57c   : > { %v3846_v22 = vmax.f32 %v8569_v16, 0.0 }
 0x57d   : > { %v3731_v27 = vadd.f32 %v3730_v1, %v3598_v44  ;;  %3375 = vmatmul.bf16.gmra.mxu2 %v8558_v60  ;;  %3636 = vmatmul.bf16.gmra.mxu0 %v8559_v6 }
 0x57e   : > { %5165 = vmatmul.msk.bf16.gmra.mxu1 %vm1846_vm0, %v8561_v40 }
 0x57f   : > { %3508 = vmatmul.bf16.gmra.mxu3 %v8560_v31  ;;  %v3841_v41 = vmax.f32 %v3731_v27, 0.0 }
 0x580   : > { %v3336_v36 = vpop.f32.mrf.mxu2 }
 0x581   : > { %v3910_v37 = vpack.c.bf16 %v3841_v41, %v3840_v18  ;;  %v3337_v55 = vadd.f32 %v3336_v36, %v7560_v20  ;;  %v8566_v20 = vld [vmem:[#allocation156_spill] sm:$0xff]  ;;  %v8570_v18 = vld [vmem:[#allocation157_spill] sm:$0xff] }
 0x582   : > { %v3469_v39 = vpop.f32.mrf.mxu3  ;;  %v3599_v8 = vpop.f32.mrf.mxu0  ;;  %v8571_v41 = vld [vmem:[#allocation20_spill] sm:$0xff] }
 0x583   : > { %3959 = vst [vmem:[%s7728_s11 + $0xe0] sm:$0xff] %v3910_v37  ;;  %v3600_v56 = vadd.f32 %v3599_v8, %v3467_v11  ;;  %v3732_v46 = vpop.f32.mrf.mxu1  ;;  %v3470_v0 = vadd.f32 %v3469_v39, %v3337_v55 }
 0x585   : > { %v3733_v54 = vadd.f32 %v3732_v46, %v3600_v56 }
 0x587   : > { %v3843_v33 = vmax.f32 %v3733_v54, 0.0 }
 0x588   : > { %v3338_v21 = vpop.f32.mrf.mxu2 }
 0x589   : > { %v3911_v26 = vpack.c.bf16 %v3843_v33, %v3842_v61  ;;  %v3339_v23 = vadd.f32 %v3338_v21, %v7571_v9  ;;  %v3850_v61 = vmax.f32 %v8572_v38, 0.0  ;;  %v8577_v38 = vld [vmem:[#allocation127_spill] sm:$0xff] }
 0x58a   : > { %v3471_v28 = vpop.f32.mrf.mxu3  ;;  %v3602_v5 = vpop.f32.mrf.mxu0 }
 0x58b   : > { %3960 = vst [vmem:[%s7728_s11 + $0xe8] sm:$0xff] %v3911_v26  ;;  %v3603_v42 = vadd.f32 %v3602_v5, %v3470_v0  ;;  %v3735_v13 = vpop.f32.mrf.mxu1  ;;  %v3472_v58 = vadd.f32 %v3471_v28, %v3339_v23 }
 0x58d   : > { %v3736_v50 = vadd.f32 %v3735_v13, %v3603_v42  ;;  %3380 = vmatmul.bf16.gmra.mxu2 %v8564_v34  ;;  %3641 = vmatmul.bf16.gmra.mxu0 %v8565_v32 }
 0x58e   : > { %5166 = vmatmul.msk.bf16.gmra.mxu1 %vm1846_vm0, %v8567_v12 }
 0x58f   : > { %3513 = vmatmul.bf16.gmra.mxu3 %v8566_v20  ;;  %v3845_v63 = vmax.f32 %v3736_v50, 0.0  ;;  %v3852_v50 = vmax.f32 %v7585_v24, 0.0 }
 0x590   : > { %v3341_v49 = vpop.f32.mrf.mxu2 }
 0x591   : > { %v3912_v57 = vpack.c.bf16 %v3845_v63, %v3844_v59  ;;  %v3342_v52 = vadd.f32 %v3341_v49, %v7577_v19  ;;  %v3848_v19 = vmax.f32 %v7569_v2, 0.0 }
 0x592   : > { %v3474_v51 = vpop.f32.mrf.mxu3  ;;  %v3604_v3 = vpop.f32.mrf.mxu0 }
 0x593   : > { %3961 = vst [vmem:[%s7728_s11 + $0xf0] sm:$0xff] %v3912_v57  ;;  %v3605_v9 = vadd.f32 %v3604_v3, %v3472_v58  ;;  %v3737_v43 = vpop.f32.mrf.mxu1  ;;  %v3475_v1 = vadd.f32 %v3474_v51, %v3342_v52  ;;  %v8573_v57 = vld [vmem:[#allocation22_spill] sm:$0xff] }
 0x594   : > { %v3854_v51 = vmax.f32 %v8573_v57, 0.0 }
 0x595   : > { %v3738_v53 = vadd.f32 %v3737_v43, %v3605_v9 }
 0x597   : > { %v3847_v7 = vmax.f32 %v3738_v53, 0.0 }
 0x598   : > { %v3343_v44 = vpop.f32.mrf.mxu2 }
 0x599   : > { %v3913_v4 = vpack.c.bf16 %v3847_v7, %v3846_v22  ;;  %v3344_v40 = vadd.f32 %v3343_v44, %v7587_v14  ;;  %v3856_v44 = vmax.f32 %v7602_v48, 0.0 }
 0x59a   : > { %v3476_v27 = vpop.f32.mrf.mxu3  ;;  %v3607_v60 = vpop.f32.mrf.mxu0 }
 0x59b   : > { %3962 = vst [vmem:[%s7728_s11 + $0xf8] sm:$0xff] %v3913_v4  ;;  %v3608_v6 = vadd.f32 %v3607_v60, %v3475_v1  ;;  %v3740_v31 = vpop.f32.mrf.mxu1  ;;  %v3477_v37 = vadd.f32 %v3476_v27, %v3344_v40 }
 0x59d   : > { %v3741_v47 = vadd.f32 %v3740_v31, %v3608_v6  ;;  %3646 = vmatmul.bf16.gmra.mxu0 %v8570_v18 }
 0x59e   : > { %5167 = vmatmul.msk.bf16.gmra.mxu1 %vm1846_vm0, %v8571_v41 }
 0x59f   : > { %v3849_v36 = vmax.f32 %v3741_v47, 0.0  ;;  %v8574_v47 = vld [vmem:[#allocation26_spill] sm:$0xff] }
 0x5a0   : > { %v3346_v11 = vpop.f32.mrf.mxu2 }
 0x5a1   : > { %v3914_v39 = vpack.c.bf16 %v3849_v36, %v3848_v19  ;;  %v3347_v14 = vadd.f32 %v3346_v11, %v7593_v17  ;;  %v8575_v19 = vld [vmem:[#allocation24_spill] sm:$0xff] }
 0x5a2   : > { %v3479_v8 = vpop.f32.mrf.mxu3  ;;  %v3609_v56 = vpop.f32.mrf.mxu0  ;;  %v3858_v36 = vmax.f32 %v8575_v19, 0.0 }
 0x5a3   : > { %3963 = vst [vmem:[%s7728_s11 + $0x100] sm:$0xff] %v3914_v39  ;;  %v3610_v46 = vadd.f32 %v3609_v56, %v3477_v37  ;;  %v3742_v55 = vpop.f32.mrf.mxu1  ;;  %v3480_v0 = vadd.f32 %v3479_v8, %v3347_v14 }
 0x5a5   : > { %v3743_v54 = vadd.f32 %v3742_v55, %v3610_v46  ;;  %v8576_v55 = vld [vmem:[#allocation131_spill] sm:$0xff] }
 0x5a7   : > { %v3851_v33 = vmax.f32 %v3743_v54, 0.0 }
 0x5a8   : > { %v3348_v21 = vpop.f32.mrf.mxu2 }
 0x5a9   : > { %v3915_v2 = vpack.c.bf16 %v3851_v33, %v3850_v61  ;;  %v3349_v13 = vadd.f32 %v3348_v21, %v7604_v30  ;;  %v3860_v61 = vmax.f32 %v8577_v38, 0.0 }
 0x5aa   : > { %v3481_v26 = vpop.f32.mrf.mxu3  ;;  %v3612_v28 = vpop.f32.mrf.mxu0 }
 0x5ab   : > { %3964 = vst [vmem:[%s7728_s11 + $0x108] sm:$0xff] %v3915_v2  ;;  %v3613_v5 = vadd.f32 %v3612_v28, %v3480_v0  ;;  %v3745_v42 = vpop.f32.mrf.mxu1  ;;  %v3482_v32 = vadd.f32 %v3481_v26, %v3349_v13  ;;  %v8578_v13 = vld [vmem:[#allocation32_spill] sm:$0xff] }
 0x5ad   : > { %v3746_v23 = vadd.f32 %v3745_v42, %v3613_v5 }
 0x5af   : > { %v3853_v34 = vmax.f32 %v3746_v23, 0.0 }
 0x5b0   : > { %v3351_v17 = vpop.f32.mrf.mxu2 }
 0x5b1   : > { %v3916_v20 = vpack.c.bf16 %v3853_v34, %v3852_v50  ;;  %v3352_v49 = vadd.f32 %v3351_v17, %v7610_v25  ;;  %v8579_v34 = vld [vmem:[#allocation139_spill] sm:$0xff] }
 0x5b2   : > { %v3484_v12 = vpop.f32.mrf.mxu3  ;;  %v3614_v45 = vpop.f32.mrf.mxu0  ;;  %v3862_v17 = vmax.f32 %v8579_v34, 0.0  ;;  %v8586_v34 = vld [vmem:[#allocation151_spill] sm:$0xff] }
 0x5b3   : > { %3965 = vst [vmem:[%s7728_s11 + $0x110] sm:$0xff] %v3916_v20  ;;  %v3615_v59 = vadd.f32 %v3614_v45, %v3482_v32  ;;  %v3747_v63 = vpop.f32.mrf.mxu1  ;;  %v3485_v9 = vadd.f32 %v3484_v12, %v3352_v49 }
 0x5b5   : > { %v3748_v58 = vadd.f32 %v3747_v63, %v3615_v59 }
 0x5b7   : > { %v3855_v3 = vmax.f32 %v3748_v58, 0.0 }
 0x5b8   : > { %v3353_v30 = vpop.f32.mrf.mxu2 }
 0x5b9   : > { %v3917_v24 = vpack.c.bf16 %v3855_v3, %v3854_v51  ;;  %v3354_v22 = vadd.f32 %v3353_v30, %v7621_v35  ;;  %v8580_v3 = vld [vmem:[#allocation28_spill] sm:$0xff] }
 0x5ba   : > { %v3486_v43 = vpop.f32.mrf.mxu3  ;;  %v3617_v52 = vpop.f32.mrf.mxu0  ;;  %v3864_v30 = vmax.f32 %v8580_v3, 0.0 }
 0x5bb   : > { %3966 = vst [vmem:[%s7728_s11 + $0x118] sm:$0xff] %v3917_v24  ;;  %v3618_v53 = vadd.f32 %v3617_v52, %v3485_v9  ;;  %v3750_v16 = vpop.f32.mrf.mxu1  ;;  %v3487_v4 = vadd.f32 %v3486_v43, %v3354_v22 }
 0x5bd   : > { %v3751_v7 = vadd.f32 %v3750_v16, %v3618_v53 }
 0x5bf   : > { %v3857_v1 = vmax.f32 %v3751_v7, 0.0 }
 0x5c0   : > { %v3356_v25 = vpop.f32.mrf.mxu2 }
 0x5c1   : > { %v3918_v27 = vpack.c.bf16 %v3857_v1, %v3856_v44  ;;  %v3357_v18 = vadd.f32 %v3356_v25, %v8574_v47  ;;  %v8581_v44 = vld [vmem:[#allocation36_spill] sm:$0xff] }
 0x5c2   : > { %v3489_v60 = vpop.f32.mrf.mxu3  ;;  %v3619_v6 = vpop.f32.mrf.mxu0 }
 0x5c3   : > { %3967 = vst [vmem:[%s7728_s11 + $0x120] sm:$0xff] %v3918_v27  ;;  %v3620_v31 = vadd.f32 %v3619_v6, %v3487_v4  ;;  %v3752_v40 = vpop.f32.mrf.mxu1  ;;  %v3490_v37 = vadd.f32 %v3489_v60, %v3357_v18  ;;  %v8582_v4 = vld [vmem:[#allocation30_spill] sm:$0xff] }
 0x5c4   : > { %v3866_v27 = vmax.f32 %v8582_v4, 0.0 }
 0x5c5   : > { %v3753_v41 = vadd.f32 %v3752_v40, %v3620_v31 }
 0x5c7   : > { %v3859_v11 = vmax.f32 %v3753_v41, 0.0 }
 0x5c8   : > { %v3358_v35 = vpop.f32.mrf.mxu2 }
 0x5c9   : > { %v3919_v48 = vpack.c.bf16 %v3859_v11, %v3858_v36  ;;  %v3359_v14 = vadd.f32 %v3358_v35, %v8576_v55  ;;  %v8583_v11 = vld [vmem:[#allocation135_spill] sm:$0xff] }
 0x5ca   : > { %v3491_v39 = vpop.f32.mrf.mxu3  ;;  %v3622_v8 = vpop.f32.mrf.mxu0  ;;  %v3868_v35 = vmax.f32 %v8583_v11, 0.0  ;;  %v8591_v11 = vld [vmem:[#allocation143_spill] sm:$0xff] }
 0x5cb   : > { %3968 = vst [vmem:[%s7728_s11 + $0x128] sm:$0xff] %v3919_v48  ;;  %v3623_v56 = vadd.f32 %v3622_v8, %v3490_v37  ;;  %v3755_v46 = vpop.f32.mrf.mxu1  ;;  %v3492_v0 = vadd.f32 %v3491_v39, %v3359_v14 }
 0x5cd   : > { %v3756_v54 = vadd.f32 %v3755_v46, %v3623_v56 }
 0x5cf   : > { %v3861_v33 = vmax.f32 %v3756_v54, 0.0  ;;  %v8584_v54 = vld [vmem:[#allocation38_spill] sm:$0xff] }
 0x5d0   : > { %v3361_v21 = vpop.f32.mrf.mxu2 }
 0x5d1   : > { %v3920_v2 = vpack.c.bf16 %v3861_v33, %v3860_v61  ;;  %v3362_v23 = vadd.f32 %v3361_v21, %v8578_v13  ;;  %v8585_v33 = vld [vmem:[#allocation34_spill] sm:$0xff] }
 0x5d2   : > { %v3494_v26 = vpop.f32.mrf.mxu3  ;;  %v3624_v28 = vpop.f32.mrf.mxu0  ;;  %v3870_v21 = vmax.f32 %v8585_v33, 0.0 }
 0x5d3   : > { %3969 = vst [vmem:[%s7728_s11 + $0x130] sm:$0xff] %v3920_v2  ;;  %v3625_v5 = vadd.f32 %v3624_v28, %v3492_v0  ;;  %v3757_v42 = vpop.f32.mrf.mxu1  ;;  %v3495_v12 = vadd.f32 %v3494_v26, %v3362_v23 }
 0x5d5   : > { %v3758_v50 = vadd.f32 %v3757_v42, %v3625_v5 }
 0x5d7   : > { %v3863_v32 = vmax.f32 %v3758_v50, 0.0 }
 0x5d8   : > { %v3363_v20 = vpop.f32.mrf.mxu2 }
 0x5d9   : > { %v3921_v45 = vpack.c.bf16 %v3863_v32, %v3862_v17  ;;  %v3364_v57 = vadd.f32 %v3363_v20, %v7655_v29  ;;  %v3872_v17 = vmax.f32 %v8586_v34, 0.0 }
 0x5da   : > { %v3496_v59 = vpop.f32.mrf.mxu3  ;;  %v3627_v63 = vpop.f32.mrf.mxu0 }
 0x5db   : > { %3970 = vst [vmem:[%s7728_s11 + $0x138] sm:$0xff] %v3921_v45  ;;  %v3628_v49 = vadd.f32 %v3627_v63, %v3495_v12  ;;  %v3760_v58 = vpop.f32.mrf.mxu1  ;;  %v3497_v43 = vadd.f32 %v3496_v59, %v3364_v57  ;;  %v8587_v57 = vld [vmem:[#allocation42_spill] sm:$0xff] }
 0x5dd   : > { %v3761_v51 = vadd.f32 %v3760_v58, %v3628_v49 }
 0x5df   : > { %v3865_v9 = vmax.f32 %v3761_v51, 0.0 }
 0x5e0   : > { %v3366_v24 = vpop.f32.mrf.mxu2 }
 0x5e1   : > { %v3922_v52 = vpack.c.bf16 %v3865_v9, %v3864_v30  ;;  %v3367_v1 = vadd.f32 %v3366_v24, %v8581_v44  ;;  %v8588_v30 = vld [vmem:[#allocation152_spill] sm:$0xff] }
 0x5e2   : > { %v3499_v53 = vpop.f32.mrf.mxu3  ;;  %v3629_v16 = vpop.f32.mrf.mxu0  ;;  %v3874_v9 = vmax.f32 %v8588_v30, 0.0 }
 0x5e3   : > { %3971 = vst [vmem:[%s7728_s11 + $0x140] sm:$0xff] %v3922_v52  ;;  %v3630_v22 = vadd.f32 %v3629_v16, %v3497_v43  ;;  %v3762_v7 = vpop.f32.mrf.mxu1  ;;  %v3500_v6 = vadd.f32 %v3499_v53, %v3367_v1 }
 0x5e5   : > { %v3763_v25 = vadd.f32 %v3762_v7, %v3630_v22 }
 0x5e7   : > { %v3867_v60 = vmax.f32 %v3763_v25, 0.0  ;;  %v8589_v25 = vld [vmem:[#allocation40_spill] sm:$0xff] }
 0x5e8   : > { %v3368_v29 = vpop.f32.mrf.mxu2  ;;  %v3876_v4 = vmax.f32 %v8589_v25, 0.0 }
 0x5e9   : > { %v3923_v31 = vpack.c.bf16 %v3867_v60, %v3866_v27  ;;  %v3369_v19 = vadd.f32 %v3368_v29, %v7672_v62 }
 0x5ea   : > { %v3501_v40 = vpop.f32.mrf.mxu3  ;;  %v3632_v47 = vpop.f32.mrf.mxu0 }
 0x5eb   : > { %3972 = vst [vmem:[%s7728_s11 + $0x148] sm:$0xff] %v3923_v31  ;;  %v3633_v18 = vadd.f32 %v3632_v47, %v3500_v6  ;;  %v3765_v41 = vpop.f32.mrf.mxu1  ;;  %v3502_v39 = vadd.f32 %v3501_v40, %v3369_v19 }
 0x5ed   : > { %v3766_v36 = vadd.f32 %v3765_v41, %v3633_v18  ;;  %v8590_v41 = vld [vmem:[#allocation147_spill] sm:$0xff] }
 0x5ef   : > { %v3869_v37 = vmax.f32 %v3766_v36, 0.0 }
 0x5f0   : > { %v3371_v48 = vpop.f32.mrf.mxu2 }
 0x5f1   : > { %v3924_v8 = vpack.c.bf16 %v3869_v37, %v3868_v35  ;;  %v3372_v38 = vadd.f32 %v3371_v48, %v8584_v54  ;;  %v3878_v35 = vmax.f32 %v8591_v11, 0.0  ;;  %v8592_v54 = vld [vmem:[#allocation44_spill] sm:$0xff] }
 0x5f2   : > { %v3504_v56 = vpop.f32.mrf.mxu3  ;;  %v3634_v46 = vpop.f32.mrf.mxu0 }
 0x5f3   : > { %3973 = vst [vmem:[%s7728_s11 + $0x150] sm:$0xff] %v3924_v8  ;;  %v3635_v55 = vadd.f32 %v3634_v46, %v3502_v39  ;;  %v3767_v14 = vpop.f32.mrf.mxu1  ;;  %v3505_v2 = vadd.f32 %v3504_v56, %v3372_v38  ;;  %v3880_v38 = vmax.f32 %v8592_v54, 0.0 }
 0x5f5   : > { %v3768_v61 = vadd.f32 %v3767_v14, %v3635_v55 }
 0x5f7   : > { %v3871_v0 = vmax.f32 %v3768_v61, 0.0 }
 0x5f8   : > { %v3373_v62 = vpop.f32.mrf.mxu2 }
 0x5f9   : > { %v3925_v26 = vpack.c.bf16 %v3871_v0, %v3870_v21  ;;  %v3374_v23 = vadd.f32 %v3373_v62, %v7689_v10 }
 0x5fa   : > { %v3506_v28 = vpop.f32.mrf.mxu3  ;;  %v3637_v5 = vpop.f32.mrf.mxu0 }
 0x5fb   : > { %3974 = vst [vmem:[%s7728_s11 + $0x158] sm:$0xff] %v3925_v26  ;;  %v3638_v42 = vadd.f32 %v3637_v5, %v3505_v2  ;;  %v3770_v13 = vpop.f32.mrf.mxu1  ;;  %v3507_v12 = vadd.f32 %v3506_v28, %v3374_v23 }
 0x5fd   : > { %v3771_v50 = vadd.f32 %v3770_v13, %v3638_v42 }
 0x5ff   : > { %v3873_v32 = vmax.f32 %v3771_v50, 0.0 }
 0x600   : > { %v3376_v20 = vpop.f32.mrf.mxu2 }
 0x601   : > { %v3926_v45 = vpack.c.bf16 %v3873_v32, %v3872_v17  ;;  %v3377_v51 = vadd.f32 %v3376_v20, %v8587_v57 }
 0x602   : > { %v3509_v59 = vpop.f32.mrf.mxu3  ;;  %v3639_v63 = vpop.f32.mrf.mxu0 }
 0x603   : > { %3975 = vst [vmem:[%s7728_s11 + $0x160] sm:$0xff] %v3926_v45  ;;  %v3640_v49 = vadd.f32 %v3639_v63, %v3507_v12  ;;  %v3772_v58 = vpop.f32.mrf.mxu1  ;;  %v3510_v43 = vadd.f32 %v3509_v59, %v3377_v51 }
 0x605   : > { %v3773_v3 = vadd.f32 %v3772_v58, %v3640_v49 }
 0x607   : > { %v3875_v24 = vmax.f32 %v3773_v3, 0.0 }
 0x608   : > { %v3378_v10 = vpop.f32.mrf.mxu2 }
 0x609   : > { %v3927_v52 = vpack.c.bf16 %v3875_v24, %v3874_v9  ;;  %v3379_v44 = vadd.f32 %v3378_v10, %v7706_v15 }
 0x60a   : > { %v3511_v53 = vpop.f32.mrf.mxu3  ;;  %v3642_v16 = vpop.f32.mrf.mxu0 }
 0x60b   : > { %3976 = vst [vmem:[%s7728_s11 + $0x168] sm:$0xff] %v3927_v52  ;;  %v3643_v22 = vadd.f32 %v3642_v16, %v3510_v43  ;;  %v3775_v7 = vpop.f32.mrf.mxu1  ;;  %v3512_v29 = vadd.f32 %v3511_v53, %v3379_v44 }
 0x60d   : > { %v3776_v1 = vadd.f32 %v3775_v7, %v3643_v22 }
 0x60f   : > { %v3877_v27 = vmax.f32 %v3776_v1, 0.0 }
 0x610   : > { %v3381_v60 = vpop.f32.mrf.mxu2 }
 0x611   : > { %v3928_v6 = vpack.c.bf16 %v3877_v27, %v3876_v4  ;;  %v3382_v19 = vadd.f32 %v3381_v60, %v8590_v41 }
 0x612   : > { %v3514_v31 = vpop.f32.mrf.mxu3  ;;  %v3644_v40 = vpop.f32.mrf.mxu0 }
 0x613   : > { %3977 = vst [vmem:[%s7728_s11 + $0x170] sm:$0xff] %v3928_v6  ;;  %v3645_v47 = vadd.f32 %v3644_v40, %v3512_v29  ;;  %v3777_v18 = vpop.f32.mrf.mxu1  ;;  %v3515_v48 = vadd.f32 %v3514_v31, %v3382_v19 }
 0x615   : > { %v3778_v36 = vadd.f32 %v3777_v18, %v3645_v47 }
 0x617   : > { %v3879_v15 = vmax.f32 %v3778_v36, 0.0 }
 0x618   : > { %v3383_v37 = vpop.f32.mrf.mxu2 }
 0x619   : > { %v3929_v39 = vpack.c.bf16 %v3879_v15, %v3878_v35 }
 0x61a   : > { %v3516_v8 = vpop.f32.mrf.mxu3  ;;  %v3647_v56 = vpop.f32.mrf.mxu0 }
 0x61b   : > { %3978 = vst [vmem:[%s7728_s11 + $0x178] sm:$0xff] %v3929_v39  ;;  %v3648_v46 = vadd.f32 %v3647_v56, %v3515_v48  ;;  %v3780_v55 = vpop.f32.mrf.mxu1 }
 0x61d   : > { %v3781_v14 = vadd.f32 %v3780_v55, %v3648_v46 }
 0x61f   : > { %v3881_v61 = vmax.f32 %v3781_v14, 0.0 }
 0x621   : > { %v3930_v33 = vpack.c.bf16 %v3881_v61, %v3880_v38 }
 0x622   : > { %v3649_v21 = vpop.f32.mrf.mxu0 }
 0x623   : > { %3979 = vst [vmem:[%s7728_s11 + $0x180] sm:$0xff] %v3930_v33  ;;  %v3782_v0 = vpop.f32.mrf.mxu1 }
 0x624 PF: > { %s13_s12 = sadd.s32 1, %s5471_s12  }
 0x625   : > { %p10_p4 = scmp.ge.s32.totalorder %s13_s12, 6  }
 0x627   :  { %12 = sbr.rel (!%p10_p4) target bundleno = 1 (0x1), region = 62 }

// kernel: tile.18
= control target key start
LH: loop header
LB: loop body
LE: loop exit
PB: predicated region body
PF: predicated region fallthrough
CT: control target
= control target key end

     0   :  { %s28_s0 = inlined_call_operand.vmem [shape: f32[16], index: 0, kind: input, shape index: {}]   ;;  %s29_s1 = inlined_call_operand.vmem [shape: f32[10,16], index: 1, kind: output, shape index: {}]  }
   0x1   :  { %v4_v0 = vld [vmem:[%s28_s0] ss:$0 sm:$0xff] }
   0x2   :  { %5 = vst [vmem:[%s29_s1] sm:$0xff] %v4_v0 }
   0x3   :  { %8 = vst [vmem:[%s29_s1 + $0x8] sm:$0xff] %v4_v0 }

// kernel: tile.19
= control target key start
LH: loop header
LB: loop body
LE: loop exit
PB: predicated region body
PF: predicated region fallthrough
CT: control target
= control target key end

     0   :  { %s69_s10 = smov 112   ;;  %s70_s11 = smov 80   ;;  %vm4_vm0 = vcmask 130048   ;;  %vm10_vm1 = vcmask 1048448   ;;  %vm16_vm2 = vcmask 917248   ;;  %vm22_vm3 = vcmask 786048   ;;  %s113_s0 = inlined_call_operand.vmem [shape: f32[10,16], index: 0, kind: input, shape index: {}]   ;;  %s114_s1 = inlined_call_operand.vmem [shape: f32[160], index: 1, kind: output, shape index: {}]  }
   0x1   :  { %v55_v0 = vld [vmem:[%s113_s0 + $0x7] sm:$0x1]   ;;  %v57_v1 = vld [vmem:[%s113_s0 + $0x5] sm:$0x1]   ;;  %v59_v2 = vld [vmem:[%s113_s0 + $0x3] sm:$0x1]  }
   0x2   :  { %8 = vrot.lane.b32.xlu0 %v55_v0, %s69_s10  ;;  %20 = vrot.lane.b32.xlu1 %v57_v1, %s70_s11  ;;  %s71_s14 = smov 48   ;;  %v56_v3 = vld [vmem:[%s113_s0 + $0x6] sm:$0x1]   ;;  %v58_v4 = vld [vmem:[%s113_s0 + $0x4] sm:$0x1]   ;;  %s72_s19 = smov 96  }
   0x3   :  { %32 = vrot.lane.b32.xlu2 %v59_v2, %s71_s14  ;;  %s73_s20 = smov 64   ;;  %v60_v5 = vld [vmem:[%s113_s0 + $0x2] sm:$0x1]   ;;  %s43_s23 = smov 3  ;;  %vm28_vm4 = vcmask 654848   ;;  %vm34_vm5 = vcmask 523648  }
   0x4   :  { %s74_s24 = smov 32   ;;  %v61_v6 = vld [vmem:[%s113_s0 + $0x1] ss:$8 sm:%s43_s23]   ;;  %s75_s27 = smov 16   ;;  %vm40_vm6 = vcmask 392448   ;;  %vm47_vm7 = vcmask 261248  }
   0x5   :  { %s2_s28 = smov 3 }
   0x6   :  { %v3_v7 = vld [vmem:[%s113_s0] ss:$8 sm:%s2_s28]  }
   0x7   :  { %5 = vst.msk [vmem:[#allocation0] sm:$0x3] %vm4_vm0, %v3_v7  }
   0xa   :  { %14 = vrot.lane.b32.xlu0 %v56_v3, %s72_s19  ;;  %26 = vrot.lane.b32.xlu1 %v58_v4, %s73_s20 }
   0xb   :  { %38 = vrot.lane.b32.xlu2 %v60_v5, %s74_s24 }
  0x12   :  { %45 = vrot.lane.b32.xlu0 %v61_v6, %s75_s27 }
  0x5d   :  { %v33_v8 = vpop.permute.xlu2 %32  }
  0x65   :  { %v39_v9 = vpop.permute.xlu2 %38  }
  0x74   :  { %v9_v10 = vpop.permute.xlu0 %8   ;;  %v21_v11 = vpop.permute.xlu1 %20  }
  0x75   :  { %11 = vst.msk [vmem:[#allocation0] sm:$0x1] %vm10_vm1, %v9_v10  }
  0x7c   :  { %v15_v12 = vpop.permute.xlu0 %14   ;;  %v27_v13 = vpop.permute.xlu1 %26  }
  0x7d   :  { %17 = vst.msk [vmem:[#allocation0] sm:$0x1] %vm16_vm2, %v15_v12  }
  0x7e   :  { %23 = vst.msk [vmem:[#allocation0] sm:$0x1] %vm22_vm3, %v21_v11  }
  0x7f   :  { %29 = vst.msk [vmem:[#allocation0] sm:$0x1] %vm28_vm4, %v27_v13  }
  0x80   :  { %35 = vst.msk [vmem:[#allocation0] sm:$0x1] %vm34_vm5, %v33_v8  }
  0x81   :  { %41 = vst.msk [vmem:[#allocation0] sm:$0x1] %vm40_vm6, %v39_v9  }
  0x84   :  { %v46_v14 = vpop.permute.xlu0 %45  }
  0x85   :  { %48 = vst.msk [vmem:[#allocation0] sm:$0x3] %vm47_vm7, %v46_v14  }
  0x8c   :  { %v51_v15 = vld [vmem:[#allocation0] sm:$0x3] }
  0x8d   :  { %54 = vst [vmem:[%s114_s1] sm:$0x3] %v51_v15 }

// kernel: net3d4_forward.3
= control target key start
LH: loop header
LB: loop body
LE: loop exit
PB: predicated region body
PF: predicated region fallthrough
CT: control target
= control target key end

     0   :  { %vm2943_vm0 = vcmask 1043456   ;;  %vm2903_vm1 = vcmask 457728   ;;  %s12481_s1 = inlined_call_operand.vmem [shape: bf16[2104,256], index: 1, kind: input, shape index: {}]   ;;  %s12482_s0 = inlined_call_operand.vmem [shape: bf16[200,2104], index: 0, kind: input, shape index: {}]   ;;  %s12483_s2 = inlined_call_operand.vmem [shape: f32[1,256], index: 2, kind: input, shape index: {}]   ;;  %s12484_s3 = inlined_call_operand.vmem [shape: f32[200,256], index: 3, kind: output, shape index: {}]  }
   0x1   :  { %v6410_v0 = vld [vmem:[%s12481_s1 + $0x70] sm:$0xf]  ;;  %v7645_v1 = vld [vmem:[%s12481_s1 + $0x74] sm:$0xf0]  ;;  %v6402_v5 = vld [vmem:[%s12481_s1 + $0x60] sm:$0xf] }
   0x2   :  { %v6474_v2 = vld [vmem:[%s12481_s1 + $0xf0] sm:$0xf]  ;;  %v6411_v3 = vor.u32 %v7645_v1, %v6410_v0  ;;  %v7661_v4 = vld [vmem:[%s12481_s1 + $0xf4] sm:$0xf0]  ;;  %v7643_v6 = vld [vmem:[%s12481_s1 + $0x64] sm:$0xf0] }
   0x3   :  { %v6475_v7 = vor.u32 %v7661_v4, %v6474_v2  ;;  %v6466_v8 = vld [vmem:[%s12481_s1 + $0xe0] sm:$0xf]  ;;  %v7659_v9 = vld [vmem:[%s12481_s1 + $0xe4] sm:$0xf0]  ;;  %v6403_v10 = vor.u32 %v7643_v6, %v6402_v5  ;;  %v6394_v12 = vld [vmem:[%s12481_s1 + $0x50] sm:$0xf] }
   0x4   :  { %2950 = vmatpush.bf16.msra.mxu0 %v6411_v3  ;;  %7892 = vmatpush.bf16.msra.mxu2 %v6411_v3  ;;  %v6467_v11 = vor.u32 %v7659_v9, %v6466_v8  ;;  %v7641_v13 = vld [vmem:[%s12481_s1 + $0x54] sm:$0xf0]  ;;  %v6458_v14 = vld [vmem:[%s12481_s1 + $0xd0] sm:$0xf]  ;;  %v6386_v18 = vld [vmem:[%s12481_s1 + $0x40] sm:$0xf] }
   0x5   :  { %3023 = vmatpush.bf16.msra.mxu1 %v6475_v7  ;;  %7900 = vmatpush.bf16.msra.mxu3 %v6475_v7  ;;  %v7657_v15 = vld [vmem:[%s12481_s1 + $0xd4] sm:$0xf0]  ;;  %v6395_v16 = vor.u32 %v7641_v13, %v6394_v12  ;;  %v7639_v19 = vld [vmem:[%s12481_s1 + $0x44] sm:$0xf0]  ;;  %v6450_v20 = vld [vmem:[%s12481_s1 + $0xc0] sm:$0xf] }
   0x6   :  { %v6459_v17 = vor.u32 %v7657_v15, %v6458_v14  ;;  %v7655_v21 = vld [vmem:[%s12481_s1 + $0xc4] sm:$0xf0]  ;;  %v6387_v22 = vor.u32 %v7639_v19, %v6386_v18  ;;  %v6378_v24 = vld [vmem:[%s12481_s1 + $0x30] sm:$0xf]  ;;  %v7637_v25 = vld [vmem:[%s12481_s1 + $0x34] sm:$0xf0] }
   0x7   :  { %v6451_v23 = vor.u32 %v7655_v21, %v6450_v20  ;;  %v6442_v26 = vld [vmem:[%s12481_s1 + $0xb0] sm:$0xf]  ;;  %v7653_v27 = vld [vmem:[%s12481_s1 + $0xb4] sm:$0xf0]  ;;  %v6379_v28 = vor.u32 %v7637_v25, %v6378_v24  ;;  %v6370_v30 = vld [vmem:[%s12481_s1 + $0x20] sm:$0xf] }
   0x8   :  { %2951 = vmatpush.bf16.msra.mxu0 %v6403_v10  ;;  %7893 = vmatpush.bf16.msra.mxu2 %v6403_v10  ;;  %v6443_v29 = vor.u32 %v7653_v27, %v6442_v26  ;;  %v7635_v31 = vld [vmem:[%s12481_s1 + $0x24] sm:$0xf0]  ;;  %v6434_v32 = vld [vmem:[%s12481_s1 + $0xa0] sm:$0xf]  ;;  %v6362_v36 = vld [vmem:[%s12481_s1 + $0x10] sm:$0xf] }
   0x9   :  { %3024 = vmatpush.bf16.msra.mxu1 %v6467_v11  ;;  %7901 = vmatpush.bf16.msra.mxu3 %v6467_v11  ;;  %v7651_v33 = vld [vmem:[%s12481_s1 + $0xa4] sm:$0xf0]  ;;  %v6371_v34 = vor.u32 %v7635_v31, %v6370_v30  ;;  %v7633_v37 = vld [vmem:[%s12481_s1 + $0x14] sm:$0xf0]  ;;  %v6426_v38 = vld [vmem:[%s12481_s1 + $0x90] sm:$0xf] }
   0xa   :  { %v6435_v35 = vor.u32 %v7651_v33, %v6434_v32  ;;  %v7649_v39 = vld [vmem:[%s12481_s1 + $0x94] sm:$0xf0]  ;;  %v6363_v40 = vor.u32 %v7633_v37, %v6362_v36  ;;  %v6354_v41 = vld [vmem:[%s12481_s1] sm:$0xf]  ;;  %v7631_v43 = vld [vmem:[%s12481_s1 + $0x4] sm:$0xf0] }
   0xb   :  { %v6427_v42 = vor.u32 %v7649_v39, %v6426_v38  ;;  %v6418_v44 = vld [vmem:[%s12481_s1 + $0x80] sm:$0xf]  ;;  %v7647_v45 = vld [vmem:[%s12481_s1 + $0x84] sm:$0xf0]  ;;  %v7434_v47 = vld [vmem:[%s12482_s0 + $0x40] sm:$0xf0]  ;;  %v6355_v54 = vor.u32 %v7631_v43, %v6354_v41 }
   0xc   :  { %2952 = vmatpush.bf16.msra.mxu0 %v6395_v16  ;;  %7894 = vmatpush.bf16.msra.mxu2 %v6395_v16  ;;  %v5538_v46 = vld [vmem:[%s12482_s0] sm:$0xf]  ;;  %v6014_v48 = vld [vmem:[%s12482_s0 + $0x3b8] sm:$0xf]  ;;  %v7553_v49 = vld [vmem:[%s12482_s0 + $0x3f8] sm:$0xf0]  ;;  %v6419_v58 = vor.u32 %v7647_v45, %v6418_v44 }
   0xd   :  { %3025 = vmatpush.bf16.msra.mxu1 %v6459_v17  ;;  %7902 = vmatpush.bf16.msra.mxu3 %v6459_v17  ;;  %v6666_v50 = vld [vmem:[%s12481_s1 + $0x270] sm:$0xf]  ;;  %v7709_v51 = vld [vmem:[%s12481_s1 + $0x274] sm:$0xf0]  ;;  %v7426_v55 = vld [vmem:[%s12482_s0 + $0x4] sm:$0xf]  ;;  %v8077_v3 = vor.u32 %v7434_v47, %v5538_v46  ;;  %v8079_v4 = vor.u32 %v7553_v49, %v6014_v48 }
   0xe   :  { %v6730_v52 = vld [vmem:[%s12481_s1 + $0x2f0] sm:$0xf]  ;;  %v7725_v53 = vld [vmem:[%s12481_s1 + $0x2f4] sm:$0xf0]  ;;  %v5540_v56 = vld [vmem:[%s12482_s0 + $0x44] sm:$0xf0]  ;;  %v6667_v62 = vor.u32 %v7709_v51, %v6666_v50 }
   0xf   :  { %v7545_v57 = vld [vmem:[%s12482_s0 + $0x3bc] sm:$0xf]  ;;  %v6016_v59 = vld [vmem:[%s12482_s0 + $0x3fc] sm:$0xf0]  ;;  %v6538_v60 = vld [vmem:[%s12481_s1 + $0x170] sm:$0xf]  ;;  %v6731_v63 = vor.u32 %v7725_v53, %v6730_v52  ;;  %v8090_v8 = vor.u32 %v7426_v55, %v5540_v56 }
  0x10   :  { %2953 = vmatpush.bf16.msra.mxu0 %v6387_v22  ;;  %7895 = vmatpush.bf16.msra.mxu2 %v6387_v22  ;;  %v7677_v61 = vld [vmem:[%s12481_s1 + $0x174] sm:$0xf0]  ;;  %v6602_v0 = vld [vmem:[%s12481_s1 + $0x1f0] sm:$0xf]  ;;  %v6658_v2 = vld [vmem:[%s12481_s1 + $0x260] sm:$0xf]  ;;  %v8092_v9 = vor.u32 %v7545_v57, %v6016_v59 }
  0x11   :  { %3026 = vmatpush.bf16.msra.mxu1 %v6451_v23  ;;  %7903 = vmatpush.bf16.msra.mxu3 %v6451_v23  ;;  %v7693_v1 = vld [vmem:[%s12481_s1 + $0x1f4] sm:$0xf0]  ;;  %v7707_v5 = vld [vmem:[%s12481_s1 + $0x264] sm:$0xf0]  ;;  %v6722_v6 = vld [vmem:[%s12481_s1 + $0x2e0] sm:$0xf]  ;;  %v6539_v10 = vor.u32 %v7677_v61, %v6538_v60 }
  0x12   :  { %v7723_v7 = vld [vmem:[%s12481_s1 + $0x2e4] sm:$0xf0]  ;;  %12672 = vst [vmem:[#allocation2_spill] sm:$0xff] %v8092_v9  ;;  %v6603_v11 = vor.u32 %v7693_v1, %v6602_v0  ;;  %v6530_v12 = vld [vmem:[%s12481_s1 + $0x160] sm:$0xf]  ;;  %v6659_v14 = vor.u32 %v7707_v5, %v6658_v2 }
  0x13   :  { %v7675_v13 = vld [vmem:[%s12481_s1 + $0x164] sm:$0xf0]  ;;  %v6723_v15 = vor.u32 %v7723_v7, %v6722_v6  ;;  %v6594_v16 = vld [vmem:[%s12481_s1 + $0x1e0] sm:$0xf]  ;;  %v6650_v18 = vld [vmem:[%s12481_s1 + $0x250] sm:$0xf] }
  0x14   :  { %2954 = vmatpush.bf16.msra.mxu0 %v6379_v28  ;;  %7896 = vmatpush.bf16.msra.mxu2 %v6379_v28  ;;  %v7691_v17 = vld [vmem:[%s12481_s1 + $0x1e4] sm:$0xf0]  ;;  %v7705_v19 = vld [vmem:[%s12481_s1 + $0x254] sm:$0xf0]  ;;  %v6714_v20 = vld [vmem:[%s12481_s1 + $0x2d0] sm:$0xf]  ;;  %v6531_v22 = vor.u32 %v7675_v13, %v6530_v12 }
  0x15   :  { %3027 = vmatpush.bf16.msra.mxu1 %v6443_v29  ;;  %7904 = vmatpush.bf16.msra.mxu3 %v6443_v29  ;;  %v7721_v21 = vld [vmem:[%s12481_s1 + $0x2d4] sm:$0xf0]  ;;  %v6595_v23 = vor.u32 %v7691_v17, %v6594_v16  ;;  %v6522_v24 = vld [vmem:[%s12481_s1 + $0x150] sm:$0xf]  ;;  %v6651_v26 = vor.u32 %v7705_v19, %v6650_v18  ;;  %v6642_v30 = vld [vmem:[%s12481_s1 + $0x240] sm:$0xf] }
  0x16   :  { %v7673_v25 = vld [vmem:[%s12481_s1 + $0x154] sm:$0xf0]  ;;  %v6715_v27 = vor.u32 %v7721_v21, %v6714_v20  ;;  %v6586_v28 = vld [vmem:[%s12481_s1 + $0x1d0] sm:$0xf]  ;;  %v7703_v31 = vld [vmem:[%s12481_s1 + $0x244] sm:$0xf0] }
  0x17   :  { %v7689_v29 = vld [vmem:[%s12481_s1 + $0x1d4] sm:$0xf0]  ;;  %v6706_v32 = vld [vmem:[%s12481_s1 + $0x2c0] sm:$0xf]  ;;  %v7719_v33 = vld [vmem:[%s12481_s1 + $0x2c4] sm:$0xf0]  ;;  %v6643_v37 = vor.u32 %v7703_v31, %v6642_v30 }
  0x18   :  { %2955 = vmatpush.bf16.msra.mxu0 %v6371_v34  ;;  %7897 = vmatpush.bf16.msra.mxu2 %v6371_v34  ;;  %v6523_v34 = vor.u32 %v7673_v25, %v6522_v24  ;;  %v6514_v36 = vld [vmem:[%s12481_s1 + $0x140] sm:$0xf]  ;;  %v6707_v38 = vor.u32 %v7719_v33, %v6706_v32  ;;  %v7671_v39 = vld [vmem:[%s12481_s1 + $0x144] sm:$0xf0]  ;;  %v7451_v43 = vld [vmem:[%s12482_s0 + $0xc8] sm:$0xf0] }
  0x19   :  { %3028 = vmatpush.bf16.msra.mxu1 %v6435_v35  ;;  %7905 = vmatpush.bf16.msra.mxu3 %v6435_v35  ;;  %v6587_v35 = vor.u32 %v7689_v29, %v6586_v28  ;;  %v7687_v41 = vld [vmem:[%s12481_s1 + $0x1c4] sm:$0xf0]  ;;  %v6082_v44 = vld [vmem:[%s12482_s0 + $0x440] sm:$0xf]  ;;  %v7570_v45 = vld [vmem:[%s12482_s0 + $0x480] sm:$0xf0]  ;;  %v6515_v50 = vor.u32 %v7671_v39, %v6514_v36 }
  0x1a   :  { %v7443_v46 = vld [vmem:[%s12482_s0 + $0x8c] sm:$0xf]  ;;  %v5608_v47 = vld [vmem:[%s12482_s0 + $0xcc] sm:$0xf0]  ;;  %v7562_v48 = vld [vmem:[%s12482_s0 + $0x444] sm:$0xf]  ;;  %v8184_v53 = vor.u32 %v7570_v45, %v6082_v44 }
  0x1b   :  { %v6084_v49 = vld [vmem:[%s12482_s0 + $0x484] sm:$0xf0]  ;;  %v6506_v56 = vld [vmem:[%s12481_s1 + $0x130] sm:$0xf]  ;;  %v7669_v57 = vld [vmem:[%s12481_s1 + $0x134] sm:$0xf0] }
  0x1c   :  { %2956 = vmatpush.bf16.msra.mxu0 %v6363_v40  ;;  %7898 = vmatpush.bf16.msra.mxu2 %v6363_v40  ;;  %v6578_v40 = vld [vmem:[%s12481_s1 + $0x1c0] sm:$0xf]  ;;  %v8188_v55 = vor.u32 %v7562_v48, %v6084_v49  ;;  %v6507_v59 = vor.u32 %v7669_v57, %v6506_v56  ;;  %v7701_v60 = vld [vmem:[%s12481_s1 + $0x234] sm:$0xf0]  ;;  %v6698_v61 = vld [vmem:[%s12481_s1 + $0x2b0] sm:$0xf] }
  0x1d   :  { %3029 = vmatpush.bf16.msra.mxu1 %v6427_v42  ;;  %7906 = vmatpush.bf16.msra.mxu3 %v6427_v42  ;;  %v5606_v42 = vld [vmem:[%s12482_s0 + $0x88] sm:$0xf]  ;;  %v6579_v51 = vor.u32 %v7687_v41, %v6578_v40  ;;  %v6570_v1 = vld [vmem:[%s12481_s1 + $0x1b0] sm:$0xf]  ;;  %v7685_v2 = vld [vmem:[%s12481_s1 + $0x1b4] sm:$0xf0] }
  0x1e   :  { %v8182_v52 = vor.u32 %v7451_v43, %v5606_v42  ;;  %12674 = vst [vmem:[#allocation4_spill] sm:$0xff] %v8188_v55  ;;  %v6571_v5 = vor.u32 %v7685_v2, %v6570_v1  ;;  %v5674_v6 = vld [vmem:[%s12482_s0 + $0x110] sm:$0xf]  ;;  %v7468_v7 = vld [vmem:[%s12482_s0 + $0x150] sm:$0xf0] }
  0x1f   :  { %v7460_v12 = vld [vmem:[%s12482_s0 + $0x114] sm:$0xf]  ;;  %v5676_v13 = vld [vmem:[%s12482_s0 + $0x154] sm:$0xf0]  ;;  %v8242_v16 = vor.u32 %v7468_v7, %v5674_v6  ;;  %v6498_v20 = vld [vmem:[%s12481_s1 + $0x120] sm:$0xf] }
  0x20   :  { %2957 = vmatpush.bf16.msra.mxu0 %v6355_v54  ;;  %7899 = vmatpush.bf16.msra.mxu2 %v6355_v54  ;;  %v8186_v54 = vor.u32 %v7443_v46, %v5608_v47  ;;  %v8246_v18 = vor.u32 %v7460_v12, %v5676_v13  ;;  %v7667_v21 = vld [vmem:[%s12481_s1 + $0x124] sm:$0xf0]  ;;  %v6626_v25 = vld [vmem:[%s12481_s1 + $0x220] sm:$0xf]  ;;  %v6490_v31 = vld [vmem:[%s12481_s1 + $0x110] sm:$0xf] }
  0x21   :  { %3030 = vmatpush.bf16.msra.mxu1 %v6419_v58  ;;  %7907 = vmatpush.bf16.msra.mxu3 %v6419_v58  ;;  %v6634_v58 = vld [vmem:[%s12481_s1 + $0x230] sm:$0xf]  ;;  %v7683_v24 = vld [vmem:[%s12481_s1 + $0x1a4] sm:$0xf0]  ;;  %v6690_v29 = vld [vmem:[%s12481_s1 + $0x2a0] sm:$0xf] }
  0x22   :  { %12673 = vst [vmem:[#allocation3_spill] sm:$0xff] %v8186_v54  ;;  %v7715_v30 = vld [vmem:[%s12481_s1 + $0x2a4] sm:$0xf0]  ;;  %v7665_v33 = vld [vmem:[%s12481_s1 + $0x114] sm:$0xf0] }
  0x23   :  { %2958 = vmatmul.bf16.vlgmr.msra.gmra.mxu0 %v8077_v3  ;;  %2993 = vmatmul.bf16.vlgmr.msra.gmra.mxu2 %v8079_v4  ;;  %12675 = vst [vmem:[#allocation5_spill] sm:$0xff] %v8246_v18  ;;  %v6691_v32 = vor.u32 %v7715_v30, %v6690_v29  ;;  %v7485_v36 = vld [vmem:[%s12482_s0 + $0x1d8] sm:$0xf0]  ;;  %v5744_v40 = vld [vmem:[%s12482_s0 + $0x1dc] sm:$0xf0] }
  0x24   :  { %3242 = vmatpush.bf16.msrb.mxu0 %v6667_v62  ;;  %3031 = vmatmul.bf16.vlgmr.msra.gmra.mxu1 %v8090_v8  ;;  %v7717_v62 = vld [vmem:[%s12481_s1 + $0x2b4] sm:$0xf0]  ;;  %v7477_v39 = vld [vmem:[%s12482_s0 + $0x19c] sm:$0xf]  ;;  %v7596_v41 = vld [vmem:[%s12482_s0 + $0x554] sm:$0xf] }
  0x25   :  { %3315 = vmatpush.bf16.msrb.mxu1 %v6731_v63  ;;  %3066 = vmatmul.bf16.vlgmr.msra.gmra.mxu3 %v8092_v9  ;;  %v6635_v63 = vor.u32 %v7701_v60, %v6634_v58  ;;  %v6699_v0 = vor.u32 %v7717_v62, %v6698_v61  ;;  %v6220_v42 = vld [vmem:[%s12482_s0 + $0x594] sm:$0xf0]  ;;  %v8312_v45 = vor.u32 %v7477_v39, %v5744_v40  ;;  %v6554_v47 = vld [vmem:[%s12481_s1 + $0x190] sm:$0xf]  ;;  %v6482_v60 = vld [vmem:[%s12481_s1 + $0x100] sm:$0xf] }
  0x26   :  { %3096 = vmatpush.bf16.msrb.mxu2 %v6539_v10  ;;  %3169 = vmatpush.bf16.msrb.mxu3 %v6603_v11  ;;  %v6150_v10 = vld [vmem:[%s12482_s0 + $0x4c8] sm:$0xf]  ;;  %v7587_v11 = vld [vmem:[%s12482_s0 + $0x508] sm:$0xf0]  ;;  %v8314_v46 = vor.u32 %v7596_v41, %v6220_v42  ;;  %v7681_v48 = vld [vmem:[%s12481_s1 + $0x194] sm:$0xf0] }
  0x27   :  { %v8244_v17 = vor.u32 %v7587_v11, %v6150_v10  ;;  %12677 = vst [vmem:[#allocation7_spill] sm:$0xff] %v8312_v45  ;;  %v6618_v49 = vld [vmem:[%s12481_s1 + $0x210] sm:$0xf]  ;;  %v7713_v57 = vld [vmem:[%s12481_s1 + $0x294] sm:$0xf0] }
  0x28   :  { %3243 = vmatpush.bf16.msrb.mxu0 %v6659_v14  ;;  %v7579_v14 = vld [vmem:[%s12482_s0 + $0x4cc] sm:$0xf]  ;;  %12678 = vst [vmem:[#allocation8_spill] sm:$0xff] %v8314_v46  ;;  %v6682_v56 = vld [vmem:[%s12481_s1 + $0x290] sm:$0xf] }
  0x29   :  { %3316 = vmatpush.bf16.msrb.mxu1 %v6723_v15  ;;  %v6152_v15 = vld [vmem:[%s12482_s0 + $0x50c] sm:$0xf0]  ;;  %v7663_v61 = vld [vmem:[%s12481_s1 + $0x104] sm:$0xf0]  ;;  %v6546_v62 = vld [vmem:[%s12481_s1 + $0x180] sm:$0xf] }
  0x2a   :  { %3097 = vmatpush.bf16.msrb.mxu2 %v6531_v22  ;;  %3170 = vmatpush.bf16.msrb.mxu3 %v6595_v23  ;;  %v8248_v19 = vor.u32 %v7579_v14, %v6152_v15  ;;  %v6562_v22 = vld [vmem:[%s12481_s1 + $0x1a0] sm:$0xf]  ;;  %v6499_v23 = vor.u32 %v7667_v21, %v6498_v20  ;;  %v6286_v6 = vld [vmem:[%s12482_s0 + $0x5d8] sm:$0xf]  ;;  %v7621_v7 = vld [vmem:[%s12482_s0 + $0x618] sm:$0xf0] }
  0x2b   :  { %v5810_v2 = vld [vmem:[%s12482_s0 + $0x220] sm:$0xf]  ;;  %v7494_v10 = vld [vmem:[%s12482_s0 + $0x224] sm:$0xf]  ;;  %v5812_v11 = vld [vmem:[%s12482_s0 + $0x264] sm:$0xf0]  ;;  %v8376_v15 = vor.u32 %v7621_v7, %v6286_v6 }
  0x2c   :  { %3244 = vmatpush.bf16.msrb.mxu0 %v6651_v26  ;;  %12676 = vst [vmem:[#allocation6_spill] sm:$0xff] %v8248_v19  ;;  %v7699_v26 = vld [vmem:[%s12481_s1 + $0x224] sm:$0xf0]  ;;  %v7613_v12 = vld [vmem:[%s12482_s0 + $0x5dc] sm:$0xf]  ;;  %v8378_v20 = vor.u32 %v7494_v10, %v5812_v11 }
  0x2d   :  { %3317 = vmatpush.bf16.msrb.mxu1 %v6715_v27  ;;  %v6563_v27 = vor.u32 %v7683_v24, %v6562_v22  ;;  %v6627_v28 = vor.u32 %v7699_v26, %v6626_v25  ;;  %v6288_v13 = vld [vmem:[%s12482_s0 + $0x61c] sm:$0xf0]  ;;  %v7711_v26 = vld [vmem:[%s12481_s1 + $0x284] sm:$0xf0]  ;;  %v7511_v39 = vld [vmem:[%s12482_s0 + $0x2ac] sm:$0xf] }
  0x2e   :  { %3098 = vmatpush.bf16.msrb.mxu2 %v6523_v34  ;;  %3171 = vmatpush.bf16.msrb.mxu3 %v6587_v35  ;;  %v6491_v34 = vor.u32 %v7665_v33, %v6490_v31  ;;  %v5742_v35 = vld [vmem:[%s12482_s0 + $0x198] sm:$0xf]  ;;  %12679 = vst [vmem:[#allocation9_spill] sm:$0xff] %v8378_v20  ;;  %v8380_v21 = vor.u32 %v7613_v12, %v6288_v13  ;;  %v6610_v22 = vld [vmem:[%s12481_s1 + $0x200] sm:$0xf] }
  0x2f   :  { %v8308_v43 = vor.u32 %v7485_v36, %v5742_v35  ;;  %v6674_v24 = vld [vmem:[%s12481_s1 + $0x280] sm:$0xf]  ;;  %v6858_v31 = vld [vmem:[%s12481_s1 + $0x3f0] sm:$0xf]  ;;  %v5878_v36 = vld [vmem:[%s12482_s0 + $0x2a8] sm:$0xf] }
  0x30   :  { %3245 = vmatpush.bf16.msrb.mxu0 %v6643_v37  ;;  %v6218_v37 = vld [vmem:[%s12482_s0 + $0x550] sm:$0xf]  ;;  %12680 = vst [vmem:[#allocation10_spill] sm:$0xff] %v8380_v21  ;;  %v6675_v29 = vor.u32 %v7711_v26, %v6674_v24  ;;  %v6786_v11 = vld [vmem:[%s12481_s1 + $0x360] sm:$0xf] }
  0x31   :  { %3318 = vmatpush.bf16.msrb.mxu1 %v6707_v38  ;;  %v7604_v38 = vld [vmem:[%s12482_s0 + $0x590] sm:$0xf0]  ;;  %v5880_v40 = vld [vmem:[%s12482_s0 + $0x2ec] sm:$0xf0]  ;;  %v7739_v12 = vld [vmem:[%s12481_s1 + $0x364] sm:$0xf0] }
  0x32   :  { %3099 = vmatpush.bf16.msrb.mxu2 %v6515_v50  ;;  %3172 = vmatpush.bf16.msrb.mxu3 %v6579_v51  ;;  %v8310_v44 = vor.u32 %v7604_v38, %v6218_v37  ;;  %v6555_v50 = vor.u32 %v7681_v48, %v6554_v47  ;;  %v7697_v51 = vld [vmem:[%s12481_s1 + $0x214] sm:$0xf0]  ;;  %v7519_v37 = vld [vmem:[%s12482_s0 + $0x2e8] sm:$0xf0]  ;;  %v8429_v47 = vor.u32 %v7511_v39, %v5880_v40  ;;  %v7452_v26 = vld [vmem:[%s12482_s0 + $0xd0] sm:$0xf0] }
  0x33   :  { %2963 = vmatmul.bf16.gmra.mxu0 %v8182_v52  ;;  %2998 = vmatmul.bf16.gmra.mxu2 %v8184_v53  ;;  %v6619_v58 = vor.u32 %v7697_v51, %v6618_v49  ;;  %v8425_v41 = vor.u32 %v7519_v37, %v5878_v36  ;;  %v6922_v49 = vld [vmem:[%s12481_s1 + $0x470] sm:$0xf]  ;;  %v6787_v13 = vor.u32 %v7739_v12, %v6786_v11  ;;  %v7444_v36 = vld [vmem:[%s12482_s0 + $0x94] sm:$0xf]  ;;  %v5616_v37 = vld [vmem:[%s12482_s0 + $0xd4] sm:$0xf0] }
  0x34   :  { %3036 = vmatmul.bf16.gmra.mxu1 %v8186_v54  ;;  %3246 = vmatpush.bf16.msrb.mxu0 %v6635_v63  ;;  %v6483_v63 = vor.u32 %v7663_v61, %v6482_v60  ;;  %12681 = vst [vmem:[#allocation11_spill] sm:$0xff] %v8429_v47  ;;  %v6986_v51 = vld [vmem:[%s12481_s1 + $0x4f0] sm:$0xf]  ;;  %v7536_v60 = vld [vmem:[%s12482_s0 + $0x370] sm:$0xf0] }
  0x35   :  { %3071 = vmatmul.bf16.gmra.mxu3 %v8188_v55  ;;  %3319 = vmatpush.bf16.msrb.mxu1 %v6699_v0  ;;  %v7679_v0 = vld [vmem:[%s12481_s1 + $0x184] sm:$0xf0]  ;;  %v7528_v61 = vld [vmem:[%s12482_s0 + $0x334] sm:$0xf]  ;;  %v6778_v11 = vld [vmem:[%s12481_s1 + $0x350] sm:$0xf] }
  0x36   :  { %3100 = vmatpush.bf16.msrb.mxu2 %v6507_v59  ;;  %3173 = vmatpush.bf16.msrb.mxu3 %v6571_v5  ;;  %v6683_v59 = vor.u32 %v7713_v57, %v6682_v56  ;;  %v6547_v1 = vor.u32 %v7679_v0, %v6546_v62  ;;  %v7502_v5 = vld [vmem:[%s12482_s0 + $0x260] sm:$0xf0]  ;;  %v7789_v57 = vld [vmem:[%s12481_s1 + $0x4f4] sm:$0xf0]  ;;  %v5546_v62 = vld [vmem:[%s12482_s0 + $0x8] sm:$0xf] }
  0x37   :  { %v8374_v14 = vor.u32 %v7502_v5, %v5810_v2  ;;  %v5948_v0 = vld [vmem:[%s12482_s0 + $0x374] sm:$0xf0]  ;;  %v5548_v2 = vld [vmem:[%s12482_s0 + $0x4c] sm:$0xf0] }
  0x38   :  { %3247 = vmatpush.bf16.msrb.mxu0 %v6627_v28  ;;  %v7741_v28 = vld [vmem:[%s12481_s1 + $0x374] sm:$0xf0]  ;;  %v8477_v7 = vor.u32 %v7528_v61, %v5948_v0  ;;  %v7445_v61 = vld [vmem:[%s12482_s0 + $0x9c] sm:$0xf]  ;;  %v5684_v0 = vld [vmem:[%s12482_s0 + $0x15c] sm:$0xf0] }
  0x39   :  { %3320 = vmatpush.bf16.msrb.mxu1 %v6691_v32  ;;  %v7757_v32 = vld [vmem:[%s12481_s1 + $0x3f4] sm:$0xf0] }
  0x3a   :  { %3101 = vmatpush.bf16.msrb.mxu2 %v6499_v23  ;;  %3174 = vmatpush.bf16.msrb.mxu3 %v6563_v27  ;;  %v7695_v23 = vld [vmem:[%s12481_s1 + $0x204] sm:$0xf0]  ;;  %v6794_v27 = vld [vmem:[%s12481_s1 + $0x370] sm:$0xf]  ;;  %v6859_v33 = vor.u32 %v7757_v32, %v6858_v31  ;;  %12683 = vst [vmem:[#allocation13_spill] sm:$0xff] %v8477_v7 }
  0x3b   :  { %v6611_v25 = vor.u32 %v7695_v23, %v6610_v22  ;;  %v6795_v30 = vor.u32 %v7741_v28, %v6794_v27  ;;  %v6850_v22 = vld [vmem:[%s12481_s1 + $0x3e0] sm:$0xf]  ;;  %v7755_v23 = vld [vmem:[%s12481_s1 + $0x3e4] sm:$0xf0]  ;;  %v5554_v27 = vld [vmem:[%s12482_s0 + $0x10] sm:$0xf] }
  0x3c   :  { %3248 = vmatpush.bf16.msrb.mxu0 %v6619_v58  ;;  %v6987_v58 = vor.u32 %v7789_v57, %v6986_v51  ;;  %v6851_v24 = vor.u32 %v7755_v23, %v6850_v22  ;;  %v6914_v28 = vld [vmem:[%s12481_s1 + $0x460] sm:$0xf]  ;;  %v7436_v31 = vld [vmem:[%s12482_s0 + $0x50] sm:$0xf0]  ;;  %v5682_v57 = vld [vmem:[%s12482_s0 + $0x118] sm:$0xf] }
  0x3d   :  { %3321 = vmatpush.bf16.msrb.mxu1 %v6683_v59  ;;  %v5946_v59 = vld [vmem:[%s12482_s0 + $0x330] sm:$0xf]  ;;  %v7428_v32 = vld [vmem:[%s12482_s0 + $0x14] sm:$0xf]  ;;  %v8535_v40 = vor.u32 %v7436_v31, %v5554_v27  ;;  %v503_v51 = vld [vmem:[%s12483_s2] sm:$0x3] }
  0x3e   :  { %3102 = vmatpush.bf16.msrb.mxu2 %v6491_v34  ;;  %3175 = vmatpush.bf16.msrb.mxu3 %v6555_v50  ;;  %v231_v34 = vld [vmem:[%s12482_s0 + $0x660] sm:$0xff]  ;;  %v7773_v50 = vld [vmem:[%s12481_s1 + $0x474] sm:$0xf0]  ;;  %v8473_v5 = vor.u32 %v7536_v60, %v5946_v59  ;;  %v7453_v60 = vld [vmem:[%s12482_s0 + $0xd8] sm:$0xf0] }
  0x3f   :  { %v1142_v35 = vunpack.c.l.b16 %v231_v34  ;;  %v1143_v38 = vunpack.c.h.b16 %v231_v34  ;;  %v6923_v56 = vor.u32 %v7773_v50, %v6922_v49  ;;  %v7787_v34 = vld [vmem:[%s12481_s1 + $0x4e4] sm:$0xf0]  ;;  %12686 = vst [vmem:[#allocation16_spill] sm:$0xff] %v8535_v40  ;;  %v8539_v50 = vor.u32 %v7444_v36, %v5616_v37  ;;  %v5622_v59 = vld [vmem:[%s12482_s0 + $0x98] sm:$0xf] }
  0x40   :  { %3249 = vmatpush.bf16.msrb.mxu0 %v6611_v25  ;;  %v5614_v25 = vld [vmem:[%s12482_s0 + $0x90] sm:$0xf]  ;;  %v7737_v12 = vld [vmem:[%s12481_s1 + $0x354] sm:$0xf0] }
  0x41   :  { %3322 = vmatpush.bf16.msrb.mxu1 %v6675_v29  ;;  %v8427_v42 = vpack.c.b16 %v1142_v35, %v1142_v35  ;;  %v8431_v48 = vpack.c.b16 %v1143_v38, %v1143_v38  ;;  %v7771_v29 = vld [vmem:[%s12481_s1 + $0x464] sm:$0xf0]  ;;  %v5556_v35 = vld [vmem:[%s12482_s0 + $0x54] sm:$0xf0]  ;;  %v8533_v39 = vor.u32 %v7452_v26, %v5614_v25  ;;  %12688 = vst [vmem:[#allocation18_spill] sm:$0xff] %v8539_v50 }
  0x42   :  { %3103 = vmatpush.bf16.msrb.mxu2 %v6483_v63  ;;  %3176 = vmatpush.bf16.msrb.mxu3 %v6547_v1  ;;  %v7435_v63 = vld [vmem:[%s12482_s0 + $0x48] sm:$0xf0]  ;;  %v8537_v49 = vor.u32 %v7428_v32, %v5556_v35 }
  0x43   :  { %2968 = vmatmul.bf16.gmra.mxu0 %v8242_v16  ;;  %3003 = vmatmul.bf16.gmra.mxu2 %v8244_v17  ;;  %12682 = vst [vmem:[#allocation12_spill] sm:$0xff] %v8431_v48  ;;  %v7427_v1 = vld [vmem:[%s12482_s0 + $0xc] sm:$0xf]  ;;  %v8475_v6 = vor.u32 %v7435_v63, %v5546_v62  ;;  %v5624_v62 = vld [vmem:[%s12482_s0 + $0xdc] sm:$0xf0] }
  0x44   :  { %3041 = vmatmul.bf16.gmra.mxu1 %v8246_v18  ;;  %3534 = vmatpush.bf16.msra.mxu0 %v6923_v56  ;;  %v8479_v10 = vor.u32 %v7427_v1, %v5548_v2  ;;  %12685 = vst [vmem:[#allocation15_spill] sm:$0xff] %v8533_v39  ;;  %v8548_v56 = vperm.slane %v503_v51, 0  ;;  %v7461_v63 = vld [vmem:[%s12482_s0 + $0x11c] sm:$0xf]  ;;  %v8576_v2 = vor.u32 %v7453_v60, %v5622_v59  ;;  %v7769_v51 = vld [vmem:[%s12481_s1 + $0x454] sm:$0xf0] }
  0x45   :  { %3076 = vmatmul.bf16.gmra.mxu3 %v8248_v19  ;;  %3607 = vmatpush.bf16.msra.mxu1 %v6987_v58  ;;  %12687 = vst [vmem:[#allocation17_spill] sm:$0xff] %v8537_v49  ;;  %v7469_v58 = vld [vmem:[%s12482_s0 + $0x158] sm:$0xf0]  ;;  %v8584_v22 = vor.u32 %v7445_v61, %v5624_v62  ;;  %v8586_v23 = vor.u32 %v7461_v63, %v5684_v0  ;;  %v7785_v59 = vld [vmem:[%s12481_s1 + $0x4d4] sm:$0xf0] }
  0x46   :  { %3388 = vmatpush.bf16.msra.mxu2 %v6795_v30  ;;  %3461 = vmatpush.bf16.msra.mxu3 %v6859_v33  ;;  %12684 = vst [vmem:[#allocation14_spill] sm:$0xff] %v8479_v10  ;;  %v6978_v30 = vld [vmem:[%s12481_s1 + $0x4e0] sm:$0xf]  ;;  %v6915_v33 = vor.u32 %v7771_v29, %v6914_v28  ;;  %v8574_v1 = vor.u32 %v7469_v58, %v5682_v57  ;;  %v6842_v28 = vld [vmem:[%s12481_s1 + $0x3d0] sm:$0xf] }
  0x47   :  { %v6979_v38 = vor.u32 %v7787_v34, %v6978_v30  ;;  %12690 = vst [vmem:[#allocation20_spill] sm:$0xff] %v8576_v2  ;;  %v7753_v29 = vld [vmem:[%s12481_s1 + $0x3d4] sm:$0xf0]  ;;  %v6970_v57 = vld [vmem:[%s12481_s1 + $0x4d0] sm:$0xf] }
  0x48   :  { %3535 = vmatpush.bf16.msra.mxu0 %v6915_v33  ;;  %12689 = vst [vmem:[#allocation19_spill] sm:$0xff] %v8574_v1  ;;  %v6843_v30 = vor.u32 %v7753_v29, %v6842_v28  ;;  %v5750_v61 = vld [vmem:[%s12482_s0 + $0x1a0] sm:$0xf]  ;;  %v7486_v62 = vld [vmem:[%s12482_s0 + $0x1e0] sm:$0xf0]  ;;  %v6971_v63 = vor.u32 %v7785_v59, %v6970_v57 }
  0x49   :  { %3608 = vmatpush.bf16.msra.mxu1 %v6979_v38  ;;  %12691 = vst [vmem:[#allocation21_spill] sm:$0xff] %v8584_v22  ;;  %v6906_v38 = vld [vmem:[%s12481_s1 + $0x450] sm:$0xf]  ;;  %v5690_v0 = vld [vmem:[%s12482_s0 + $0x120] sm:$0xf] }
  0x4a   :  { %3389 = vmatpush.bf16.msra.mxu2 %v6787_v13  ;;  %3462 = vmatpush.bf16.msra.mxu3 %v6851_v24  ;;  %12692 = vst [vmem:[#allocation22_spill] sm:$0xff] %v8586_v23  ;;  %v6779_v24 = vor.u32 %v7737_v12, %v6778_v11  ;;  %v6907_v58 = vor.u32 %v7769_v51, %v6906_v38  ;;  %v7470_v11 = vld [vmem:[%s12482_s0 + $0x160] sm:$0xf0] }
  0x4b   :  { %v7462_v12 = vld [vmem:[%s12482_s0 + $0x124] sm:$0xf] }
  0x4c   :  { %3536 = vmatpush.bf16.msra.mxu0 %v6907_v58 }
  0x4d   :  { %3609 = vmatpush.bf16.msra.mxu1 %v6971_v63 }
  0x4e   :  { %3390 = vmatpush.bf16.msra.mxu2 %v6779_v24  ;;  %3463 = vmatpush.bf16.msra.mxu3 %v6843_v30  ;;  %v7478_v24 = vld [vmem:[%s12482_s0 + $0x1a4] sm:$0xf]  ;;  %v8644_v30 = vor.u32 %v7486_v62, %v5750_v61 }
  0x50   :  { %12693 = vst [vmem:[#allocation23_spill] sm:$0xff] %v8644_v30 }
  0x53   :  { %2973 = vmatmul.bf16.gmra.mxu0 %v8308_v43  ;;  %3008 = vmatmul.bf16.gmra.mxu2 %v8310_v44 }
  0x54   :  { %3046 = vmatmul.bf16.gmra.mxu1 %v8312_v45 }
  0x55   :  { %3081 = vmatmul.bf16.gmra.mxu3 %v8314_v46 }
  0x63   :  { %2978 = vmatmul.bf16.gmra.mxu0 %v8374_v14  ;;  %3013 = vmatmul.bf16.gmra.mxu2 %v8376_v15 }
  0x64   :  { %3051 = vmatmul.bf16.gmra.mxu1 %v8378_v20 }
  0x65   :  { %3086 = vmatmul.bf16.gmra.mxu3 %v8380_v21 }
  0x73   :  { %2983 = vmatmul.bf16.gmra.mxu0 %v8425_v41  ;;  %3018 = vmatmul.bf16.gmra.mxu2 %v8427_v42 }
  0x74   :  { %3056 = vmatmul.bf16.gmra.mxu1 %v8429_v47 }
  0x75   :  { %3091 = vmatmul.bf16.gmra.mxu3 %v8431_v48 }
  0x83   :  { %2988 = vmatmul.bf16.gmra.mxu0 %v8473_v5  ;;  %3104 = vmatmul.bf16.vlgmr.msrb.gmra.mxu2 %v8475_v6 }
  0x84   :  { %3061 = vmatmul.bf16.gmra.mxu1 %v8477_v7 }
  0x85   :  { %3177 = vmatmul.bf16.vlgmr.msrb.gmra.mxu3 %v8479_v10 }
  0x93   :  { %3109 = vmatmul.bf16.gmra.mxu2 %v8533_v39  ;;  %3250 = vmatmul.bf16.vlgmr.msrb.gmra.mxu0 %v8535_v40  ;;  %v6874_v39 = vld [vmem:[%s12481_s1 + $0x410] sm:$0xf] }
  0x94   :  { %3323 = vmatmul.bf16.vlgmr.msrb.gmra.mxu1 %v8537_v49 }
  0x95   :  { %3182 = vmatmul.bf16.gmra.mxu3 %v8539_v50 }
  0xa0   :  { %v2959_v13 = vpop.f32.mrf.mxu0 }
  0xa1   :  { %v2960_v25 = vadd.f32 %v2959_v13, %v8548_v56  ;;  %v3032_v26 = vpop.f32.mrf.mxu1  ;;  %v5692_v13 = vld [vmem:[%s12482_s0 + $0x164] sm:$0xf0] }
  0xa3   :  { %v8589_v27 = vadd.f32 %v3032_v26, %v2960_v25  ;;  %3114 = vmatmul.bf16.gmra.mxu2 %v8574_v1  ;;  %3255 = vmatmul.bf16.gmra.mxu0 %v8576_v2  ;;  %v5752_v25 = vld [vmem:[%s12482_s0 + $0x1e4] sm:$0xf0] }
  0xa4   :  { %3328 = vmatmul.bf16.gmra.mxu1 %v8584_v22 }
  0xa5   :  { %3187 = vmatmul.bf16.gmra.mxu3 %v8586_v23 }
  0xa6   :  { %v2994_v31 = vpop.f32.mrf.mxu2 }
  0xa7   :  { %v2995_v32 = vadd.f32 %v2994_v31, %v8548_v56  ;;  %v8646_v31 = vor.u32 %v7470_v11, %v5690_v0  ;;  %v5818_v11 = vld [vmem:[%s12482_s0 + $0x228] sm:$0xf] }
  0xa8   :  { %v3067_v33 = vpop.f32.mrf.mxu3  ;;  %v2961_v34 = vpop.f32.mrf.mxu0 }
  0xa9   :  { %v8602_v35 = vadd.f32 %v3067_v33, %v2995_v32  ;;  %v2962_v36 = vadd.f32 %v2961_v34, %v8548_v56  ;;  %v3034_v37 = vpop.f32.mrf.mxu1  ;;  %12694 = vst [vmem:[#allocation24_spill] sm:$0xff] %v8646_v31  ;;  %v8648_v33 = vor.u32 %v7462_v12, %v5692_v13  ;;  %v8650_v34 = vor.u32 %v7478_v24, %v5752_v25  ;;  %v7503_v12 = vld [vmem:[%s12482_s0 + $0x268] sm:$0xf0]  ;;  %v5758_v13 = vld [vmem:[%s12482_s0 + $0x1a8] sm:$0xf] }
  0xaa   :  { %v6770_v25 = vld [vmem:[%s12481_s1 + $0x340] sm:$0xf] }
  0xab   :  { %v8617_v60 = vadd.f32 %v3034_v37, %v2962_v36  ;;  %12695 = vst [vmem:[#allocation25_spill] sm:$0xff] %v8648_v33 }
  0xac   :  { %12696 = vst [vmem:[#allocation26_spill] sm:$0xff] %v8650_v34 }
  0xae   :  { %v2996_v26 = vpop.f32.mrf.mxu2 }
  0xaf   :  { %v2997_v28 = vadd.f32 %v2996_v26, %v8548_v56  ;;  %v7735_v26 = vld [vmem:[%s12481_s1 + $0x344] sm:$0xf0] }
  0xb0   :  { %v3069_v29 = vpop.f32.mrf.mxu3  ;;  %v2964_v32 = vpop.f32.mrf.mxu0 }
  0xb1   :  { %v8652_v36 = vadd.f32 %v3069_v29, %v2997_v28  ;;  %v2965_v37 = vadd.f32 %v2964_v32, %v8548_v56  ;;  %v3037_v38 = vpop.f32.mrf.mxu1  ;;  %v6834_v28 = vld [vmem:[%s12481_s1 + $0x3c0] sm:$0xf]  ;;  %v7487_v29 = vld [vmem:[%s12482_s0 + $0x1e8] sm:$0xf0] }
  0xb2   :  { %v7479_v32 = vld [vmem:[%s12482_s0 + $0x1ac] sm:$0xf] }
  0xb3   :  { %v8655_v51 = vadd.f32 %v3037_v38, %v2965_v37  ;;  %3119 = vmatmul.bf16.gmra.mxu2 %v8644_v30  ;;  %3260 = vmatmul.bf16.gmra.mxu0 %v8646_v31  ;;  %v6771_v37 = vor.u32 %v7735_v26, %v6770_v25  ;;  %v7751_v38 = vld [vmem:[%s12481_s1 + $0x3c4] sm:$0xf0]  ;;  %v8704_v26 = vor.u32 %v7503_v12, %v5818_v11  ;;  %v6898_v11 = vld [vmem:[%s12481_s1 + $0x440] sm:$0xf] }
  0xb4   :  { %3333 = vmatmul.bf16.gmra.mxu1 %v8648_v33  ;;  %v8706_v33 = vor.u32 %v7487_v29, %v5758_v13  ;;  %v7767_v12 = vld [vmem:[%s12481_s1 + $0x444] sm:$0xf0]  ;;  %v6962_v13 = vld [vmem:[%s12481_s1 + $0x4c0] sm:$0xf] }
  0xb5   :  { %3192 = vmatmul.bf16.gmra.mxu3 %v8650_v34  ;;  %3391 = vmatpush.bf16.msra.mxu2 %v6771_v37  ;;  %12697 = vst [vmem:[#allocation27_spill] sm:$0xff] %v8704_v26 }
  0xb6   :  { %v2999_v57 = vpop.f32.mrf.mxu2  ;;  %12698 = vst [vmem:[#allocation28_spill] sm:$0xff] %v8706_v33 }
  0xb7   :  { %v3000_v58 = vadd.f32 %v2999_v57, %v8548_v56  ;;  %v5760_v57 = vld [vmem:[%s12482_s0 + $0x1ec] sm:$0xf0] }
  0xb8   :  { %v3072_v59 = vpop.f32.mrf.mxu3  ;;  %v2966_v61 = vpop.f32.mrf.mxu0  ;;  %v8708_v49 = vor.u32 %v7479_v32, %v5760_v57 }
  0xb9   :  { %v8662_v62 = vadd.f32 %v3072_v59, %v3000_v58  ;;  %v2967_v63 = vadd.f32 %v2966_v61, %v8548_v56  ;;  %v3039_v0 = vpop.f32.mrf.mxu1  ;;  %v7495_v58 = vld [vmem:[%s12482_s0 + $0x22c] sm:$0xf]  ;;  %v5820_v59 = vld [vmem:[%s12482_s0 + $0x26c] sm:$0xf0]  ;;  %v6835_v61 = vor.u32 %v7751_v38, %v6834_v28 }
  0xba   :  { %12699 = vst [vmem:[#allocation29_spill] sm:$0xff] %v8708_v49  ;;  %v8710_v48 = vor.u32 %v7495_v58, %v5820_v59 }
  0xbb   :  { %v8674_v24 = vadd.f32 %v3039_v0, %v2967_v63  ;;  %3464 = vmatpush.bf16.msra.mxu3 %v6835_v61 }
  0xbc   :  { %12700 = vst [vmem:[#allocation30_spill] sm:$0xff] %v8710_v48 }
  0xbe   :  { %v3001_v63 = vpop.f32.mrf.mxu2 }
  0xbf   :  { %v3002_v0 = vadd.f32 %v3001_v63, %v8548_v56 }
  0xc0   :  { %v3074_v25 = vpop.f32.mrf.mxu3  ;;  %v2969_v22 = vpop.f32.mrf.mxu0 }
  0xc1   :  { %v8712_v21 = vadd.f32 %v3074_v25, %v3002_v0  ;;  %v2970_v46 = vadd.f32 %v2969_v22, %v8548_v56  ;;  %v3042_v28 = vpop.f32.mrf.mxu1  ;;  %v7783_v22 = vld [vmem:[%s12481_s1 + $0x4c4] sm:$0xf0]  ;;  %v5886_v25 = vld [vmem:[%s12482_s0 + $0x2b0] sm:$0xf] }
  0xc2   :  { %v6963_v29 = vor.u32 %v7783_v22, %v6962_v13  ;;  %v7496_v13 = vld [vmem:[%s12482_s0 + $0x234] sm:$0xf] }
  0xc3   :  { %v8715_v38 = vadd.f32 %v3042_v28, %v2970_v46  ;;  %3124 = vmatmul.bf16.gmra.mxu2 %v8704_v26  ;;  %3265 = vmatmul.bf16.gmra.mxu0 %v8706_v33  ;;  %v6899_v46 = vor.u32 %v7767_v12, %v6898_v11  ;;  %v7520_v28 = vld [vmem:[%s12482_s0 + $0x2f0] sm:$0xf0]  ;;  %v5826_v11 = vld [vmem:[%s12482_s0 + $0x230] sm:$0xf] }
  0xc4   :  { %3338 = vmatmul.bf16.gmra.mxu1 %v8708_v49  ;;  %v7504_v12 = vld [vmem:[%s12482_s0 + $0x270] sm:$0xf0] }
  0xc5   :  { %3197 = vmatmul.bf16.gmra.mxu3 %v8710_v48  ;;  %3537 = vmatpush.bf16.msra.mxu0 %v6899_v46  ;;  %v5828_v46 = vld [vmem:[%s12482_s0 + $0x274] sm:$0xf0]  ;;  %v7512_v22 = vld [vmem:[%s12482_s0 + $0x2b4] sm:$0xf] }
  0xc6   :  { %v3004_v32 = vpop.f32.mrf.mxu2  ;;  %3610 = vmatpush.bf16.msra.mxu1 %v6963_v29  ;;  %v5888_v29 = vld [vmem:[%s12482_s0 + $0x2f4] sm:$0xf0]  ;;  %v8768_v49 = vor.u32 %v7496_v13, %v5828_v46 }
  0xc7   :  { %v3005_v37 = vadd.f32 %v3004_v32, %v8548_v56  ;;  %v8770_v19 = vor.u32 %v7512_v22, %v5888_v29 }
  0xc8   :  { %v3077_v57 = vpop.f32.mrf.mxu3  ;;  %v2971_v58 = vpop.f32.mrf.mxu0  ;;  %12703 = vst [vmem:[#allocation33_spill] sm:$0xff] %v8768_v49 }
  0xc9   :  { %v8734_v59 = vadd.f32 %v3077_v57, %v3005_v37  ;;  %v2972_v61 = vadd.f32 %v2971_v58, %v8548_v56  ;;  %v3044_v63 = vpop.f32.mrf.mxu1  ;;  %v8764_v58 = vor.u32 %v7520_v28, %v5886_v25  ;;  %12704 = vst [vmem:[#allocation34_spill] sm:$0xff] %v8770_v19  ;;  %v6762_v25 = vld [vmem:[%s12481_s1 + $0x330] sm:$0xf]  ;;  %v7733_v28 = vld [vmem:[%s12481_s1 + $0x334] sm:$0xf0] }
  0xcb   :  { %v8737_v0 = vadd.f32 %v3044_v63, %v2972_v61  ;;  %12701 = vst [vmem:[#allocation31_spill] sm:$0xff] %v8764_v58  ;;  %v8766_v61 = vor.u32 %v7504_v12, %v5826_v11  ;;  %v6763_v11 = vor.u32 %v7733_v28, %v6762_v25  ;;  %v7537_v25 = vld [vmem:[%s12482_s0 + $0x378] sm:$0xf0]  ;;  %v5894_v28 = vld [vmem:[%s12482_s0 + $0x2b8] sm:$0xf] }
  0xcd   :  { %12702 = vst [vmem:[#allocation32_spill] sm:$0xff] %v8766_v61  ;;  %3392 = vmatpush.bf16.msra.mxu2 %v6763_v11 }
  0xce   :  { %v3006_v32 = vpop.f32.mrf.mxu2 }
  0xcf   :  { %v3007_v37 = vadd.f32 %v3006_v32, %v8548_v56 }
  0xd0   :  { %v3079_v57 = vpop.f32.mrf.mxu3  ;;  %v2974_v63 = vpop.f32.mrf.mxu0 }
  0xd1   :  { %v8772_v55 = vadd.f32 %v3079_v57, %v3007_v37  ;;  %v2975_v9 = vadd.f32 %v2974_v63, %v8548_v56  ;;  %v3047_v7 = vpop.f32.mrf.mxu1  ;;  %v5954_v63 = vld [vmem:[%s12482_s0 + $0x338] sm:$0xf] }
  0xd3   :  { %v8775_v48 = vadd.f32 %v3047_v7, %v2975_v9  ;;  %3129 = vmatmul.bf16.gmra.mxu2 %v8764_v58  ;;  %3270 = vmatmul.bf16.gmra.mxu0 %v8766_v61  ;;  %v6826_v9 = vld [vmem:[%s12481_s1 + $0x3b0] sm:$0xf]  ;;  %v7749_v7 = vld [vmem:[%s12481_s1 + $0x3b4] sm:$0xf0]  ;;  %v8836_v61 = vor.u32 %v7537_v25, %v5954_v63 }
  0xd4   :  { %3343 = vmatmul.bf16.gmra.mxu1 %v8768_v49  ;;  %v6827_v12 = vor.u32 %v7749_v7, %v6826_v9  ;;  %v6890_v9 = vld [vmem:[%s12481_s1 + $0x430] sm:$0xf]  ;;  %v7765_v7 = vld [vmem:[%s12481_s1 + $0x434] sm:$0xf0]  ;;  %v5956_v49 = vld [vmem:[%s12482_s0 + $0x37c] sm:$0xf0] }
  0xd5   :  { %3202 = vmatmul.bf16.gmra.mxu3 %v8770_v19  ;;  %12705 = vst [vmem:[#allocation35_spill] sm:$0xff] %v8836_v61 }
  0xd6   :  { %v3009_v13 = vpop.f32.mrf.mxu2  ;;  %3465 = vmatpush.bf16.msra.mxu3 %v6827_v12  ;;  %v6954_v12 = vld [vmem:[%s12481_s1 + $0x4b0] sm:$0xf] }
  0xd7   :  { %v3010_v46 = vadd.f32 %v3009_v13, %v8548_v56  ;;  %v7521_v13 = vld [vmem:[%s12482_s0 + $0x2f8] sm:$0xf0] }
  0xd8   :  { %v3082_v22 = vpop.f32.mrf.mxu3  ;;  %v2976_v29 = vpop.f32.mrf.mxu0  ;;  %v8838_v47 = vor.u32 %v7521_v13, %v5894_v28 }
  0xd9   :  { %v8794_v32 = vadd.f32 %v3082_v22, %v3010_v46  ;;  %v2977_v37 = vadd.f32 %v2976_v29, %v8548_v56  ;;  %v3049_v57 = vpop.f32.mrf.mxu1  ;;  %v7513_v46 = vld [vmem:[%s12482_s0 + $0x2bc] sm:$0xf]  ;;  %v6891_v22 = vor.u32 %v7765_v7, %v6890_v9  ;;  %v7781_v29 = vld [vmem:[%s12481_s1 + $0x4b4] sm:$0xf0] }
  0xda   :  { %v6955_v19 = vor.u32 %v7781_v29, %v6954_v12  ;;  %12706 = vst [vmem:[#allocation36_spill] sm:$0xff] %v8838_v47 }
  0xdb   :  { %v8806_v11 = vadd.f32 %v3049_v57, %v2977_v37  ;;  %v5896_v37 = vld [vmem:[%s12482_s0 + $0x2fc] sm:$0xf0]  ;;  %v7529_v57 = vld [vmem:[%s12482_s0 + $0x33c] sm:$0xf]  ;;  %3538 = vmatpush.bf16.msra.mxu0 %v6891_v22 }
  0xdc   :  { %3611 = vmatpush.bf16.msra.mxu1 %v6955_v19  ;;  %v8840_v33 = vor.u32 %v7513_v46, %v5896_v37  ;;  %v8842_v34 = vor.u32 %v7529_v57, %v5956_v49  ;;  %v7554_v46 = vld [vmem:[%s12482_s0 + $0x400] sm:$0xf0]  ;;  %v6754_v22 = vld [vmem:[%s12481_s1 + $0x320] sm:$0xf]  ;;  %v7731_v37 = vld [vmem:[%s12481_s1 + $0x324] sm:$0xf0] }
  0xdd   :  { %v5962_v57 = vld [vmem:[%s12482_s0 + $0x340] sm:$0xf] }
  0xde   :  { %v3011_v58 = vpop.f32.mrf.mxu2  ;;  %12707 = vst [vmem:[#allocation37_spill] sm:$0xff] %v8840_v33 }
  0xdf   :  { %v3012_v9 = vadd.f32 %v3011_v58, %v8548_v56  ;;  %12708 = vst [vmem:[#allocation38_spill] sm:$0xff] %v8842_v34 }
  0xe0   :  { %v3084_v7 = vpop.f32.mrf.mxu3  ;;  %v2979_v26 = vpop.f32.mrf.mxu0 }
  0xe1   :  { %v8844_v20 = vadd.f32 %v3084_v7, %v3012_v9  ;;  %v2980_v30 = vadd.f32 %v2979_v26, %v8548_v56  ;;  %v3052_v12 = vpop.f32.mrf.mxu1  ;;  %v7538_v9 = vld [vmem:[%s12482_s0 + $0x380] sm:$0xf0] }
  0xe2   :  { %v7530_v7 = vld [vmem:[%s12482_s0 + $0x344] sm:$0xf] }
  0xe3   :  { %v8847_v29 = vadd.f32 %v3052_v12, %v2980_v30  ;;  %3134 = vmatmul.bf16.gmra.mxu2 %v8836_v61  ;;  %3275 = vmatmul.bf16.gmra.mxu0 %v8838_v47  ;;  %v6022_v30 = vld [vmem:[%s12482_s0 + $0x3c0] sm:$0xf]  ;;  %v6755_v12 = vor.u32 %v7731_v37, %v6754_v22  ;;  %v8892_v22 = vor.u32 %v7538_v9, %v5962_v57 }
  0xe4   :  { %3348 = vmatmul.bf16.gmra.mxu1 %v8840_v33  ;;  %v8890_v33 = vor.u32 %v7554_v46, %v6022_v30  ;;  %v6818_v37 = vld [vmem:[%s12481_s1 + $0x3a0] sm:$0xf] }
  0xe5   :  { %3207 = vmatmul.bf16.gmra.mxu3 %v8842_v34  ;;  %3393 = vmatpush.bf16.msra.mxu2 %v6755_v12  ;;  %12710 = vst [vmem:[#allocation40_spill] sm:$0xff] %v8892_v22  ;;  %v7747_v34 = vld [vmem:[%s12481_s1 + $0x3a4] sm:$0xf0]  ;;  %v6946_v9 = vld [vmem:[%s12481_s1 + $0x4a0] sm:$0xf] }
  0xe6   :  { %v3014_v19 = vpop.f32.mrf.mxu2  ;;  %12709 = vst [vmem:[#allocation39_spill] sm:$0xff] %v8890_v33  ;;  %v6819_v12 = vor.u32 %v7747_v34, %v6818_v37  ;;  %v6882_v34 = vld [vmem:[%s12481_s1 + $0x420] sm:$0xf] }
  0xe7   :  { %v3015_v58 = vadd.f32 %v3014_v19, %v8548_v56  ;;  %v5964_v19 = vld [vmem:[%s12482_s0 + $0x384] sm:$0xf0] }
  0xe8   :  { %v3087_v49 = vpop.f32.mrf.mxu3  ;;  %v2981_v63 = vpop.f32.mrf.mxu0  ;;  %v8900_v47 = vor.u32 %v7530_v7, %v5964_v19  ;;  %3466 = vmatpush.bf16.msra.mxu3 %v6819_v12  ;;  %v7779_v19 = vld [vmem:[%s12481_s1 + $0x4a4] sm:$0xf0] }
  0xe9   :  { %v8854_v25 = vadd.f32 %v3087_v49, %v3015_v58  ;;  %v2982_v26 = vadd.f32 %v2981_v63, %v8548_v56  ;;  %v3054_v28 = vpop.f32.mrf.mxu1  ;;  %v7546_v58 = vld [vmem:[%s12482_s0 + $0x3c4] sm:$0xf]  ;;  %v6024_v49 = vld [vmem:[%s12482_s0 + $0x404] sm:$0xf0] }
  0xea   :  { %12711 = vst [vmem:[#allocation41_spill] sm:$0xff] %v8900_v47  ;;  %v8902_v31 = vor.u32 %v7546_v58, %v6024_v49  ;;  %v6947_v49 = vor.u32 %v7779_v19, %v6946_v9  ;;  %v6030_v9 = vld [vmem:[%s12482_s0 + $0x3c8] sm:$0xf]  ;;  %v7547_v19 = vld [vmem:[%s12482_s0 + $0x3cc] sm:$0xf] }
  0xeb   :  { %v8860_v13 = vadd.f32 %v3054_v28, %v2982_v26 }
  0xec   :  { %12712 = vst [vmem:[#allocation42_spill] sm:$0xff] %v8902_v31  ;;  %3612 = vmatpush.bf16.msra.mxu1 %v6947_v49  ;;  %v7563_v49 = vld [vmem:[%s12482_s0 + $0x44c] sm:$0xf] }
  0xee   :  { %v3016_v63 = vpop.f32.mrf.mxu2 }
  0xef   :  { %v3017_v26 = vadd.f32 %v3016_v63, %v8548_v56 }
  0xf0   :  { %v3089_v28 = vpop.f32.mrf.mxu3  ;;  %v2984_v61 = vpop.f32.mrf.mxu0 }
  0xf1   :  { %v8904_v63 = vadd.f32 %v3089_v28, %v3017_v26  ;;  %v2985_v30 = vadd.f32 %v2984_v61, %v8548_v56  ;;  %v3057_v46 = vpop.f32.mrf.mxu1  ;;  %v7763_v61 = vld [vmem:[%s12481_s1 + $0x424] sm:$0xf0] }
  0xf2   :  { %v6883_v7 = vor.u32 %v7763_v61, %v6882_v34  ;;  %v6090_v34 = vld [vmem:[%s12482_s0 + $0x448] sm:$0xf]  ;;  %v7571_v61 = vld [vmem:[%s12482_s0 + $0x488] sm:$0xf0] }
  0xf3   :  { %v8907_v57 = vadd.f32 %v3057_v46, %v2985_v30  ;;  %3139 = vmatmul.bf16.gmra.mxu2 %v8890_v33  ;;  %3280 = vmatmul.bf16.gmra.mxu0 %v8892_v22 }
  0xf4   :  { %3353 = vmatmul.bf16.gmra.mxu1 %v8900_v47  ;;  %3539 = vmatpush.bf16.msra.mxu0 %v6883_v7  ;;  %v7555_v7 = vld [vmem:[%s12482_s0 + $0x408] sm:$0xf0] }
  0xf5   :  { %3212 = vmatmul.bf16.gmra.mxu3 %v8902_v31 }
  0xf6   :  { %v3019_v58 = vpop.f32.mrf.mxu2 }
  0xf7   :  { %v3020_v26 = vadd.f32 %v3019_v58, %v8548_v56  ;;  %v6032_v58 = vld [vmem:[%s12482_s0 + $0x40c] sm:$0xf0] }
  0xf8   :  { %v3092_v28 = vpop.f32.mrf.mxu3  ;;  %v2986_v37 = vpop.f32.mrf.mxu0  ;;  %v8959_v33 = vor.u32 %v7547_v19, %v6032_v58 }
  0xf9   :  { %v8926_v12 = vadd.f32 %v3092_v28, %v3020_v26  ;;  %v2987_v30 = vadd.f32 %v2986_v37, %v8548_v56  ;;  %v3059_v46 = vpop.f32.mrf.mxu1  ;;  %v6092_v26 = vld [vmem:[%s12482_s0 + $0x48c] sm:$0xf0] }
  0xfa   :  { %12715 = vst [vmem:[#allocation45_spill] sm:$0xff] %v8959_v33  ;;  %v8961_v22 = vor.u32 %v7563_v49, %v6092_v26  ;;  %v6158_v26 = vld [vmem:[%s12482_s0 + $0x4d0] sm:$0xf] }
  0xfb   :  { %v8929_v47 = vadd.f32 %v3059_v46, %v2987_v30  ;;  %v8955_v30 = vor.u32 %v7571_v61, %v6090_v34  ;;  %v8957_v46 = vor.u32 %v7555_v7, %v6030_v9  ;;  %v6746_v7 = vld [vmem:[%s12481_s1 + $0x310] sm:$0xf] }
  0xfc   :  { %12716 = vst [vmem:[#allocation46_spill] sm:$0xff] %v8961_v22 }
  0xfd   :  { %12713 = vst [vmem:[#allocation43_spill] sm:$0xff] %v8955_v30 }
  0xfe   :  { %v3021_v28 = vpop.f32.mrf.mxu2  ;;  %12714 = vst [vmem:[#allocation44_spill] sm:$0xff] %v8957_v46 }
  0xff   :  { %v7588_v28 = vld [vmem:[%s12482_s0 + $0x510] sm:$0xf0] }
 0x100   :  { %v3094_v37 = vpop.f32.mrf.mxu3  ;;  %v2989_v31 = vpop.f32.mrf.mxu0 }
 0x101   :  { %v2990_v23 = vadd.f32 %v2989_v31, %v8548_v56  ;;  %v3062_v45 = vpop.f32.mrf.mxu1  ;;  %v6810_v37 = vld [vmem:[%s12481_s1 + $0x390] sm:$0xf] }
 0x103   :  { %v8964_v1 = vadd.f32 %v3062_v45, %v2990_v23  ;;  %3144 = vmatmul.bf16.gmra.mxu2 %v8955_v30  ;;  %3285 = vmatmul.bf16.gmra.mxu0 %v8957_v46  ;;  %v7729_v45 = vld [vmem:[%s12481_s1 + $0x314] sm:$0xf0] }
 0x104   :  { %3358 = vmatmul.bf16.gmra.mxu1 %v8959_v33  ;;  %v6747_v31 = vor.u32 %v7729_v45, %v6746_v7  ;;  %v6100_v45 = vld [vmem:[%s12482_s0 + $0x494] sm:$0xf0] }
 0x105   :  { %3217 = vmatmul.bf16.gmra.mxu3 %v8961_v22  ;;  %v9011_v22 = vor.u32 %v7588_v28, %v6158_v26  ;;  %v6938_v26 = vld [vmem:[%s12481_s1 + $0x490] sm:$0xf] }
 0x106   :  { %v3105_v34 = vpop.f32.mrf.mxu2  ;;  %3394 = vmatpush.bf16.msra.mxu2 %v6747_v31  ;;  %v6160_v31 = vld [vmem:[%s12482_s0 + $0x514] sm:$0xf0] }
 0x107   :  { %v3106_v61 = vadd.f32 %v3105_v34, %v8589_v27  ;;  %v6098_v34 = vld [vmem:[%s12482_s0 + $0x450] sm:$0xf]  ;;  %12717 = vst [vmem:[#allocation47_spill] sm:$0xff] %v9011_v22 }
 0x108   :  { %v3178_v9 = vpop.f32.mrf.mxu3  ;;  %v2991_v23 = vpop.f32.mrf.mxu0 }
 0x109   :  { %v3179_v19 = vadd.f32 %v3178_v9, %v3106_v61  ;;  %v2992_v58 = vadd.f32 %v2991_v23, %v8548_v56  ;;  %v3064_v49 = vpop.f32.mrf.mxu1  ;;  %v7745_v56 = vld [vmem:[%s12481_s1 + $0x394] sm:$0xf0]  ;;  %v7572_v61 = vld [vmem:[%s12482_s0 + $0x490] sm:$0xf0] }
 0x10a   :  { %v7564_v9 = vld [vmem:[%s12482_s0 + $0x454] sm:$0xf]  ;;  %v6811_v7 = vor.u32 %v7745_v56, %v6810_v37  ;;  %v9013_v37 = vor.u32 %v7572_v61, %v6098_v34  ;;  %v7777_v34 = vld [vmem:[%s12481_s1 + $0x494] sm:$0xf0] }
 0x10b   :  { %v8981_v27 = vadd.f32 %v3064_v49, %v2992_v58  ;;  %v7580_v23 = vld [vmem:[%s12482_s0 + $0x4d4] sm:$0xf]  ;;  %v9015_v30 = vor.u32 %v7564_v9, %v6100_v45 }
 0x10c   :  { %3467 = vmatpush.bf16.msra.mxu3 %v6811_v7  ;;  %12718 = vst [vmem:[#allocation48_spill] sm:$0xff] %v9013_v37  ;;  %v9017_v46 = vor.u32 %v7580_v23, %v6160_v31  ;;  %v6226_v31 = vld [vmem:[%s12482_s0 + $0x558] sm:$0xf] }
 0x10d   :  { %12719 = vst [vmem:[#allocation49_spill] sm:$0xff] %v9015_v30 }
 0x10e   :  { %v3107_v58 = vpop.f32.mrf.mxu2  ;;  %12720 = vst [vmem:[#allocation50_spill] sm:$0xff] %v9017_v46 }
 0x10f   :  { %v3108_v49 = vadd.f32 %v3107_v58, %v8617_v60  ;;  %v7761_v60 = vld [vmem:[%s12481_s1 + $0x414] sm:$0xf0]  ;;  %v7605_v58 = vld [vmem:[%s12482_s0 + $0x598] sm:$0xf0] }
 0x110   :  { %v3180_v33 = vpop.f32.mrf.mxu3  ;;  %v3251_v56 = vpop.f32.mrf.mxu0  ;;  %v6875_v28 = vor.u32 %v7761_v60, %v6874_v39  ;;  %v7597_v60 = vld [vmem:[%s12482_s0 + $0x55c] sm:$0xf] }
 0x111   :  { %v3181_v2 = vadd.f32 %v3180_v33, %v3108_v49  ;;  %v3252_v50 = vadd.f32 %v3251_v56, %v3179_v19  ;;  %v3324_v18 = vpop.f32.mrf.mxu1  ;;  %v6939_v19 = vor.u32 %v7777_v34, %v6938_v26  ;;  %v6166_v49 = vld [vmem:[%s12482_s0 + $0x4d8] sm:$0xf]  ;;  %v6168_v56 = vld [vmem:[%s12482_s0 + $0x51c] sm:$0xf0] }
 0x112   :  { %3540 = vmatpush.bf16.msra.mxu0 %v6875_v28  ;;  %v6228_v26 = vld [vmem:[%s12482_s0 + $0x59c] sm:$0xf0] }
 0x113   :  { %v9031_v33 = vadd.f32 %v3324_v18, %v3252_v50  ;;  %3149 = vmatmul.bf16.gmra.mxu2 %v9011_v22  ;;  %3290 = vmatmul.bf16.gmra.mxu0 %v9013_v37 }
 0x114   :  { %3363 = vmatmul.bf16.gmra.mxu1 %v9015_v30 }
 0x115   :  { %3222 = vmatmul.bf16.gmra.mxu3 %v9017_v46  ;;  %3613 = vmatpush.bf16.msra.mxu1 %v6939_v19 }
 0x116   :  { %v3110_v61 = vpop.f32.mrf.mxu2 }
 0x117   :  { %v3111_v39 = vadd.f32 %v3110_v61, %v8655_v51  ;;  %v7589_v51 = vld [vmem:[%s12482_s0 + $0x518] sm:$0xf0]  ;;  %v9065_v61 = vor.u32 %v7605_v58, %v6226_v31  ;;  %v7727_v31 = vld [vmem:[%s12481_s1 + $0x304] sm:$0xf0]  ;;  %v6802_v58 = vld [vmem:[%s12481_s1 + $0x380] sm:$0xf] }
 0x118   :  { %v3183_v9 = vpop.f32.mrf.mxu3  ;;  %v3253_v7 = vpop.f32.mrf.mxu0 }
 0x119   :  { %v3184_v45 = vadd.f32 %v3183_v9, %v3111_v39  ;;  %v3254_v23 = vadd.f32 %v3253_v7, %v3181_v2  ;;  %v3326_v18 = vpop.f32.mrf.mxu1  ;;  %v7581_v2 = vld [vmem:[%s12482_s0 + $0x4dc] sm:$0xf]  ;;  %12721 = vst [vmem:[#allocation51_spill] sm:$0xff] %v9065_v61  ;;  %v9067_v39 = vor.u32 %v7589_v51, %v6166_v49 }
 0x11a   :  { %v9069_v7 = vor.u32 %v7581_v2, %v6168_v56 }
 0x11b   :  { %v9038_v50 = vadd.f32 %v3326_v18, %v3254_v23  ;;  %12722 = vst [vmem:[#allocation52_spill] sm:$0xff] %v9067_v39  ;;  %v9071_v23 = vor.u32 %v7597_v60, %v6228_v26 }
 0x11c   :  { %12723 = vst [vmem:[#allocation53_spill] sm:$0xff] %v9069_v7 }
 0x11d   :  { %12724 = vst [vmem:[#allocation54_spill] sm:$0xff] %v9071_v23 }
 0x11e   :  { %v3112_v28 = vpop.f32.mrf.mxu2 }
 0x11f   :  { %v3113_v34 = vadd.f32 %v3112_v28, %v8674_v24  ;;  %v6738_v24 = vld [vmem:[%s12481_s1 + $0x300] sm:$0xf] }
 0x120   :  { %v3185_v19 = vpop.f32.mrf.mxu3  ;;  %v3256_v9 = vpop.f32.mrf.mxu0 }
 0x121   :  { %v3186_v18 = vadd.f32 %v3185_v19, %v3113_v34  ;;  %v3257_v30 = vadd.f32 %v3256_v9, %v3184_v45  ;;  %v3329_v46 = vpop.f32.mrf.mxu1  ;;  %v6294_v34 = vld [vmem:[%s12482_s0 + $0x5e0] sm:$0xf]  ;;  %v7622_v19 = vld [vmem:[%s12482_s0 + $0x620] sm:$0xf0] }
 0x122   :  { %v6234_v9 = vld [vmem:[%s12482_s0 + $0x560] sm:$0xf] }
 0x123   :  { %v9073_v22 = vadd.f32 %v3329_v46, %v3257_v30  ;;  %3154 = vmatmul.bf16.gmra.mxu2 %v9065_v61  ;;  %3295 = vmatmul.bf16.gmra.mxu0 %v9067_v39  ;;  %v6739_v30 = vor.u32 %v7727_v31, %v6738_v24  ;;  %v7743_v46 = vld [vmem:[%s12481_s1 + $0x384] sm:$0xf0]  ;;  %v6930_v31 = vld [vmem:[%s12481_s1 + $0x480] sm:$0xf] }
 0x124   :  { %3368 = vmatmul.bf16.gmra.mxu1 %v9069_v7  ;;  %v6803_v45 = vor.u32 %v7743_v46, %v6802_v58  ;;  %v7606_v58 = vld [vmem:[%s12482_s0 + $0x5a0] sm:$0xf0] }
 0x125   :  { %3227 = vmatmul.bf16.gmra.mxu3 %v9071_v23  ;;  %3395 = vmatpush.bf16.msra.mxu2 %v6739_v30  ;;  %v7598_v30 = vld [vmem:[%s12482_s0 + $0x564] sm:$0xf]  ;;  %v9133_v7 = vor.u32 %v7606_v58, %v6234_v9 }
 0x126   :  { %v3115_v49 = vpop.f32.mrf.mxu2  ;;  %3468 = vmatpush.bf16.msra.mxu3 %v6803_v45  ;;  %v7775_v45 = vld [vmem:[%s12481_s1 + $0x484] sm:$0xf0] }
 0x127   :  { %v3116_v51 = vadd.f32 %v3115_v49, %v8715_v38  ;;  %v6866_v38 = vld [vmem:[%s12481_s1 + $0x400] sm:$0xf]  ;;  %v6236_v49 = vld [vmem:[%s12482_s0 + $0x5a4] sm:$0xf0]  ;;  %12726 = vst [vmem:[#allocation56_spill] sm:$0xff] %v9133_v7 }
 0x128   :  { %v3188_v2 = vpop.f32.mrf.mxu3  ;;  %v3258_v56 = vpop.f32.mrf.mxu0  ;;  %v9135_v61 = vor.u32 %v7598_v30, %v6236_v49  ;;  %v7050_v30 = vld [vmem:[%s12481_s1 + $0x570] sm:$0xf] }
 0x129   :  { %v3189_v60 = vadd.f32 %v3188_v2, %v3116_v51  ;;  %v3259_v26 = vadd.f32 %v3258_v56, %v3186_v18  ;;  %v3331_v28 = vpop.f32.mrf.mxu1  ;;  %v7759_v18 = vld [vmem:[%s12481_s1 + $0x404] sm:$0xf0]  ;;  %v7614_v51 = vld [vmem:[%s12482_s0 + $0x5e4] sm:$0xf]  ;;  %v6931_v56 = vor.u32 %v7775_v45, %v6930_v31  ;;  %v7623_v45 = vld [vmem:[%s12482_s0 + $0x628] sm:$0xf0] }
 0x12a   :  { %v6867_v46 = vor.u32 %v7759_v18, %v6866_v38  ;;  %v6296_v2 = vld [vmem:[%s12482_s0 + $0x624] sm:$0xf0]  ;;  %v9131_v18 = vor.u32 %v7622_v19, %v6294_v34  ;;  %12727 = vst [vmem:[#allocation57_spill] sm:$0xff] %v9135_v61 }
 0x12b   :  { %v9101_v24 = vadd.f32 %v3331_v28, %v3259_v26  ;;  %3614 = vmatpush.bf16.msra.mxu1 %v6931_v56  ;;  %v9137_v39 = vor.u32 %v7614_v51, %v6296_v2  ;;  %v7821_v2 = vld [vmem:[%s12481_s1 + $0x5f4] sm:$0xf0]  ;;  %v7615_v56 = vld [vmem:[%s12482_s0 + $0x5ec] sm:$0xf] }
 0x12c   :  { %3541 = vmatpush.bf16.msra.mxu0 %v6867_v46  ;;  %12725 = vst [vmem:[#allocation55_spill] sm:$0xff] %v9131_v18  ;;  %v7114_v46 = vld [vmem:[%s12481_s1 + $0x5f0] sm:$0xf] }
 0x12d   :  { %12728 = vst [vmem:[#allocation58_spill] sm:$0xff] %v9137_v39 }
 0x12e   :  { %v3117_v26 = vpop.f32.mrf.mxu2 }
 0x12f   :  { %v3118_v28 = vadd.f32 %v3117_v26, %v8737_v0  ;;  %v6304_v26 = vld [vmem:[%s12482_s0 + $0x62c] sm:$0xf0] }
 0x130   :  { %v3190_v38 = vpop.f32.mrf.mxu3  ;;  %v3261_v23 = vpop.f32.mrf.mxu0 }
 0x131   :  { %v3191_v37 = vadd.f32 %v3190_v38, %v3118_v28  ;;  %v3262_v40 = vadd.f32 %v3261_v23, %v3189_v60  ;;  %v3334_v10 = vpop.f32.mrf.mxu1  ;;  %v232_v23 = vld [vmem:[%s12482_s0 + $0x668] sm:$0xff]  ;;  %v7115_v28 = vor.u32 %v7821_v2, %v7114_v46  ;;  %v7853_v46 = vld [vmem:[%s12481_s1 + $0x6f4] sm:$0xf0] }
 0x132   :  { %v1144_v58 = vunpack.c.l.b16 %v232_v23  ;;  %v1145_v49 = vunpack.c.h.b16 %v232_v23 }
 0x133   :  { %v9139_v54 = vadd.f32 %v3334_v10, %v3262_v40  ;;  %3159 = vmatmul.bf16.gmra.mxu2 %v9131_v18  ;;  %3300 = vmatmul.bf16.gmra.mxu0 %v9133_v7 }
 0x134   :  { %3373 = vmatmul.bf16.gmra.mxu1 %v9135_v61  ;;  %3753 = vmatpush.bf16.msrb.mxu3 %v7115_v28 }
 0x135   :  { %3232 = vmatmul.bf16.gmra.mxu3 %v9137_v39 }
 0x136   :  { %v3120_v0 = vpop.f32.mrf.mxu2 }
 0x137   :  { %v3121_v34 = vadd.f32 %v3120_v0, %v8775_v48  ;;  %v7805_v48 = vld [vmem:[%s12481_s1 + $0x574] sm:$0xf0] }
 0x138   :  { %v3193_v19 = vpop.f32.mrf.mxu3  ;;  %v3263_v9 = vpop.f32.mrf.mxu0  ;;  %v7051_v51 = vor.u32 %v7805_v48, %v7050_v30 }
 0x139   :  { %v3194_v60 = vadd.f32 %v3193_v19, %v3121_v34  ;;  %v3264_v10 = vadd.f32 %v3263_v9, %v3191_v37  ;;  %v3336_v40 = vpop.f32.mrf.mxu1  ;;  %v6302_v37 = vld [vmem:[%s12482_s0 + $0x5e8] sm:$0xf]  ;;  %v9176_v19 = vpack.c.b16 %v1144_v58, %v1144_v58  ;;  %v7837_v58 = vld [vmem:[%s12481_s1 + $0x674] sm:$0xf0] }
 0x13a   :  { %3680 = vmatpush.bf16.msrb.mxu2 %v7051_v51  ;;  %v9178_v9 = vor.u32 %v7623_v45, %v6302_v37 }
 0x13b   :  { %v9149_v31 = vadd.f32 %v3336_v40, %v3264_v10  ;;  %12729 = vst [vmem:[#allocation59_spill] sm:$0xff] %v9176_v19  ;;  %v9180_v10 = vor.u32 %v7615_v56, %v6304_v26  ;;  %v9182_v40 = vpack.c.b16 %v1145_v49, %v1145_v49  ;;  %v233_v56 = vld [vmem:[%s12482_s0 + $0x670] sm:$0xff] }
 0x13c   :  { %12730 = vst [vmem:[#allocation60_spill] sm:$0xff] %v9178_v9 }
 0x13d   :  { %12731 = vst [vmem:[#allocation61_spill] sm:$0xff] %v9180_v10 }
 0x13e   :  { %v3122_v38 = vpop.f32.mrf.mxu2  ;;  %12732 = vst [vmem:[#allocation62_spill] sm:$0xff] %v9182_v40 }
 0x13f   :  { %v3123_v0 = vadd.f32 %v3122_v38, %v8806_v11  ;;  %v7178_v11 = vld [vmem:[%s12481_s1 + $0x670] sm:$0xf] }
 0x140   :  { %v3195_v34 = vpop.f32.mrf.mxu3  ;;  %v3266_v23 = vpop.f32.mrf.mxu0 }
 0x141   :  { %v3196_v30 = vadd.f32 %v3195_v34, %v3123_v0  ;;  %v3267_v48 = vadd.f32 %v3266_v23, %v3194_v60  ;;  %v3339_v61 = vpop.f32.mrf.mxu1  ;;  %v7179_v60 = vor.u32 %v7837_v58, %v7178_v11  ;;  %v1146_v34 = vunpack.c.l.b16 %v233_v56  ;;  %v7429_v11 = vld [vmem:[%s12482_s0 + $0x1c] sm:$0xf] }
 0x142   :  { %v1147_v23 = vunpack.c.h.b16 %v233_v56 }
 0x143   :  { %v9184_v39 = vadd.f32 %v3339_v61, %v3267_v48  ;;  %3164 = vmatmul.bf16.gmra.mxu2 %v9176_v19  ;;  %3305 = vmatmul.bf16.gmra.mxu0 %v9178_v9  ;;  %v7242_v61 = vld [vmem:[%s12481_s1 + $0x6f0] sm:$0xf]  ;;  %v5562_v48 = vld [vmem:[%s12482_s0 + $0x18] sm:$0xf] }
 0x144   :  { %3378 = vmatmul.bf16.gmra.mxu1 %v9180_v10  ;;  %v7243_v45 = vor.u32 %v7853_v46, %v7242_v61  ;;  %3826 = vmatpush.bf16.msrb.mxu0 %v7179_v60  ;;  %v9221_v46 = vpack.c.b16 %v1146_v34, %v1146_v34  ;;  %v7803_v34 = vld [vmem:[%s12481_s1 + $0x564] sm:$0xf0] }
 0x145   :  { %3237 = vmatmul.bf16.gmra.mxu3 %v9182_v40 }
 0x146   :  { %v3125_v37 = vpop.f32.mrf.mxu2  ;;  %3899 = vmatpush.bf16.msrb.mxu1 %v7243_v45  ;;  %12733 = vst [vmem:[#allocation63_spill] sm:$0xff] %v9221_v46 }
 0x147   :  { %v3126_v49 = vadd.f32 %v3125_v37, %v8847_v29  ;;  %v7437_v29 = vld [vmem:[%s12482_s0 + $0x58] sm:$0xf0] }
 0x148   :  { %v3198_v51 = vpop.f32.mrf.mxu3  ;;  %v3268_v2 = vpop.f32.mrf.mxu0  ;;  %v9223_v37 = vor.u32 %v7437_v29, %v5562_v48 }
 0x149   :  { %v3199_v26 = vadd.f32 %v3198_v51, %v3126_v49  ;;  %v3269_v28 = vadd.f32 %v3268_v2, %v3196_v30  ;;  %v3341_v38 = vpop.f32.mrf.mxu1  ;;  %v5564_v30 = vld [vmem:[%s12482_s0 + $0x5c] sm:$0xf0]  ;;  %v9225_v49 = vpack.c.b16 %v1147_v23, %v1147_v23 }
 0x14a   :  { %12734 = vst [vmem:[#allocation64_spill] sm:$0xff] %v9223_v37  ;;  %v9227_v51 = vor.u32 %v7429_v11, %v5564_v30  ;;  %v7106_v11 = vld [vmem:[%s12481_s1 + $0x5e0] sm:$0xf]  ;;  %v7819_v30 = vld [vmem:[%s12481_s1 + $0x5e4] sm:$0xf0] }
 0x14b   :  { %v9206_v0 = vadd.f32 %v3341_v38, %v3269_v28  ;;  %12735 = vst [vmem:[#allocation65_spill] sm:$0xff] %v9225_v49 }
 0x14c   :  { %12736 = vst [vmem:[#allocation66_spill] sm:$0xff] %v9227_v51 }
 0x14e   :  { %v3127_v58 = vpop.f32.mrf.mxu2 }
 0x14f   :  { %v3128_v61 = vadd.f32 %v3127_v58, %v8860_v13  ;;  %v7042_v13 = vld [vmem:[%s12481_s1 + $0x560] sm:$0xf] }
 0x150   :  { %v3200_v60 = vpop.f32.mrf.mxu3  ;;  %v3271_v45 = vpop.f32.mrf.mxu0 }
 0x151   :  { %v3201_v2 = vadd.f32 %v3200_v60, %v3128_v61  ;;  %v3272_v56 = vadd.f32 %v3271_v45, %v3199_v26  ;;  %v3344_v28 = vpop.f32.mrf.mxu1  ;;  %v7043_v26 = vor.u32 %v7803_v34, %v7042_v13  ;;  %v7107_v61 = vor.u32 %v7819_v30, %v7106_v11  ;;  %v5570_v13 = vld [vmem:[%s12482_s0 + $0x20] sm:$0xf]  ;;  %v7851_v30 = vld [vmem:[%s12481_s1 + $0x6e4] sm:$0xf0] }
 0x153   :  { %v9229_v38 = vadd.f32 %v3344_v28, %v3272_v56  ;;  %3310 = vmatmul.bf16.gmra.mxu0 %v9221_v46  ;;  %3396 = vmatmul.bf16.vlgmr.msra.gmra.mxu2 %v9223_v37  ;;  %v5630_v28 = vld [vmem:[%s12482_s0 + $0xa0] sm:$0xf] }
 0x154   :  { %3383 = vmatmul.bf16.gmra.mxu1 %v9225_v49  ;;  %3681 = vmatpush.bf16.msrb.mxu2 %v7043_v26  ;;  %v7835_v26 = vld [vmem:[%s12481_s1 + $0x664] sm:$0xf0] }
 0x155   :  { %3469 = vmatmul.bf16.vlgmr.msra.gmra.mxu3 %v9227_v51 }
 0x156   :  { %v3130_v23 = vpop.f32.mrf.mxu2  ;;  %3754 = vmatpush.bf16.msrb.mxu3 %v7107_v61  ;;  %v7446_v61 = vld [vmem:[%s12482_s0 + $0xa4] sm:$0xf] }
 0x157   :  { %v3131_v48 = vadd.f32 %v3130_v23, %v8907_v57  ;;  %v7454_v57 = vld [vmem:[%s12482_s0 + $0xe0] sm:$0xf0]  ;;  %v7234_v23 = vld [vmem:[%s12481_s1 + $0x6e0] sm:$0xf] }
 0x158   :  { %v3203_v29 = vpop.f32.mrf.mxu3  ;;  %v3273_v58 = vpop.f32.mrf.mxu0  ;;  %v9287_v10 = vor.u32 %v7454_v57, %v5630_v28 }
 0x159   :  { %v3204_v60 = vadd.f32 %v3203_v29, %v3131_v48  ;;  %v3274_v45 = vadd.f32 %v3273_v58, %v3201_v2  ;;  %v3346_v56 = vpop.f32.mrf.mxu1  ;;  %v7170_v2 = vld [vmem:[%s12481_s1 + $0x660] sm:$0xf]  ;;  %v7438_v48 = vld [vmem:[%s12482_s0 + $0x60] sm:$0xf0]  ;;  %v5572_v58 = vld [vmem:[%s12482_s0 + $0x64] sm:$0xf0] }
 0x15a   :  { %v7430_v29 = vld [vmem:[%s12482_s0 + $0x24] sm:$0xf]  ;;  %v7171_v11 = vor.u32 %v7835_v26, %v7170_v2  ;;  %12737 = vst [vmem:[#allocation67_spill] sm:$0xff] %v9287_v10  ;;  %v9289_v51 = vor.u32 %v7438_v48, %v5570_v13 }
 0x15b   :  { %v9257_v34 = vadd.f32 %v3346_v56, %v3274_v45  ;;  %v5632_v45 = vld [vmem:[%s12482_s0 + $0xe4] sm:$0xf0]  ;;  %v7235_v56 = vor.u32 %v7851_v30, %v7234_v23  ;;  %v9291_v46 = vor.u32 %v7430_v29, %v5572_v58  ;;  %v5640_v29 = vld [vmem:[%s12482_s0 + $0xec] sm:$0xf0] }
 0x15c   :  { %3827 = vmatpush.bf16.msrb.mxu0 %v7171_v11  ;;  %12738 = vst [vmem:[#allocation68_spill] sm:$0xff] %v9289_v51  ;;  %v9293_v40 = vor.u32 %v7446_v61, %v5632_v45  ;;  %v7463_v11 = vld [vmem:[%s12482_s0 + $0x12c] sm:$0xf]  ;;  %v5700_v30 = vld [vmem:[%s12482_s0 + $0x16c] sm:$0xf0] }
 0x15d   :  { %3900 = vmatpush.bf16.msrb.mxu1 %v7235_v56  ;;  %12739 = vst [vmem:[#allocation69_spill] sm:$0xff] %v9291_v46 }
 0x15e   :  { %v3132_v49 = vpop.f32.mrf.mxu2  ;;  %12740 = vst [vmem:[#allocation70_spill] sm:$0xff] %v9293_v40 }
 0x15f   :  { %v3133_v2 = vadd.f32 %v3132_v49, %v8929_v47 }
 0x160   :  { %v3205_v26 = vpop.f32.mrf.mxu3  ;;  %v3276_v37 = vpop.f32.mrf.mxu0 }
 0x161   :  { %v3206_v19 = vadd.f32 %v3205_v26, %v3133_v2  ;;  %v3277_v9 = vadd.f32 %v3276_v37, %v3204_v60  ;;  %v3349_v18 = vpop.f32.mrf.mxu1  ;;  %v5638_v60 = vld [vmem:[%s12482_s0 + $0xa8] sm:$0xf]  ;;  %v7034_v26 = vld [vmem:[%s12481_s1 + $0x550] sm:$0xf] }
 0x163   :  { %v9295_v7 = vadd.f32 %v3349_v18, %v3277_v9  ;;  %3401 = vmatmul.bf16.gmra.mxu2 %v9287_v10  ;;  %3542 = vmatmul.bf16.vlgmr.msra.gmra.mxu0 %v9289_v51  ;;  %v5698_v18 = vld [vmem:[%s12482_s0 + $0x128] sm:$0xf]  ;;  %v7471_v9 = vld [vmem:[%s12482_s0 + $0x168] sm:$0xf0] }
 0x164   :  { %3615 = vmatmul.bf16.vlgmr.msra.gmra.mxu1 %v9291_v46  ;;  %v9329_v56 = vor.u32 %v7471_v9, %v5698_v18 }
 0x165   :  { %3474 = vmatmul.bf16.gmra.mxu3 %v9293_v40 }
 0x166   :  { %v3135_v47 = vpop.f32.mrf.mxu2  ;;  %12741 = vst [vmem:[#allocation71_spill] sm:$0xff] %v9329_v56 }
 0x167   :  { %v3136_v49 = vadd.f32 %v3135_v47, %v8964_v1  ;;  %v7455_v1 = vld [vmem:[%s12482_s0 + $0xe8] sm:$0xf0]  ;;  %v7801_v47 = vld [vmem:[%s12481_s1 + $0x554] sm:$0xf0] }
 0x168   :  { %v3208_v28 = vpop.f32.mrf.mxu3  ;;  %v3278_v57 = vpop.f32.mrf.mxu0  ;;  %v9331_v2 = vor.u32 %v7455_v1, %v5638_v60  ;;  %v7098_v60 = vld [vmem:[%s12481_s1 + $0x5d0] sm:$0xf]  ;;  %v7817_v1 = vld [vmem:[%s12481_s1 + $0x5d4] sm:$0xf0] }
 0x169   :  { %v3209_v13 = vadd.f32 %v3208_v28, %v3136_v49  ;;  %v3279_v23 = vadd.f32 %v3278_v57, %v3206_v19  ;;  %v3351_v48 = vpop.f32.mrf.mxu1  ;;  %v7447_v19 = vld [vmem:[%s12482_s0 + $0xac] sm:$0xf]  ;;  %v9341_v57 = vor.u32 %v7463_v11, %v5700_v30 }
 0x16a   :  { %12742 = vst [vmem:[#allocation72_spill] sm:$0xff] %v9331_v2  ;;  %v9339_v28 = vor.u32 %v7447_v19, %v5640_v29 }
 0x16b   :  { %v9302_v37 = vadd.f32 %v3351_v48, %v3279_v23  ;;  %12744 = vst [vmem:[#allocation74_spill] sm:$0xff] %v9341_v57  ;;  %v7035_v23 = vor.u32 %v7801_v47, %v7034_v26  ;;  %v7162_v26 = vld [vmem:[%s12481_s1 + $0x650] sm:$0xf]  ;;  %v7833_v47 = vld [vmem:[%s12481_s1 + $0x654] sm:$0xf0] }
 0x16c   :  { %12743 = vst [vmem:[#allocation73_spill] sm:$0xff] %v9339_v28 }
 0x16d   :  { %3682 = vmatpush.bf16.msrb.mxu2 %v7035_v23  ;;  %v7163_v23 = vor.u32 %v7833_v47, %v7162_v26 }
 0x16e   :  { %v3137_v58 = vpop.f32.mrf.mxu2 }
 0x16f   :  { %v3138_v61 = vadd.f32 %v3137_v58, %v8981_v27  ;;  %3828 = vmatpush.bf16.msrb.mxu0 %v7163_v23 }
 0x170   :  { %v3210_v45 = vpop.f32.mrf.mxu3  ;;  %v3281_v49 = vpop.f32.mrf.mxu0 }
 0x171   :  { %v3211_v27 = vadd.f32 %v3210_v45, %v3138_v61  ;;  %v3282_v48 = vadd.f32 %v3281_v49, %v3209_v13  ;;  %v3354_v18 = vpop.f32.mrf.mxu1  ;;  %v7099_v13 = vor.u32 %v7817_v1, %v7098_v60  ;;  %v7226_v49 = vld [vmem:[%s12481_s1 + $0x6d0] sm:$0xf] }
 0x172   :  { %v5706_v1 = vld [vmem:[%s12482_s0 + $0x130] sm:$0xf] }
 0x173   :  { %v9343_v9 = vadd.f32 %v3354_v18, %v3282_v48  ;;  %3406 = vmatmul.bf16.gmra.mxu2 %v9329_v56  ;;  %3547 = vmatmul.bf16.gmra.mxu0 %v9331_v2  ;;  %v7488_v18 = vld [vmem:[%s12482_s0 + $0x1f0] sm:$0xf0] }
 0x174   :  { %3620 = vmatmul.bf16.gmra.mxu1 %v9339_v28  ;;  %3755 = vmatpush.bf16.msrb.mxu3 %v7099_v13  ;;  %v7472_v13 = vld [vmem:[%s12482_s0 + $0x170] sm:$0xf0] }
 0x175   :  { %3479 = vmatmul.bf16.gmra.mxu3 %v9341_v57 }
 0x176   :  { %v3140_v19 = vpop.f32.mrf.mxu2 }
 0x177   :  { %v3141_v29 = vadd.f32 %v3140_v19, %v8602_v35  ;;  %v7849_v35 = vld [vmem:[%s12481_s1 + $0x6d4] sm:$0xf0]  ;;  %v7464_v19 = vld [vmem:[%s12482_s0 + $0x134] sm:$0xf] }
 0x178   :  { %v3213_v11 = vpop.f32.mrf.mxu3  ;;  %v3283_v30 = vpop.f32.mrf.mxu0  ;;  %v7227_v60 = vor.u32 %v7849_v35, %v7226_v49  ;;  %v9397_v49 = vor.u32 %v7472_v13, %v5706_v1 }
 0x179   :  { %v3214_v58 = vadd.f32 %v3213_v11, %v3141_v29  ;;  %v3284_v61 = vadd.f32 %v3283_v30, %v3211_v27  ;;  %v3356_v45 = vpop.f32.mrf.mxu1  ;;  %v5766_v27 = vld [vmem:[%s12482_s0 + $0x1b0] sm:$0xf]  ;;  %v5708_v29 = vld [vmem:[%s12482_s0 + $0x174] sm:$0xf0]  ;;  %v7480_v11 = vld [vmem:[%s12482_s0 + $0x1b4] sm:$0xf] }
 0x17a   :  { %v5768_v30 = vld [vmem:[%s12482_s0 + $0x1f4] sm:$0xf0]  ;;  %3901 = vmatpush.bf16.msrb.mxu1 %v7227_v60  ;;  %v9395_v47 = vor.u32 %v7488_v18, %v5766_v27  ;;  %12746 = vst [vmem:[#allocation76_spill] sm:$0xff] %v9397_v49  ;;  %v9399_v35 = vor.u32 %v7464_v19, %v5708_v29 }
 0x17b   :  { %v9368_v48 = vadd.f32 %v3356_v45, %v3284_v61  ;;  %v9401_v28 = vor.u32 %v7480_v11, %v5768_v30  ;;  %v7090_v11 = vld [vmem:[%s12481_s1 + $0x5c0] sm:$0xf]  ;;  %v7489_v30 = vld [vmem:[%s12482_s0 + $0x1f8] sm:$0xf0] }
 0x17c   :  { %12745 = vst [vmem:[#allocation75_spill] sm:$0xff] %v9395_v47 }
 0x17d   :  { %12747 = vst [vmem:[#allocation77_spill] sm:$0xff] %v9399_v35 }
 0x17e   :  { %v3142_v61 = vpop.f32.mrf.mxu2  ;;  %12748 = vst [vmem:[#allocation78_spill] sm:$0xff] %v9401_v28 }
 0x17f   :  { %v3143_v45 = vadd.f32 %v3142_v61, %v8652_v36  ;;  %v7481_v61 = vld [vmem:[%s12482_s0 + $0x1bc] sm:$0xf] }
 0x180   :  { %v3215_v26 = vpop.f32.mrf.mxu3  ;;  %v3286_v23 = vpop.f32.mrf.mxu0 }
 0x181   :  { %v3216_v46 = vadd.f32 %v3215_v26, %v3143_v45  ;;  %v3287_v57 = vadd.f32 %v3286_v23, %v3214_v58  ;;  %v3359_v56 = vpop.f32.mrf.mxu1  ;;  %v5774_v58 = vld [vmem:[%s12482_s0 + $0x1b8] sm:$0xf]  ;;  %v7815_v26 = vld [vmem:[%s12481_s1 + $0x5c4] sm:$0xf0]  ;;  %v5776_v23 = vld [vmem:[%s12482_s0 + $0x1fc] sm:$0xf0] }
 0x183   :  { %v9403_v2 = vadd.f32 %v3359_v56, %v3287_v57  ;;  %3411 = vmatmul.bf16.gmra.mxu2 %v9395_v47  ;;  %3552 = vmatmul.bf16.gmra.mxu0 %v9397_v49  ;;  %v5834_v56 = vld [vmem:[%s12482_s0 + $0x238] sm:$0xf]  ;;  %v7505_v57 = vld [vmem:[%s12482_s0 + $0x278] sm:$0xf0] }
 0x184   :  { %3625 = vmatmul.bf16.gmra.mxu1 %v9399_v35 }
 0x185   :  { %3484 = vmatmul.bf16.gmra.mxu3 %v9401_v28  ;;  %v9453_v28 = vor.u32 %v7481_v61, %v5776_v23 }
 0x186   :  { %v3145_v36 = vpop.f32.mrf.mxu2 }
 0x187   :  { %v3146_v27 = vadd.f32 %v3145_v36, %v8662_v62  ;;  %v7026_v62 = vld [vmem:[%s12481_s1 + $0x540] sm:$0xf]  ;;  %v7497_v36 = vld [vmem:[%s12482_s0 + $0x23c] sm:$0xf]  ;;  %12751 = vst [vmem:[#allocation81_spill] sm:$0xff] %v9453_v28 }
 0x188   :  { %v3218_v18 = vpop.f32.mrf.mxu3  ;;  %v3288_v60 = vpop.f32.mrf.mxu0 }
 0x189   :  { %v3219_v1 = vadd.f32 %v3218_v18, %v3146_v27  ;;  %v3289_v13 = vadd.f32 %v3288_v60, %v3216_v46  ;;  %v3361_v19 = vpop.f32.mrf.mxu1  ;;  %v7799_v46 = vld [vmem:[%s12481_s1 + $0x544] sm:$0xf0]  ;;  %v5836_v27 = vld [vmem:[%s12482_s0 + $0x27c] sm:$0xf0]  ;;  %v7091_v18 = vor.u32 %v7815_v26, %v7090_v11 }
 0x18a   :  { %v7027_v45 = vor.u32 %v7799_v46, %v7026_v62  ;;  %v9449_v62 = vor.u32 %v7505_v57, %v5834_v56  ;;  %v9451_v46 = vor.u32 %v7489_v30, %v5774_v58  ;;  %v9455_v47 = vor.u32 %v7497_v36, %v5836_v27  ;;  %v7831_v56 = vld [vmem:[%s12481_s1 + $0x644] sm:$0xf0]  ;;  %v7218_v57 = vld [vmem:[%s12481_s1 + $0x6c0] sm:$0xf]  ;;  %v7522_v27 = vld [vmem:[%s12482_s0 + $0x300] sm:$0xf0] }
 0x18b   :  { %v9419_v29 = vadd.f32 %v3361_v19, %v3289_v13  ;;  %3756 = vmatpush.bf16.msrb.mxu3 %v7091_v18  ;;  %v5902_v36 = vld [vmem:[%s12482_s0 + $0x2c0] sm:$0xf]  ;;  %v7506_v18 = vld [vmem:[%s12482_s0 + $0x280] sm:$0xf0] }
 0x18c   :  { %3683 = vmatpush.bf16.msrb.mxu2 %v7027_v45  ;;  %12749 = vst [vmem:[#allocation79_spill] sm:$0xff] %v9449_v62 }
 0x18d   :  { %12750 = vst [vmem:[#allocation80_spill] sm:$0xff] %v9451_v46 }
 0x18e   :  { %v3147_v60 = vpop.f32.mrf.mxu2  ;;  %12752 = vst [vmem:[#allocation82_spill] sm:$0xff] %v9455_v47 }
 0x18f   :  { %v3148_v13 = vadd.f32 %v3147_v60, %v8712_v21  ;;  %v7154_v21 = vld [vmem:[%s12481_s1 + $0x640] sm:$0xf]  ;;  %v5844_v60 = vld [vmem:[%s12482_s0 + $0x284] sm:$0xf0] }
 0x190   :  { %v3220_v19 = vpop.f32.mrf.mxu3  ;;  %v3291_v35 = vpop.f32.mrf.mxu0 }
 0x191   :  { %v3221_v49 = vadd.f32 %v3220_v19, %v3148_v13  ;;  %v3292_v40 = vadd.f32 %v3291_v35, %v3219_v1  ;;  %v3364_v10 = vpop.f32.mrf.mxu1  ;;  %v7514_v13 = vld [vmem:[%s12482_s0 + $0x2c4] sm:$0xf]  ;;  %v5904_v19 = vld [vmem:[%s12482_s0 + $0x304] sm:$0xf0] }
 0x193   :  { %v9457_v51 = vadd.f32 %v3364_v10, %v3292_v40  ;;  %3416 = vmatmul.bf16.gmra.mxu2 %v9449_v62  ;;  %3557 = vmatmul.bf16.gmra.mxu0 %v9451_v46  ;;  %v7155_v10 = vor.u32 %v7831_v56, %v7154_v21  ;;  %v7847_v40 = vld [vmem:[%s12481_s1 + $0x6c4] sm:$0xf0] }
 0x194   :  { %3630 = vmatmul.bf16.gmra.mxu1 %v9453_v28  ;;  %v7219_v35 = vor.u32 %v7847_v40, %v7218_v57 }
 0x195   :  { %3489 = vmatmul.bf16.gmra.mxu3 %v9455_v47  ;;  %3829 = vmatpush.bf16.msrb.mxu0 %v7155_v10  ;;  %v9503_v10 = vor.u32 %v7522_v27, %v5902_v36  ;;  %v7797_v36 = vld [vmem:[%s12481_s1 + $0x534] sm:$0xf0]  ;;  %v7082_v27 = vld [vmem:[%s12481_s1 + $0x5b0] sm:$0xf] }
 0x196   :  { %v3150_v1 = vpop.f32.mrf.mxu2  ;;  %3902 = vmatpush.bf16.msrb.mxu1 %v7219_v35 }
 0x197   :  { %v3151_v58 = vadd.f32 %v3150_v1, %v8734_v59  ;;  %v5842_v59 = vld [vmem:[%s12482_s0 + $0x240] sm:$0xf]  ;;  %12753 = vst [vmem:[#allocation83_spill] sm:$0xff] %v9503_v10 }
 0x198   :  { %v3223_v11 = vpop.f32.mrf.mxu3  ;;  %v3293_v30 = vpop.f32.mrf.mxu0  ;;  %v9505_v40 = vor.u32 %v7506_v18, %v5842_v59  ;;  %v7813_v59 = vld [vmem:[%s12481_s1 + $0x5b4] sm:$0xf0] }
 0x199   :  { %v3224_v61 = vadd.f32 %v3223_v11, %v3151_v58  ;;  %v3294_v45 = vadd.f32 %v3293_v30, %v3221_v49  ;;  %v3366_v26 = vpop.f32.mrf.mxu1  ;;  %v7498_v49 = vld [vmem:[%s12482_s0 + $0x244] sm:$0xf]  ;;  %v9509_v58 = vor.u32 %v7514_v13, %v5904_v19  ;;  %v7083_v18 = vor.u32 %v7813_v59, %v7082_v27  ;;  %v7515_v27 = vld [vmem:[%s12482_s0 + $0x2cc] sm:$0xf] }
 0x19a   :  { %12754 = vst [vmem:[#allocation84_spill] sm:$0xff] %v9505_v40  ;;  %v9507_v1 = vor.u32 %v7498_v49, %v5844_v60 }
 0x19b   :  { %v9476_v23 = vadd.f32 %v3366_v26, %v3294_v45  ;;  %12756 = vst [vmem:[#allocation86_spill] sm:$0xff] %v9509_v58  ;;  %3757 = vmatpush.bf16.msrb.mxu3 %v7083_v18  ;;  %v7845_v18 = vld [vmem:[%s12481_s1 + $0x6b4] sm:$0xf0] }
 0x19c   :  { %12755 = vst [vmem:[#allocation85_spill] sm:$0xff] %v9507_v1 }
 0x19e   :  { %v3152_v21 = vpop.f32.mrf.mxu2 }
 0x19f   :  { %v3153_v56 = vadd.f32 %v3152_v21, %v8772_v55  ;;  %v7018_v55 = vld [vmem:[%s12481_s1 + $0x530] sm:$0xf] }
 0x1a0   :  { %v3225_v57 = vpop.f32.mrf.mxu3  ;;  %v3296_v35 = vpop.f32.mrf.mxu0 }
 0x1a1   :  { %v3226_v11 = vadd.f32 %v3225_v57, %v3153_v56  ;;  %v3297_v30 = vadd.f32 %v3296_v35, %v3224_v61  ;;  %v3369_v45 = vpop.f32.mrf.mxu1  ;;  %v7019_v61 = vor.u32 %v7797_v36, %v7018_v55  ;;  %v5970_v35 = vld [vmem:[%s12482_s0 + $0x348] sm:$0xf]  ;;  %v7210_v36 = vld [vmem:[%s12481_s1 + $0x6b0] sm:$0xf] }
 0x1a3   :  { %v9511_v26 = vadd.f32 %v3369_v45, %v3297_v30  ;;  %3421 = vmatmul.bf16.gmra.mxu2 %v9503_v10  ;;  %3562 = vmatmul.bf16.gmra.mxu0 %v9505_v40  ;;  %v7539_v30 = vld [vmem:[%s12482_s0 + $0x388] sm:$0xf0]  ;;  %v5910_v45 = vld [vmem:[%s12482_s0 + $0x2c8] sm:$0xf] }
 0x1a4   :  { %3635 = vmatmul.bf16.gmra.mxu1 %v9507_v1  ;;  %3684 = vmatpush.bf16.msrb.mxu2 %v7019_v61  ;;  %v7523_v61 = vld [vmem:[%s12482_s0 + $0x308] sm:$0xf0] }
 0x1a5   :  { %3494 = vmatmul.bf16.gmra.mxu3 %v9509_v58  ;;  %v9571_v1 = vor.u32 %v7523_v61, %v5910_v45 }
 0x1a6   :  { %v3155_v49 = vpop.f32.mrf.mxu2 }
 0x1a7   :  { %v3156_v60 = vadd.f32 %v3155_v49, %v8794_v32  ;;  %v7146_v32 = vld [vmem:[%s12481_s1 + $0x630] sm:$0xf]  ;;  %12758 = vst [vmem:[#allocation88_spill] sm:$0xff] %v9571_v1 }
 0x1a8   :  { %v3228_v13 = vpop.f32.mrf.mxu3  ;;  %v3298_v19 = vpop.f32.mrf.mxu0  ;;  %v5912_v49 = vld [vmem:[%s12482_s0 + $0x30c] sm:$0xf0] }
 0x1a9   :  { %v3229_v21 = vadd.f32 %v3228_v13, %v3156_v60  ;;  %v3299_v56 = vadd.f32 %v3298_v19, %v3226_v11  ;;  %v3371_v57 = vpop.f32.mrf.mxu1  ;;  %v7829_v11 = vld [vmem:[%s12481_s1 + $0x634] sm:$0xf0]  ;;  %v7531_v60 = vld [vmem:[%s12482_s0 + $0x34c] sm:$0xf]  ;;  %v5972_v13 = vld [vmem:[%s12482_s0 + $0x38c] sm:$0xf0]  ;;  %v7211_v19 = vor.u32 %v7845_v18, %v7210_v36  ;;  %v9573_v58 = vor.u32 %v7515_v27, %v5912_v49 }
 0x1aa   :  { %v7147_v59 = vor.u32 %v7829_v11, %v7146_v32  ;;  %v9569_v11 = vor.u32 %v7539_v30, %v5970_v35  ;;  %v9575_v10 = vor.u32 %v7531_v60, %v5972_v13  ;;  %v7540_v18 = vld [vmem:[%s12482_s0 + $0x390] sm:$0xf0]  ;;  %v5980_v60 = vld [vmem:[%s12482_s0 + $0x394] sm:$0xf0] }
 0x1ab   :  { %v9539_v55 = vadd.f32 %v3371_v57, %v3299_v56  ;;  %3903 = vmatpush.bf16.msrb.mxu1 %v7211_v19  ;;  %12759 = vst [vmem:[#allocation89_spill] sm:$0xff] %v9573_v58  ;;  %v7532_v49 = vld [vmem:[%s12482_s0 + $0x354] sm:$0xf]  ;;  %v6040_v19 = vld [vmem:[%s12482_s0 + $0x414] sm:$0xf0] }
 0x1ac   :  { %3830 = vmatpush.bf16.msrb.mxu0 %v7147_v59  ;;  %12757 = vst [vmem:[#allocation87_spill] sm:$0xff] %v9569_v11  ;;  %v5978_v59 = vld [vmem:[%s12482_s0 + $0x350] sm:$0xf]  ;;  %v7548_v13 = vld [vmem:[%s12482_s0 + $0x3d4] sm:$0xf] }
 0x1ad   :  { %12760 = vst [vmem:[#allocation90_spill] sm:$0xff] %v9575_v10 }
 0x1ae   :  { %v3157_v56 = vpop.f32.mrf.mxu2 }
 0x1af   :  { %v3158_v57 = vadd.f32 %v3157_v56, %v8844_v20 }
 0x1b0   :  { %v3230_v32 = vpop.f32.mrf.mxu3  ;;  %v3301_v28 = vpop.f32.mrf.mxu0 }
 0x1b1   :  { %v3231_v40 = vadd.f32 %v3230_v32, %v3158_v57  ;;  %v3302_v47 = vadd.f32 %v3301_v28, %v3229_v21  ;;  %v3374_v62 = vpop.f32.mrf.mxu1  ;;  %v7010_v28 = vld [vmem:[%s12481_s1 + $0x520] sm:$0xf] }
 0x1b3   :  { %v9577_v46 = vadd.f32 %v3374_v62, %v3302_v47  ;;  %3426 = vmatmul.bf16.gmra.mxu2 %v9569_v11  ;;  %3567 = vmatmul.bf16.gmra.mxu0 %v9571_v1  ;;  %v7795_v47 = vld [vmem:[%s12481_s1 + $0x524] sm:$0xf0] }
 0x1b4   :  { %3640 = vmatmul.bf16.gmra.mxu1 %v9573_v58  ;;  %v7011_v62 = vor.u32 %v7795_v47, %v7010_v28  ;;  %v9629_v28 = vor.u32 %v7548_v13, %v6040_v19 }
 0x1b5   :  { %3499 = vmatmul.bf16.gmra.mxu3 %v9575_v10 }
 0x1b6   :  { %v3160_v20 = vpop.f32.mrf.mxu2  ;;  %3685 = vmatpush.bf16.msrb.mxu2 %v7011_v62  ;;  %12764 = vst [vmem:[#allocation94_spill] sm:$0xff] %v9629_v28 }
 0x1b7   :  { %v3161_v35 = vadd.f32 %v3160_v20, %v8854_v25  ;;  %v6038_v25 = vld [vmem:[%s12482_s0 + $0x3d0] sm:$0xf] }
 0x1b8   :  { %v3233_v30 = vpop.f32.mrf.mxu3  ;;  %v3303_v45 = vpop.f32.mrf.mxu0 }
 0x1b9   :  { %v3234_v36 = vadd.f32 %v3233_v30, %v3161_v35  ;;  %v3304_v61 = vadd.f32 %v3303_v45, %v3231_v40  ;;  %v3376_v27 = vpop.f32.mrf.mxu1  ;;  %v7556_v40 = vld [vmem:[%s12482_s0 + $0x410] sm:$0xf0]  ;;  %v9619_v35 = vor.u32 %v7540_v18, %v5978_v59  ;;  %v7074_v30 = vld [vmem:[%s12481_s1 + $0x5a0] sm:$0xf]  ;;  %v7811_v45 = vld [vmem:[%s12481_s1 + $0x5a4] sm:$0xf0] }
 0x1ba   :  { %v9617_v20 = vor.u32 %v7556_v40, %v6038_v25  ;;  %v7075_v47 = vor.u32 %v7811_v45, %v7074_v30  ;;  %v7138_v59 = vld [vmem:[%s12481_s1 + $0x620] sm:$0xf] }
 0x1bb   :  { %v9590_v21 = vadd.f32 %v3376_v27, %v3304_v61  ;;  %12762 = vst [vmem:[#allocation92_spill] sm:$0xff] %v9619_v35  ;;  %v9627_v27 = vor.u32 %v7532_v49, %v5980_v60  ;;  %v7202_v18 = vld [vmem:[%s12481_s1 + $0x6a0] sm:$0xf]  ;;  %v7843_v60 = vld [vmem:[%s12481_s1 + $0x6a4] sm:$0xf0] }
 0x1bc   :  { %12761 = vst [vmem:[#allocation91_spill] sm:$0xff] %v9617_v20  ;;  %3758 = vmatpush.bf16.msrb.mxu3 %v7075_v47  ;;  %v7203_v19 = vor.u32 %v7843_v60, %v7202_v18  ;;  %v7565_v18 = vld [vmem:[%s12482_s0 + $0x45c] sm:$0xf] }
 0x1bd   :  { %12763 = vst [vmem:[#allocation93_spill] sm:$0xff] %v9627_v27 }
 0x1be   :  { %v3162_v56 = vpop.f32.mrf.mxu2  ;;  %3904 = vmatpush.bf16.msrb.mxu1 %v7203_v19 }
 0x1bf   :  { %v3163_v57 = vadd.f32 %v3162_v56, %v8904_v63 }
 0x1c0   :  { %v3235_v32 = vpop.f32.mrf.mxu3  ;;  %v3306_v61 = vpop.f32.mrf.mxu0 }
 0x1c1   :  { %v3236_v63 = vadd.f32 %v3235_v32, %v3163_v57  ;;  %v3307_v62 = vadd.f32 %v3306_v61, %v3234_v36  ;;  %v3379_v25 = vpop.f32.mrf.mxu1  ;;  %v7827_v36 = vld [vmem:[%s12481_s1 + $0x624] sm:$0xf0] }
 0x1c2   :  { %v7139_v49 = vor.u32 %v7827_v36, %v7138_v59  ;;  %v7557_v59 = vld [vmem:[%s12482_s0 + $0x418] sm:$0xf0]  ;;  %v6048_v36 = vld [vmem:[%s12482_s0 + $0x41c] sm:$0xf0] }
 0x1c3   :  { %v9631_v40 = vadd.f32 %v3379_v25, %v3307_v62  ;;  %3431 = vmatmul.bf16.gmra.mxu2 %v9617_v20  ;;  %3572 = vmatmul.bf16.gmra.mxu0 %v9619_v35  ;;  %v6106_v62 = vld [vmem:[%s12482_s0 + $0x458] sm:$0xf]  ;;  %v7573_v25 = vld [vmem:[%s12482_s0 + $0x498] sm:$0xf0]  ;;  %v7130_v35 = vld [vmem:[%s12481_s1 + $0x610] sm:$0xf] }
 0x1c4   :  { %3645 = vmatmul.bf16.gmra.mxu1 %v9627_v27  ;;  %3831 = vmatpush.bf16.msrb.mxu0 %v7139_v49  ;;  %v6108_v49 = vld [vmem:[%s12482_s0 + $0x49c] sm:$0xf0]  ;;  %v9676_v19 = vor.u32 %v7573_v25, %v6106_v62 }
 0x1c5   :  { %3504 = vmatmul.bf16.gmra.mxu3 %v9629_v28 }
 0x1c6   :  { %v3165_v13 = vpop.f32.mrf.mxu2  ;;  %12765 = vst [vmem:[#allocation95_spill] sm:$0xff] %v9676_v19 }
 0x1c7   :  { %v3166_v56 = vadd.f32 %v3165_v13, %v8926_v12  ;;  %v6046_v12 = vld [vmem:[%s12482_s0 + $0x3d8] sm:$0xf] }
 0x1c8   :  { %v3238_v57 = vpop.f32.mrf.mxu3  ;;  %v3308_v32 = vpop.f32.mrf.mxu0 }
 0x1c9   :  { %v3239_v30 = vadd.f32 %v3238_v57, %v3166_v56  ;;  %v3309_v45 = vadd.f32 %v3308_v32, %v3236_v63  ;;  %v3381_v61 = vpop.f32.mrf.mxu1  ;;  %v7549_v63 = vld [vmem:[%s12482_s0 + $0x3dc] sm:$0xf]  ;;  %v9678_v56 = vor.u32 %v7557_v59, %v6046_v12  ;;  %v7002_v59 = vld [vmem:[%s12481_s1 + $0x510] sm:$0xf] }
 0x1ca   :  { %v9680_v32 = vor.u32 %v7549_v63, %v6048_v36 }
 0x1cb   :  { %v9650_v47 = vadd.f32 %v3381_v61, %v3309_v45  ;;  %12766 = vst [vmem:[#allocation96_spill] sm:$0xff] %v9678_v56  ;;  %v9682_v45 = vor.u32 %v7565_v18, %v6108_v49  ;;  %v6174_v49 = vld [vmem:[%s12482_s0 + $0x4e0] sm:$0xf] }
 0x1cc   :  { %12767 = vst [vmem:[#allocation97_spill] sm:$0xff] %v9680_v32 }
 0x1cd   :  { %12768 = vst [vmem:[#allocation98_spill] sm:$0xff] %v9682_v45 }
 0x1ce   :  { %v3167_v60 = vpop.f32.mrf.mxu2 }
 0x1cf   :  { %v7066_v60 = vld [vmem:[%s12481_s1 + $0x590] sm:$0xf] }
 0x1d0   :  { %v3240_v13 = vpop.f32.mrf.mxu3  ;;  %v3311_v57 = vpop.f32.mrf.mxu0 }
 0x1d1   :  { %v3312_v61 = vadd.f32 %v3311_v57, %v3239_v30  ;;  %v3384_v27 = vpop.f32.mrf.mxu1  ;;  %v7809_v13 = vld [vmem:[%s12481_s1 + $0x594] sm:$0xf0]  ;;  %v6114_v57 = vld [vmem:[%s12482_s0 + $0x460] sm:$0xf] }
 0x1d3   :  { %v9684_v58 = vadd.f32 %v3384_v27, %v3312_v61  ;;  %3436 = vmatmul.bf16.gmra.mxu2 %v9676_v19  ;;  %3577 = vmatmul.bf16.gmra.mxu0 %v9678_v56  ;;  %v7793_v27 = vld [vmem:[%s12481_s1 + $0x514] sm:$0xf0]  ;;  %v7574_v61 = vld [vmem:[%s12482_s0 + $0x4a0] sm:$0xf0] }
 0x1d4   :  { %3650 = vmatmul.bf16.gmra.mxu1 %v9680_v32  ;;  %v7003_v63 = vor.u32 %v7793_v27, %v7002_v59  ;;  %v7582_v59 = vld [vmem:[%s12482_s0 + $0x4e4] sm:$0xf]  ;;  %v6176_v27 = vld [vmem:[%s12482_s0 + $0x524] sm:$0xf0] }
 0x1d5   :  { %3509 = vmatmul.bf16.gmra.mxu3 %v9682_v45  ;;  %v9734_v19 = vor.u32 %v7582_v59, %v6176_v27 }
 0x1d6   :  { %v3397_v62 = vpop.f32.mrf.mxu2  ;;  %3686 = vmatpush.bf16.msrb.mxu2 %v7003_v63 }
 0x1d7   :  { %v3398_v25 = vadd.f32 %v3397_v62, %v9031_v33  ;;  %v7590_v33 = vld [vmem:[%s12482_s0 + $0x520] sm:$0xf0]  ;;  %12772 = vst [vmem:[#allocation102_spill] sm:$0xff] %v9734_v19 }
 0x1d8   :  { %v3470_v12 = vpop.f32.mrf.mxu3  ;;  %v3313_v30 = vpop.f32.mrf.mxu0  ;;  %v7566_v62 = vld [vmem:[%s12482_s0 + $0x464] sm:$0xf]  ;;  %v9728_v32 = vor.u32 %v7590_v33, %v6174_v49  ;;  %v7194_v49 = vld [vmem:[%s12481_s1 + $0x690] sm:$0xf] }
 0x1d9   :  { %v3471_v36 = vadd.f32 %v3470_v12, %v3398_v25  ;;  %v3386_v18 = vpop.f32.mrf.mxu1  ;;  %v7067_v25 = vor.u32 %v7809_v13, %v7066_v60  ;;  %v6116_v12 = vld [vmem:[%s12482_s0 + $0x4a4] sm:$0xf0]  ;;  %v9730_v60 = vor.u32 %v7574_v61, %v6114_v57  ;;  %v7841_v57 = vld [vmem:[%s12481_s1 + $0x694] sm:$0xf0] }
 0x1da   :  { %12769 = vst [vmem:[#allocation99_spill] sm:$0xff] %v9728_v32  ;;  %v9732_v45 = vor.u32 %v7566_v62, %v6116_v12 }
 0x1db   :  { %3759 = vmatpush.bf16.msrb.mxu3 %v7067_v25  ;;  %12770 = vst [vmem:[#allocation100_spill] sm:$0xff] %v9730_v60 }
 0x1dc   :  { %12771 = vst [vmem:[#allocation101_spill] sm:$0xff] %v9732_v45 }
 0x1de   :  { %v3399_v30 = vpop.f32.mrf.mxu2 }
 0x1df   :  { %v3400_v63 = vadd.f32 %v3399_v30, %v9038_v50  ;;  %v7825_v50 = vld [vmem:[%s12481_s1 + $0x614] sm:$0xf0]  ;;  %v6242_v30 = vld [vmem:[%s12482_s0 + $0x568] sm:$0xf] }
 0x1e0   :  { %v3472_v18 = vpop.f32.mrf.mxu3  ;;  %v3543_v13 = vpop.f32.mrf.mxu0  ;;  %v7131_v33 = vor.u32 %v7825_v50, %v7130_v35  ;;  %v7599_v50 = vld [vmem:[%s12482_s0 + $0x56c] sm:$0xf] }
 0x1e1   :  { %v3473_v56 = vadd.f32 %v3472_v18, %v3400_v63  ;;  %v3544_v28 = vadd.f32 %v3543_v13, %v3471_v36  ;;  %v3616_v20 = vpop.f32.mrf.mxu1  ;;  %v7195_v36 = vor.u32 %v7841_v57, %v7194_v49  ;;  %v7607_v63 = vld [vmem:[%s12482_s0 + $0x5a8] sm:$0xf0]  ;;  %v6182_v18 = vld [vmem:[%s12482_s0 + $0x4e8] sm:$0xf]  ;;  %v6184_v13 = vld [vmem:[%s12482_s0 + $0x52c] sm:$0xf0] }
 0x1e2   :  { %3832 = vmatpush.bf16.msrb.mxu0 %v7131_v33  ;;  %v6244_v49 = vld [vmem:[%s12482_s0 + $0x5ac] sm:$0xf0] }
 0x1e3   :  { %v9748_v61 = vadd.f32 %v3616_v20, %v3544_v28  ;;  %3441 = vmatmul.bf16.gmra.mxu2 %v9728_v32  ;;  %3582 = vmatmul.bf16.gmra.mxu0 %v9730_v60 }
 0x1e4   :  { %3655 = vmatmul.bf16.gmra.mxu1 %v9732_v45 }
 0x1e5   :  { %3514 = vmatmul.bf16.gmra.mxu3 %v9734_v19  ;;  %3905 = vmatpush.bf16.msrb.mxu1 %v7195_v36 }
 0x1e6   :  { %v3402_v62 = vpop.f32.mrf.mxu2 }
 0x1e7   :  { %v3403_v35 = vadd.f32 %v3402_v62, %v9073_v22  ;;  %v7591_v22 = vld [vmem:[%s12482_s0 + $0x528] sm:$0xf0]  ;;  %v9782_v62 = vor.u32 %v7607_v63, %v6242_v30  ;;  %v7791_v30 = vld [vmem:[%s12481_s1 + $0x504] sm:$0xf0]  ;;  %v7058_v63 = vld [vmem:[%s12481_s1 + $0x580] sm:$0xf] }
 0x1e8   :  { %v3475_v25 = vpop.f32.mrf.mxu3  ;;  %v3545_v12 = vpop.f32.mrf.mxu0 }
 0x1e9   :  { %v3476_v59 = vadd.f32 %v3475_v25, %v3403_v35  ;;  %v3546_v27 = vadd.f32 %v3545_v12, %v3473_v56  ;;  %v3618_v20 = vpop.f32.mrf.mxu1  ;;  %v7583_v56 = vld [vmem:[%s12482_s0 + $0x4ec] sm:$0xf]  ;;  %12773 = vst [vmem:[#allocation103_spill] sm:$0xff] %v9782_v62  ;;  %v9784_v35 = vor.u32 %v7591_v22, %v6182_v18 }
 0x1ea   :  { %v9786_v12 = vor.u32 %v7583_v56, %v6184_v13 }
 0x1eb   :  { %v9755_v28 = vadd.f32 %v3618_v20, %v3546_v27  ;;  %12774 = vst [vmem:[#allocation104_spill] sm:$0xff] %v9784_v35  ;;  %v9788_v27 = vor.u32 %v7599_v50, %v6244_v49 }
 0x1ec   :  { %12775 = vst [vmem:[#allocation105_spill] sm:$0xff] %v9786_v12 }
 0x1ed   :  { %12776 = vst [vmem:[#allocation106_spill] sm:$0xff] %v9788_v27 }
 0x1ee   :  { %v3404_v33 = vpop.f32.mrf.mxu2 }
 0x1ef   :  { %v3405_v57 = vadd.f32 %v3404_v33, %v9101_v24  ;;  %v6994_v24 = vld [vmem:[%s12481_s1 + $0x500] sm:$0xf] }
 0x1f0   :  { %v3477_v36 = vpop.f32.mrf.mxu3  ;;  %v3548_v25 = vpop.f32.mrf.mxu0 }
 0x1f1   :  { %v3478_v20 = vadd.f32 %v3477_v36, %v3405_v57  ;;  %v3549_v45 = vadd.f32 %v3548_v25, %v3476_v59  ;;  %v3621_v19 = vpop.f32.mrf.mxu1  ;;  %v6310_v57 = vld [vmem:[%s12482_s0 + $0x5f0] sm:$0xf]  ;;  %v7624_v36 = vld [vmem:[%s12482_s0 + $0x630] sm:$0xf0] }
 0x1f2   :  { %v6250_v25 = vld [vmem:[%s12482_s0 + $0x570] sm:$0xf] }
 0x1f3   :  { %v9790_v32 = vadd.f32 %v3621_v19, %v3549_v45  ;;  %3446 = vmatmul.bf16.gmra.mxu2 %v9782_v62  ;;  %3587 = vmatmul.bf16.gmra.mxu0 %v9784_v35  ;;  %v6995_v19 = vor.u32 %v7791_v30, %v6994_v24  ;;  %v7807_v45 = vld [vmem:[%s12481_s1 + $0x584] sm:$0xf0]  ;;  %v7186_v30 = vld [vmem:[%s12481_s1 + $0x680] sm:$0xf] }
 0x1f4   :  { %3660 = vmatmul.bf16.gmra.mxu1 %v9786_v12  ;;  %v7059_v59 = vor.u32 %v7807_v45, %v7058_v63  ;;  %v7608_v63 = vld [vmem:[%s12482_s0 + $0x5b0] sm:$0xf0] }
 0x1f5   :  { %3519 = vmatmul.bf16.gmra.mxu3 %v9788_v27  ;;  %3687 = vmatpush.bf16.msrb.mxu2 %v6995_v19  ;;  %v7600_v19 = vld [vmem:[%s12482_s0 + $0x574] sm:$0xf]  ;;  %v9850_v12 = vor.u32 %v7608_v63, %v6250_v25 }
 0x1f6   :  { %v3407_v18 = vpop.f32.mrf.mxu2  ;;  %3760 = vmatpush.bf16.msrb.mxu3 %v7059_v59  ;;  %v7839_v59 = vld [vmem:[%s12481_s1 + $0x684] sm:$0xf0] }
 0x1f7   :  { %v3408_v22 = vadd.f32 %v3407_v18, %v9139_v54  ;;  %v7122_v54 = vld [vmem:[%s12481_s1 + $0x600] sm:$0xf]  ;;  %v6252_v18 = vld [vmem:[%s12482_s0 + $0x5b4] sm:$0xf0]  ;;  %12778 = vst [vmem:[#allocation108_spill] sm:$0xff] %v9850_v12 }
 0x1f8   :  { %v3480_v56 = vpop.f32.mrf.mxu3  ;;  %v3550_v13 = vpop.f32.mrf.mxu0  ;;  %v9852_v62 = vor.u32 %v7600_v19, %v6252_v18  ;;  %v7306_v19 = vld [vmem:[%s12481_s1 + $0x770] sm:$0xf] }
 0x1f9   :  { %v3481_v50 = vadd.f32 %v3480_v56, %v3408_v22  ;;  %v3551_v49 = vadd.f32 %v3550_v13, %v3478_v20  ;;  %v3623_v33 = vpop.f32.mrf.mxu1  ;;  %v7823_v20 = vld [vmem:[%s12481_s1 + $0x604] sm:$0xf0]  ;;  %v7616_v22 = vld [vmem:[%s12482_s0 + $0x5f4] sm:$0xf]  ;;  %v6312_v56 = vld [vmem:[%s12482_s0 + $0x634] sm:$0xf0]  ;;  %v7187_v13 = vor.u32 %v7839_v59, %v7186_v30 }
 0x1fa   :  { %v7123_v45 = vor.u32 %v7823_v20, %v7122_v54  ;;  %v9848_v20 = vor.u32 %v7624_v36, %v6310_v57  ;;  %12779 = vst [vmem:[#allocation109_spill] sm:$0xff] %v9852_v62  ;;  %v9854_v35 = vor.u32 %v7616_v22, %v6312_v56  ;;  %v7625_v59 = vld [vmem:[%s12482_s0 + $0x638] sm:$0xf0]  ;;  %v7885_v56 = vld [vmem:[%s12481_s1 + $0x7f4] sm:$0xf0] }
 0x1fb   :  { %v9818_v24 = vadd.f32 %v3623_v33, %v3551_v49  ;;  %3906 = vmatpush.bf16.msrb.mxu1 %v7187_v13  ;;  %v7617_v13 = vld [vmem:[%s12482_s0 + $0x5fc] sm:$0xf] }
 0x1fc   :  { %3833 = vmatpush.bf16.msrb.mxu0 %v7123_v45  ;;  %12777 = vst [vmem:[#allocation107_spill] sm:$0xff] %v9848_v20  ;;  %v7370_v45 = vld [vmem:[%s12481_s1 + $0x7f0] sm:$0xf] }
 0x1fd   :  { %12780 = vst [vmem:[#allocation110_spill] sm:$0xff] %v9854_v35 }
 0x1fe   :  { %v3409_v49 = vpop.f32.mrf.mxu2 }
 0x1ff   :  { %v3410_v33 = vadd.f32 %v3409_v49, %v9149_v31  ;;  %v6320_v49 = vld [vmem:[%s12482_s0 + $0x63c] sm:$0xf0] }
 0x200   :  { %v3482_v54 = vpop.f32.mrf.mxu3  ;;  %v3553_v27 = vpop.f32.mrf.mxu0 }
 0x201   :  { %v3483_v60 = vadd.f32 %v3482_v54, %v3410_v33  ;;  %v3554_v10 = vadd.f32 %v3553_v27, %v3481_v50  ;;  %v3626_v11 = vpop.f32.mrf.mxu1  ;;  %v234_v27 = vld [vmem:[%s12482_s0 + $0x678] sm:$0xff]  ;;  %v7371_v33 = vor.u32 %v7885_v56, %v7370_v45 }
 0x202   :  { %v1148_v63 = vunpack.c.l.b16 %v234_v27  ;;  %v1149_v18 = vunpack.c.h.b16 %v234_v27 }
 0x203   :  { %v9856_v1 = vadd.f32 %v3626_v11, %v3554_v10  ;;  %3451 = vmatmul.bf16.gmra.mxu2 %v9848_v20  ;;  %3592 = vmatmul.bf16.gmra.mxu0 %v9850_v12 }
 0x204   :  { %3665 = vmatmul.bf16.gmra.mxu1 %v9852_v62  ;;  %4045 = vmatpush.bf16.msra.mxu3 %v7371_v33 }
 0x205   :  { %3524 = vmatmul.bf16.gmra.mxu3 %v9854_v35 }
 0x206   :  { %v3412_v31 = vpop.f32.mrf.mxu2 }
 0x207   :  { %v3413_v57 = vadd.f32 %v3412_v31, %v9184_v39  ;;  %v7869_v39 = vld [vmem:[%s12481_s1 + $0x774] sm:$0xf0] }
 0x208   :  { %v3485_v36 = vpop.f32.mrf.mxu3  ;;  %v3555_v25 = vpop.f32.mrf.mxu0  ;;  %v7307_v22 = vor.u32 %v7869_v39, %v7306_v19 }
 0x209   :  { %v3486_v50 = vadd.f32 %v3485_v36, %v3413_v57  ;;  %v3556_v10 = vadd.f32 %v3555_v25, %v3483_v60  ;;  %v3628_v11 = vpop.f32.mrf.mxu1  ;;  %v6318_v60 = vld [vmem:[%s12482_s0 + $0x5f8] sm:$0xf]  ;;  %v9893_v36 = vpack.c.b16 %v1148_v63, %v1148_v63  ;;  %v7644_v63 = vld [vmem:[%s12481_s1 + $0x74] sm:$0xf] }
 0x20a   :  { %3972 = vmatpush.bf16.msra.mxu2 %v7307_v22  ;;  %v9895_v25 = vor.u32 %v7625_v59, %v6318_v60 }
 0x20b   :  { %v9866_v30 = vadd.f32 %v3628_v11, %v3556_v10  ;;  %12781 = vst [vmem:[#allocation111_spill] sm:$0xff] %v9893_v36  ;;  %v9897_v10 = vor.u32 %v7617_v13, %v6320_v49  ;;  %v9899_v11 = vpack.c.b16 %v1149_v18, %v1149_v18  ;;  %v235_v13 = vld [vmem:[%s12482_s0 + $0x680] sm:$0xff] }
 0x20c   :  { %12782 = vst [vmem:[#allocation112_spill] sm:$0xff] %v9895_v25 }
 0x20d   :  { %12783 = vst [vmem:[#allocation113_spill] sm:$0xff] %v9897_v10 }
 0x20e   :  { %v3414_v54 = vpop.f32.mrf.mxu2  ;;  %12784 = vst [vmem:[#allocation114_spill] sm:$0xff] %v9899_v11 }
 0x20f   :  { %v3415_v31 = vadd.f32 %v3414_v54, %v9206_v0  ;;  %v502_v0 = vld [vmem:[%s12481_s1 + $0x830] sm:$0xff] }
 0x210   :  { %v3487_v57 = vpop.f32.mrf.mxu3  ;;  %v3558_v27 = vpop.f32.mrf.mxu0 }
 0x211   :  { %v3488_v19 = vadd.f32 %v3487_v57, %v3415_v31  ;;  %v3559_v39 = vadd.f32 %v3558_v27, %v3486_v50  ;;  %v3631_v62 = vpop.f32.mrf.mxu1  ;;  %v2375_v50 = vunpack.c.l.b16 %v502_v0  ;;  %v1150_v27 = vunpack.c.l.b16 %v235_v13  ;;  %v7439_v0 = vld [vmem:[%s12482_s0 + $0x68] sm:$0xf0] }
 0x213   :  { %v9901_v35 = vadd.f32 %v3631_v62, %v3559_v39  ;;  %3456 = vmatmul.bf16.gmra.mxu2 %v9893_v36  ;;  %3597 = vmatmul.bf16.gmra.mxu0 %v9895_v25  ;;  %v6412_v62 = vld [vmem:[%s12481_s1 + $0x78] sm:$0xf0]  ;;  %v2639_v22 = vpack.c.b16 %v2375_v50, %v2375_v50  ;;  %v1151_v39 = vunpack.c.h.b16 %v235_v13 }
 0x214   :  { %3670 = vmatmul.bf16.gmra.mxu1 %v9897_v10  ;;  %v6415_v45 = vor.u32 %v7644_v63, %v6412_v62  ;;  %v5580_v63 = vld [vmem:[%s12482_s0 + $0x6c] sm:$0xf0] }
 0x215   :  { %3529 = vmatmul.bf16.gmra.mxu3 %v9899_v11  ;;  %v2945_v31 = vsel %vm2943_vm0, %v2639_v22, 0  ;;  %v9940_v22 = vpack.c.b16 %v1151_v39, %v1151_v39 }
 0x216   :  { %v3417_v60 = vpop.f32.mrf.mxu2  ;;  %4191 = vmatpush.bf16.msra.mxu1 %v6415_v45  ;;  %4122 = vmatpush.bf16.msra.mxu0 %v2945_v31 }
 0x217   :  { %v3418_v59 = vadd.f32 %v3417_v60, %v9229_v38  ;;  %v5578_v38 = vld [vmem:[%s12482_s0 + $0x28] sm:$0xf]  ;;  %v9936_v60 = vpack.c.b16 %v1150_v27, %v1150_v27  ;;  %12787 = vst [vmem:[#allocation117_spill] sm:$0xff] %v9940_v22 }
 0x218   :  { %v3490_v18 = vpop.f32.mrf.mxu3  ;;  %v3560_v56 = vpop.f32.mrf.mxu0  ;;  %v7867_v27 = vld [vmem:[%s12481_s1 + $0x764] sm:$0xf0] }
 0x219   :  { %v3491_v49 = vadd.f32 %v3490_v18, %v3418_v59  ;;  %v3561_v33 = vadd.f32 %v3560_v56, %v3488_v19  ;;  %v3633_v54 = vpop.f32.mrf.mxu1  ;;  %v7431_v19 = vld [vmem:[%s12482_s0 + $0x2c] sm:$0xf]  ;;  %12785 = vst [vmem:[#allocation115_spill] sm:$0xff] %v9936_v60  ;;  %v9938_v59 = vor.u32 %v7439_v0, %v5578_v38 }
 0x21a   :  { %v9942_v56 = vor.u32 %v7431_v19, %v5580_v63  ;;  %v7362_v19 = vld [vmem:[%s12481_s1 + $0x7e0] sm:$0xf]  ;;  %v7883_v63 = vld [vmem:[%s12481_s1 + $0x7e4] sm:$0xf0] }
 0x21b   :  { %v9921_v57 = vadd.f32 %v3633_v54, %v3561_v33  ;;  %12786 = vst [vmem:[#allocation116_spill] sm:$0xff] %v9938_v59 }
 0x21c   :  { %12788 = vst [vmem:[#allocation118_spill] sm:$0xff] %v9942_v56 }
 0x21e   :  { %v3419_v62 = vpop.f32.mrf.mxu2 }
 0x21f   :  { %v3420_v50 = vadd.f32 %v3419_v62, %v9257_v34  ;;  %v7298_v34 = vld [vmem:[%s12481_s1 + $0x760] sm:$0xf] }
 0x220   :  { %v3492_v45 = vpop.f32.mrf.mxu3  ;;  %v3563_v18 = vpop.f32.mrf.mxu0 }
 0x221   :  { %v3493_v13 = vadd.f32 %v3492_v45, %v3420_v50  ;;  %v3564_v33 = vadd.f32 %v3563_v18, %v3491_v49  ;;  %v3636_v54 = vpop.f32.mrf.mxu1  ;;  %v7299_v49 = vor.u32 %v7867_v27, %v7298_v34  ;;  %v7363_v50 = vor.u32 %v7883_v63, %v7362_v19  ;;  %v7456_v34 = vld [vmem:[%s12482_s0 + $0xf0] sm:$0xf0]  ;;  %v7642_v27 = vld [vmem:[%s12481_s1 + $0x64] sm:$0xf]  ;;  %v5588_v19 = vld [vmem:[%s12482_s0 + $0x74] sm:$0xf0] }
 0x222   :  { %v7448_v63 = vld [vmem:[%s12482_s0 + $0xb4] sm:$0xf] }
 0x223   :  { %v9944_v31 = vadd.f32 %v3636_v54, %v3564_v33  ;;  %3602 = vmatmul.bf16.gmra.mxu0 %v9936_v60  ;;  %3688 = vmatmul.bf16.vlgmr.msrb.gmra.mxu2 %v9938_v59  ;;  %v5646_v54 = vld [vmem:[%s12482_s0 + $0xb0] sm:$0xf] }
 0x224   :  { %3675 = vmatmul.bf16.gmra.mxu1 %v9940_v22  ;;  %3973 = vmatpush.bf16.msra.mxu2 %v7299_v49  ;;  %v5586_v49 = vld [vmem:[%s12482_s0 + $0x30] sm:$0xf]  ;;  %v9996_v22 = vor.u32 %v7456_v34, %v5646_v54 }
 0x225   :  { %3761 = vmatmul.bf16.vlgmr.msrb.gmra.mxu3 %v9942_v56 }
 0x226   :  { %v3422_v39 = vpop.f32.mrf.mxu2  ;;  %4046 = vmatpush.bf16.msra.mxu3 %v7363_v50  ;;  %12789 = vst [vmem:[#allocation119_spill] sm:$0xff] %v9996_v22 }
 0x227   :  { %v3423_v38 = vadd.f32 %v3422_v39, %v9295_v7  ;;  %v7440_v39 = vld [vmem:[%s12482_s0 + $0x70] sm:$0xf0] }
 0x228   :  { %v3495_v0 = vpop.f32.mrf.mxu3  ;;  %v3565_v62 = vpop.f32.mrf.mxu0 }
 0x229   :  { %v3496_v45 = vadd.f32 %v3495_v0, %v3423_v38  ;;  %v3566_v18 = vadd.f32 %v3565_v62, %v3493_v13  ;;  %v3638_v33 = vpop.f32.mrf.mxu1  ;;  %v6404_v13 = vld [vmem:[%s12481_s1 + $0x68] sm:$0xf0]  ;;  %v7432_v38 = vld [vmem:[%s12482_s0 + $0x34] sm:$0xf]  ;;  %v5648_v62 = vld [vmem:[%s12482_s0 + $0xf4] sm:$0xf0] }
 0x22a   :  { %v6407_v0 = vor.u32 %v7642_v27, %v6404_v13  ;;  %v9998_v27 = vor.u32 %v7440_v39, %v5586_v49  ;;  %v10000_v10 = vor.u32 %v7432_v38, %v5588_v19  ;;  %v10002_v56 = vor.u32 %v7448_v63, %v5648_v62  ;;  %v5654_v19 = vld [vmem:[%s12482_s0 + $0xb8] sm:$0xf]  ;;  %v5656_v63 = vld [vmem:[%s12482_s0 + $0xfc] sm:$0xf0]  ;;  %v7465_v62 = vld [vmem:[%s12482_s0 + $0x13c] sm:$0xf] }
 0x22b   :  { %v9966_v7 = vadd.f32 %v3638_v33, %v3566_v18 }
 0x22c   :  { %4192 = vmatpush.bf16.msra.mxu1 %v6407_v0  ;;  %12790 = vst [vmem:[#allocation120_spill] sm:$0xff] %v9998_v27 }
 0x22d   :  { %12791 = vst [vmem:[#allocation121_spill] sm:$0xff] %v10000_v10 }
 0x22e   :  { %v3424_v50 = vpop.f32.mrf.mxu2  ;;  %12792 = vst [vmem:[#allocation122_spill] sm:$0xff] %v10002_v56 }
 0x22f   :  { %v3425_v18 = vadd.f32 %v3424_v50, %v9302_v37  ;;  %v5716_v50 = vld [vmem:[%s12482_s0 + $0x17c] sm:$0xf0] }
 0x230   :  { %v3497_v33 = vpop.f32.mrf.mxu3  ;;  %v3568_v13 = vpop.f32.mrf.mxu0 }
 0x231   :  { %v3498_v59 = vadd.f32 %v3497_v33, %v3425_v18  ;;  %v3569_v60 = vadd.f32 %v3568_v13, %v3496_v45  ;;  %v3641_v11 = vpop.f32.mrf.mxu1 }
 0x233   :  { %v10004_v36 = vadd.f32 %v3641_v11, %v3569_v60  ;;  %3693 = vmatmul.bf16.gmra.mxu2 %v9996_v22  ;;  %3834 = vmatmul.bf16.vlgmr.msrb.gmra.mxu0 %v9998_v27  ;;  %v5714_v11 = vld [vmem:[%s12482_s0 + $0x138] sm:$0xf]  ;;  %v7473_v60 = vld [vmem:[%s12482_s0 + $0x178] sm:$0xf0] }
 0x234   :  { %3907 = vmatmul.bf16.vlgmr.msrb.gmra.mxu1 %v10000_v10  ;;  %v10050_v10 = vor.u32 %v7465_v62, %v5716_v50 }
 0x235   :  { %3766 = vmatmul.bf16.gmra.mxu3 %v10002_v56 }
 0x236   :  { %v3427_v37 = vpop.f32.mrf.mxu2  ;;  %12796 = vst [vmem:[#allocation126_spill] sm:$0xff] %v10050_v10 }
 0x237   :  { %v3428_v54 = vadd.f32 %v3427_v37, %v9343_v9  ;;  %v7457_v9 = vld [vmem:[%s12482_s0 + $0xf8] sm:$0xf0]  ;;  %v10038_v37 = vor.u32 %v7473_v60, %v5714_v11 }
 0x238   :  { %v3500_v34 = vpop.f32.mrf.mxu3  ;;  %v3570_v49 = vpop.f32.mrf.mxu0 }
 0x239   :  { %v3501_v39 = vadd.f32 %v3500_v34, %v3428_v54  ;;  %v3571_v38 = vadd.f32 %v3570_v49, %v3498_v59  ;;  %v3643_v0 = vpop.f32.mrf.mxu1  ;;  %v7449_v59 = vld [vmem:[%s12482_s0 + $0xbc] sm:$0xf]  ;;  %12793 = vst [vmem:[#allocation123_spill] sm:$0xff] %v10038_v37  ;;  %v10040_v54 = vor.u32 %v7457_v9, %v5654_v19  ;;  %v7290_v34 = vld [vmem:[%s12481_s1 + $0x750] sm:$0xf] }
 0x23a   :  { %v7865_v49 = vld [vmem:[%s12481_s1 + $0x754] sm:$0xf0]  ;;  %v7354_v19 = vld [vmem:[%s12481_s1 + $0x7d0] sm:$0xf] }
 0x23b   :  { %v10011_v45 = vadd.f32 %v3643_v0, %v3571_v38  ;;  %12794 = vst [vmem:[#allocation124_spill] sm:$0xff] %v10040_v54  ;;  %v10048_v0 = vor.u32 %v7449_v59, %v5656_v63  ;;  %v7291_v56 = vor.u32 %v7865_v49, %v7290_v34  ;;  %v7881_v9 = vld [vmem:[%s12481_s1 + $0x7d4] sm:$0xf0]  ;;  %v7394_v34 = vld [vmem:[%s12481_s1 + $0x820] sm:$0xf] }
 0x23c   :  { %v7891_v49 = vld [vmem:[%s12481_s1 + $0x824] sm:$0xf0] }
 0x23d   :  { %12795 = vst [vmem:[#allocation125_spill] sm:$0xff] %v10048_v0  ;;  %3974 = vmatpush.bf16.msra.mxu2 %v7291_v56 }
 0x23e   :  { %v3429_v18 = vpop.f32.mrf.mxu2 }
 0x23f   :  { %v3430_v33 = vadd.f32 %v3429_v18, %v9368_v48 }
 0x240   :  { %v3502_v13 = vpop.f32.mrf.mxu3  ;;  %v3573_v38 = vpop.f32.mrf.mxu0 }
 0x241   :  { %v3503_v48 = vadd.f32 %v3502_v13, %v3430_v33  ;;  %v3574_v18 = vadd.f32 %v3573_v38, %v3501_v39  ;;  %v3646_v11 = vpop.f32.mrf.mxu1  ;;  %v7355_v39 = vor.u32 %v7881_v9, %v7354_v19  ;;  %v7640_v38 = vld [vmem:[%s12481_s1 + $0x54] sm:$0xf]  ;;  %v7490_v19 = vld [vmem:[%s12482_s0 + $0x200] sm:$0xf0] }
 0x243   :  { %v10052_v60 = vadd.f32 %v3646_v11, %v3574_v18  ;;  %3698 = vmatmul.bf16.gmra.mxu2 %v10038_v37  ;;  %3839 = vmatmul.bf16.gmra.mxu0 %v10040_v54  ;;  %v7395_v18 = vor.u32 %v7891_v49, %v7394_v34 }
 0x244   :  { %3912 = vmatmul.bf16.gmra.mxu1 %v10048_v0  ;;  %4047 = vmatpush.bf16.msra.mxu3 %v7355_v39  ;;  %v5722_v39 = vld [vmem:[%s12482_s0 + $0x140] sm:$0xf] }
 0x245   :  { %3771 = vmatmul.bf16.gmra.mxu3 %v10050_v10  ;;  %4123 = vmatpush.bf16.msra.mxu0 %v7395_v18 }
 0x246   :  { %v3432_v56 = vpop.f32.mrf.mxu2 }
 0x247   :  { %v3433_v59 = vadd.f32 %v3432_v56, %v9403_v2  ;;  %v6396_v2 = vld [vmem:[%s12481_s1 + $0x58] sm:$0xf0]  ;;  %v7474_v56 = vld [vmem:[%s12482_s0 + $0x180] sm:$0xf0] }
 0x248   :  { %v3505_v63 = vpop.f32.mrf.mxu3  ;;  %v3575_v62 = vpop.f32.mrf.mxu0  ;;  %v6399_v9 = vor.u32 %v7640_v38, %v6396_v2  ;;  %v10106_v18 = vor.u32 %v7474_v56, %v5722_v39 }
 0x249   :  { %v3506_v50 = vadd.f32 %v3505_v63, %v3433_v59  ;;  %v3576_v33 = vadd.f32 %v3575_v62, %v3503_v48  ;;  %v3648_v13 = vpop.f32.mrf.mxu1  ;;  %v5782_v48 = vld [vmem:[%s12482_s0 + $0x1c0] sm:$0xf]  ;;  %v7466_v59 = vld [vmem:[%s12482_s0 + $0x144] sm:$0xf]  ;;  %v5724_v63 = vld [vmem:[%s12482_s0 + $0x184] sm:$0xf0] }
 0x24a   :  { %v7482_v62 = vld [vmem:[%s12482_s0 + $0x1c4] sm:$0xf]  ;;  %4193 = vmatpush.bf16.msra.mxu1 %v6399_v9  ;;  %v10104_v38 = vor.u32 %v7490_v19, %v5782_v48  ;;  %12798 = vst [vmem:[#allocation128_spill] sm:$0xff] %v10106_v18  ;;  %v10108_v0 = vor.u32 %v7466_v59, %v5724_v63 }
 0x24b   :  { %v10077_v11 = vadd.f32 %v3648_v13, %v3576_v33  ;;  %v5784_v33 = vld [vmem:[%s12482_s0 + $0x204] sm:$0xf0] }
 0x24c   :  { %12797 = vst [vmem:[#allocation127_spill] sm:$0xff] %v10104_v38  ;;  %v10110_v10 = vor.u32 %v7482_v62, %v5784_v33  ;;  %v7346_v62 = vld [vmem:[%s12481_s1 + $0x7c0] sm:$0xf]  ;;  %v7491_v33 = vld [vmem:[%s12482_s0 + $0x208] sm:$0xf0] }
 0x24d   :  { %12799 = vst [vmem:[#allocation129_spill] sm:$0xff] %v10108_v0 }
 0x24e   :  { %v3434_v13 = vpop.f32.mrf.mxu2  ;;  %12800 = vst [vmem:[#allocation130_spill] sm:$0xff] %v10110_v10 }
 0x24f   :  { %v3435_v34 = vadd.f32 %v3434_v13, %v9419_v29  ;;  %v7483_v13 = vld [vmem:[%s12482_s0 + $0x1cc] sm:$0xf] }
 0x250   :  { %v3507_v49 = vpop.f32.mrf.mxu3  ;;  %v3578_v2 = vpop.f32.mrf.mxu0 }
 0x251   :  { %v3508_v37 = vadd.f32 %v3507_v49, %v3435_v34  ;;  %v3579_v54 = vadd.f32 %v3578_v2, %v3506_v50  ;;  %v3651_v22 = vpop.f32.mrf.mxu1  ;;  %v5790_v50 = vld [vmem:[%s12482_s0 + $0x1c8] sm:$0xf]  ;;  %v5792_v2 = vld [vmem:[%s12482_s0 + $0x20c] sm:$0xf0] }
 0x252   :  { %v7879_v49 = vld [vmem:[%s12481_s1 + $0x7c4] sm:$0xf0] }
 0x253   :  { %v10112_v27 = vadd.f32 %v3651_v22, %v3579_v54  ;;  %3703 = vmatmul.bf16.gmra.mxu2 %v10104_v38  ;;  %3844 = vmatmul.bf16.gmra.mxu0 %v10106_v18  ;;  %v5850_v22 = vld [vmem:[%s12482_s0 + $0x248] sm:$0xf]  ;;  %v7507_v54 = vld [vmem:[%s12482_s0 + $0x288] sm:$0xf0] }
 0x254   :  { %3917 = vmatmul.bf16.gmra.mxu1 %v10108_v0 }
 0x255   :  { %3776 = vmatmul.bf16.gmra.mxu3 %v10110_v10  ;;  %v10162_v10 = vor.u32 %v7483_v13, %v5792_v2  ;;  %v5858_v2 = vld [vmem:[%s12482_s0 + $0x250] sm:$0xf] }
 0x256   :  { %v3437_v29 = vpop.f32.mrf.mxu2 }
 0x257   :  { %v3438_v48 = vadd.f32 %v3437_v29, %v9457_v51  ;;  %v7282_v51 = vld [vmem:[%s12481_s1 + $0x740] sm:$0xf]  ;;  %v7499_v29 = vld [vmem:[%s12482_s0 + $0x24c] sm:$0xf]  ;;  %12803 = vst [vmem:[#allocation133_spill] sm:$0xff] %v10162_v10 }
 0x258   :  { %v3510_v19 = vpop.f32.mrf.mxu3  ;;  %v3580_v9 = vpop.f32.mrf.mxu0 }
 0x259   :  { %v3511_v39 = vadd.f32 %v3510_v19, %v3438_v48  ;;  %v3581_v56 = vadd.f32 %v3580_v9, %v3508_v37  ;;  %v3653_v59 = vpop.f32.mrf.mxu1  ;;  %v7863_v37 = vld [vmem:[%s12481_s1 + $0x744] sm:$0xf0]  ;;  %v5852_v48 = vld [vmem:[%s12482_s0 + $0x28c] sm:$0xf0]  ;;  %v7347_v19 = vor.u32 %v7879_v49, %v7346_v62  ;;  %v7524_v49 = vld [vmem:[%s12482_s0 + $0x310] sm:$0xf0] }
 0x25a   :  { %v7283_v34 = vor.u32 %v7863_v37, %v7282_v51  ;;  %v10158_v51 = vor.u32 %v7507_v54, %v5850_v22  ;;  %v10160_v37 = vor.u32 %v7491_v33, %v5790_v50  ;;  %v10164_v38 = vor.u32 %v7499_v29, %v5852_v48  ;;  %v6388_v22 = vld [vmem:[%s12481_s1 + $0x48] sm:$0xf0]  ;;  %v5860_v29 = vld [vmem:[%s12482_s0 + $0x294] sm:$0xf0]  ;;  %v7516_v48 = vld [vmem:[%s12482_s0 + $0x2d4] sm:$0xf] }
 0x25b   :  { %v10128_v63 = vadd.f32 %v3653_v59, %v3581_v56  ;;  %4048 = vmatpush.bf16.msra.mxu3 %v7347_v19  ;;  %v5920_v19 = vld [vmem:[%s12482_s0 + $0x314] sm:$0xf0] }
 0x25c   :  { %3975 = vmatpush.bf16.msra.mxu2 %v7283_v34  ;;  %12801 = vst [vmem:[#allocation131_spill] sm:$0xff] %v10158_v51  ;;  %v5918_v34 = vld [vmem:[%s12482_s0 + $0x2d0] sm:$0xf] }
 0x25d   :  { %12802 = vst [vmem:[#allocation132_spill] sm:$0xff] %v10160_v37 }
 0x25e   :  { %v3439_v9 = vpop.f32.mrf.mxu2  ;;  %12804 = vst [vmem:[#allocation134_spill] sm:$0xff] %v10164_v38 }
 0x25f   :  { %v3440_v56 = vadd.f32 %v3439_v9, %v9476_v23  ;;  %v7638_v23 = vld [vmem:[%s12481_s1 + $0x44] sm:$0xf] }
 0x260   :  { %v3512_v59 = vpop.f32.mrf.mxu3  ;;  %v3583_v0 = vpop.f32.mrf.mxu0 }
 0x261   :  { %v3513_v18 = vadd.f32 %v3512_v59, %v3440_v56  ;;  %v3584_v25 = vadd.f32 %v3583_v0, %v3511_v39  ;;  %v3656_v20 = vpop.f32.mrf.mxu1  ;;  %v6391_v0 = vor.u32 %v7638_v23, %v6388_v22  ;;  %v10206_v23 = vor.u32 %v7524_v49, %v5918_v34  ;;  %v7861_v34 = vld [vmem:[%s12481_s1 + $0x734] sm:$0xf0]  ;;  %v7338_v49 = vld [vmem:[%s12481_s1 + $0x7b0] sm:$0xf] }
 0x263   :  { %v10166_v12 = vadd.f32 %v3656_v20, %v3584_v25  ;;  %3708 = vmatmul.bf16.gmra.mxu2 %v10158_v51  ;;  %3849 = vmatmul.bf16.gmra.mxu0 %v10160_v37  ;;  %12805 = vst [vmem:[#allocation135_spill] sm:$0xff] %v10206_v23 }
 0x264   :  { %3922 = vmatmul.bf16.gmra.mxu1 %v10162_v10 }
 0x265   :  { %3781 = vmatmul.bf16.gmra.mxu3 %v10164_v38  ;;  %4194 = vmatpush.bf16.msra.mxu1 %v6391_v0 }
 0x266   :  { %v3442_v39 = vpop.f32.mrf.mxu2 }
 0x267   :  { %v3443_v20 = vadd.f32 %v3442_v39, %v9511_v26  ;;  %v7508_v26 = vld [vmem:[%s12482_s0 + $0x290] sm:$0xf0] }
 0x268   :  { %v3515_v25 = vpop.f32.mrf.mxu3  ;;  %v3585_v54 = vpop.f32.mrf.mxu0  ;;  %v10208_v22 = vor.u32 %v7508_v26, %v5858_v2  ;;  %v7877_v2 = vld [vmem:[%s12481_s1 + $0x7b4] sm:$0xf0] }
 0x269   :  { %v3516_v50 = vadd.f32 %v3515_v25, %v3443_v20  ;;  %v3586_v62 = vadd.f32 %v3585_v54, %v3513_v18  ;;  %v3658_v33 = vpop.f32.mrf.mxu1  ;;  %v7500_v18 = vld [vmem:[%s12482_s0 + $0x254] sm:$0xf]  ;;  %v10212_v20 = vor.u32 %v7516_v48, %v5920_v19  ;;  %v7339_v26 = vor.u32 %v7877_v2, %v7338_v49  ;;  %v7517_v49 = vld [vmem:[%s12482_s0 + $0x2dc] sm:$0xf] }
 0x26a   :  { %12806 = vst [vmem:[#allocation136_spill] sm:$0xff] %v10208_v22  ;;  %v10210_v39 = vor.u32 %v7500_v18, %v5860_v29 }
 0x26b   :  { %v10179_v13 = vadd.f32 %v3658_v33, %v3586_v62  ;;  %12808 = vst [vmem:[#allocation138_spill] sm:$0xff] %v10212_v20  ;;  %4049 = vmatpush.bf16.msra.mxu3 %v7339_v26  ;;  %v6380_v26 = vld [vmem:[%s12481_s1 + $0x38] sm:$0xf0] }
 0x26c   :  { %12807 = vst [vmem:[#allocation137_spill] sm:$0xff] %v10210_v39 }
 0x26e   :  { %v3444_v9 = vpop.f32.mrf.mxu2 }
 0x26f   :  { %v3445_v56 = vadd.f32 %v3444_v9, %v9539_v55  ;;  %v7274_v55 = vld [vmem:[%s12481_s1 + $0x730] sm:$0xf] }
 0x270   :  { %v3517_v59 = vpop.f32.mrf.mxu3  ;;  %v3588_v0 = vpop.f32.mrf.mxu0 }
 0x271   :  { %v3518_v25 = vadd.f32 %v3517_v59, %v3445_v56  ;;  %v3589_v54 = vadd.f32 %v3588_v0, %v3516_v50  ;;  %v3661_v62 = vpop.f32.mrf.mxu1  ;;  %v7275_v50 = vor.u32 %v7861_v34, %v7274_v55  ;;  %v5986_v0 = vld [vmem:[%s12482_s0 + $0x358] sm:$0xf]  ;;  %v7636_v34 = vld [vmem:[%s12481_s1 + $0x34] sm:$0xf] }
 0x273   :  { %v10214_v33 = vadd.f32 %v3661_v62, %v3589_v54  ;;  %3713 = vmatmul.bf16.gmra.mxu2 %v10206_v23  ;;  %3854 = vmatmul.bf16.gmra.mxu0 %v10208_v22  ;;  %v7541_v54 = vld [vmem:[%s12482_s0 + $0x398] sm:$0xf0]  ;;  %v5926_v62 = vld [vmem:[%s12482_s0 + $0x2d8] sm:$0xf] }
 0x274   :  { %3927 = vmatmul.bf16.gmra.mxu1 %v10210_v39  ;;  %3976 = vmatpush.bf16.msra.mxu2 %v7275_v50  ;;  %v7525_v50 = vld [vmem:[%s12482_s0 + $0x318] sm:$0xf0] }
 0x275   :  { %3786 = vmatmul.bf16.gmra.mxu3 %v10212_v20  ;;  %v10274_v39 = vor.u32 %v7525_v50, %v5926_v62 }
 0x276   :  { %v3447_v18 = vpop.f32.mrf.mxu2 }
 0x277   :  { %v3448_v29 = vadd.f32 %v3447_v18, %v9577_v46  ;;  %v7386_v46 = vld [vmem:[%s12481_s1 + $0x810] sm:$0xf]  ;;  %v5928_v18 = vld [vmem:[%s12482_s0 + $0x31c] sm:$0xf0] }
 0x278   :  { %v3520_v48 = vpop.f32.mrf.mxu3  ;;  %v3590_v19 = vpop.f32.mrf.mxu0  ;;  %v10276_v20 = vor.u32 %v7517_v49, %v5928_v18  ;;  %v7534_v18 = vld [vmem:[%s12482_s0 + $0x364] sm:$0xf] }
 0x279   :  { %v3521_v9 = vadd.f32 %v3520_v48, %v3448_v29  ;;  %v3591_v56 = vadd.f32 %v3590_v19, %v3518_v25  ;;  %v3663_v59 = vpop.f32.mrf.mxu1  ;;  %v7889_v25 = vld [vmem:[%s12481_s1 + $0x814] sm:$0xf0]  ;;  %v7533_v29 = vld [vmem:[%s12482_s0 + $0x35c] sm:$0xf]  ;;  %v5988_v48 = vld [vmem:[%s12482_s0 + $0x39c] sm:$0xf0]  ;;  %v6383_v19 = vor.u32 %v7636_v34, %v6380_v26 }
 0x27a   :  { %v7387_v2 = vor.u32 %v7889_v25, %v7386_v46  ;;  %v10272_v25 = vor.u32 %v7541_v54, %v5986_v0  ;;  %12809 = vst [vmem:[#allocation139_spill] sm:$0xff] %v10276_v20  ;;  %v10278_v23 = vor.u32 %v7533_v29, %v5988_v48  ;;  %v7542_v26 = vld [vmem:[%s12482_s0 + $0x3a0] sm:$0xf0]  ;;  %v5996_v29 = vld [vmem:[%s12482_s0 + $0x3a4] sm:$0xf0] }
 0x27b   :  { %v10242_v55 = vadd.f32 %v3663_v59, %v3591_v56  ;;  %4195 = vmatpush.bf16.msra.mxu1 %v6383_v19  ;;  %v7550_v48 = vld [vmem:[%s12482_s0 + $0x3e4] sm:$0xf]  ;;  %v6056_v19 = vld [vmem:[%s12482_s0 + $0x424] sm:$0xf0] }
 0x27c   :  { %4124 = vmatpush.bf16.msra.mxu0 %v7387_v2  ;;  %12810 = vst [vmem:[#allocation140_spill] sm:$0xff] %v10278_v23  ;;  %v5994_v2 = vld [vmem:[%s12482_s0 + $0x360] sm:$0xf] }
 0x27e   :  { %v3449_v56 = vpop.f32.mrf.mxu2 }
 0x27f   :  { %v3450_v59 = vadd.f32 %v3449_v56, %v9590_v21 }
 0x280   :  { %v3522_v46 = vpop.f32.mrf.mxu3  ;;  %v3593_v10 = vpop.f32.mrf.mxu0 }
 0x281   :  { %v3523_v22 = vadd.f32 %v3522_v46, %v3450_v59  ;;  %v3594_v38 = vadd.f32 %v3593_v10, %v3521_v9  ;;  %v3666_v51 = vpop.f32.mrf.mxu1  ;;  %v7266_v10 = vld [vmem:[%s12481_s1 + $0x720] sm:$0xf] }
 0x283   :  { %v10280_v37 = vadd.f32 %v3666_v51, %v3594_v38  ;;  %3718 = vmatmul.bf16.gmra.mxu2 %v10272_v25  ;;  %3859 = vmatmul.bf16.gmra.mxu0 %v10274_v39  ;;  %v7859_v38 = vld [vmem:[%s12481_s1 + $0x724] sm:$0xf0] }
 0x284   :  { %3932 = vmatmul.bf16.gmra.mxu1 %v10276_v20  ;;  %v7267_v51 = vor.u32 %v7859_v38, %v7266_v10  ;;  %v10332_v10 = vor.u32 %v7550_v48, %v6056_v19 }
 0x285   :  { %3791 = vmatmul.bf16.gmra.mxu3 %v10278_v23 }
 0x286   :  { %v3452_v21 = vpop.f32.mrf.mxu2  ;;  %3977 = vmatpush.bf16.msra.mxu2 %v7267_v51  ;;  %12814 = vst [vmem:[#allocation144_spill] sm:$0xff] %v10332_v10 }
 0x287   :  { %v3453_v0 = vadd.f32 %v3452_v21, %v9631_v40  ;;  %v6054_v40 = vld [vmem:[%s12482_s0 + $0x3e0] sm:$0xf] }
 0x288   :  { %v3525_v54 = vpop.f32.mrf.mxu3  ;;  %v3595_v62 = vpop.f32.mrf.mxu0 }
 0x289   :  { %v3526_v34 = vadd.f32 %v3525_v54, %v3453_v0  ;;  %v3596_v50 = vadd.f32 %v3595_v62, %v3523_v22  ;;  %v3668_v49 = vpop.f32.mrf.mxu1  ;;  %v7558_v22 = vld [vmem:[%s12482_s0 + $0x420] sm:$0xf0]  ;;  %v10322_v0 = vor.u32 %v7542_v26, %v5994_v2  ;;  %v7330_v54 = vld [vmem:[%s12481_s1 + $0x7a0] sm:$0xf]  ;;  %v7875_v62 = vld [vmem:[%s12481_s1 + $0x7a4] sm:$0xf0] }
 0x28a   :  { %v10320_v21 = vor.u32 %v7558_v22, %v6054_v40  ;;  %v7331_v38 = vor.u32 %v7875_v62, %v7330_v54  ;;  %v7634_v2 = vld [vmem:[%s12481_s1 + $0x24] sm:$0xf]  ;;  %v6122_v62 = vld [vmem:[%s12482_s0 + $0x468] sm:$0xf] }
 0x28b   :  { %v10293_v9 = vadd.f32 %v3668_v49, %v3596_v50  ;;  %12812 = vst [vmem:[#allocation142_spill] sm:$0xff] %v10322_v0  ;;  %v10330_v49 = vor.u32 %v7534_v18, %v5996_v29 }
 0x28c   :  { %12811 = vst [vmem:[#allocation141_spill] sm:$0xff] %v10320_v21  ;;  %4050 = vmatpush.bf16.msra.mxu3 %v7331_v38  ;;  %v7559_v38 = vld [vmem:[%s12482_s0 + $0x428] sm:$0xf0] }
 0x28d   :  { %12813 = vst [vmem:[#allocation143_spill] sm:$0xff] %v10330_v49 }
 0x28e   :  { %v3454_v56 = vpop.f32.mrf.mxu2 }
 0x28f   :  { %v3455_v59 = vadd.f32 %v3454_v56, %v9650_v47 }
 0x290   :  { %v3527_v46 = vpop.f32.mrf.mxu3  ;;  %v3598_v50 = vpop.f32.mrf.mxu0 }
 0x291   :  { %v3528_v47 = vadd.f32 %v3527_v46, %v3455_v59  ;;  %v3599_v51 = vadd.f32 %v3598_v50, %v3526_v34  ;;  %v3671_v40 = vpop.f32.mrf.mxu1  ;;  %v6372_v34 = vld [vmem:[%s12481_s1 + $0x28] sm:$0xf0] }
 0x292   :  { %v6375_v26 = vor.u32 %v7634_v2, %v6372_v34  ;;  %v7575_v50 = vld [vmem:[%s12482_s0 + $0x4a8] sm:$0xf0]  ;;  %v6124_v2 = vld [vmem:[%s12482_s0 + $0x4ac] sm:$0xf0] }
 0x293   :  { %v10334_v22 = vadd.f32 %v3671_v40, %v3599_v51  ;;  %3723 = vmatmul.bf16.gmra.mxu2 %v10320_v21  ;;  %3864 = vmatmul.bf16.gmra.mxu0 %v10322_v0  ;;  %v6064_v51 = vld [vmem:[%s12482_s0 + $0x42c] sm:$0xf0]  ;;  %v7567_v40 = vld [vmem:[%s12482_s0 + $0x46c] sm:$0xf]  ;;  %v7378_v0 = vld [vmem:[%s12481_s1 + $0x800] sm:$0xf] }
 0x294   :  { %3937 = vmatmul.bf16.gmra.mxu1 %v10330_v49 }
 0x295   :  { %3796 = vmatmul.bf16.gmra.mxu3 %v10332_v10  ;;  %4196 = vmatpush.bf16.msra.mxu1 %v6375_v26 }
 0x296   :  { %v3457_v18 = vpop.f32.mrf.mxu2 }
 0x297   :  { %v3458_v29 = vadd.f32 %v3457_v18, %v9684_v58  ;;  %v6062_v58 = vld [vmem:[%s12482_s0 + $0x3e8] sm:$0xf]  ;;  %v10373_v18 = vor.u32 %v7575_v50, %v6122_v62 }
 0x298   :  { %v3530_v48 = vpop.f32.mrf.mxu3  ;;  %v3600_v19 = vpop.f32.mrf.mxu0 }
 0x299   :  { %v3531_v56 = vadd.f32 %v3530_v48, %v3458_v29  ;;  %v3601_v59 = vadd.f32 %v3600_v19, %v3528_v47  ;;  %v3673_v46 = vpop.f32.mrf.mxu1  ;;  %v7551_v47 = vld [vmem:[%s12482_s0 + $0x3ec] sm:$0xf]  ;;  %12815 = vst [vmem:[#allocation145_spill] sm:$0xff] %v10373_v18  ;;  %v10375_v29 = vor.u32 %v7559_v38, %v6062_v58  ;;  %v7258_v38 = vld [vmem:[%s12481_s1 + $0x710] sm:$0xf] }
 0x29a   :  { %v10377_v19 = vor.u32 %v7551_v47, %v6064_v51 }
 0x29b   :  { %v10347_v54 = vadd.f32 %v3673_v46, %v3601_v59  ;;  %12816 = vst [vmem:[#allocation146_spill] sm:$0xff] %v10375_v29  ;;  %v10379_v59 = vor.u32 %v7567_v40, %v6124_v2  ;;  %v6190_v2 = vld [vmem:[%s12482_s0 + $0x4f0] sm:$0xf] }
 0x29c   :  { %12817 = vst [vmem:[#allocation147_spill] sm:$0xff] %v10377_v19 }
 0x29d   :  { %12818 = vst [vmem:[#allocation148_spill] sm:$0xff] %v10379_v59 }
 0x29e   :  { %v3459_v34 = vpop.f32.mrf.mxu2 }
 0x29f   :  { %v7322_v34 = vld [vmem:[%s12481_s1 + $0x790] sm:$0xf] }
 0x2a0   :  { %v3532_v26 = vpop.f32.mrf.mxu3  ;;  %v3603_v48 = vpop.f32.mrf.mxu0 }
 0x2a1   :  { %v3604_v46 = vadd.f32 %v3603_v48, %v3531_v56  ;;  %v3676_v49 = vpop.f32.mrf.mxu1  ;;  %v7873_v26 = vld [vmem:[%s12481_s1 + $0x794] sm:$0xf0]  ;;  %v6130_v48 = vld [vmem:[%s12482_s0 + $0x470] sm:$0xf] }
 0x2a3   :  { %v10381_v20 = vadd.f32 %v3676_v49, %v3604_v46  ;;  %3728 = vmatmul.bf16.gmra.mxu2 %v10373_v18  ;;  %3869 = vmatmul.bf16.gmra.mxu0 %v10375_v29  ;;  %v7857_v49 = vld [vmem:[%s12481_s1 + $0x714] sm:$0xf0]  ;;  %v7576_v46 = vld [vmem:[%s12482_s0 + $0x4b0] sm:$0xf0] }
 0x2a4   :  { %3942 = vmatmul.bf16.gmra.mxu1 %v10377_v19  ;;  %v7259_v47 = vor.u32 %v7857_v49, %v7258_v38  ;;  %v7584_v38 = vld [vmem:[%s12482_s0 + $0x4f4] sm:$0xf]  ;;  %v6192_v49 = vld [vmem:[%s12482_s0 + $0x534] sm:$0xf0] }
 0x2a5   :  { %3801 = vmatmul.bf16.gmra.mxu3 %v10379_v59  ;;  %v10431_v18 = vor.u32 %v7584_v38, %v6192_v49 }
 0x2a6   :  { %v3689_v62 = vpop.f32.mrf.mxu2  ;;  %3978 = vmatpush.bf16.msra.mxu2 %v7259_v47 }
 0x2a7   :  { %v3690_v50 = vadd.f32 %v3689_v62, %v9748_v61  ;;  %v7592_v61 = vld [vmem:[%s12482_s0 + $0x530] sm:$0xf0]  ;;  %12822 = vst [vmem:[#allocation152_spill] sm:$0xff] %v10431_v18 }
 0x2a8   :  { %v3762_v58 = vpop.f32.mrf.mxu3  ;;  %v3605_v56 = vpop.f32.mrf.mxu0  ;;  %v7568_v62 = vld [vmem:[%s12482_s0 + $0x474] sm:$0xf]  ;;  %v10425_v19 = vor.u32 %v7592_v61, %v6190_v2 }
 0x2a9   :  { %v3763_v51 = vadd.f32 %v3762_v58, %v3690_v50  ;;  %v3678_v40 = vpop.f32.mrf.mxu1  ;;  %v7323_v50 = vor.u32 %v7873_v26, %v7322_v34  ;;  %v6132_v58 = vld [vmem:[%s12482_s0 + $0x4b4] sm:$0xf0]  ;;  %v10427_v34 = vor.u32 %v7576_v46, %v6130_v48  ;;  %v7632_v2 = vld [vmem:[%s12481_s1 + $0x14] sm:$0xf]  ;;  %v6364_v48 = vld [vmem:[%s12481_s1 + $0x18] sm:$0xf0] }
 0x2aa   :  { %12819 = vst [vmem:[#allocation149_spill] sm:$0xff] %v10425_v19  ;;  %v10429_v59 = vor.u32 %v7568_v62, %v6132_v58 }
 0x2ab   :  { %4051 = vmatpush.bf16.msra.mxu3 %v7323_v50  ;;  %12820 = vst [vmem:[#allocation150_spill] sm:$0xff] %v10427_v34 }
 0x2ac   :  { %12821 = vst [vmem:[#allocation151_spill] sm:$0xff] %v10429_v59 }
 0x2ae   :  { %v3691_v56 = vpop.f32.mrf.mxu2 }
 0x2af   :  { %v3692_v47 = vadd.f32 %v3691_v56, %v9755_v28  ;;  %v7887_v28 = vld [vmem:[%s12481_s1 + $0x804] sm:$0xf0]  ;;  %v6258_v56 = vld [vmem:[%s12482_s0 + $0x578] sm:$0xf] }
 0x2b0   :  { %v3764_v40 = vpop.f32.mrf.mxu3  ;;  %v3835_v26 = vpop.f32.mrf.mxu0  ;;  %v7379_v61 = vor.u32 %v7887_v28, %v7378_v0  ;;  %v7601_v28 = vld [vmem:[%s12482_s0 + $0x57c] sm:$0xf] }
 0x2b1   :  { %v3765_v29 = vadd.f32 %v3764_v40, %v3692_v47  ;;  %v3836_v10 = vadd.f32 %v3835_v26, %v3763_v51  ;;  %v3908_v21 = vpop.f32.mrf.mxu1  ;;  %v6367_v51 = vor.u32 %v7632_v2, %v6364_v48  ;;  %v7609_v47 = vld [vmem:[%s12482_s0 + $0x5b8] sm:$0xf0]  ;;  %v6198_v40 = vld [vmem:[%s12482_s0 + $0x4f8] sm:$0xf]  ;;  %v6200_v26 = vld [vmem:[%s12482_s0 + $0x53c] sm:$0xf0] }
 0x2b2   :  { %4125 = vmatpush.bf16.msra.mxu0 %v7379_v61  ;;  %v6260_v2 = vld [vmem:[%s12482_s0 + $0x5bc] sm:$0xf0] }
 0x2b3   :  { %v10445_v46 = vadd.f32 %v3908_v21, %v3836_v10  ;;  %3733 = vmatmul.bf16.gmra.mxu2 %v10425_v19  ;;  %3874 = vmatmul.bf16.gmra.mxu0 %v10427_v34 }
 0x2b4   :  { %3947 = vmatmul.bf16.gmra.mxu1 %v10429_v59 }
 0x2b5   :  { %3806 = vmatmul.bf16.gmra.mxu3 %v10431_v18  ;;  %4197 = vmatpush.bf16.msra.mxu1 %v6367_v51 }
 0x2b6   :  { %v3694_v62 = vpop.f32.mrf.mxu2 }
 0x2b7   :  { %v3695_v0 = vadd.f32 %v3694_v62, %v9790_v32  ;;  %v7593_v32 = vld [vmem:[%s12482_s0 + $0x538] sm:$0xf0]  ;;  %v10479_v62 = vor.u32 %v7609_v47, %v6258_v56  ;;  %v7855_v56 = vld [vmem:[%s12481_s1 + $0x704] sm:$0xf0]  ;;  %v7314_v47 = vld [vmem:[%s12481_s1 + $0x780] sm:$0xf] }
 0x2b8   :  { %v3767_v50 = vpop.f32.mrf.mxu3  ;;  %v3837_v58 = vpop.f32.mrf.mxu0 }
 0x2b9   :  { %v3768_v38 = vadd.f32 %v3767_v50, %v3695_v0  ;;  %v3838_v49 = vadd.f32 %v3837_v58, %v3765_v29  ;;  %v3910_v21 = vpop.f32.mrf.mxu1  ;;  %v7585_v29 = vld [vmem:[%s12482_s0 + $0x4fc] sm:$0xf]  ;;  %12823 = vst [vmem:[#allocation153_spill] sm:$0xff] %v10479_v62  ;;  %v10481_v0 = vor.u32 %v7593_v32, %v6198_v40 }
 0x2ba   :  { %v10483_v58 = vor.u32 %v7585_v29, %v6200_v26 }
 0x2bb   :  { %v10452_v10 = vadd.f32 %v3910_v21, %v3838_v49  ;;  %12824 = vst [vmem:[#allocation154_spill] sm:$0xff] %v10481_v0  ;;  %v10485_v49 = vor.u32 %v7601_v28, %v6260_v2 }
 0x2bc   :  { %12825 = vst [vmem:[#allocation155_spill] sm:$0xff] %v10483_v58 }
 0x2bd   :  { %12826 = vst [vmem:[#allocation156_spill] sm:$0xff] %v10485_v49 }
 0x2be   :  { %v3696_v61 = vpop.f32.mrf.mxu2 }
 0x2bf   :  { %v3697_v48 = vadd.f32 %v3696_v61, %v9818_v24  ;;  %v7250_v24 = vld [vmem:[%s12481_s1 + $0x700] sm:$0xf] }
 0x2c0   :  { %v3769_v51 = vpop.f32.mrf.mxu3  ;;  %v3840_v50 = vpop.f32.mrf.mxu0 }
 0x2c1   :  { %v3770_v21 = vadd.f32 %v3769_v51, %v3697_v48  ;;  %v3841_v59 = vadd.f32 %v3840_v50, %v3768_v38  ;;  %v3913_v18 = vpop.f32.mrf.mxu1  ;;  %v6326_v48 = vld [vmem:[%s12482_s0 + $0x600] sm:$0xf]  ;;  %v7626_v50 = vld [vmem:[%s12482_s0 + $0x640] sm:$0xf0] }
 0x2c3   :  { %v10487_v19 = vadd.f32 %v3913_v18, %v3841_v59  ;;  %3738 = vmatmul.bf16.gmra.mxu2 %v10479_v62  ;;  %3879 = vmatmul.bf16.gmra.mxu0 %v10481_v0  ;;  %v7251_v18 = vor.u32 %v7855_v56, %v7250_v24  ;;  %v7871_v59 = vld [vmem:[%s12481_s1 + $0x784] sm:$0xf0]  ;;  %v6356_v24 = vld [vmem:[%s12481_s1 + $0x8] sm:$0xf0]  ;;  %v7610_v56 = vld [vmem:[%s12482_s0 + $0x5c0] sm:$0xf0] }
 0x2c4   :  { %3952 = vmatmul.bf16.gmra.mxu1 %v10483_v58  ;;  %v7315_v38 = vor.u32 %v7871_v59, %v7314_v47  ;;  %v7602_v47 = vld [vmem:[%s12482_s0 + $0x584] sm:$0xf]  ;;  %v6268_v59 = vld [vmem:[%s12482_s0 + $0x5c4] sm:$0xf0] }
 0x2c5   :  { %3811 = vmatmul.bf16.gmra.mxu3 %v10485_v49  ;;  %3979 = vmatpush.bf16.msra.mxu2 %v7251_v18 }
 0x2c6   :  { %v3699_v40 = vpop.f32.mrf.mxu2  ;;  %4052 = vmatpush.bf16.msra.mxu3 %v7315_v38  ;;  %v7618_v38 = vld [vmem:[%s12482_s0 + $0x604] sm:$0xf] }
 0x2c7   :  { %v3700_v32 = vadd.f32 %v3699_v40, %v9856_v1  ;;  %v7630_v1 = vld [vmem:[%s12481_s1 + $0x4] sm:$0xf]  ;;  %v6328_v40 = vld [vmem:[%s12482_s0 + $0x644] sm:$0xf0] }
 0x2c8   :  { %v3772_v29 = vpop.f32.mrf.mxu3  ;;  %v3842_v26 = vpop.f32.mrf.mxu0  ;;  %v6359_v18 = vor.u32 %v7630_v1, %v6356_v24  ;;  %v10543_v24 = vor.u32 %v7602_v47, %v6268_v59  ;;  %v10545_v58 = vor.u32 %v7618_v38, %v6328_v40  ;;  %v7660_v59 = vld [vmem:[%s12481_s1 + $0xf4] sm:$0xf]  ;;  %v7627_v40 = vld [vmem:[%s12482_s0 + $0x648] sm:$0xf0] }
 0x2c9   :  { %v3773_v28 = vadd.f32 %v3772_v29, %v3700_v32  ;;  %v3843_v2 = vadd.f32 %v3842_v26, %v3770_v21  ;;  %v3915_v61 = vpop.f32.mrf.mxu1  ;;  %v6266_v21 = vld [vmem:[%s12482_s0 + $0x580] sm:$0xf]  ;;  %v7676_v38 = vld [vmem:[%s12481_s1 + $0x174] sm:$0xf] }
 0x2ca   :  { %4198 = vmatpush.bf16.msra.mxu1 %v6359_v18  ;;  %12829 = vst [vmem:[#allocation159_spill] sm:$0xff] %v10543_v24 }
 0x2cb   :  { %v10509_v51 = vadd.f32 %v3915_v61, %v3843_v2  ;;  %v10539_v2 = vor.u32 %v7626_v50, %v6326_v48  ;;  %v10541_v61 = vor.u32 %v7610_v56, %v6266_v21  ;;  %12830 = vst [vmem:[#allocation160_spill] sm:$0xff] %v10545_v58 }
 0x2cd   :  { %12827 = vst [vmem:[#allocation157_spill] sm:$0xff] %v10539_v2 }
 0x2ce   :  { %v3701_v32 = vpop.f32.mrf.mxu2  ;;  %12828 = vst [vmem:[#allocation158_spill] sm:$0xff] %v10541_v61 }
 0x2cf   :  { %v3702_v29 = vadd.f32 %v3701_v32, %v9866_v30 }
 0x2d0   :  { %v3774_v26 = vpop.f32.mrf.mxu3  ;;  %v3845_v1 = vpop.f32.mrf.mxu0 }
 0x2d1   :  { %v3775_v49 = vadd.f32 %v3774_v26, %v3702_v29  ;;  %v3846_v62 = vadd.f32 %v3845_v1, %v3773_v28  ;;  %v3918_v0 = vpop.f32.mrf.mxu1  ;;  %v236_v28 = vld [vmem:[%s12482_s0 + $0x688] sm:$0xff]  ;;  %v6540_v26 = vld [vmem:[%s12481_s1 + $0x178] sm:$0xf0] }
 0x2d2   :  { %v1152_v18 = vunpack.c.l.b16 %v236_v28  ;;  %v1153_v32 = vunpack.c.h.b16 %v236_v28  ;;  %v7619_v1 = vld [vmem:[%s12482_s0 + $0x60c] sm:$0xf] }
 0x2d3   :  { %v10547_v34 = vadd.f32 %v3918_v0, %v3846_v62  ;;  %3743 = vmatmul.bf16.gmra.mxu2 %v10539_v2  ;;  %3884 = vmatmul.bf16.gmra.mxu0 %v10541_v61 }
 0x2d4   :  { %3957 = vmatmul.bf16.gmra.mxu1 %v10543_v24  ;;  %v10584_v28 = vpack.c.b16 %v1152_v18, %v1152_v18  ;;  %v10590_v24 = vpack.c.b16 %v1153_v32, %v1153_v32  ;;  %v6604_v18 = vld [vmem:[%s12481_s1 + $0x1f8] sm:$0xf0] }
 0x2d5   :  { %3816 = vmatmul.bf16.gmra.mxu3 %v10545_v58 }
 0x2d6   :  { %v3704_v30 = vpop.f32.mrf.mxu2  ;;  %12831 = vst [vmem:[#allocation161_spill] sm:$0xff] %v10584_v28 }
 0x2d7   :  { %v3705_v48 = vadd.f32 %v3704_v30, %v9901_v35  ;;  %v6476_v35 = vld [vmem:[%s12481_s1 + $0xf8] sm:$0xf0]  ;;  %v6336_v30 = vld [vmem:[%s12482_s0 + $0x64c] sm:$0xf0]  ;;  %12833 = vst [vmem:[#allocation163_spill] sm:$0xff] %v10590_v24 }
 0x2d8   :  { %v3777_v50 = vpop.f32.mrf.mxu3  ;;  %v3847_v21 = vpop.f32.mrf.mxu0  ;;  %v6479_v29 = vor.u32 %v7660_v59, %v6476_v35  ;;  %v10588_v35 = vor.u32 %v7619_v1, %v6336_v30 }
 0x2d9   :  { %v3778_v56 = vadd.f32 %v3777_v50, %v3705_v48  ;;  %v3848_v62 = vadd.f32 %v3847_v21, %v3775_v49  ;;  %v3920_v0 = vpop.f32.mrf.mxu1  ;;  %v6334_v49 = vld [vmem:[%s12482_s0 + $0x608] sm:$0xf]  ;;  %v6543_v48 = vor.u32 %v7676_v38, %v6540_v26  ;;  %v237_v26 = vld [vmem:[%s12482_s0 + $0x690] sm:$0xff] }
 0x2da   :  { %4264 = vmatpush.bf16.msrb.mxu2 %v6479_v29  ;;  %12832 = vst [vmem:[#allocation162_spill] sm:$0xff] %v10588_v35 }
 0x2db   :  { %v10557_v47 = vadd.f32 %v3920_v0, %v3848_v62  ;;  %v10586_v0 = vor.u32 %v7627_v40, %v6334_v49  ;;  %4337 = vmatpush.bf16.msrb.mxu3 %v6543_v48 }
 0x2de   :  { %v3706_v50 = vpop.f32.mrf.mxu2 }
 0x2df   :  { %v3707_v21 = vadd.f32 %v3706_v50, %v9921_v57  ;;  %v7692_v57 = vld [vmem:[%s12481_s1 + $0x1f4] sm:$0xf] }
 0x2e0   :  { %v3779_v62 = vpop.f32.mrf.mxu3  ;;  %v3850_v59 = vpop.f32.mrf.mxu0 }
 0x2e1   :  { %v3780_v58 = vadd.f32 %v3779_v62, %v3707_v21  ;;  %v3851_v2 = vadd.f32 %v3850_v59, %v3778_v56  ;;  %v3923_v61 = vpop.f32.mrf.mxu1  ;;  %v6668_v56 = vld [vmem:[%s12481_s1 + $0x278] sm:$0xf0]  ;;  %v1154_v21 = vunpack.c.l.b16 %v237_v26  ;;  %v1155_v62 = vunpack.c.h.b16 %v237_v26  ;;  %v5594_v59 = vld [vmem:[%s12482_s0 + $0x38] sm:$0xf] }
 0x2e3   :  { %v10592_v23 = vadd.f32 %v3923_v61, %v3851_v2  ;;  %3748 = vmatmul.bf16.gmra.mxu2 %v10584_v28  ;;  %3889 = vmatmul.bf16.gmra.mxu0 %v10586_v0  ;;  %v7708_v2 = vld [vmem:[%s12481_s1 + $0x274] sm:$0xf]  ;;  %v6607_v61 = vor.u32 %v7692_v57, %v6604_v18  ;;  %v7433_v57 = vld [vmem:[%s12482_s0 + $0x3c] sm:$0xf] }
 0x2e4   :  { %3962 = vmatmul.bf16.gmra.mxu1 %v10588_v35  ;;  %v6671_v49 = vor.u32 %v7708_v2, %v6668_v56  ;;  %v10629_v56 = vpack.c.b16 %v1154_v21, %v1154_v21  ;;  %v6468_v21 = vld [vmem:[%s12481_s1 + $0xe8] sm:$0xf0] }
 0x2e5   :  { %3821 = vmatmul.bf16.gmra.mxu3 %v10590_v24  ;;  %4410 = vmatpush.bf16.msrb.mxu0 %v6607_v61 }
 0x2e6   :  { %v3709_v38 = vpop.f32.mrf.mxu2  ;;  %4483 = vmatpush.bf16.msrb.mxu1 %v6671_v49  ;;  %12834 = vst [vmem:[#allocation164_spill] sm:$0xff] %v10629_v56 }
 0x2e7   :  { %v3710_v40 = vadd.f32 %v3709_v38, %v9944_v31  ;;  %v7441_v31 = vld [vmem:[%s12482_s0 + $0x78] sm:$0xf0] }
 0x2e8   :  { %v3782_v32 = vpop.f32.mrf.mxu3  ;;  %v3852_v29 = vpop.f32.mrf.mxu0  ;;  %v10631_v38 = vor.u32 %v7441_v31, %v5594_v59 }
 0x2e9   :  { %v3783_v1 = vadd.f32 %v3782_v32, %v3710_v40  ;;  %v3853_v30 = vadd.f32 %v3852_v29, %v3780_v58  ;;  %v3925_v48 = vpop.f32.mrf.mxu1  ;;  %v5596_v58 = vld [vmem:[%s12482_s0 + $0x7c] sm:$0xf0]  ;;  %v10633_v40 = vpack.c.b16 %v1155_v62, %v1155_v62 }
 0x2ea   :  { %12835 = vst [vmem:[#allocation165_spill] sm:$0xff] %v10631_v38  ;;  %v10635_v32 = vor.u32 %v7433_v57, %v5596_v58  ;;  %v7674_v57 = vld [vmem:[%s12481_s1 + $0x164] sm:$0xf]  ;;  %v6532_v58 = vld [vmem:[%s12481_s1 + $0x168] sm:$0xf0] }
 0x2eb   :  { %v10614_v50 = vadd.f32 %v3925_v48, %v3853_v30  ;;  %12836 = vst [vmem:[#allocation166_spill] sm:$0xff] %v10633_v40 }
 0x2ec   :  { %12837 = vst [vmem:[#allocation167_spill] sm:$0xff] %v10635_v32 }
 0x2ee   :  { %v3711_v18 = vpop.f32.mrf.mxu2 }
 0x2ef   :  { %v3712_v2 = vadd.f32 %v3711_v18, %v9966_v7  ;;  %v7658_v7 = vld [vmem:[%s12481_s1 + $0xe4] sm:$0xf] }
 0x2f0   :  { %v3784_v61 = vpop.f32.mrf.mxu3  ;;  %v3855_v49 = vpop.f32.mrf.mxu0 }
 0x2f1   :  { %v3785_v29 = vadd.f32 %v3784_v61, %v3712_v2  ;;  %v3856_v26 = vadd.f32 %v3855_v49, %v3783_v1  ;;  %v3928_v30 = vpop.f32.mrf.mxu1  ;;  %v6471_v1 = vor.u32 %v7658_v7, %v6468_v21  ;;  %v6535_v2 = vor.u32 %v7674_v57, %v6532_v58  ;;  %v7690_v21 = vld [vmem:[%s12481_s1 + $0x1e4] sm:$0xf]  ;;  %v6660_v57 = vld [vmem:[%s12481_s1 + $0x268] sm:$0xf0] }
 0x2f2   :  { %v7450_v58 = vld [vmem:[%s12482_s0 + $0xc4] sm:$0xf] }
 0x2f3   :  { %v10637_v48 = vadd.f32 %v3928_v30, %v3856_v26  ;;  %3894 = vmatmul.bf16.gmra.mxu0 %v10629_v56  ;;  %3980 = vmatmul.bf16.vlgmr.msra.gmra.mxu2 %v10631_v38  ;;  %v5662_v30 = vld [vmem:[%s12482_s0 + $0xc0] sm:$0xf] }
 0x2f4   :  { %3967 = vmatmul.bf16.gmra.mxu1 %v10633_v40  ;;  %4265 = vmatpush.bf16.msrb.mxu2 %v6471_v1  ;;  %v7706_v1 = vld [vmem:[%s12481_s1 + $0x264] sm:$0xf] }
 0x2f5   :  { %4053 = vmatmul.bf16.vlgmr.msra.gmra.mxu3 %v10635_v32 }
 0x2f6   :  { %v3714_v62 = vpop.f32.mrf.mxu2  ;;  %4338 = vmatpush.bf16.msrb.mxu3 %v6535_v2  ;;  %v6663_v2 = vor.u32 %v7706_v1, %v6660_v57 }
 0x2f7   :  { %v3715_v59 = vadd.f32 %v3714_v62, %v10004_v36  ;;  %v7458_v36 = vld [vmem:[%s12482_s0 + $0x100] sm:$0xf0]  ;;  %v5602_v62 = vld [vmem:[%s12482_s0 + $0x40] sm:$0xf] }
 0x2f8   :  { %v3787_v31 = vpop.f32.mrf.mxu3  ;;  %v3857_v18 = vpop.f32.mrf.mxu0  ;;  %v10689_v35 = vor.u32 %v7458_v36, %v5662_v30  ;;  %4484 = vmatpush.bf16.msrb.mxu1 %v6663_v2 }
 0x2f9   :  { %v3788_v61 = vadd.f32 %v3787_v31, %v3715_v59  ;;  %v3858_v49 = vadd.f32 %v3857_v18, %v3785_v29  ;;  %v3930_v26 = vpop.f32.mrf.mxu1  ;;  %v6596_v29 = vld [vmem:[%s12481_s1 + $0x1e8] sm:$0xf0]  ;;  %v7442_v59 = vld [vmem:[%s12482_s0 + $0x80] sm:$0xf0]  ;;  %v5664_v18 = vld [vmem:[%s12482_s0 + $0x104] sm:$0xf0] }
 0x2fa   :  { %v6599_v31 = vor.u32 %v7690_v21, %v6596_v29  ;;  %v10691_v21 = vor.u32 %v7442_v59, %v5602_v62  ;;  %v10693_v32 = vor.u32 %v7450_v58, %v5664_v18 }
 0x2fb   :  { %v10662_v7 = vadd.f32 %v3930_v26, %v3858_v49 }
 0x2fc   :  { %4411 = vmatpush.bf16.msrb.mxu0 %v6599_v31  ;;  %v5732_v31 = vld [vmem:[%s12482_s0 + $0x18c] sm:$0xf0] }
 0x2fe   :  { %v3716_v49 = vpop.f32.mrf.mxu2 }
 0x2ff   :  { %v3717_v26 = vadd.f32 %v3716_v49, %v10011_v45 }
 0x300   :  { %v3789_v40 = vpop.f32.mrf.mxu3  ;;  %v3860_v29 = vpop.f32.mrf.mxu0 }
 0x301   :  { %v3790_v38 = vadd.f32 %v3789_v40, %v3717_v26  ;;  %v3861_v56 = vadd.f32 %v3860_v29, %v3788_v61  ;;  %v3933_v24 = vpop.f32.mrf.mxu1  ;;  %v7656_v26 = vld [vmem:[%s12481_s1 + $0xd4] sm:$0xf]  ;;  %v6460_v29 = vld [vmem:[%s12481_s1 + $0xd8] sm:$0xf0] }
 0x303   :  { %v10695_v28 = vadd.f32 %v3933_v24, %v3861_v56  ;;  %3985 = vmatmul.bf16.gmra.mxu2 %v10689_v35  ;;  %7400 = vmatmul.msk.bf16.vlgmr.msra.gmra.mxu0 %vm2903_vm1, %v10691_v21  ;;  %v5730_v24 = vld [vmem:[%s12482_s0 + $0x148] sm:$0xf] }
 0x304   :  { %4199 = vmatmul.bf16.vlgmr.msra.gmra.mxu1 %v8077_v3  ;;  %v7475_v3 = vld [vmem:[%s12482_s0 + $0x188] sm:$0xf0]  ;;  %v5670_v56 = vld [vmem:[%s12482_s0 + $0xc8] sm:$0xf] }
 0x305   :  { %4058 = vmatmul.bf16.gmra.mxu3 %v10693_v32  ;;  %v10724_v2 = vor.u32 %v7475_v3, %v5730_v24  ;;  %v7672_v24 = vld [vmem:[%s12481_s1 + $0x154] sm:$0xf]  ;;  %v6524_v3 = vld [vmem:[%s12481_s1 + $0x158] sm:$0xf0] }
 0x306   :  { %v3719_v45 = vpop.f32.mrf.mxu2 }
 0x307   :  { %v3720_v30 = vadd.f32 %v3719_v45, %v10052_v60  ;;  %v7459_v60 = vld [vmem:[%s12482_s0 + $0x108] sm:$0xf0]  ;;  %12838 = vst [vmem:[#allocation168_spill] sm:$0xff] %v10724_v2 }
 0x308   :  { %v3792_v36 = vpop.f32.mrf.mxu3  ;;  %v3862_v1 = vpop.f32.mrf.mxu0  ;;  %v10726_v49 = vor.u32 %v7459_v60, %v5670_v56 }
 0x309   :  { %v3793_v62 = vadd.f32 %v3792_v36, %v3720_v30  ;;  %v3863_v40 = vadd.f32 %v3862_v1, %v3790_v38  ;;  %v3935_v61 = vpop.f32.mrf.mxu1  ;;  %v7467_v38 = vld [vmem:[%s12482_s0 + $0x14c] sm:$0xf]  ;;  %v6463_v36 = vor.u32 %v7656_v26, %v6460_v29  ;;  %v7688_v26 = vld [vmem:[%s12481_s1 + $0x1d4] sm:$0xf] }
 0x30a   :  { %12839 = vst [vmem:[#allocation169_spill] sm:$0xff] %v10726_v49  ;;  %v10734_v30 = vor.u32 %v7467_v38, %v5732_v31  ;;  %v7704_v29 = vld [vmem:[%s12481_s1 + $0x254] sm:$0xf] }
 0x30b   :  { %v10703_v59 = vadd.f32 %v3935_v61, %v3863_v40  ;;  %4266 = vmatpush.bf16.msrb.mxu2 %v6463_v36 }
 0x30c   :  { %12840 = vst [vmem:[#allocation170_spill] sm:$0xff] %v10734_v30 }
 0x30e   :  { %v3721_v57 = vpop.f32.mrf.mxu2 }
 0x30f   :  { %v3722_v58 = vadd.f32 %v3721_v57, %v10077_v11 }
 0x310   :  { %v3794_v18 = vpop.f32.mrf.mxu3  ;;  %v3865_v45 = vpop.f32.mrf.mxu0 }
 0x311   :  { %v3795_v1 = vadd.f32 %v3794_v18, %v3722_v58  ;;  %v3866_v40 = vadd.f32 %v3865_v45, %v3793_v62  ;;  %v3938_v11 = vpop.f32.mrf.mxu1  ;;  %v6527_v62 = vor.u32 %v7672_v24, %v6524_v3  ;;  %v5738_v24 = vld [vmem:[%s12482_s0 + $0x150] sm:$0xf]  ;;  %v7476_v3 = vld [vmem:[%s12482_s0 + $0x190] sm:$0xf0] }
 0x313   :  { %v10736_v61 = vadd.f32 %v3938_v11, %v3866_v40  ;;  %3990 = vmatmul.bf16.gmra.mxu2 %v10724_v2  ;;  %7401 = vmatmul.msk.bf16.gmra.mxu0 %vm2903_vm1, %v10726_v49  ;;  %v7492_v11 = vld [vmem:[%s12482_s0 + $0x210] sm:$0xf0] }
 0x314   :  { %4204 = vmatmul.bf16.gmra.mxu1 %v8182_v52  ;;  %4339 = vmatpush.bf16.msrb.mxu3 %v6527_v62  ;;  %v6588_v52 = vld [vmem:[%s12481_s1 + $0x1d8] sm:$0xf0]  ;;  %v7484_v62 = vld [vmem:[%s12482_s0 + $0x1d4] sm:$0xf] }
 0x315   :  { %4063 = vmatmul.bf16.gmra.mxu3 %v10734_v30  ;;  %v6591_v45 = vor.u32 %v7688_v26, %v6588_v52 }
 0x316   :  { %v3724_v56 = vpop.f32.mrf.mxu2 }
 0x317   :  { %v3725_v60 = vadd.f32 %v3724_v56, %v10112_v27  ;;  %v6652_v27 = vld [vmem:[%s12481_s1 + $0x258] sm:$0xf0]  ;;  %4412 = vmatpush.bf16.msrb.mxu0 %v6591_v45  ;;  %v5800_v56 = vld [vmem:[%s12482_s0 + $0x214] sm:$0xf0] }
 0x318   :  { %v3797_v38 = vpop.f32.mrf.mxu3  ;;  %v3867_v31 = vpop.f32.mrf.mxu0  ;;  %v6655_v40 = vor.u32 %v7704_v29, %v6652_v27  ;;  %v10787_v52 = vor.u32 %v7484_v62, %v5800_v56  ;;  %v5866_v62 = vld [vmem:[%s12482_s0 + $0x258] sm:$0xf]  ;;  %v7509_v56 = vld [vmem:[%s12482_s0 + $0x298] sm:$0xf0] }
 0x319   :  { %v3798_v57 = vadd.f32 %v3797_v38, %v3725_v60  ;;  %v3868_v58 = vadd.f32 %v3867_v31, %v3795_v1  ;;  %v3940_v18 = vpop.f32.mrf.mxu1  ;;  %v5798_v1 = vld [vmem:[%s12482_s0 + $0x1d0] sm:$0xf] }
 0x31a   :  { %4485 = vmatpush.bf16.msrb.mxu1 %v6655_v40  ;;  %12843 = vst [vmem:[#allocation173_spill] sm:$0xff] %v10787_v52 }
 0x31b   :  { %v10762_v36 = vadd.f32 %v3940_v18, %v3868_v58  ;;  %v10783_v58 = vor.u32 %v7492_v11, %v5798_v1  ;;  %v10785_v18 = vor.u32 %v7476_v3, %v5738_v24 }
 0x31d   :  { %12841 = vst [vmem:[#allocation171_spill] sm:$0xff] %v10783_v58 }
 0x31e   :  { %v3726_v60 = vpop.f32.mrf.mxu2  ;;  %12842 = vst [vmem:[#allocation172_spill] sm:$0xff] %v10785_v18 }
 0x31f   :  { %v3727_v38 = vadd.f32 %v3726_v60, %v10128_v63 }
 0x320   :  { %v3799_v31 = vpop.f32.mrf.mxu3  ;;  %v3870_v26 = vpop.f32.mrf.mxu0 }
 0x321   :  { %v3800_v29 = vadd.f32 %v3799_v31, %v3727_v38  ;;  %v3871_v45 = vadd.f32 %v3870_v26, %v3798_v57  ;;  %v3943_v27 = vpop.f32.mrf.mxu1  ;;  %v7670_v38 = vld [vmem:[%s12481_s1 + $0x144] sm:$0xf]  ;;  %v5806_v31 = vld [vmem:[%s12482_s0 + $0x1d8] sm:$0xf]  ;;  %v7493_v26 = vld [vmem:[%s12482_s0 + $0x218] sm:$0xf0] }
 0x323   :  { %v10789_v30 = vadd.f32 %v3943_v27, %v3871_v45  ;;  %3995 = vmatmul.bf16.gmra.mxu2 %v10783_v58  ;;  %7402 = vmatmul.msk.bf16.gmra.mxu0 %vm2903_vm1, %v10785_v18  ;;  %v6516_v45 = vld [vmem:[%s12481_s1 + $0x148] sm:$0xf0]  ;;  %v7501_v27 = vld [vmem:[%s12482_s0 + $0x25c] sm:$0xf] }
 0x324   :  { %4209 = vmatmul.bf16.gmra.mxu1 %v8242_v16  ;;  %v7654_v16 = vld [vmem:[%s12481_s1 + $0xc4] sm:$0xf] }
 0x325   :  { %4068 = vmatmul.bf16.gmra.mxu3 %v10787_v52 }
 0x326   :  { %v3729_v63 = vpop.f32.mrf.mxu2 }
 0x327   :  { %v3730_v1 = vadd.f32 %v3729_v63, %v10166_v12  ;;  %v6452_v12 = vld [vmem:[%s12481_s1 + $0xc8] sm:$0xf0]  ;;  %v5868_v63 = vld [vmem:[%s12482_s0 + $0x29c] sm:$0xf0] }
 0x328   :  { %v3802_v40 = vpop.f32.mrf.mxu3  ;;  %v3872_v11 = vpop.f32.mrf.mxu0  ;;  %v10834_v52 = vor.u32 %v7501_v27, %v5868_v63 }
 0x329   :  { %v3803_v24 = vadd.f32 %v3802_v40, %v3730_v1  ;;  %v3873_v3 = vadd.f32 %v3872_v11, %v3800_v29  ;;  %v3945_v57 = vpop.f32.mrf.mxu1  ;;  %v6455_v29 = vor.u32 %v7654_v16, %v6452_v12  ;;  %v6519_v1 = vor.u32 %v7670_v38, %v6516_v45 }
 0x32a   :  { %v10832_v16 = vor.u32 %v7493_v26, %v5806_v31  ;;  %12844 = vst [vmem:[#allocation174_spill] sm:$0xff] %v10834_v52 }
 0x32b   :  { %v10803_v60 = vadd.f32 %v3945_v57, %v3873_v3  ;;  %4267 = vmatpush.bf16.msrb.mxu2 %v6455_v29  ;;  %v10830_v57 = vor.u32 %v7509_v56, %v5866_v62  ;;  %4340 = vmatpush.bf16.msrb.mxu3 %v6519_v1  ;;  %v6580_v62 = vld [vmem:[%s12481_s1 + $0x1c8] sm:$0xf0] }
 0x32e   :  { %v3731_v40 = vpop.f32.mrf.mxu2 }
 0x32f   :  { %v3732_v11 = vadd.f32 %v3731_v40, %v10179_v13  ;;  %v7686_v13 = vld [vmem:[%s12481_s1 + $0x1c4] sm:$0xf] }
 0x330   :  { %v3804_v3 = vpop.f32.mrf.mxu3  ;;  %v3875_v12 = vpop.f32.mrf.mxu0  ;;  %v7526_v40 = vld [vmem:[%s12482_s0 + $0x320] sm:$0xf0] }
 0x331   :  { %v3805_v58 = vadd.f32 %v3804_v3, %v3732_v11  ;;  %v3876_v18 = vadd.f32 %v3875_v12, %v3803_v24  ;;  %v3948_v2 = vpop.f32.mrf.mxu1  ;;  %v7702_v24 = vld [vmem:[%s12481_s1 + $0x244] sm:$0xf]  ;;  %v5936_v3 = vld [vmem:[%s12482_s0 + $0x324] sm:$0xf0] }
 0x332   :  { %v7510_v11 = vld [vmem:[%s12482_s0 + $0x2a0] sm:$0xf0] }
 0x333   :  { %v10836_v49 = vadd.f32 %v3948_v2, %v3876_v18  ;;  %4000 = vmatmul.bf16.gmra.mxu2 %v10830_v57  ;;  %7403 = vmatmul.msk.bf16.gmra.mxu0 %vm2903_vm1, %v10832_v16  ;;  %v6583_v2 = vor.u32 %v7686_v13, %v6580_v62  ;;  %v6644_v18 = vld [vmem:[%s12481_s1 + $0x248] sm:$0xf0] }
 0x334   :  { %4214 = vmatmul.bf16.gmra.mxu1 %v8308_v43  ;;  %v6647_v56 = vor.u32 %v7702_v24, %v6644_v18  ;;  %v5934_v43 = vld [vmem:[%s12482_s0 + $0x2e0] sm:$0xf] }
 0x335   :  { %4073 = vmatmul.bf16.gmra.mxu3 %v10834_v52  ;;  %4413 = vmatpush.bf16.msrb.mxu0 %v6583_v2  ;;  %v10877_v24 = vor.u32 %v7526_v40, %v5934_v43  ;;  %v6508_v43 = vld [vmem:[%s12481_s1 + $0x138] sm:$0xf0] }
 0x336   :  { %v3734_v38 = vpop.f32.mrf.mxu2  ;;  %4486 = vmatpush.bf16.msrb.mxu1 %v6647_v56 }
 0x337   :  { %v3735_v31 = vadd.f32 %v3734_v38, %v10214_v33  ;;  %v5874_v33 = vld [vmem:[%s12482_s0 + $0x260] sm:$0xf]  ;;  %12845 = vst [vmem:[#allocation175_spill] sm:$0xff] %v10877_v24 }
 0x338   :  { %v3807_v26 = vpop.f32.mrf.mxu3  ;;  %v3877_v29 = vpop.f32.mrf.mxu0  ;;  %v10879_v2 = vor.u32 %v7510_v11, %v5874_v33 }
 0x339   :  { %v3808_v45 = vadd.f32 %v3807_v26, %v3735_v31  ;;  %v3878_v27 = vadd.f32 %v3877_v29, %v3805_v58  ;;  %v3950_v63 = vpop.f32.mrf.mxu1  ;;  %v7518_v58 = vld [vmem:[%s12482_s0 + $0x2e4] sm:$0xf] }
 0x33a   :  { %12846 = vst [vmem:[#allocation176_spill] sm:$0xff] %v10879_v2  ;;  %v10881_v56 = vor.u32 %v7518_v58, %v5936_v3 }
 0x33b   :  { %v10856_v1 = vadd.f32 %v3950_v63, %v3878_v27  ;;  %v6444_v27 = vld [vmem:[%s12481_s1 + $0xb8] sm:$0xf0]  ;;  %v7668_v63 = vld [vmem:[%s12481_s1 + $0x134] sm:$0xf] }
 0x33c   :  { %12847 = vst [vmem:[#allocation177_spill] sm:$0xff] %v10881_v56  ;;  %v6511_v40 = vor.u32 %v7668_v63, %v6508_v43  ;;  %v6636_v63 = vld [vmem:[%s12481_s1 + $0x238] sm:$0xf0]  ;;  %v7535_v43 = vld [vmem:[%s12482_s0 + $0x36c] sm:$0xf] }
 0x33e   :  { %v3736_v12 = vpop.f32.mrf.mxu2  ;;  %4341 = vmatpush.bf16.msrb.mxu3 %v6511_v40  ;;  %v6004_v40 = vld [vmem:[%s12482_s0 + $0x3ac] sm:$0xf0] }
 0x33f   :  { %v3737_v13 = vadd.f32 %v3736_v12, %v10242_v55  ;;  %v7652_v55 = vld [vmem:[%s12481_s1 + $0xb4] sm:$0xf] }
 0x340   :  { %v3809_v62 = vpop.f32.mrf.mxu3  ;;  %v3880_v18 = vpop.f32.mrf.mxu0 }
 0x341   :  { %v3810_v38 = vadd.f32 %v3809_v62, %v3737_v13  ;;  %v3881_v31 = vadd.f32 %v3880_v18, %v3808_v45  ;;  %v3953_v26 = vpop.f32.mrf.mxu1  ;;  %v6447_v45 = vor.u32 %v7652_v55, %v6444_v27  ;;  %v6002_v62 = vld [vmem:[%s12482_s0 + $0x368] sm:$0xf]  ;;  %v7543_v18 = vld [vmem:[%s12482_s0 + $0x3a8] sm:$0xf0] }
 0x342   :  { %v5942_v55 = vld [vmem:[%s12482_s0 + $0x2e8] sm:$0xf]  ;;  %v7527_v27 = vld [vmem:[%s12482_s0 + $0x328] sm:$0xf0] }
 0x343   :  { %v10883_v29 = vadd.f32 %v3953_v26, %v3881_v31  ;;  %4005 = vmatmul.bf16.gmra.mxu2 %v10877_v24  ;;  %7404 = vmatmul.msk.bf16.gmra.mxu0 %vm2903_vm1, %v10879_v2  ;;  %v6572_v26 = vld [vmem:[%s12481_s1 + $0x1b8] sm:$0xf0] }
 0x344   :  { %4219 = vmatmul.bf16.gmra.mxu1 %v8374_v14  ;;  %4268 = vmatpush.bf16.msrb.mxu2 %v6447_v45 }
 0x345   :  { %4078 = vmatmul.bf16.gmra.mxu3 %v10881_v56 }
 0x346   :  { %v3739_v33 = vpop.f32.mrf.mxu2 }
 0x347   :  { %v3740_v11 = vadd.f32 %v3739_v33, %v10280_v37  ;;  %v7684_v37 = vld [vmem:[%s12481_s1 + $0x1b4] sm:$0xf] }
 0x348   :  { %v3812_v58 = vpop.f32.mrf.mxu3  ;;  %v3882_v3 = vpop.f32.mrf.mxu0  ;;  %v6575_v45 = vor.u32 %v7684_v37, %v6572_v26  ;;  %v10940_v26 = vor.u32 %v7535_v43, %v6004_v40  ;;  %v7544_v43 = vld [vmem:[%s12482_s0 + $0x3b0] sm:$0xf0] }
 0x349   :  { %v3813_v14 = vadd.f32 %v3812_v58, %v3740_v11  ;;  %v3883_v12 = vadd.f32 %v3882_v3, %v3810_v38  ;;  %v3955_v13 = vpop.f32.mrf.mxu1  ;;  %v7700_v38 = vld [vmem:[%s12481_s1 + $0x234] sm:$0xf] }
 0x34a   :  { %v6639_v33 = vor.u32 %v7700_v38, %v6636_v63  ;;  %4414 = vmatpush.bf16.msrb.mxu0 %v6575_v45  ;;  %v6010_v63 = vld [vmem:[%s12482_s0 + $0x370] sm:$0xf]  ;;  %v7552_v40 = vld [vmem:[%s12482_s0 + $0x3f4] sm:$0xf] }
 0x34b   :  { %v10909_v31 = vadd.f32 %v3955_v13, %v3883_v12  ;;  %v10936_v12 = vor.u32 %v7543_v18, %v6002_v62  ;;  %v10938_v13 = vor.u32 %v7527_v27, %v5942_v55 }
 0x34c   :  { %4487 = vmatpush.bf16.msrb.mxu1 %v6639_v33  ;;  %v6072_v33 = vld [vmem:[%s12482_s0 + $0x434] sm:$0xf0] }
 0x34e   :  { %v3741_v11 = vpop.f32.mrf.mxu2 }
 0x34f   :  { %v3742_v58 = vadd.f32 %v3741_v11, %v10293_v9 }
 0x350   :  { %v3814_v3 = vpop.f32.mrf.mxu3  ;;  %v3885_v37 = vpop.f32.mrf.mxu0 }
 0x351   :  { %v3815_v56 = vadd.f32 %v3814_v3, %v3742_v58  ;;  %v3886_v24 = vadd.f32 %v3885_v37, %v3813_v14  ;;  %v3958_v2 = vpop.f32.mrf.mxu1 }
 0x353   :  { %v10942_v52 = vadd.f32 %v3958_v2, %v3886_v24  ;;  %4010 = vmatmul.bf16.gmra.mxu2 %v10936_v12  ;;  %7405 = vmatmul.msk.bf16.gmra.mxu0 %vm2903_vm1, %v10938_v13  ;;  %v7650_v24 = vld [vmem:[%s12481_s1 + $0xa4] sm:$0xf]  ;;  %v6436_v2 = vld [vmem:[%s12481_s1 + $0xa8] sm:$0xf0] }
 0x354   :  { %4224 = vmatmul.bf16.gmra.mxu1 %v8425_v41  ;;  %v6439_v45 = vor.u32 %v7650_v24, %v6436_v2 }
 0x355   :  { %4083 = vmatmul.bf16.gmra.mxu3 %v10940_v26 }
 0x356   :  { %v3744_v9 = vpop.f32.mrf.mxu2  ;;  %4269 = vmatpush.bf16.msrb.mxu2 %v6439_v45 }
 0x357   :  { %v3745_v62 = vadd.f32 %v3744_v9, %v10334_v22  ;;  %v6070_v22 = vld [vmem:[%s12482_s0 + $0x3f0] sm:$0xf]  ;;  %v10979_v9 = vor.u32 %v7544_v43, %v6010_v63 }
 0x358   :  { %v3817_v18 = vpop.f32.mrf.mxu3  ;;  %v3887_v38 = vpop.f32.mrf.mxu0 }
 0x359   :  { %v3818_v55 = vadd.f32 %v3817_v18, %v3745_v62  ;;  %v3888_v27 = vadd.f32 %v3887_v38, %v3815_v56  ;;  %v3960_v14 = vpop.f32.mrf.mxu1  ;;  %v7560_v56 = vld [vmem:[%s12482_s0 + $0x430] sm:$0xf0]  ;;  %v7666_v62 = vld [vmem:[%s12481_s1 + $0x124] sm:$0xf]  ;;  %v6500_v18 = vld [vmem:[%s12481_s1 + $0x128] sm:$0xf0] }
 0x35a   :  { %v10977_v37 = vor.u32 %v7560_v56, %v6070_v22  ;;  %v7682_v22 = vld [vmem:[%s12481_s1 + $0x1a4] sm:$0xf] }
 0x35b   :  { %v10956_v41 = vadd.f32 %v3960_v14, %v3888_v27  ;;  %v10987_v27 = vor.u32 %v7552_v40, %v6072_v33  ;;  %v6503_v14 = vor.u32 %v7666_v62, %v6500_v18  ;;  %v7698_v56 = vld [vmem:[%s12481_s1 + $0x224] sm:$0xf] }
 0x35c   :  { %12848 = vst [vmem:[#allocation178_spill] sm:$0xff] %v10977_v37 }
 0x35d   :  { %12849 = vst [vmem:[#allocation179_spill] sm:$0xff] %v10987_v27  ;;  %4342 = vmatpush.bf16.msrb.mxu3 %v6503_v14  ;;  %v6138_v14 = vld [vmem:[%s12482_s0 + $0x478] sm:$0xf] }
 0x35e   :  { %v3746_v11 = vpop.f32.mrf.mxu2 }
 0x35f   :  { %v3747_v58 = vadd.f32 %v3746_v11, %v10347_v54 }
 0x360   :  { %v3819_v3 = vpop.f32.mrf.mxu3  ;;  %v3890_v38 = vpop.f32.mrf.mxu0 }
 0x361   :  { %v3820_v24 = vadd.f32 %v3819_v3, %v3747_v58  ;;  %v3891_v2 = vadd.f32 %v3890_v38, %v3818_v55  ;;  %v3963_v54 = vpop.f32.mrf.mxu1  ;;  %v6564_v55 = vld [vmem:[%s12481_s1 + $0x1a8] sm:$0xf0] }
 0x362   :  { %v6567_v43 = vor.u32 %v7682_v22, %v6564_v55  ;;  %v6140_v22 = vld [vmem:[%s12482_s0 + $0x4bc] sm:$0xf0] }
 0x363   :  { %v10989_v45 = vadd.f32 %v3963_v54, %v3891_v2  ;;  %4015 = vmatmul.bf16.gmra.mxu2 %v10977_v37  ;;  %7406 = vmatmul.msk.bf16.gmra.mxu0 %vm2903_vm1, %v10979_v9  ;;  %v7577_v2 = vld [vmem:[%s12482_s0 + $0x4b8] sm:$0xf0]  ;;  %v7680_v37 = vld [vmem:[%s12481_s1 + $0x194] sm:$0xf] }
 0x364   :  { %4229 = vmatmul.bf16.gmra.mxu1 %v8473_v5  ;;  %v6628_v5 = vld [vmem:[%s12481_s1 + $0x228] sm:$0xf0]  ;;  %4415 = vmatpush.bf16.msrb.mxu0 %v6567_v43  ;;  %v7569_v54 = vld [vmem:[%s12482_s0 + $0x47c] sm:$0xf] }
 0x365   :  { %4088 = vmatmul.bf16.gmra.mxu3 %v10987_v27  ;;  %v6631_v11 = vor.u32 %v7698_v56, %v6628_v5 }
 0x366   :  { %v3749_v63 = vpop.f32.mrf.mxu2 }
 0x367   :  { %v3750_v40 = vadd.f32 %v3749_v63, %v10381_v20  ;;  %4488 = vmatpush.bf16.msrb.mxu1 %v6631_v11  ;;  %v6078_v20 = vld [vmem:[%s12482_s0 + $0x3f8] sm:$0xf]  ;;  %v11029_v63 = vor.u32 %v7577_v2, %v6138_v14  ;;  %v7648_v14 = vld [vmem:[%s12481_s1 + $0x94] sm:$0xf] }
 0x368   :  { %v3822_v33 = vpop.f32.mrf.mxu3  ;;  %v3892_v58 = vpop.f32.mrf.mxu0 }
 0x369   :  { %v3823_v3 = vadd.f32 %v3822_v33, %v3750_v40  ;;  %v3893_v62 = vadd.f32 %v3892_v58, %v3820_v24  ;;  %v3965_v18 = vpop.f32.mrf.mxu1  ;;  %v7561_v24 = vld [vmem:[%s12482_s0 + $0x438] sm:$0xf0]  ;;  %12850 = vst [vmem:[#allocation180_spill] sm:$0xff] %v11029_v63  ;;  %v11033_v40 = vor.u32 %v7569_v54, %v6140_v22  ;;  %v7594_v22 = vld [vmem:[%s12482_s0 + $0x540] sm:$0xf0] }
 0x36a   :  { %v11031_v43 = vor.u32 %v7561_v24, %v6078_v20 }
 0x36b   :  { %v11009_v38 = vadd.f32 %v3965_v18, %v3893_v62  ;;  %12852 = vst [vmem:[#allocation182_spill] sm:$0xff] %v11033_v40 }
 0x36c   :  { %12851 = vst [vmem:[#allocation181_spill] sm:$0xff] %v11031_v43 }
 0x36e   :  { %v3751_v55 = vpop.f32.mrf.mxu2 }
 0x36f   :  { %v6146_v55 = vld [vmem:[%s12482_s0 + $0x480] sm:$0xf] }
 0x370   :  { %v3824_v56 = vpop.f32.mrf.mxu3  ;;  %v3895_v5 = vpop.f32.mrf.mxu0 }
 0x371   :  { %v3896_v33 = vadd.f32 %v3895_v5, %v3823_v3  ;;  %v3968_v11 = vpop.f32.mrf.mxu1  ;;  %v6428_v3 = vld [vmem:[%s12481_s1 + $0x98] sm:$0xf0]  ;;  %v7578_v56 = vld [vmem:[%s12482_s0 + $0x4c0] sm:$0xf0]  ;;  %v6208_v5 = vld [vmem:[%s12482_s0 + $0x544] sm:$0xf0] }
 0x372   :  { %v6431_v20 = vor.u32 %v7648_v14, %v6428_v3 }
 0x373   :  { %v11035_v58 = vadd.f32 %v3968_v11, %v3896_v33  ;;  %4020 = vmatmul.bf16.gmra.mxu2 %v11029_v63  ;;  %7407 = vmatmul.msk.bf16.gmra.mxu0 %vm2903_vm1, %v11031_v43  ;;  %v7664_v33 = vld [vmem:[%s12481_s1 + $0x114] sm:$0xf]  ;;  %v6492_v11 = vld [vmem:[%s12481_s1 + $0x118] sm:$0xf0] }
 0x374   :  { %4234 = vmatmul.bf16.gmra.mxu1 %v8079_v4  ;;  %4270 = vmatpush.bf16.msrb.mxu2 %v6431_v20  ;;  %v6206_v4 = vld [vmem:[%s12482_s0 + $0x500] sm:$0xf]  ;;  %v6495_v14 = vor.u32 %v7664_v33, %v6492_v11 }
 0x375   :  { %4093 = vmatmul.bf16.gmra.mxu3 %v11033_v40  ;;  %v11073_v20 = vor.u32 %v7594_v22, %v6206_v4  ;;  %v6620_v22 = vld [vmem:[%s12481_s1 + $0x218] sm:$0xf0] }
 0x376   :  { %v3981_v62 = vpop.f32.mrf.mxu2  ;;  %4343 = vmatpush.bf16.msrb.mxu3 %v6495_v14  ;;  %v7611_v14 = vld [vmem:[%s12482_s0 + $0x5c8] sm:$0xf0] }
 0x377   :  { %v3982_v54 = vadd.f32 %v3981_v62, %v10445_v46  ;;  %v7586_v46 = vld [vmem:[%s12482_s0 + $0x504] sm:$0xf]  ;;  %12853 = vst [vmem:[#allocation183_spill] sm:$0xff] %v11073_v20 }
 0x378   :  { %v4054_v18 = vpop.f32.mrf.mxu3  ;;  %v3897_v2 = vpop.f32.mrf.mxu0  ;;  %v11077_v63 = vor.u32 %v7586_v46, %v6208_v5 }
 0x379   :  { %v3970_v24 = vpop.f32.mrf.mxu1  ;;  %v4055_v3 = vadd.f32 %v4054_v18, %v3982_v54  ;;  %v6556_v18 = vld [vmem:[%s12481_s1 + $0x198] sm:$0xf0]  ;;  %v7696_v54 = vld [vmem:[%s12481_s1 + $0x214] sm:$0xf] }
 0x37a   :  { %v11075_v24 = vor.u32 %v7578_v56, %v6146_v55  ;;  %12855 = vst [vmem:[#allocation185_spill] sm:$0xff] %v11077_v63  ;;  %v6559_v4 = vor.u32 %v7680_v37, %v6556_v18  ;;  %v6623_v56 = vor.u32 %v7696_v54, %v6620_v22  ;;  %v6276_v18 = vld [vmem:[%s12482_s0 + $0x5cc] sm:$0xf0] }
 0x37c   :  { %12854 = vst [vmem:[#allocation184_spill] sm:$0xff] %v11075_v24  ;;  %4416 = vmatpush.bf16.msrb.mxu0 %v6559_v4  ;;  %4489 = vmatpush.bf16.msrb.mxu1 %v6623_v56 }
 0x37e   :  { %v3983_v62 = vpop.f32.mrf.mxu2 }
 0x380   :  { %v4056_v2 = vpop.f32.mrf.mxu3  ;;  %v4127_v40 = vpop.f32.mrf.mxu0 }
 0x381   :  { %v4128_v43 = vadd.f32 %v4127_v40, %v4055_v3  ;;  %v11079_v27 = vpop.f32.mrf.mxu1  ;;  %v3984_v40 = vadd.f32 %v3983_v62, %v10452_v10  ;;  %v6214_v3 = vld [vmem:[%s12482_s0 + $0x508] sm:$0xf] }
 0x383   :  { %v5432_v55 = vmax.f32 %v4128_v43, 0.0  ;;  %4025 = vmatmul.bf16.gmra.mxu2 %v11073_v20  ;;  %7408 = vmatmul.msk.bf16.gmra.mxu0 %vm2903_vm1, %v11075_v24  ;;  %v4057_v46 = vadd.f32 %v4056_v2, %v3984_v40  ;;  %v7595_v2 = vld [vmem:[%s12482_s0 + $0x548] sm:$0xf0] }
 0x384   :  { %4239 = vmatmul.bf16.gmra.mxu1 %v8184_v53  ;;  %v6274_v53 = vld [vmem:[%s12482_s0 + $0x588] sm:$0xf] }
 0x385   :  { %4098 = vmatmul.bf16.gmra.mxu3 %v11077_v63  ;;  %5482 = vst [vmem:[%s12484_s3] sm:$0xff] %v5432_v55  ;;  %v11126_v40 = vor.u32 %v7611_v14, %v6274_v53  ;;  %v11128_v55 = vor.u32 %v7595_v2, %v6214_v3  ;;  %v6484_v14 = vld [vmem:[%s12481_s1 + $0x108] sm:$0xf0] }
 0x386   :  { %v3986_v37 = vpop.f32.mrf.mxu2 }
 0x387   :  { %v3987_v11 = vadd.f32 %v3986_v37, %v10487_v19  ;;  %v7603_v19 = vld [vmem:[%s12482_s0 + $0x58c] sm:$0xf]  ;;  %12856 = vst [vmem:[#allocation186_spill] sm:$0xff] %v11126_v40 }
 0x388   :  { %v4059_v10 = vpop.f32.mrf.mxu3  ;;  %v4129_v43 = vpop.f32.mrf.mxu0  ;;  %12857 = vst [vmem:[#allocation187_spill] sm:$0xff] %v11128_v55  ;;  %v11130_v37 = vor.u32 %v7603_v19, %v6276_v18 }
 0x389   :  { %v4130_v5 = vadd.f32 %v4129_v43, %v4057_v46  ;;  %v11102_v33 = vpop.f32.mrf.mxu1  ;;  %v4060_v4 = vadd.f32 %v4059_v10, %v3987_v11  ;;  %v7646_v10 = vld [vmem:[%s12481_s1 + $0x84] sm:$0xf] }
 0x38a   :  { %12858 = vst [vmem:[#allocation188_spill] sm:$0xff] %v11130_v37 }
 0x38b   :  { %v5434_v62 = vmax.f32 %v4130_v5, 0.0 }
 0x38d   :  { %5484 = vst [vmem:[%s12484_s3 + $0x10] sm:$0xff] %v5434_v62 }
 0x38e   :  { %v3988_v54 = vpop.f32.mrf.mxu2 }
 0x38f   :  { %v3989_v5 = vadd.f32 %v3988_v54, %v10509_v51  ;;  %v6420_v51 = vld [vmem:[%s12481_s1 + $0x88] sm:$0xf0] }
 0x390   :  { %v4061_v22 = vpop.f32.mrf.mxu3  ;;  %v4132_v56 = vpop.f32.mrf.mxu0  ;;  %v6423_v53 = vor.u32 %v7646_v10, %v6420_v51  ;;  %v7628_v10 = vld [vmem:[%s12482_s0 + $0x650] sm:$0xf0] }
 0x391   :  { %v4133_v46 = vadd.f32 %v4132_v56, %v4060_v4  ;;  %v11132_v43 = vpop.f32.mrf.mxu1  ;;  %v4062_v3 = vadd.f32 %v4061_v22, %v3989_v5  ;;  %v6342_v56 = vld [vmem:[%s12482_s0 + $0x610] sm:$0xf]  ;;  %v7612_v5 = vld [vmem:[%s12482_s0 + $0x5d0] sm:$0xf0] }
 0x392   :  { %4271 = vmatpush.bf16.msrb.mxu2 %v6423_v53  ;;  %v6282_v22 = vld [vmem:[%s12482_s0 + $0x590] sm:$0xf]  ;;  %v7620_v51 = vld [vmem:[%s12482_s0 + $0x614] sm:$0xf]  ;;  %v6548_v53 = vld [vmem:[%s12481_s1 + $0x188] sm:$0xf0] }
 0x393   :  { %v5436_v62 = vmax.f32 %v4133_v46, 0.0  ;;  %4030 = vmatmul.bf16.gmra.mxu2 %v11126_v40  ;;  %7409 = vmatmul.msk.bf16.gmra.mxu0 %vm2903_vm1, %v11128_v55 }
 0x394   :  { %4244 = vmatmul.bf16.gmra.mxu1 %v8244_v17  ;;  %v7662_v17 = vld [vmem:[%s12481_s1 + $0x104] sm:$0xf] }
 0x395   :  { %4103 = vmatmul.bf16.gmra.mxu3 %v11130_v37  ;;  %5486 = vst [vmem:[%s12484_s3 + $0x20] sm:$0xff] %v5436_v62  ;;  %v6487_v19 = vor.u32 %v7662_v17, %v6484_v14  ;;  %v11193_v37 = vor.u32 %v7612_v5, %v6282_v22 }
 0x396   :  { %v3991_v11 = vpop.f32.mrf.mxu2 }
 0x397   :  { %4344 = vmatpush.bf16.msrb.mxu3 %v6487_v19  ;;  %v3992_v46 = vadd.f32 %v3991_v11, %v10547_v34  ;;  %v6344_v34 = vld [vmem:[%s12482_s0 + $0x654] sm:$0xf0]  ;;  %v7678_v11 = vld [vmem:[%s12481_s1 + $0x184] sm:$0xf]  ;;  %v6612_v19 = vld [vmem:[%s12481_s1 + $0x208] sm:$0xf0] }
 0x398   :  { %v4064_v2 = vpop.f32.mrf.mxu3  ;;  %v4134_v18 = vpop.f32.mrf.mxu0  ;;  %v6551_v14 = vor.u32 %v7678_v11, %v6548_v53  ;;  %v11195_v63 = vor.u32 %v7620_v51, %v6344_v34  ;;  %v6350_v51 = vld [vmem:[%s12482_s0 + $0x618] sm:$0xf]  ;;  %v7724_v34 = vld [vmem:[%s12481_s1 + $0x2f4] sm:$0xf] }
 0x399   :  { %v4135_v54 = vadd.f32 %v4134_v18, %v4062_v3  ;;  %v11155_v4 = vpop.f32.mrf.mxu1  ;;  %v7694_v3 = vld [vmem:[%s12481_s1 + $0x204] sm:$0xf]  ;;  %v4065_v18 = vadd.f32 %v4064_v2, %v3992_v46 }
 0x39a   :  { %v6615_v40 = vor.u32 %v7694_v3, %v6612_v19  ;;  %4417 = vmatpush.bf16.msrb.mxu0 %v6551_v14  ;;  %v7740_v3 = vld [vmem:[%s12481_s1 + $0x374] sm:$0xf]  ;;  %v6796_v19 = vld [vmem:[%s12481_s1 + $0x378] sm:$0xf0] }
 0x39b   :  { %v5438_v62 = vmax.f32 %v4135_v54, 0.0 }
 0x39c   :  { %4490 = vmatpush.bf16.msrb.mxu1 %v6615_v40 }
 0x39d   :  { %5488 = vst [vmem:[%s12484_s3 + $0x30] sm:$0xff] %v5438_v62  ;;  %v11191_v62 = vor.u32 %v7628_v10, %v6342_v56 }
 0x39e   :  { %v3993_v17 = vpop.f32.mrf.mxu2 }
 0x39f   :  { %v3994_v20 = vadd.f32 %v3993_v17, %v10557_v47  ;;  %v238_v47 = vld [vmem:[%s12482_s0 + $0x698] sm:$0xff] }
 0x3a0   :  { %v4066_v54 = vpop.f32.mrf.mxu3  ;;  %v4137_v55 = vpop.f32.mrf.mxu0  ;;  %v1156_v5 = vunpack.c.l.b16 %v238_v47 }
 0x3a1   :  { %v4138_v11 = vadd.f32 %v4137_v55, %v4065_v18  ;;  %v11197_v53 = vpop.f32.mrf.mxu1  ;;  %v4067_v2 = vadd.f32 %v4066_v54, %v3994_v20  ;;  %v7629_v20 = vld [vmem:[%s12482_s0 + $0x658] sm:$0xf0] }
 0x3a3   :  { %v5440_v24 = vmax.f32 %v4138_v11, 0.0  ;;  %4035 = vmatmul.bf16.gmra.mxu2 %v11191_v62  ;;  %7410 = vmatmul.msk.bf16.gmra.mxu0 %vm2903_vm1, %v11193_v37  ;;  %v11235_v11 = vpack.c.b16 %v1156_v5, %v1156_v5 }
 0x3a4   :  { %4249 = vmatmul.bf16.gmra.mxu1 %v8310_v44 }
 0x3a5   :  { %4108 = vmatmul.bf16.gmra.mxu3 %v11195_v63  ;;  %5490 = vst [vmem:[%s12484_s3 + $0x40] sm:$0xff] %v5440_v24  ;;  %v1157_v24 = vunpack.c.h.b16 %v238_v47 }
 0x3a6   :  { %v3996_v55 = vpop.f32.mrf.mxu2 }
 0x3a7   :  { %v3997_v22 = vadd.f32 %v3996_v55, %v10592_v23  ;;  %v6732_v23 = vld [vmem:[%s12481_s1 + $0x2f8] sm:$0xf0]  ;;  %v11237_v55 = vor.u32 %v7629_v20, %v6350_v51  ;;  %v11239_v47 = vpack.c.b16 %v1157_v24, %v1157_v24 }
 0x3a8   :  { %v4069_v56 = vpop.f32.mrf.mxu3  ;;  %v4139_v40 = vpop.f32.mrf.mxu0  ;;  %v6735_v14 = vor.u32 %v7724_v34, %v6732_v23  ;;  %v6924_v51 = vld [vmem:[%s12481_s1 + $0x478] sm:$0xf0] }
 0x3a9   :  { %v4140_v46 = vadd.f32 %v4139_v40, %v4067_v2  ;;  %v11211_v10 = vpop.f32.mrf.mxu1  ;;  %v4070_v18 = vadd.f32 %v4069_v56, %v3997_v22  ;;  %v6799_v2 = vor.u32 %v7740_v3, %v6796_v19  ;;  %v7756_v56 = vld [vmem:[%s12481_s1 + $0x3f4] sm:$0xf]  ;;  %v239_v3 = vld [vmem:[%s12482_s0 + $0x6a0] sm:$0xf] }
 0x3aa   :  { %4556 = vmatpush.bf16.msra.mxu2 %v6735_v14 }
 0x3ab   :  { %v5442_v44 = vmax.f32 %v4140_v46, 0.0  ;;  %4629 = vmatpush.bf16.msra.mxu3 %v6799_v2 }
 0x3ad   :  { %5492 = vst [vmem:[%s12484_s3 + $0x50] sm:$0xff] %v5442_v44 }
 0x3ae   :  { %v3998_v17 = vpop.f32.mrf.mxu2 }
 0x3af   :  { %v3999_v34 = vadd.f32 %v3998_v17, %v10614_v50  ;;  %v6860_v50 = vld [vmem:[%s12481_s1 + $0x3f8] sm:$0xf0] }
 0x3b0   :  { %v4071_v54 = vpop.f32.mrf.mxu3  ;;  %v4142_v40 = vpop.f32.mrf.mxu0  ;;  %v6863_v5 = vor.u32 %v7756_v56, %v6860_v50 }
 0x3b1   :  { %v4143_v46 = vadd.f32 %v4142_v40, %v4070_v18  ;;  %v11241_v44 = vpop.f32.mrf.mxu1  ;;  %v4072_v20 = vadd.f32 %v4071_v54, %v3999_v34 }
 0x3b2   :  { %4702 = vmatpush.bf16.msra.mxu0 %v6863_v5 }
 0x3b3   :  { %v5444_v23 = vmax.f32 %v4143_v46, 0.0  ;;  %4040 = vmatmul.bf16.gmra.mxu2 %v11235_v11  ;;  %7411 = vmatmul.msk.bf16.gmra.mxu0 %vm2903_vm1, %v11237_v55  ;;  %v1158_v46 = vunpack.c.l.b16 %v239_v3 }
 0x3b4   :  { %4254 = vmatmul.bf16.gmra.mxu1 %v8376_v15  ;;  %v7772_v15 = vld [vmem:[%s12481_s1 + $0x474] sm:$0xf] }
 0x3b5   :  { %4113 = vmatmul.bf16.gmra.mxu3 %v11239_v47  ;;  %5494 = vst [vmem:[%s12484_s3 + $0x60] sm:$0xff] %v5444_v23  ;;  %v6927_v17 = vor.u32 %v7772_v15, %v6924_v51  ;;  %v11273_v56 = vpack.c.b16 %v1158_v46, %v1158_v46 }
 0x3b6   :  { %v4001_v22 = vpop.f32.mrf.mxu2 }
 0x3b7   :  { %4775 = vmatpush.bf16.msra.mxu1 %v6927_v17  ;;  %v4002_v2 = vadd.f32 %v4001_v22, %v10637_v48  ;;  %v7722_v48 = vld [vmem:[%s12481_s1 + $0x2e4] sm:$0xf] }
 0x3b8   :  { %v4074_v24 = vpop.f32.mrf.mxu3  ;;  %v4144_v14 = vpop.f32.mrf.mxu0 }
 0x3b9   :  { %v4145_v19 = vadd.f32 %v4144_v14, %v4072_v20  ;;  %v11267_v18 = vpop.f32.mrf.mxu1  ;;  %v4075_v34 = vadd.f32 %v4074_v24, %v4002_v2 }
 0x3bb   :  { %v5446_v40 = vmax.f32 %v4145_v19, 0.0 }
 0x3bd   :  { %5496 = vst [vmem:[%s12484_s3 + $0x70] sm:$0xff] %v5446_v40 }
 0x3be   :  { %v4003_v54 = vpop.f32.mrf.mxu2 }
 0x3bf   :  { %v4004_v51 = vadd.f32 %v4003_v54, %v10662_v7  ;;  %v6724_v7 = vld [vmem:[%s12481_s1 + $0x2e8] sm:$0xf0]  ;;  %v7754_v54 = vld [vmem:[%s12481_s1 + $0x3e4] sm:$0xf] }
 0x3c0   :  { %v4076_v23 = vpop.f32.mrf.mxu3  ;;  %v4147_v50 = vpop.f32.mrf.mxu0  ;;  %v6727_v24 = vor.u32 %v7722_v48, %v6724_v7 }
 0x3c1   :  { %v4148_v15 = vadd.f32 %v4147_v50, %v4075_v34  ;;  %v11275_v5 = vpop.f32.mrf.mxu1  ;;  %v4077_v17 = vadd.f32 %v4076_v23, %v4004_v51  ;;  %v6852_v34 = vld [vmem:[%s12481_s1 + $0x3e8] sm:$0xf0] }
 0x3c2   :  { %4557 = vmatpush.bf16.msra.mxu2 %v6727_v24  ;;  %v6855_v50 = vor.u32 %v7754_v54, %v6852_v34 }
 0x3c3   :  { %v5448_v20 = vmax.f32 %v4148_v15, 0.0  ;;  %7412 = vmatmul.msk.bf16.gmra.mxu0 %vm2903_vm1, %v11273_v56  ;;  %4272 = vmatmul.bf16.vlgmr.msrb.gmra.mxu2 %v8090_v8  ;;  %v7770_v15 = vld [vmem:[%s12481_s1 + $0x464] sm:$0xf] }
 0x3c4   :  { %4259 = vmatmul.bf16.gmra.mxu1 %v8427_v42  ;;  %v7738_v42 = vld [vmem:[%s12481_s1 + $0x364] sm:$0xf]  ;;  %4703 = vmatpush.bf16.msra.mxu0 %v6855_v50 }
 0x3c5   :  { %4345 = vmatmul.bf16.vlgmr.msrb.gmra.mxu3 %v8475_v6  ;;  %5498 = vst [vmem:[%s12484_s3 + $0x80] sm:$0xff] %v5448_v20  ;;  %v6788_v6 = vld [vmem:[%s12481_s1 + $0x368] sm:$0xf0] }
 0x3c6   :  { %v4006_v22 = vpop.f32.mrf.mxu2  ;;  %v6791_v3 = vor.u32 %v7738_v42, %v6788_v6  ;;  %v12859_v6 = vld [vmem:[#allocation3_spill] sm:$0xff] }
 0x3c7   :  { %v4007_v40 = vadd.f32 %v4006_v22, %v10695_v28  ;;  %v6916_v28 = vld [vmem:[%s12481_s1 + $0x468] sm:$0xf0] }
 0x3c8   :  { %v4079_v8 = vpop.f32.mrf.mxu3  ;;  %v4149_v14 = vpop.f32.mrf.mxu0  ;;  %4630 = vmatpush.bf16.msra.mxu3 %v6791_v3  ;;  %v6919_v48 = vor.u32 %v7770_v15, %v6916_v28  ;;  %v12861_v3 = vld [vmem:[#allocation16_spill] sm:$0xff] }
 0x3c9   :  { %v4150_v19 = vadd.f32 %v4149_v14, %v4077_v17  ;;  %v11298_v2 = vpop.f32.mrf.mxu1  ;;  %v4080_v51 = vadd.f32 %v4079_v8, %v4007_v40  ;;  %v12860_v14 = vld [vmem:[#allocation14_spill] sm:$0xff] }
 0x3ca   :  { %4776 = vmatpush.bf16.msra.mxu1 %v6919_v48  ;;  %v7720_v48 = vld [vmem:[%s12481_s1 + $0x2d4] sm:$0xf] }
 0x3cb   :  { %v5450_v46 = vmax.f32 %v4150_v19, 0.0  ;;  %v12862_v19 = vld [vmem:[#allocation15_spill] sm:$0xff] }
 0x3cd   :  { %5500 = vst [vmem:[%s12484_s3 + $0x90] sm:$0xff] %v5450_v46 }
 0x3ce   :  { %v4008_v23 = vpop.f32.mrf.mxu2 }
 0x3cf   :  { %v4009_v17 = vadd.f32 %v4008_v23, %v10703_v59 }
 0x3d0   :  { %v4081_v20 = vpop.f32.mrf.mxu3  ;;  %v4152_v7 = vpop.f32.mrf.mxu0 }
 0x3d1   :  { %v4153_v22 = vadd.f32 %v4152_v7, %v4080_v51  ;;  %v11316_v24 = vpop.f32.mrf.mxu1  ;;  %v4082_v40 = vadd.f32 %v4081_v20, %v4009_v17  ;;  %v6716_v20 = vld [vmem:[%s12481_s1 + $0x2d8] sm:$0xf0] }
 0x3d3   :  { %v5452_v42 = vmax.f32 %v4153_v22, 0.0  ;;  %4277 = vmatmul.bf16.gmra.mxu2 %v12859_v6  ;;  %4418 = vmatmul.bf16.vlgmr.msrb.gmra.mxu0 %v12860_v14  ;;  %v6719_v22 = vor.u32 %v7720_v48, %v6716_v20  ;;  %v12863_v14 = vld [vmem:[#allocation5_spill] sm:$0xff]  ;;  %v7752_v48 = vld [vmem:[%s12481_s1 + $0x3d4] sm:$0xf] }
 0x3d4   :  { %4491 = vmatmul.bf16.vlgmr.msrb.gmra.mxu1 %v12861_v3  ;;  %v12864_v3 = vld [vmem:[#allocation18_spill] sm:$0xff]  ;;  %v6844_v20 = vld [vmem:[%s12481_s1 + $0x3d8] sm:$0xf0] }
 0x3d5   :  { %4350 = vmatmul.bf16.gmra.mxu3 %v12862_v19  ;;  %5502 = vst [vmem:[%s12484_s3 + $0xa0] sm:$0xff] %v5452_v42  ;;  %4558 = vmatpush.bf16.msra.mxu2 %v6719_v22  ;;  %v12865_v19 = vld [vmem:[#allocation20_spill] sm:$0xff]  ;;  %v6847_v22 = vor.u32 %v7752_v48, %v6844_v20 }
 0x3d6   :  { %v4011_v8 = vpop.f32.mrf.mxu2 }
 0x3d7   :  { %v4012_v59 = vadd.f32 %v4011_v8, %v10736_v61  ;;  %v12866_v8 = vld [vmem:[#allocation19_spill] sm:$0xff]  ;;  %4704 = vmatpush.bf16.msra.mxu0 %v6847_v22 }
 0x3d8   :  { %v4084_v46 = vpop.f32.mrf.mxu3  ;;  %v4154_v54 = vpop.f32.mrf.mxu0 }
 0x3d9   :  { %v4155_v34 = vadd.f32 %v4154_v54, %v4082_v40  ;;  %v11326_v50 = vpop.f32.mrf.mxu1  ;;  %v4085_v28 = vadd.f32 %v4084_v46, %v4012_v59  ;;  %v7736_v40 = vld [vmem:[%s12481_s1 + $0x354] sm:$0xf] }
 0x3db   :  { %v5454_v23 = vmax.f32 %v4155_v34, 0.0 }
 0x3dd   :  { %5504 = vst [vmem:[%s12484_s3 + $0xb0] sm:$0xff] %v5454_v23 }
 0x3de   :  { %v4013_v15 = vpop.f32.mrf.mxu2 }
 0x3df   :  { %v4014_v42 = vadd.f32 %v4013_v15, %v10762_v36  ;;  %v6780_v36 = vld [vmem:[%s12481_s1 + $0x358] sm:$0xf0] }
 0x3e0   :  { %v4086_v51 = vpop.f32.mrf.mxu3  ;;  %v4157_v7 = vpop.f32.mrf.mxu0  ;;  %v6783_v54 = vor.u32 %v7736_v40, %v6780_v36 }
 0x3e1   :  { %v4158_v17 = vadd.f32 %v4157_v7, %v4085_v28  ;;  %v11338_v61 = vpop.f32.mrf.mxu1  ;;  %v4087_v34 = vadd.f32 %v4086_v51, %v4014_v42  ;;  %v7768_v7 = vld [vmem:[%s12481_s1 + $0x454] sm:$0xf]  ;;  %v6908_v51 = vld [vmem:[%s12481_s1 + $0x458] sm:$0xf0] }
 0x3e2   :  { %4631 = vmatpush.bf16.msra.mxu3 %v6783_v54 }
 0x3e3   :  { %v5456_v6 = vmax.f32 %v4158_v17, 0.0  ;;  %4282 = vmatmul.bf16.gmra.mxu2 %v12863_v14  ;;  %4423 = vmatmul.bf16.gmra.mxu0 %v12864_v3 }
 0x3e4   :  { %4496 = vmatmul.bf16.gmra.mxu1 %v12865_v19 }
 0x3e5   :  { %4355 = vmatmul.bf16.gmra.mxu3 %v12866_v8  ;;  %5506 = vst [vmem:[%s12484_s3 + $0xc0] sm:$0xff] %v5456_v6  ;;  %v6911_v6 = vor.u32 %v7768_v7, %v6908_v51 }
 0x3e6   :  { %v4016_v46 = vpop.f32.mrf.mxu2 }
 0x3e7   :  { %v4017_v17 = vadd.f32 %v4016_v46, %v10789_v30  ;;  %4777 = vmatpush.bf16.msra.mxu1 %v6911_v6  ;;  %v12868_v30 = vld [vmem:[#allocation22_spill] sm:$0xff]  ;;  %v12869_v46 = vld [vmem:[#allocation24_spill] sm:$0xff]  ;;  %v6708_v6 = vld [vmem:[%s12481_s1 + $0x2c8] sm:$0xf0] }
 0x3e8   :  { %v4089_v59 = vpop.f32.mrf.mxu3  ;;  %v4159_v23 = vpop.f32.mrf.mxu0 }
 0x3e9   :  { %v4160_v15 = vadd.f32 %v4159_v23, %v4087_v34  ;;  %v11354_v28 = vpop.f32.mrf.mxu1  ;;  %v4090_v3 = vadd.f32 %v4089_v59, %v4017_v17  ;;  %v12867_v23 = vld [vmem:[#allocation7_spill] sm:$0xff] }
 0x3eb   :  { %v5458_v42 = vmax.f32 %v4160_v15, 0.0  ;;  %v12870_v15 = vld [vmem:[#allocation23_spill] sm:$0xff] }
 0x3ed   :  { %5508 = vst [vmem:[%s12484_s3 + $0xd0] sm:$0xff] %v5458_v42  ;;  %v7718_v42 = vld [vmem:[%s12481_s1 + $0x2c4] sm:$0xf] }
 0x3ee   :  { %v4018_v14 = vpop.f32.mrf.mxu2 }
 0x3ef   :  { %v4019_v54 = vadd.f32 %v4018_v14, %v10803_v60 }
 0x3f0   :  { %v4091_v19 = vpop.f32.mrf.mxu3  ;;  %v4162_v8 = vpop.f32.mrf.mxu0 }
 0x3f1   :  { %v4163_v40 = vadd.f32 %v4162_v8, %v4090_v3  ;;  %v11372_v36 = vpop.f32.mrf.mxu1  ;;  %v4092_v48 = vadd.f32 %v4091_v19, %v4019_v54  ;;  %v6711_v3 = vor.u32 %v7718_v42, %v6708_v6  ;;  %v7734_v19 = vld [vmem:[%s12481_s1 + $0x344] sm:$0xf]  ;;  %v6900_v6 = vld [vmem:[%s12481_s1 + $0x448] sm:$0xf0] }
 0x3f2   :  { %v7766_v42 = vld [vmem:[%s12481_s1 + $0x444] sm:$0xf] }
 0x3f3   :  { %v5460_v34 = vmax.f32 %v4163_v40, 0.0  ;;  %4287 = vmatmul.bf16.gmra.mxu2 %v12867_v23  ;;  %4428 = vmatmul.bf16.gmra.mxu0 %v12868_v30 }
 0x3f4   :  { %4501 = vmatmul.bf16.gmra.mxu1 %v12869_v46  ;;  %4559 = vmatpush.bf16.msra.mxu2 %v6711_v3 }
 0x3f5   :  { %4360 = vmatmul.bf16.gmra.mxu3 %v12870_v15  ;;  %5510 = vst [vmem:[%s12484_s3 + $0xe0] sm:$0xff] %v5460_v34 }
 0x3f6   :  { %v4021_v59 = vpop.f32.mrf.mxu2 }
 0x3f7   :  { %v4022_v60 = vadd.f32 %v4021_v59, %v10836_v49  ;;  %v6772_v49 = vld [vmem:[%s12481_s1 + $0x348] sm:$0xf0]  ;;  %v12871_v59 = vld [vmem:[#allocation9_spill] sm:$0xff] }
 0x3f8   :  { %v4094_v20 = vpop.f32.mrf.mxu3  ;;  %v4164_v7 = vpop.f32.mrf.mxu0  ;;  %v6775_v54 = vor.u32 %v7734_v19, %v6772_v49  ;;  %v6903_v19 = vor.u32 %v7766_v42, %v6900_v6  ;;  %v7716_v42 = vld [vmem:[%s12481_s1 + $0x2b4] sm:$0xf] }
 0x3f9   :  { %v4165_v22 = vadd.f32 %v4164_v7, %v4092_v48  ;;  %v11382_v51 = vpop.f32.mrf.mxu1  ;;  %v4095_v8 = vadd.f32 %v4094_v20, %v4022_v60  ;;  %v12872_v48 = vld [vmem:[#allocation26_spill] sm:$0xff]  ;;  %v12873_v7 = vld [vmem:[#allocation28_spill] sm:$0xff] }
 0x3fa   :  { %4632 = vmatpush.bf16.msra.mxu3 %v6775_v54  ;;  %v7750_v20 = vld [vmem:[%s12481_s1 + $0x3c4] sm:$0xf]  ;;  %4778 = vmatpush.bf16.msra.mxu1 %v6903_v19  ;;  %v6764_v19 = vld [vmem:[%s12481_s1 + $0x338] sm:$0xf0] }
 0x3fb   :  { %v5462_v17 = vmax.f32 %v4165_v22, 0.0  ;;  %v12874_v22 = vld [vmem:[#allocation27_spill] sm:$0xff] }
 0x3fd   :  { %5512 = vst [vmem:[%s12484_s3 + $0xf0] sm:$0xff] %v5462_v17 }
 0x3fe   :  { %v4023_v14 = vpop.f32.mrf.mxu2 }
 0x3ff   :  { %v4024_v46 = vadd.f32 %v4023_v14, %v10856_v1  ;;  %v6836_v1 = vld [vmem:[%s12481_s1 + $0x3c8] sm:$0xf0] }
 0x400   :  { %v4096_v40 = vpop.f32.mrf.mxu3  ;;  %v4167_v34 = vpop.f32.mrf.mxu0  ;;  %v6839_v17 = vor.u32 %v7750_v20, %v6836_v1  ;;  %v12875_v1 = vld [vmem:[#allocation11_spill] sm:$0xff] }
 0x401   :  { %v4168_v23 = vadd.f32 %v4167_v34, %v4095_v8  ;;  %v11400_v30 = vpop.f32.mrf.mxu1  ;;  %v4097_v14 = vadd.f32 %v4096_v40, %v4024_v46 }
 0x402   :  { %4705 = vmatpush.bf16.msra.mxu0 %v6839_v17  ;;  %v12876_v17 = vld [vmem:[#allocation30_spill] sm:$0xff] }
 0x403   :  { %v5464_v15 = vmax.f32 %v4168_v23, 0.0  ;;  %4292 = vmatmul.bf16.gmra.mxu2 %v12871_v59  ;;  %4433 = vmatmul.bf16.gmra.mxu0 %v12872_v48 }
 0x404   :  { %4506 = vmatmul.bf16.gmra.mxu1 %v12873_v7 }
 0x405   :  { %4365 = vmatmul.bf16.gmra.mxu3 %v12874_v22  ;;  %5514 = vst [vmem:[%s12484_s3 + $0x100] sm:$0xff] %v5464_v15 }
 0x406   :  { %v4026_v60 = vpop.f32.mrf.mxu2 }
 0x407   :  { %v4027_v34 = vadd.f32 %v4026_v60, %v10883_v29  ;;  %v12877_v29 = vld [vmem:[#allocation32_spill] sm:$0xff]  ;;  %v12878_v60 = vld [vmem:[#allocation31_spill] sm:$0xff] }
 0x408   :  { %v4099_v3 = vpop.f32.mrf.mxu3  ;;  %v4169_v49 = vpop.f32.mrf.mxu0 }
 0x409   :  { %v4170_v8 = vadd.f32 %v4169_v49, %v4097_v14  ;;  %v11422_v54 = vpop.f32.mrf.mxu1  ;;  %v4100_v59 = vadd.f32 %v4099_v3, %v4027_v34  ;;  %v7732_v3 = vld [vmem:[%s12481_s1 + $0x334] sm:$0xf] }
 0x40a   :  { %v6767_v34 = vor.u32 %v7732_v3, %v6764_v19 }
 0x40b   :  { %v5466_v23 = vmax.f32 %v4170_v8, 0.0 }
 0x40c   :  { %4633 = vmatpush.bf16.msra.mxu3 %v6767_v34  ;;  %v12880_v34 = vld [vmem:[#allocation34_spill] sm:$0xff] }
 0x40d   :  { %5516 = vst [vmem:[%s12484_s3 + $0x110] sm:$0xff] %v5466_v23 }
 0x40e   :  { %v4028_v15 = vpop.f32.mrf.mxu2 }
 0x40f   :  { %v4029_v22 = vadd.f32 %v4028_v15, %v10909_v31  ;;  %v6700_v31 = vld [vmem:[%s12481_s1 + $0x2b8] sm:$0xf0] }
 0x410   :  { %v4101_v48 = vpop.f32.mrf.mxu3  ;;  %v4172_v7 = vpop.f32.mrf.mxu0  ;;  %v6703_v14 = vor.u32 %v7716_v42, %v6700_v31 }
 0x411   :  { %v4173_v40 = vadd.f32 %v4172_v7, %v4100_v59  ;;  %v11428_v46 = vpop.f32.mrf.mxu1  ;;  %v4102_v49 = vadd.f32 %v4101_v48, %v4029_v22  ;;  %v6828_v48 = vld [vmem:[%s12481_s1 + $0x3b8] sm:$0xf0] }
 0x412   :  { %4560 = vmatpush.bf16.msra.mxu2 %v6703_v14 }
 0x413   :  { %v5468_v20 = vmax.f32 %v4173_v40, 0.0  ;;  %4297 = vmatmul.bf16.gmra.mxu2 %v12875_v1  ;;  %4438 = vmatmul.bf16.gmra.mxu0 %v12876_v17  ;;  %v7764_v17 = vld [vmem:[%s12481_s1 + $0x434] sm:$0xf] }
 0x414   :  { %4511 = vmatmul.bf16.gmra.mxu1 %v12877_v29 }
 0x415   :  { %4370 = vmatmul.bf16.gmra.mxu3 %v12878_v60  ;;  %5518 = vst [vmem:[%s12484_s3 + $0x120] sm:$0xff] %v5468_v20  ;;  %v7748_v20 = vld [vmem:[%s12481_s1 + $0x3b4] sm:$0xf] }
 0x416   :  { %v4031_v6 = vpop.f32.mrf.mxu2  ;;  %v6831_v1 = vor.u32 %v7748_v20, %v6828_v48 }
 0x417   :  { %v4032_v7 = vadd.f32 %v4031_v6, %v10942_v52  ;;  %v6892_v52 = vld [vmem:[%s12481_s1 + $0x438] sm:$0xf0] }
 0x418   :  { %v4104_v8 = vpop.f32.mrf.mxu3  ;;  %v4174_v23 = vpop.f32.mrf.mxu0  ;;  %v6895_v42 = vor.u32 %v7764_v17, %v6892_v52  ;;  %4706 = vmatpush.bf16.msra.mxu0 %v6831_v1 }
 0x419   :  { %v4175_v15 = vadd.f32 %v4174_v23, %v4102_v49  ;;  %v11450_v59 = vpop.f32.mrf.mxu1  ;;  %v4105_v29 = vadd.f32 %v4104_v8, %v4032_v7  ;;  %v12879_v49 = vld [vmem:[#allocation13_spill] sm:$0xff]  ;;  %v12881_v23 = vld [vmem:[#allocation36_spill] sm:$0xff] }
 0x41a   :  { %4779 = vmatpush.bf16.msra.mxu1 %v6895_v42 }
 0x41b   :  { %v5470_v40 = vmax.f32 %v4175_v15, 0.0  ;;  %v12882_v15 = vld [vmem:[#allocation35_spill] sm:$0xff] }
 0x41d   :  { %5520 = vst [vmem:[%s12484_s3 + $0x130] sm:$0xff] %v5470_v40 }
 0x41e   :  { %v4033_v22 = vpop.f32.mrf.mxu2 }
 0x41f   :  { %v4034_v3 = vadd.f32 %v4033_v22, %v10956_v41  ;;  %v7714_v41 = vld [vmem:[%s12481_s1 + $0x2a4] sm:$0xf]  ;;  %v6692_v22 = vld [vmem:[%s12481_s1 + $0x2a8] sm:$0xf0] }
 0x420   :  { %v4106_v60 = vpop.f32.mrf.mxu3  ;;  %v4177_v31 = vpop.f32.mrf.mxu0  ;;  %v6695_v17 = vor.u32 %v7714_v41, %v6692_v22  ;;  %v6820_v41 = vld [vmem:[%s12481_s1 + $0x3a8] sm:$0xf0] }
 0x421   :  { %v4178_v6 = vadd.f32 %v4177_v31, %v4105_v29  ;;  %v11468_v14 = vpop.f32.mrf.mxu1  ;;  %v4107_v7 = vadd.f32 %v4106_v60, %v4034_v3  ;;  %v6756_v3 = vld [vmem:[%s12481_s1 + $0x328] sm:$0xf0] }
 0x422   :  { %4561 = vmatpush.bf16.msra.mxu2 %v6695_v17  ;;  %v6884_v17 = vld [vmem:[%s12481_s1 + $0x428] sm:$0xf0] }
 0x423   :  { %v5472_v19 = vmax.f32 %v4178_v6, 0.0  ;;  %4302 = vmatmul.bf16.gmra.mxu2 %v12879_v49  ;;  %4443 = vmatmul.bf16.gmra.mxu0 %v12880_v34  ;;  %v7730_v6 = vld [vmem:[%s12481_s1 + $0x324] sm:$0xf] }
 0x424   :  { %4516 = vmatmul.bf16.gmra.mxu1 %v12881_v23  ;;  %v6759_v49 = vor.u32 %v7730_v6, %v6756_v3 }
 0x425   :  { %4375 = vmatmul.bf16.gmra.mxu3 %v12882_v15  ;;  %5522 = vst [vmem:[%s12484_s3 + $0x140] sm:$0xff] %v5472_v19 }
 0x426   :  { %v4036_v8 = vpop.f32.mrf.mxu2  ;;  %4634 = vmatpush.bf16.msra.mxu3 %v6759_v49 }
 0x427   :  { %v4037_v52 = vadd.f32 %v4036_v8, %v10989_v45  ;;  %v12883_v8 = vld [vmem:[#allocation2_spill] sm:$0xff] }
 0x428   :  { %v4109_v40 = vpop.f32.mrf.mxu3  ;;  %v4179_v20 = vpop.f32.mrf.mxu0 }
 0x429   :  { %v4180_v48 = vadd.f32 %v4179_v20, %v4107_v7  ;;  %v11478_v1 = vpop.f32.mrf.mxu1  ;;  %v4110_v42 = vadd.f32 %v4109_v40, %v4037_v52  ;;  %v12884_v7 = vld [vmem:[#allocation38_spill] sm:$0xff]  ;;  %v12885_v40 = vld [vmem:[#allocation40_spill] sm:$0xff]  ;;  %v12886_v20 = vld [vmem:[#allocation39_spill] sm:$0xff] }
 0x42b   :  { %v5474_v29 = vmax.f32 %v4180_v48, 0.0  ;;  %v7746_v48 = vld [vmem:[%s12481_s1 + $0x3a4] sm:$0xf] }
 0x42c   :  { %v6823_v22 = vor.u32 %v7746_v48, %v6820_v41 }
 0x42d   :  { %5524 = vst [vmem:[%s12484_s3 + $0x150] sm:$0xff] %v5474_v29 }
 0x42e   :  { %v4038_v60 = vpop.f32.mrf.mxu2  ;;  %4707 = vmatpush.bf16.msra.mxu0 %v6823_v22  ;;  %v12889_v22 = vld [vmem:[#allocation44_spill] sm:$0xff] }
 0x42f   :  { %v4039_v23 = vadd.f32 %v4038_v60, %v11009_v38  ;;  %v7762_v38 = vld [vmem:[%s12481_s1 + $0x424] sm:$0xf] }
 0x430   :  { %v4111_v31 = vpop.f32.mrf.mxu3  ;;  %v4182_v19 = vpop.f32.mrf.mxu0  ;;  %v6887_v29 = vor.u32 %v7762_v38, %v6884_v17  ;;  %v12888_v38 = vld [vmem:[#allocation42_spill] sm:$0xff]  ;;  %v12890_v17 = vld [vmem:[#allocation43_spill] sm:$0xff] }
 0x431   :  { %v4183_v45 = vadd.f32 %v4182_v19, %v4110_v42  ;;  %v11496_v34 = vpop.f32.mrf.mxu1  ;;  %v4112_v60 = vadd.f32 %v4111_v31, %v4039_v23  ;;  %v7908_v31 = vld [vmem:[%s12483_s2] sm:$0x3] }
 0x432   :  { %4780 = vmatpush.bf16.msra.mxu1 %v6887_v29  ;;  %v11527_v23 = vperm.slane %v7908_v31, 1 }
 0x433   :  { %v5476_v15 = vmax.f32 %v4183_v45, 0.0  ;;  %4307 = vmatmul.bf16.gmra.mxu2 %v12883_v8  ;;  %4448 = vmatmul.bf16.gmra.mxu0 %v12884_v7 }
 0x434   :  { %4521 = vmatmul.bf16.gmra.mxu1 %v12885_v40  ;;  %v4203_v31 = vadd.f32 %v11102_v33, %v11527_v23  ;;  %v7760_v33 = vld [vmem:[%s12481_s1 + $0x414] sm:$0xf] }
 0x435   :  { %4380 = vmatmul.bf16.gmra.mxu3 %v12886_v20  ;;  %5526 = vst [vmem:[%s12484_s3 + $0x160] sm:$0xff] %v5476_v15 }
 0x436   :  { %v4041_v52 = vpop.f32.mrf.mxu2 }
 0x437   :  { %v4042_v49 = vadd.f32 %v4041_v52, %v11035_v58  ;;  %v12887_v58 = vld [vmem:[#allocation4_spill] sm:$0xff]  ;;  %v4201_v52 = vadd.f32 %v11079_v27, %v11527_v23 }
 0x438   :  { %v4114_v42 = vpop.f32.mrf.mxu3  ;;  %v4184_v6 = vpop.f32.mrf.mxu0  ;;  %v7728_v27 = vld [vmem:[%s12481_s1 + $0x314] sm:$0xf] }
 0x439   :  { %v4185_v3 = vadd.f32 %v4184_v6, %v4112_v60  ;;  %v11518_v19 = vpop.f32.mrf.mxu1  ;;  %v4115_v8 = vadd.f32 %v4114_v42, %v4042_v49  ;;  %v7712_v6 = vld [vmem:[%s12481_s1 + $0x294] sm:$0xf] }
 0x43b   :  { %v5478_v45 = vmax.f32 %v4185_v3, 0.0  ;;  %v6684_v3 = vld [vmem:[%s12481_s1 + $0x298] sm:$0xf0] }
 0x43d   :  { %5528 = vst [vmem:[%s12484_s3 + $0x170] sm:$0xff] %v5478_v45  ;;  %v6687_v45 = vor.u32 %v7712_v6, %v6684_v3  ;;  %v6876_v6 = vld [vmem:[%s12481_s1 + $0x418] sm:$0xf0] }
 0x43e   :  { %v4043_v15 = vpop.f32.mrf.mxu2 }
 0x43f   :  { %4562 = vmatpush.bf16.msra.mxu2 %v6687_v45  ;;  %v12892_v45 = vld [vmem:[#allocation46_spill] sm:$0xff] }
 0x440   :  { %v4116_v7 = vpop.f32.mrf.mxu3  ;;  %v4187_v40 = vpop.f32.mrf.mxu0 }
 0x441   :  { %v4188_v20 = vadd.f32 %v4187_v40, %v4115_v8  ;;  %v11529_v48 = vpop.f32.mrf.mxu1  ;;  %v6748_v7 = vld [vmem:[%s12481_s1 + $0x318] sm:$0xf0] }
 0x442   :  { %v6751_v40 = vor.u32 %v7728_v27, %v6748_v7  ;;  %v12894_v27 = vld [vmem:[#allocation47_spill] sm:$0xff]  ;;  %v4206_v7 = vadd.f32 %v11132_v43, %v11527_v23 }
 0x443   :  { %v5480_v41 = vmax.f32 %v4188_v20, 0.0  ;;  %4312 = vmatmul.bf16.gmra.mxu2 %v12887_v58  ;;  %4453 = vmatmul.bf16.gmra.mxu0 %v12888_v38 }
 0x444   :  { %4526 = vmatmul.bf16.gmra.mxu1 %v12889_v22  ;;  %4635 = vmatpush.bf16.msra.mxu3 %v6751_v40 }
 0x445   :  { %4385 = vmatmul.bf16.gmra.mxu3 %v12890_v17  ;;  %5530 = vst [vmem:[%s12484_s3 + $0x180] sm:$0xff] %v5480_v41 }
 0x446   :  { %v4273_v29 = vpop.f32.mrf.mxu2 }
 0x447   :  { %v4274_v60 = vadd.f32 %v4273_v29, %v4201_v52  ;;  %v7744_v29 = vld [vmem:[%s12481_s1 + $0x394] sm:$0xf] }
 0x448   :  { %v4346_v42 = vpop.f32.mrf.mxu3  ;;  %v4189_v49 = vpop.f32.mrf.mxu0 }
 0x449   :  { %v4347_v15 = vadd.f32 %v4346_v42, %v4274_v60  ;;  %v4262_v8 = vpop.f32.mrf.mxu1  ;;  %v6812_v60 = vld [vmem:[%s12481_s1 + $0x398] sm:$0xf0]  ;;  %v12891_v49 = vld [vmem:[#allocation6_spill] sm:$0xff] }
 0x44a   :  { %v6815_v42 = vor.u32 %v7744_v29, %v6812_v60  ;;  %v12893_v8 = vld [vmem:[#allocation48_spill] sm:$0xff]  ;;  %v4208_v29 = vadd.f32 %v11155_v4, %v11527_v23  ;;  %v6676_v4 = vld [vmem:[%s12481_s1 + $0x288] sm:$0xf0] }
 0x44c   :  { %4708 = vmatpush.bf16.msra.mxu0 %v6815_v42 }
 0x44e   :  { %v4275_v20 = vpop.f32.mrf.mxu2 }
 0x44f   :  { %v4276_v41 = vadd.f32 %v4275_v20, %v4203_v31 }
 0x450   :  { %v4348_v58 = vpop.f32.mrf.mxu3  ;;  %v4419_v38 = vpop.f32.mrf.mxu0 }
 0x451   :  { %v4349_v22 = vadd.f32 %v4348_v58, %v4276_v41  ;;  %v4420_v17 = vadd.f32 %v4419_v38, %v4347_v15  ;;  %v4492_v52 = vpop.f32.mrf.mxu1  ;;  %v6879_v15 = vor.u32 %v7760_v33, %v6876_v6 }
 0x453   :  { %v11566_v3 = vadd.f32 %v4492_v52, %v4420_v17  ;;  %4317 = vmatmul.bf16.gmra.mxu2 %v12891_v49  ;;  %4458 = vmatmul.bf16.gmra.mxu0 %v12892_v45 }
 0x454   :  { %4531 = vmatmul.bf16.gmra.mxu1 %v12893_v8  ;;  %v12895_v8 = vld [vmem:[#allocation8_spill] sm:$0xff] }
 0x455   :  { %4390 = vmatmul.bf16.gmra.mxu3 %v12894_v27  ;;  %4781 = vmatpush.bf16.msra.mxu1 %v6879_v15  ;;  %v12896_v27 = vld [vmem:[#allocation50_spill] sm:$0xff] }
 0x456   :  { %v4278_v40 = vpop.f32.mrf.mxu2 }
 0x457   :  { %v4279_v31 = vadd.f32 %v4278_v40, %v4206_v7  ;;  %v7726_v7 = vld [vmem:[%s12481_s1 + $0x304] sm:$0xf]  ;;  %v12897_v40 = vld [vmem:[#allocation52_spill] sm:$0xff] }
 0x458   :  { %v4351_v20 = vpop.f32.mrf.mxu3  ;;  %v4421_v41 = vpop.f32.mrf.mxu0 }
 0x459   :  { %v4352_v58 = vadd.f32 %v4351_v20, %v4279_v31  ;;  %v4422_v38 = vadd.f32 %v4421_v41, %v4349_v22  ;;  %v4494_v17 = vpop.f32.mrf.mxu1  ;;  %v7710_v22 = vld [vmem:[%s12481_s1 + $0x284] sm:$0xf]  ;;  %v12898_v31 = vld [vmem:[#allocation51_spill] sm:$0xff] }
 0x45a   :  { %v6679_v20 = vor.u32 %v7710_v22, %v6676_v4  ;;  %v6740_v41 = vld [vmem:[%s12481_s1 + $0x308] sm:$0xf0]  ;;  %v4213_v4 = vadd.f32 %v11211_v10, %v11527_v23  ;;  %v4216_v10 = vadd.f32 %v11241_v44, %v11527_v23  ;;  %v7804_v44 = vld [vmem:[%s12481_s1 + $0x574] sm:$0xf] }
 0x45b   :  { %v11574_v52 = vadd.f32 %v4494_v17, %v4422_v38  ;;  %v6743_v38 = vor.u32 %v7726_v7, %v6740_v41 }
 0x45c   :  { %4563 = vmatpush.bf16.msra.mxu2 %v6679_v20 }
 0x45d   :  { %4636 = vmatpush.bf16.msra.mxu3 %v6743_v38 }
 0x45e   :  { %v4280_v60 = vpop.f32.mrf.mxu2 }
 0x45f   :  { %v4281_v33 = vadd.f32 %v4280_v60, %v4208_v29 }
 0x460   :  { %v4353_v6 = vpop.f32.mrf.mxu3  ;;  %v4424_v49 = vpop.f32.mrf.mxu0 }
 0x461   :  { %v4354_v45 = vadd.f32 %v4353_v6, %v4281_v33  ;;  %v4425_v43 = vadd.f32 %v4424_v49, %v4352_v58  ;;  %v4497_v42 = vpop.f32.mrf.mxu1  ;;  %v4211_v58 = vadd.f32 %v11197_v53, %v11527_v23  ;;  %v6804_v53 = vld [vmem:[%s12481_s1 + $0x388] sm:$0xf0] }
 0x463   :  { %v11578_v15 = vadd.f32 %v4497_v42, %v4425_v43  ;;  %4322 = vmatmul.bf16.gmra.mxu2 %v12895_v8  ;;  %4463 = vmatmul.bf16.gmra.mxu0 %v12896_v27  ;;  %v7742_v8 = vld [vmem:[%s12481_s1 + $0x384] sm:$0xf] }
 0x464   :  { %4536 = vmatmul.bf16.gmra.mxu1 %v12897_v40  ;;  %v7758_v27 = vld [vmem:[%s12481_s1 + $0x404] sm:$0xf]  ;;  %v6807_v22 = vor.u32 %v7742_v8, %v6804_v53 }
 0x465   :  { %4395 = vmatmul.bf16.gmra.mxu3 %v12898_v31 }
 0x466   :  { %v4283_v17 = vpop.f32.mrf.mxu2  ;;  %4709 = vmatpush.bf16.msra.mxu0 %v6807_v22 }
 0x467   :  { %v4284_v29 = vadd.f32 %v4283_v17, %v4211_v58 }
 0x468   :  { %v4356_v60 = vpop.f32.mrf.mxu3  ;;  %v4426_v33 = vpop.f32.mrf.mxu0 }
 0x469   :  { %v4357_v6 = vadd.f32 %v4356_v60, %v4284_v29  ;;  %v4427_v49 = vadd.f32 %v4426_v33, %v4354_v45  ;;  %v4499_v43 = vpop.f32.mrf.mxu1  ;;  %v6868_v45 = vld [vmem:[%s12481_s1 + $0x408] sm:$0xf0]  ;;  %v12899_v60 = vld [vmem:[#allocation10_spill] sm:$0xff] }
 0x46a   :  { %v6871_v7 = vor.u32 %v7758_v27, %v6868_v45  ;;  %v12900_v33 = vld [vmem:[#allocation54_spill] sm:$0xff] }
 0x46b   :  { %v11598_v42 = vadd.f32 %v4499_v43, %v4427_v49  ;;  %v12901_v49 = vld [vmem:[#allocation56_spill] sm:$0xff]  ;;  %v12902_v43 = vld [vmem:[#allocation55_spill] sm:$0xff] }
 0x46c   :  { %4782 = vmatpush.bf16.msra.mxu1 %v6871_v7 }
 0x46e   :  { %v4285_v40 = vpop.f32.mrf.mxu2 }
 0x46f   :  { %v4286_v31 = vadd.f32 %v4285_v40, %v4213_v4  ;;  %v7788_v40 = vld [vmem:[%s12481_s1 + $0x4f4] sm:$0xf] }
 0x470   :  { %v4358_v20 = vpop.f32.mrf.mxu3  ;;  %v4429_v41 = vpop.f32.mrf.mxu0 }
 0x471   :  { %v4359_v58 = vadd.f32 %v4358_v20, %v4286_v31  ;;  %v4430_v38 = vadd.f32 %v4429_v41, %v4357_v6  ;;  %v4502_v17 = vpop.f32.mrf.mxu1  ;;  %v6988_v31 = vld [vmem:[%s12481_s1 + $0x4f8] sm:$0xf0] }
 0x472   :  { %v6991_v20 = vor.u32 %v7788_v40, %v6988_v31  ;;  %v7052_v41 = vld [vmem:[%s12481_s1 + $0x578] sm:$0xf0]  ;;  %v4221_v31 = vadd.f32 %v11275_v5, %v11527_v23  ;;  %v4223_v5 = vadd.f32 %v11298_v2, %v11527_v23  ;;  %v7786_v2 = vld [vmem:[%s12481_s1 + $0x4e4] sm:$0xf] }
 0x473   :  { %v11614_v29 = vadd.f32 %v4502_v17, %v4430_v38  ;;  %4327 = vmatmul.bf16.gmra.mxu2 %v12899_v60  ;;  %4468 = vmatmul.bf16.gmra.mxu0 %v12900_v33  ;;  %v7055_v38 = vor.u32 %v7804_v44, %v7052_v41  ;;  %v7116_v40 = vld [vmem:[%s12481_s1 + $0x5f8] sm:$0xf0] }
 0x474   :  { %4541 = vmatmul.bf16.gmra.mxu1 %v12901_v49  ;;  %4848 = vmatpush.bf16.msrb.mxu2 %v6991_v20  ;;  %v7180_v20 = vld [vmem:[%s12481_s1 + $0x678] sm:$0xf0] }
 0x475   :  { %4400 = vmatmul.bf16.gmra.mxu3 %v12902_v43 }
 0x476   :  { %v4288_v8 = vpop.f32.mrf.mxu2  ;;  %4921 = vmatpush.bf16.msrb.mxu3 %v7055_v38 }
 0x477   :  { %v4289_v53 = vadd.f32 %v4288_v8, %v4216_v10 }
 0x478   :  { %v4361_v27 = vpop.f32.mrf.mxu3  ;;  %v4431_v22 = vpop.f32.mrf.mxu0 }
 0x479   :  { %v4362_v45 = vadd.f32 %v4361_v27, %v4289_v53  ;;  %v4432_v6 = vadd.f32 %v4431_v22, %v4359_v58  ;;  %v4504_v4 = vpop.f32.mrf.mxu1  ;;  %v4218_v58 = vadd.f32 %v11267_v18, %v11527_v23  ;;  %v12903_v27 = vld [vmem:[#allocation12_spill] sm:$0xff]  ;;  %v12904_v22 = vld [vmem:[#allocation58_spill] sm:$0xff] }
 0x47a   :  { %v7820_v18 = vld [vmem:[%s12481_s1 + $0x5f4] sm:$0xf] }
 0x47b   :  { %v11622_v7 = vadd.f32 %v4504_v4, %v4432_v6  ;;  %v12905_v6 = vld [vmem:[#allocation60_spill] sm:$0xff]  ;;  %v12906_v4 = vld [vmem:[#allocation59_spill] sm:$0xff]  ;;  %v7119_v44 = vor.u32 %v7820_v18, %v7116_v40 }
 0x47d   :  { %4994 = vmatpush.bf16.msrb.mxu0 %v7119_v44  ;;  %v12907_v44 = vld [vmem:[#allocation62_spill] sm:$0xff] }
 0x47e   :  { %v4290_v17 = vpop.f32.mrf.mxu2 }
 0x47f   :  { %v4291_v60 = vadd.f32 %v4290_v17, %v4218_v58 }
 0x480   :  { %v4363_v33 = vpop.f32.mrf.mxu3  ;;  %v4434_v49 = vpop.f32.mrf.mxu0 }
 0x481   :  { %v4364_v43 = vadd.f32 %v4363_v33, %v4291_v60  ;;  %v4435_v10 = vadd.f32 %v4434_v49, %v4362_v45  ;;  %v4507_v8 = vpop.f32.mrf.mxu1  ;;  %v7836_v45 = vld [vmem:[%s12481_s1 + $0x674] sm:$0xf] }
 0x482   :  { %v7183_v58 = vor.u32 %v7836_v45, %v7180_v20  ;;  %v12908_v20 = vld [vmem:[#allocation17_spill] sm:$0xff] }
 0x483   :  { %v11638_v53 = vadd.f32 %v4507_v8, %v4435_v10  ;;  %4332 = vmatmul.bf16.gmra.mxu2 %v12903_v27  ;;  %4473 = vmatmul.bf16.gmra.mxu0 %v12904_v22 }
 0x484   :  { %4546 = vmatmul.bf16.gmra.mxu1 %v12905_v6 }
 0x485   :  { %4405 = vmatmul.bf16.gmra.mxu3 %v12906_v4  ;;  %5067 = vmatpush.bf16.msrb.mxu1 %v7183_v58  ;;  %v6980_v58 = vld [vmem:[%s12481_s1 + $0x4e8] sm:$0xf0] }
 0x486   :  { %v4293_v41 = vpop.f32.mrf.mxu2 }
 0x487   :  { %v4294_v38 = vadd.f32 %v4293_v41, %v4221_v31  ;;  %v12910_v41 = vld [vmem:[#allocation64_spill] sm:$0xff] }
 0x488   :  { %v4366_v17 = vpop.f32.mrf.mxu3  ;;  %v4436_v60 = vpop.f32.mrf.mxu0 }
 0x489   :  { %v4367_v33 = vadd.f32 %v4366_v17, %v4294_v38  ;;  %v4437_v49 = vadd.f32 %v4436_v60, %v4364_v43  ;;  %v4509_v10 = vpop.f32.mrf.mxu1  ;;  %v12909_v43 = vld [vmem:[#allocation63_spill] sm:$0xff]  ;;  %v4226_v38 = vadd.f32 %v11316_v24, %v11527_v23  ;;  %v6983_v17 = vor.u32 %v7786_v2, %v6980_v58 }
 0x48b   :  { %v11658_v8 = vadd.f32 %v4509_v10, %v4437_v49  ;;  %4849 = vmatpush.bf16.msrb.mxu2 %v6983_v17  ;;  %v7802_v10 = vld [vmem:[%s12481_s1 + $0x564] sm:$0xf] }
 0x48e   :  { %v4295_v27 = vpop.f32.mrf.mxu2 }
 0x48f   :  { %v4296_v22 = vadd.f32 %v4295_v27, %v4223_v5  ;;  %v7044_v5 = vld [vmem:[%s12481_s1 + $0x568] sm:$0xf0] }
 0x490   :  { %v4368_v6 = vpop.f32.mrf.mxu3  ;;  %v4439_v4 = vpop.f32.mrf.mxu0 }
 0x491   :  { %v4369_v18 = vadd.f32 %v4368_v6, %v4296_v22  ;;  %v4440_v40 = vadd.f32 %v4439_v4, %v4367_v33  ;;  %v4512_v45 = vpop.f32.mrf.mxu1  ;;  %v7047_v22 = vor.u32 %v7802_v10, %v7044_v5 }
 0x493   :  { %v11662_v31 = vadd.f32 %v4512_v45, %v4440_v40  ;;  %4478 = vmatmul.bf16.gmra.mxu0 %v12907_v44  ;;  %4564 = vmatmul.bf16.vlgmr.msra.gmra.mxu2 %v12908_v20  ;;  %v7818_v45 = vld [vmem:[%s12481_s1 + $0x5e4] sm:$0xf]  ;;  %v7108_v44 = vld [vmem:[%s12481_s1 + $0x5e8] sm:$0xf0] }
 0x494   :  { %4551 = vmatmul.bf16.gmra.mxu1 %v12909_v43  ;;  %4922 = vmatpush.bf16.msrb.mxu3 %v7047_v22  ;;  %v7834_v20 = vld [vmem:[%s12481_s1 + $0x664] sm:$0xf]  ;;  %v7111_v43 = vor.u32 %v7818_v45, %v7108_v44 }
 0x495   :  { %4637 = vmatmul.bf16.vlgmr.msra.gmra.mxu3 %v12910_v41  ;;  %v4228_v41 = vadd.f32 %v11326_v50, %v11527_v23  ;;  %v12912_v22 = vld [vmem:[#allocation66_spill] sm:$0xff]  ;;  %v4231_v50 = vadd.f32 %v11338_v61, %v11527_v23  ;;  %v6972_v61 = vld [vmem:[%s12481_s1 + $0x4d8] sm:$0xf0] }
 0x496   :  { %v4298_v60 = vpop.f32.mrf.mxu2  ;;  %4995 = vmatpush.bf16.msrb.mxu0 %v7111_v43 }
 0x497   :  { %v4299_v33 = vadd.f32 %v4298_v60, %v4226_v38 }
 0x498   :  { %v4371_v49 = vpop.f32.mrf.mxu3  ;;  %v4441_v27 = vpop.f32.mrf.mxu0 }
 0x499   :  { %v4372_v6 = vadd.f32 %v4371_v49, %v4299_v33  ;;  %v4442_v4 = vadd.f32 %v4441_v27, %v4369_v18  ;;  %v4514_v40 = vpop.f32.mrf.mxu1  ;;  %v7172_v18 = vld [vmem:[%s12481_s1 + $0x668] sm:$0xf0]  ;;  %v12911_v27 = vld [vmem:[#allocation21_spill] sm:$0xff] }
 0x49a   :  { %v7175_v2 = vor.u32 %v7834_v20, %v7172_v18 }
 0x49b   :  { %v11682_v24 = vadd.f32 %v4514_v40, %v4442_v4  ;;  %v12913_v4 = vld [vmem:[#allocation68_spill] sm:$0xff]  ;;  %v12914_v40 = vld [vmem:[#allocation67_spill] sm:$0xff] }
 0x49c   :  { %5068 = vmatpush.bf16.msrb.mxu1 %v7175_v2 }
 0x49e   :  { %v4300_v58 = vpop.f32.mrf.mxu2 }
 0x49f   :  { %v4301_v38 = vadd.f32 %v4300_v58, %v4228_v41  ;;  %v4233_v58 = vadd.f32 %v11354_v28, %v11527_v23  ;;  %v12915_v28 = vld [vmem:[#allocation25_spill] sm:$0xff] }
 0x4a0   :  { %v4373_v17 = vpop.f32.mrf.mxu3  ;;  %v4444_v60 = vpop.f32.mrf.mxu0 }
 0x4a1   :  { %v4374_v33 = vadd.f32 %v4373_v17, %v4301_v38  ;;  %v4445_v49 = vadd.f32 %v4444_v60, %v4372_v6  ;;  %v4517_v10 = vpop.f32.mrf.mxu1 }
 0x4a3   :  { %v11698_v5 = vadd.f32 %v4517_v10, %v4445_v49  ;;  %4569 = vmatmul.bf16.gmra.mxu2 %v12911_v27  ;;  %4710 = vmatmul.bf16.vlgmr.msra.gmra.mxu0 %v12912_v22  ;;  %v7784_v49 = vld [vmem:[%s12481_s1 + $0x4d4] sm:$0xf] }
 0x4a4   :  { %4783 = vmatmul.bf16.vlgmr.msra.gmra.mxu1 %v12913_v4  ;;  %v6975_v27 = vor.u32 %v7784_v49, %v6972_v61 }
 0x4a5   :  { %4642 = vmatmul.bf16.gmra.mxu3 %v12914_v40 }
 0x4a6   :  { %v4303_v45 = vpop.f32.mrf.mxu2  ;;  %4850 = vmatpush.bf16.msrb.mxu2 %v6975_v27  ;;  %v7100_v27 = vld [vmem:[%s12481_s1 + $0x5d8] sm:$0xf0] }
 0x4a7   :  { %v4304_v44 = vadd.f32 %v4303_v45, %v4231_v50  ;;  %v12916_v50 = vld [vmem:[#allocation70_spill] sm:$0xff]  ;;  %v7800_v45 = vld [vmem:[%s12481_s1 + $0x554] sm:$0xf] }
 0x4a8   :  { %v4376_v20 = vpop.f32.mrf.mxu3  ;;  %v4446_v43 = vpop.f32.mrf.mxu0 }
 0x4a9   :  { %v4377_v18 = vadd.f32 %v4376_v20, %v4304_v44  ;;  %v4447_v6 = vadd.f32 %v4446_v43, %v4374_v33  ;;  %v4519_v41 = vpop.f32.mrf.mxu1  ;;  %v7036_v44 = vld [vmem:[%s12481_s1 + $0x558] sm:$0xf0]  ;;  %v12917_v20 = vld [vmem:[#allocation72_spill] sm:$0xff]  ;;  %v12918_v43 = vld [vmem:[#allocation71_spill] sm:$0xff] }
 0x4ab   :  { %v11706_v2 = vadd.f32 %v4519_v41, %v4447_v6  ;;  %v4236_v6 = vadd.f32 %v11372_v36, %v11527_v23  ;;  %v7832_v36 = vld [vmem:[%s12481_s1 + $0x654] sm:$0xf] }
 0x4ae   :  { %v4305_v38 = vpop.f32.mrf.mxu2 }
 0x4af   :  { %v4306_v17 = vadd.f32 %v4305_v38, %v4233_v58 }
 0x4b0   :  { %v4378_v60 = vpop.f32.mrf.mxu3  ;;  %v4449_v10 = vpop.f32.mrf.mxu0 }
 0x4b1   :  { %v4379_v33 = vadd.f32 %v4378_v60, %v4306_v17  ;;  %v4450_v22 = vadd.f32 %v4449_v10, %v4377_v18  ;;  %v4522_v4 = vpop.f32.mrf.mxu1  ;;  %v7039_v18 = vor.u32 %v7800_v45, %v7036_v44  ;;  %v7816_v10 = vld [vmem:[%s12481_s1 + $0x5d4] sm:$0xf] }
 0x4b3   :  { %v11716_v40 = vadd.f32 %v4522_v4, %v4450_v22  ;;  %4574 = vmatmul.bf16.gmra.mxu2 %v12915_v28  ;;  %4715 = vmatmul.bf16.gmra.mxu0 %v12916_v50  ;;  %v7103_v22 = vor.u32 %v7816_v10, %v7100_v27  ;;  %v7164_v4 = vld [vmem:[%s12481_s1 + $0x658] sm:$0xf0]  ;;  %v4238_v50 = vadd.f32 %v11382_v51, %v11527_v23 }
 0x4b4   :  { %4788 = vmatmul.bf16.gmra.mxu1 %v12917_v20  ;;  %4923 = vmatpush.bf16.msrb.mxu3 %v7039_v18  ;;  %v4241_v51 = vadd.f32 %v11400_v30, %v11527_v23  ;;  %v7798_v30 = vld [vmem:[%s12481_s1 + $0x544] sm:$0xf] }
 0x4b5   :  { %4647 = vmatmul.bf16.gmra.mxu3 %v12918_v43  ;;  %4996 = vmatpush.bf16.msrb.mxu0 %v7103_v22 }
 0x4b6   :  { %v4308_v41 = vpop.f32.mrf.mxu2 }
 0x4b7   :  { %v4309_v58 = vadd.f32 %v4308_v41, %v4236_v6 }
 0x4b8   :  { %v4381_v38 = vpop.f32.mrf.mxu3  ;;  %v4451_v17 = vpop.f32.mrf.mxu0 }
 0x4b9   :  { %v4382_v60 = vadd.f32 %v4381_v38, %v4309_v58  ;;  %v4452_v49 = vadd.f32 %v4451_v17, %v4379_v33  ;;  %v4524_v61 = vpop.f32.mrf.mxu1  ;;  %v7167_v33 = vor.u32 %v7832_v36, %v7164_v4  ;;  %v12919_v38 = vld [vmem:[#allocation29_spill] sm:$0xff]  ;;  %v12920_v17 = vld [vmem:[#allocation74_spill] sm:$0xff] }
 0x4bb   :  { %v11742_v28 = vadd.f32 %v4524_v61, %v4452_v49  ;;  %5069 = vmatpush.bf16.msrb.mxu1 %v7167_v33  ;;  %v12921_v49 = vld [vmem:[#allocation76_spill] sm:$0xff]  ;;  %v12922_v61 = vld [vmem:[#allocation75_spill] sm:$0xff] }
 0x4be   :  { %v4310_v45 = vpop.f32.mrf.mxu2 }
 0x4bf   :  { %v4311_v44 = vadd.f32 %v4310_v45, %v4238_v50  ;;  %v7782_v45 = vld [vmem:[%s12481_s1 + $0x4c4] sm:$0xf] }
 0x4c0   :  { %v4383_v20 = vpop.f32.mrf.mxu3  ;;  %v4454_v43 = vpop.f32.mrf.mxu0 }
 0x4c1   :  { %v4384_v18 = vadd.f32 %v4383_v20, %v4311_v44  ;;  %v4455_v6 = vadd.f32 %v4454_v43, %v4382_v60  ;;  %v4527_v41 = vpop.f32.mrf.mxu1  ;;  %v6964_v44 = vld [vmem:[%s12481_s1 + $0x4c8] sm:$0xf0] }
 0x4c2   :  { %v6967_v20 = vor.u32 %v7782_v45, %v6964_v44  ;;  %v7028_v43 = vld [vmem:[%s12481_s1 + $0x548] sm:$0xf0] }
 0x4c3   :  { %v11746_v58 = vadd.f32 %v4527_v41, %v4455_v6  ;;  %4579 = vmatmul.bf16.gmra.mxu2 %v12919_v38  ;;  %4720 = vmatmul.bf16.gmra.mxu0 %v12920_v17  ;;  %v7031_v6 = vor.u32 %v7798_v30, %v7028_v43  ;;  %v12926_v45 = vld [vmem:[#allocation79_spill] sm:$0xff] }
 0x4c4   :  { %4793 = vmatmul.bf16.gmra.mxu1 %v12921_v49  ;;  %4851 = vmatpush.bf16.msrb.mxu2 %v6967_v20  ;;  %v7156_v30 = vld [vmem:[%s12481_s1 + $0x648] sm:$0xf0]  ;;  %v4246_v20 = vadd.f32 %v11428_v46, %v11527_v23 }
 0x4c5   :  { %4652 = vmatmul.bf16.gmra.mxu3 %v12922_v61 }
 0x4c6   :  { %v4313_v10 = vpop.f32.mrf.mxu2  ;;  %4924 = vmatpush.bf16.msrb.mxu3 %v7031_v6 }
 0x4c7   :  { %v4314_v27 = vadd.f32 %v4313_v10, %v4241_v51 }
 0x4c8   :  { %v4386_v36 = vpop.f32.mrf.mxu3  ;;  %v4456_v22 = vpop.f32.mrf.mxu0 }
 0x4c9   :  { %v4387_v4 = vadd.f32 %v4386_v36, %v4314_v27  ;;  %v4457_v60 = vadd.f32 %v4456_v22, %v4384_v18  ;;  %v4529_v33 = vpop.f32.mrf.mxu1  ;;  %v4243_v18 = vadd.f32 %v11422_v54, %v11527_v23  ;;  %v12923_v36 = vld [vmem:[#allocation33_spill] sm:$0xff]  ;;  %v12924_v22 = vld [vmem:[#allocation78_spill] sm:$0xff] }
 0x4ca   :  { %v7814_v54 = vld [vmem:[%s12481_s1 + $0x5c4] sm:$0xf] }
 0x4cb   :  { %v11754_v50 = vadd.f32 %v4529_v33, %v4457_v60  ;;  %v7092_v60 = vld [vmem:[%s12481_s1 + $0x5c8] sm:$0xf0]  ;;  %v7830_v33 = vld [vmem:[%s12481_s1 + $0x644] sm:$0xf] }
 0x4cc   :  { %v7095_v44 = vor.u32 %v7814_v54, %v7092_v60  ;;  %v7159_v43 = vor.u32 %v7830_v33, %v7156_v30  ;;  %v12927_v30 = vld [vmem:[#allocation37_spill] sm:$0xff] }
 0x4ce   :  { %v4315_v41 = vpop.f32.mrf.mxu2  ;;  %4997 = vmatpush.bf16.msrb.mxu0 %v7095_v44  ;;  %5070 = vmatpush.bf16.msrb.mxu1 %v7159_v43  ;;  %v12929_v43 = vld [vmem:[#allocation84_spill] sm:$0xff] }
 0x4cf   :  { %v4316_v38 = vadd.f32 %v4315_v41, %v4243_v18 }
 0x4d0   :  { %v4388_v17 = vpop.f32.mrf.mxu3  ;;  %v4459_v49 = vpop.f32.mrf.mxu0 }
 0x4d1   :  { %v4389_v61 = vadd.f32 %v4388_v17, %v4316_v38  ;;  %v4460_v51 = vadd.f32 %v4459_v49, %v4387_v4  ;;  %v4532_v10 = vpop.f32.mrf.mxu1  ;;  %v12925_v4 = vld [vmem:[#allocation80_spill] sm:$0xff] }
 0x4d3   :  { %v11770_v27 = vadd.f32 %v4532_v10, %v4460_v51  ;;  %4584 = vmatmul.bf16.gmra.mxu2 %v12923_v36  ;;  %4725 = vmatmul.bf16.gmra.mxu0 %v12924_v22  ;;  %v4248_v36 = vadd.f32 %v11450_v59, %v11527_v23  ;;  %v6956_v59 = vld [vmem:[%s12481_s1 + $0x4b8] sm:$0xf0] }
 0x4d4   :  { %4798 = vmatmul.bf16.gmra.mxu1 %v12925_v4 }
 0x4d5   :  { %4657 = vmatmul.bf16.gmra.mxu3 %v12926_v45 }
 0x4d6   :  { %v4318_v18 = vpop.f32.mrf.mxu2 }
 0x4d7   :  { %v4319_v6 = vadd.f32 %v4318_v18, %v4246_v20  ;;  %v12928_v20 = vld [vmem:[#allocation82_spill] sm:$0xff]  ;;  %v12930_v18 = vld [vmem:[#allocation83_spill] sm:$0xff] }
 0x4d8   :  { %v4391_v41 = vpop.f32.mrf.mxu3  ;;  %v4461_v38 = vpop.f32.mrf.mxu0 }
 0x4d9   :  { %v4392_v17 = vadd.f32 %v4391_v41, %v4319_v6  ;;  %v4462_v49 = vadd.f32 %v4461_v38, %v4389_v61  ;;  %v4534_v51 = vpop.f32.mrf.mxu1  ;;  %v7780_v61 = vld [vmem:[%s12481_s1 + $0x4b4] sm:$0xf]  ;;  %v7020_v38 = vld [vmem:[%s12481_s1 + $0x538] sm:$0xf0] }
 0x4da   :  { %v6959_v6 = vor.u32 %v7780_v61, %v6956_v59  ;;  %v7796_v41 = vld [vmem:[%s12481_s1 + $0x534] sm:$0xf]  ;;  %v4253_v59 = vadd.f32 %v11478_v1, %v11527_v23  ;;  %v4256_v1 = vadd.f32 %v11496_v34, %v11527_v23  ;;  %v4258_v34 = vadd.f32 %v11518_v19, %v11527_v23  ;;  %v12935_v19 = vld [vmem:[#allocation45_spill] sm:$0xff] }
 0x4db   :  { %v11790_v10 = vadd.f32 %v4534_v51, %v4462_v49  ;;  %v7023_v49 = vor.u32 %v7796_v41, %v7020_v38 }
 0x4dc   :  { %4852 = vmatpush.bf16.msrb.mxu2 %v6959_v6 }
 0x4dd   :  { %4925 = vmatpush.bf16.msrb.mxu3 %v7023_v49 }
 0x4de   :  { %v4320_v22 = vpop.f32.mrf.mxu2 }
 0x4df   :  { %v4321_v54 = vadd.f32 %v4320_v22, %v4248_v36 }
 0x4e0   :  { %v4393_v60 = vpop.f32.mrf.mxu3  ;;  %v4464_v4 = vpop.f32.mrf.mxu0 }
 0x4e1   :  { %v4394_v46 = vadd.f32 %v4393_v60, %v4321_v54  ;;  %v4465_v33 = vadd.f32 %v4464_v4, %v4392_v17  ;;  %v4537_v45 = vpop.f32.mrf.mxu1  ;;  %v4251_v17 = vadd.f32 %v11468_v14, %v11527_v23  ;;  %v7084_v14 = vld [vmem:[%s12481_s1 + $0x5b8] sm:$0xf0] }
 0x4e3   :  { %v11794_v44 = vadd.f32 %v4537_v45, %v4465_v33  ;;  %4589 = vmatmul.bf16.gmra.mxu2 %v12927_v30  ;;  %4730 = vmatmul.bf16.gmra.mxu0 %v12928_v20  ;;  %v7812_v30 = vld [vmem:[%s12481_s1 + $0x5b4] sm:$0xf] }
 0x4e4   :  { %4803 = vmatmul.bf16.gmra.mxu1 %v12929_v43  ;;  %v7828_v20 = vld [vmem:[%s12481_s1 + $0x634] sm:$0xf]  ;;  %v7087_v61 = vor.u32 %v7812_v30, %v7084_v14 }
 0x4e5   :  { %4662 = vmatmul.bf16.gmra.mxu3 %v12930_v18 }
 0x4e6   :  { %v4323_v51 = vpop.f32.mrf.mxu2  ;;  %4998 = vmatpush.bf16.msrb.mxu0 %v7087_v61 }
 0x4e7   :  { %v4324_v36 = vadd.f32 %v4323_v51, %v4251_v17 }
 0x4e8   :  { %v4396_v22 = vpop.f32.mrf.mxu3  ;;  %v4466_v54 = vpop.f32.mrf.mxu0 }
 0x4e9   :  { %v4397_v60 = vadd.f32 %v4396_v22, %v4324_v36  ;;  %v4467_v4 = vadd.f32 %v4466_v54, %v4394_v46  ;;  %v4539_v33 = vpop.f32.mrf.mxu1  ;;  %v7148_v46 = vld [vmem:[%s12481_s1 + $0x638] sm:$0xf0]  ;;  %v12932_v54 = vld [vmem:[#allocation86_spill] sm:$0xff] }
 0x4ea   :  { %v7151_v43 = vor.u32 %v7828_v20, %v7148_v46  ;;  %v12931_v22 = vld [vmem:[#allocation41_spill] sm:$0xff] }
 0x4eb   :  { %v11814_v45 = vadd.f32 %v4539_v33, %v4467_v4  ;;  %v12933_v4 = vld [vmem:[#allocation88_spill] sm:$0xff]  ;;  %v12934_v33 = vld [vmem:[#allocation87_spill] sm:$0xff] }
 0x4ec   :  { %5071 = vmatpush.bf16.msrb.mxu1 %v7151_v43  ;;  %v7778_v43 = vld [vmem:[%s12481_s1 + $0x4a4] sm:$0xf] }
 0x4ee   :  { %v4325_v18 = vpop.f32.mrf.mxu2 }
 0x4ef   :  { %v4326_v6 = vadd.f32 %v4325_v18, %v4253_v59  ;;  %v6948_v18 = vld [vmem:[%s12481_s1 + $0x4a8] sm:$0xf0] }
 0x4f0   :  { %v4398_v41 = vpop.f32.mrf.mxu3  ;;  %v4469_v38 = vpop.f32.mrf.mxu0 }
 0x4f1   :  { %v4399_v17 = vadd.f32 %v4398_v41, %v4326_v6  ;;  %v4470_v49 = vadd.f32 %v4469_v38, %v4397_v60  ;;  %v4542_v51 = vpop.f32.mrf.mxu1  ;;  %v6951_v6 = vor.u32 %v7778_v43, %v6948_v18  ;;  %v7826_v43 = vld [vmem:[%s12481_s1 + $0x624] sm:$0xf]  ;;  %v4261_v18 = vadd.f32 %v11529_v48, %v11527_v23 }
 0x4f3   :  { %v11830_v36 = vadd.f32 %v4542_v51, %v4470_v49  ;;  %4594 = vmatmul.bf16.gmra.mxu2 %v12931_v22  ;;  %4735 = vmatmul.bf16.gmra.mxu0 %v12932_v54  ;;  %v7012_v22 = vld [vmem:[%s12481_s1 + $0x528] sm:$0xf0] }
 0x4f4   :  { %4808 = vmatmul.bf16.gmra.mxu1 %v12933_v4  ;;  %4853 = vmatpush.bf16.msrb.mxu2 %v6951_v6 }
 0x4f5   :  { %4667 = vmatmul.bf16.gmra.mxu3 %v12934_v33 }
 0x4f6   :  { %v4328_v30 = vpop.f32.mrf.mxu2 }
 0x4f7   :  { %v4329_v14 = vadd.f32 %v4328_v30, %v4256_v1 }
 0x4f8   :  { %v4401_v20 = vpop.f32.mrf.mxu3  ;;  %v4471_v61 = vpop.f32.mrf.mxu0 }
 0x4f9   :  { %v4402_v46 = vadd.f32 %v4401_v20, %v4329_v14  ;;  %v4472_v60 = vadd.f32 %v4471_v61, %v4399_v17  ;;  %v4544_v59 = vpop.f32.mrf.mxu1  ;;  %v7794_v17 = vld [vmem:[%s12481_s1 + $0x524] sm:$0xf]  ;;  %v12937_v61 = vld [vmem:[#allocation92_spill] sm:$0xff] }
 0x4fa   :  { %v7015_v4 = vor.u32 %v7794_v17, %v7012_v22  ;;  %v12936_v20 = vld [vmem:[#allocation90_spill] sm:$0xff] }
 0x4fb   :  { %v11844_v41 = vadd.f32 %v4544_v59, %v4472_v60  ;;  %v12938_v60 = vld [vmem:[#allocation91_spill] sm:$0xff]  ;;  %v7810_v59 = vld [vmem:[%s12481_s1 + $0x5a4] sm:$0xf] }
 0x4fc   :  { %4926 = vmatpush.bf16.msrb.mxu3 %v7015_v4 }
 0x4fe   :  { %v4330_v38 = vpop.f32.mrf.mxu2 }
 0x4ff   :  { %v4331_v49 = vadd.f32 %v4330_v38, %v4258_v34  ;;  %v7140_v34 = vld [vmem:[%s12481_s1 + $0x628] sm:$0xf0] }
 0x500   :  { %v4403_v51 = vpop.f32.mrf.mxu3  ;;  %v4474_v54 = vpop.f32.mrf.mxu0 }
 0x501   :  { %v4404_v33 = vadd.f32 %v4403_v51, %v4331_v49  ;;  %v4475_v1 = vadd.f32 %v4474_v54, %v4402_v46  ;;  %v4547_v30 = vpop.f32.mrf.mxu1  ;;  %v7076_v46 = vld [vmem:[%s12481_s1 + $0x5a8] sm:$0xf0]  ;;  %v7143_v49 = vor.u32 %v7826_v43, %v7140_v34  ;;  %v12941_v43 = vld [vmem:[#allocation96_spill] sm:$0xff] }
 0x502   :  { %v7079_v6 = vor.u32 %v7810_v59, %v7076_v46  ;;  %v12939_v59 = vld [vmem:[#allocation49_spill] sm:$0xff]  ;;  %v12940_v46 = vld [vmem:[#allocation94_spill] sm:$0xff] }
 0x503   :  { %v11854_v14 = vadd.f32 %v4547_v30, %v4475_v1  ;;  %4599 = vmatmul.bf16.gmra.mxu2 %v12935_v19  ;;  %4740 = vmatmul.bf16.gmra.mxu0 %v12936_v20 }
 0x504   :  { %4813 = vmatmul.bf16.gmra.mxu1 %v12937_v61  ;;  %4999 = vmatpush.bf16.msrb.mxu0 %v7079_v6 }
 0x505   :  { %4672 = vmatmul.bf16.gmra.mxu3 %v12938_v60  ;;  %5072 = vmatpush.bf16.msrb.mxu1 %v7143_v49  ;;  %v6940_v49 = vld [vmem:[%s12481_s1 + $0x498] sm:$0xf0] }
 0x506   :  { %v4333_v38 = vpop.f32.mrf.mxu2 }
 0x507   :  { %v4334_v51 = vadd.f32 %v4333_v38, %v4261_v18  ;;  %v12942_v18 = vld [vmem:[#allocation95_spill] sm:$0xff]  ;;  %v7776_v38 = vld [vmem:[%s12481_s1 + $0x494] sm:$0xf] }
 0x508   :  { %v4406_v17 = vpop.f32.mrf.mxu3  ;;  %v4476_v22 = vpop.f32.mrf.mxu0 }
 0x509   :  { %v4407_v54 = vadd.f32 %v4406_v17, %v4334_v51  ;;  %v4477_v4 = vadd.f32 %v4476_v22, %v4404_v33  ;;  %v4549_v1 = vpop.f32.mrf.mxu1  ;;  %v6943_v17 = vor.u32 %v7776_v38, %v6940_v49  ;;  %v12943_v38 = vld [vmem:[#allocation53_spill] sm:$0xff]  ;;  %v12944_v49 = vld [vmem:[#allocation98_spill] sm:$0xff] }
 0x50b   :  { %v11874_v30 = vadd.f32 %v4549_v1, %v4477_v4  ;;  %4854 = vmatpush.bf16.msrb.mxu2 %v6943_v17  ;;  %v7792_v4 = vld [vmem:[%s12481_s1 + $0x514] sm:$0xf] }
 0x50c   :  { %v12945_v17 = vld [vmem:[#allocation100_spill] sm:$0xff] }
 0x50e   :  { %v4335_v19 = vpop.f32.mrf.mxu2 }
 0x510   :  { %v4408_v20 = vpop.f32.mrf.mxu3  ;;  %v4479_v23 = vpop.f32.mrf.mxu0 }
 0x511   :  { %v4480_v48 = vadd.f32 %v4479_v23, %v4407_v54  ;;  %v4552_v61 = vpop.f32.mrf.mxu1 }
 0x513   :  { %v11876_v60 = vadd.f32 %v4552_v61, %v4480_v48  ;;  %4604 = vmatmul.bf16.gmra.mxu2 %v12939_v59  ;;  %4745 = vmatmul.bf16.gmra.mxu0 %v12940_v46 }
 0x514   :  { %4818 = vmatmul.bf16.gmra.mxu1 %v12941_v43  ;;  %v7808_v43 = vld [vmem:[%s12481_s1 + $0x594] sm:$0xf] }
 0x515   :  { %4677 = vmatmul.bf16.gmra.mxu3 %v12942_v18  ;;  %v7068_v18 = vld [vmem:[%s12481_s1 + $0x598] sm:$0xf0] }
 0x516   :  { %v4565_v6 = vpop.f32.mrf.mxu2 }
 0x517   :  { %v4566_v33 = vadd.f32 %v4565_v6, %v11566_v3  ;;  %v7004_v3 = vld [vmem:[%s12481_s1 + $0x518] sm:$0xf0]  ;;  %v7824_v6 = vld [vmem:[%s12481_s1 + $0x614] sm:$0xf] }
 0x518   :  { %v4638_v34 = vpop.f32.mrf.mxu3  ;;  %v4481_v51 = vpop.f32.mrf.mxu0  ;;  %v7007_v1 = vor.u32 %v7792_v4, %v7004_v3 }
 0x519   :  { %v4639_v22 = vadd.f32 %v4638_v34, %v4566_v33  ;;  %v4554_v54 = vpop.f32.mrf.mxu1  ;;  %v7071_v33 = vor.u32 %v7808_v43, %v7068_v18 }
 0x51a   :  { %4927 = vmatpush.bf16.msrb.mxu3 %v7007_v1 }
 0x51b   :  { %5000 = vmatpush.bf16.msrb.mxu0 %v7071_v33 }
 0x51e   :  { %v4567_v19 = vpop.f32.mrf.mxu2 }
 0x51f   :  { %v4568_v20 = vadd.f32 %v4567_v19, %v11574_v52  ;;  %v7132_v52 = vld [vmem:[%s12481_s1 + $0x618] sm:$0xf0] }
 0x520   :  { %v4640_v23 = vpop.f32.mrf.mxu3  ;;  %v4711_v48 = vpop.f32.mrf.mxu0  ;;  %v7135_v51 = vor.u32 %v7824_v6, %v7132_v52 }
 0x521   :  { %v4641_v61 = vadd.f32 %v4640_v23, %v4568_v20  ;;  %v4712_v59 = vadd.f32 %v4711_v48, %v4639_v22  ;;  %v4784_v46 = vpop.f32.mrf.mxu1  ;;  %v12946_v22 = vld [vmem:[#allocation99_spill] sm:$0xff] }
 0x522   :  { %5073 = vmatpush.bf16.msrb.mxu1 %v7135_v51  ;;  %v6932_v51 = vld [vmem:[%s12481_s1 + $0x488] sm:$0xf0] }
 0x523   :  { %v11908_v34 = vadd.f32 %v4784_v46, %v4712_v59  ;;  %4609 = vmatmul.bf16.gmra.mxu2 %v12943_v38  ;;  %4750 = vmatmul.bf16.gmra.mxu0 %v12944_v49  ;;  %v12947_v49 = vld [vmem:[#allocation57_spill] sm:$0xff] }
 0x524   :  { %4823 = vmatmul.bf16.gmra.mxu1 %v12945_v17  ;;  %v12949_v17 = vld [vmem:[#allocation104_spill] sm:$0xff] }
 0x525   :  { %4682 = vmatmul.bf16.gmra.mxu3 %v12946_v22  ;;  %v12950_v22 = vld [vmem:[#allocation103_spill] sm:$0xff] }
 0x526   :  { %v4570_v54 = vpop.f32.mrf.mxu2 }
 0x527   :  { %v4571_v4 = vadd.f32 %v4570_v54, %v11578_v15  ;;  %v12948_v15 = vld [vmem:[#allocation102_spill] sm:$0xff] }
 0x528   :  { %v4643_v3 = vpop.f32.mrf.mxu3  ;;  %v4713_v1 = vpop.f32.mrf.mxu0 }
 0x529   :  { %v4644_v19 = vadd.f32 %v4643_v3, %v4571_v4  ;;  %v4714_v20 = vadd.f32 %v4713_v1, %v4641_v61  ;;  %v4786_v23 = vpop.f32.mrf.mxu1  ;;  %v7774_v61 = vld [vmem:[%s12481_s1 + $0x484] sm:$0xf]  ;;  %v6996_v4 = vld [vmem:[%s12481_s1 + $0x508] sm:$0xf0] }
 0x52a   :  { %v6935_v54 = vor.u32 %v7774_v61, %v6932_v51 }
 0x52b   :  { %v11915_v48 = vadd.f32 %v4786_v23, %v4714_v20 }
 0x52c   :  { %4855 = vmatpush.bf16.msrb.mxu2 %v6935_v54 }
 0x52e   :  { %v4572_v59 = vpop.f32.mrf.mxu2 }
 0x52f   :  { %v4573_v46 = vadd.f32 %v4572_v59, %v11598_v42  ;;  %v7790_v42 = vld [vmem:[%s12481_s1 + $0x504] sm:$0xf] }
 0x530   :  { %v4645_v43 = vpop.f32.mrf.mxu3  ;;  %v4716_v18 = vpop.f32.mrf.mxu0  ;;  %v6999_v3 = vor.u32 %v7790_v42, %v6996_v4 }
 0x531   :  { %v4646_v6 = vadd.f32 %v4645_v43, %v4573_v46  ;;  %v4717_v52 = vadd.f32 %v4716_v18, %v4644_v19  ;;  %v4789_v38 = vpop.f32.mrf.mxu1 }
 0x532   :  { %4928 = vmatpush.bf16.msrb.mxu3 %v6999_v3 }
 0x533   :  { %v11918_v33 = vadd.f32 %v4789_v38, %v4717_v52  ;;  %4614 = vmatmul.bf16.gmra.mxu2 %v12947_v49  ;;  %4755 = vmatmul.bf16.gmra.mxu0 %v12948_v15  ;;  %v7806_v52 = vld [vmem:[%s12481_s1 + $0x584] sm:$0xf]  ;;  %v7060_v38 = vld [vmem:[%s12481_s1 + $0x588] sm:$0xf0] }
 0x534   :  { %4828 = vmatmul.bf16.gmra.mxu1 %v12949_v17  ;;  %v7063_v49 = vor.u32 %v7806_v52, %v7060_v38 }
 0x535   :  { %4687 = vmatmul.bf16.gmra.mxu3 %v12950_v22 }
 0x536   :  { %v4575_v1 = vpop.f32.mrf.mxu2  ;;  %5001 = vmatpush.bf16.msrb.mxu0 %v7063_v49 }
 0x537   :  { %v4576_v19 = vadd.f32 %v4575_v1, %v11614_v29  ;;  %v7822_v29 = vld [vmem:[%s12481_s1 + $0x604] sm:$0xf]  ;;  %v12951_v1 = vld [vmem:[#allocation61_spill] sm:$0xff] }
 0x538   :  { %v4648_v20 = vpop.f32.mrf.mxu3  ;;  %v4718_v23 = vpop.f32.mrf.mxu0 }
 0x539   :  { %v4649_v59 = vadd.f32 %v4648_v20, %v4576_v19  ;;  %v4719_v46 = vadd.f32 %v4718_v23, %v4646_v6  ;;  %v4791_v43 = vpop.f32.mrf.mxu1  ;;  %v7124_v6 = vld [vmem:[%s12481_s1 + $0x608] sm:$0xf0]  ;;  %v12952_v19 = vld [vmem:[#allocation106_spill] sm:$0xff]  ;;  %v12953_v20 = vld [vmem:[#allocation108_spill] sm:$0xff] }
 0x53a   :  { %v7127_v15 = vor.u32 %v7822_v29, %v7124_v6  ;;  %v12954_v23 = vld [vmem:[#allocation107_spill] sm:$0xff]  ;;  %v7852_v6 = vld [vmem:[%s12481_s1 + $0x6f4] sm:$0xf] }
 0x53b   :  { %v11937_v18 = vadd.f32 %v4791_v43, %v4719_v46 }
 0x53c   :  { %5074 = vmatpush.bf16.msrb.mxu1 %v7127_v15  ;;  %v7244_v15 = vld [vmem:[%s12481_s1 + $0x6f8] sm:$0xf0] }
 0x53e   :  { %v4577_v61 = vpop.f32.mrf.mxu2 }
 0x53f   :  { %v4578_v51 = vadd.f32 %v4577_v61, %v11622_v7  ;;  %v7868_v61 = vld [vmem:[%s12481_s1 + $0x774] sm:$0xf] }
 0x540   :  { %v4650_v42 = vpop.f32.mrf.mxu3  ;;  %v4721_v17 = vpop.f32.mrf.mxu0 }
 0x541   :  { %v4651_v22 = vadd.f32 %v4650_v42, %v4578_v51  ;;  %v4722_v54 = vadd.f32 %v4721_v17, %v4649_v59  ;;  %v4794_v4 = vpop.f32.mrf.mxu1  ;;  %v7308_v51 = vld [vmem:[%s12481_s1 + $0x778] sm:$0xf0] }
 0x542   :  { %v7311_v42 = vor.u32 %v7868_v61, %v7308_v51 }
 0x543   :  { %v11952_v3 = vadd.f32 %v4794_v4, %v4722_v54  ;;  %4619 = vmatmul.bf16.gmra.mxu2 %v12951_v1  ;;  %4760 = vmatmul.bf16.gmra.mxu0 %v12952_v19 }
 0x544   :  { %4833 = vmatmul.bf16.gmra.mxu1 %v12953_v20  ;;  %5213 = vmatpush.bf16.msra.mxu3 %v7311_v42 }
 0x545   :  { %4692 = vmatmul.bf16.gmra.mxu3 %v12954_v23 }
 0x546   :  { %v4580_v46 = vpop.f32.mrf.mxu2 }
 0x547   :  { %v4581_v43 = vadd.f32 %v4580_v46, %v11638_v53  ;;  %v7247_v53 = vor.u32 %v7852_v6, %v7244_v15  ;;  %v12955_v46 = vld [vmem:[#allocation65_spill] sm:$0xff] }
 0x548   :  { %v4653_v7 = vpop.f32.mrf.mxu3  ;;  %v4723_v52 = vpop.f32.mrf.mxu0 }
 0x549   :  { %v4654_v38 = vadd.f32 %v4653_v7, %v4581_v43  ;;  %v4724_v29 = vadd.f32 %v4723_v52, %v4651_v22  ;;  %v4796_v49 = vpop.f32.mrf.mxu1  ;;  %5140 = vmatpush.bf16.msra.mxu2 %v7247_v53  ;;  %v12956_v43 = vld [vmem:[#allocation110_spill] sm:$0xff]  ;;  %v12957_v7 = vld [vmem:[#allocation112_spill] sm:$0xff]  ;;  %v12958_v52 = vld [vmem:[#allocation111_spill] sm:$0xff] }
 0x54b   :  { %v11959_v59 = vadd.f32 %v4796_v49, %v4724_v29  ;;  %v7372_v29 = vld [vmem:[%s12481_s1 + $0x7f8] sm:$0xf0] }
 0x54e   :  { %v4582_v17 = vpop.f32.mrf.mxu2 }
 0x54f   :  { %v4583_v22 = vadd.f32 %v4582_v17, %v11658_v8  ;;  %v7884_v8 = vld [vmem:[%s12481_s1 + $0x7f4] sm:$0xf] }
 0x550   :  { %v4655_v54 = vpop.f32.mrf.mxu3  ;;  %v4726_v4 = vpop.f32.mrf.mxu0  ;;  %v7375_v6 = vor.u32 %v7884_v8, %v7372_v29 }
 0x551   :  { %v4656_v1 = vadd.f32 %v4655_v54, %v4583_v22  ;;  %v4727_v19 = vadd.f32 %v4726_v4, %v4654_v38  ;;  %v4799_v20 = vpop.f32.mrf.mxu1  ;;  %v7909_v38 = vld [vmem:[%s12481_s1 + $0x830] sm:$0xff] }
 0x552   :  { %v2376_v49 = vunpack.c.h.b16 %v7909_v38  ;;  %5286 = vmatpush.bf16.msra.mxu0 %v7375_v6  ;;  %v12959_v38 = vld [vmem:[#allocation114_spill] sm:$0xff]  ;;  %v12961_v6 = vld [vmem:[#allocation115_spill] sm:$0xff] }
 0x553   :  { %v11974_v23 = vadd.f32 %v4799_v20, %v4727_v19  ;;  %4624 = vmatmul.bf16.gmra.mxu2 %v12955_v46  ;;  %4765 = vmatmul.bf16.gmra.mxu0 %v12956_v43 }
 0x554   :  { %4838 = vmatmul.bf16.gmra.mxu1 %v12957_v7  ;;  %v2640_v61 = vpack.c.b16 %v2376_v49, %v2376_v49  ;;  %v12960_v49 = vld [vmem:[#allocation69_spill] sm:$0xff] }
 0x555   :  { %4697 = vmatmul.bf16.gmra.mxu3 %v12958_v52 }
 0x556   :  { %v4585_v15 = vpop.f32.mrf.mxu2  ;;  %v2948_v17 = vsel %vm2943_vm0, %v2640_v61, 0 }
 0x557   :  { %v4586_v53 = vadd.f32 %v4585_v15, %v11662_v31  ;;  %5363 = vmatpush.bf16.msra.mxu1 %v2948_v17  ;;  %v7850_v15 = vld [vmem:[%s12481_s1 + $0x6e4] sm:$0xf] }
 0x558   :  { %v4658_v51 = vpop.f32.mrf.mxu3  ;;  %v4728_v42 = vpop.f32.mrf.mxu0  ;;  %v7866_v17 = vld [vmem:[%s12481_s1 + $0x764] sm:$0xf] }
 0x559   :  { %v4659_v22 = vadd.f32 %v4658_v51, %v4586_v53  ;;  %v4729_v54 = vadd.f32 %v4728_v42, %v4656_v1  ;;  %v4801_v4 = vpop.f32.mrf.mxu1  ;;  %v12962_v1 = vld [vmem:[#allocation116_spill] sm:$0xff] }
 0x55b   :  { %v11991_v19 = vadd.f32 %v4801_v4, %v4729_v54 }
 0x55e   :  { %v4587_v20 = vpop.f32.mrf.mxu2 }
 0x55f   :  { %v4588_v46 = vadd.f32 %v4587_v20, %v11682_v24  ;;  %v7236_v24 = vld [vmem:[%s12481_s1 + $0x6e8] sm:$0xf0] }
 0x560   :  { %v4660_v43 = vpop.f32.mrf.mxu3  ;;  %v4731_v7 = vpop.f32.mrf.mxu0  ;;  %v7239_v61 = vor.u32 %v7850_v15, %v7236_v24 }
 0x561   :  { %v4661_v52 = vadd.f32 %v4660_v43, %v4588_v46  ;;  %v4732_v8 = vadd.f32 %v4731_v7, %v4659_v22  ;;  %v4804_v29 = vpop.f32.mrf.mxu1  ;;  %v7300_v22 = vld [vmem:[%s12481_s1 + $0x768] sm:$0xf0] }
 0x562   :  { %5141 = vmatpush.bf16.msra.mxu2 %v7239_v61  ;;  %v7303_v4 = vor.u32 %v7866_v17, %v7300_v22  ;;  %v12966_v17 = vld [vmem:[#allocation119_spill] sm:$0xff] }
 0x563   :  { %v11994_v31 = vadd.f32 %v4804_v29, %v4732_v8  ;;  %4770 = vmatmul.bf16.gmra.mxu0 %v12959_v38  ;;  %4856 = vmatmul.bf16.vlgmr.msrb.gmra.mxu2 %v12960_v49  ;;  %v7364_v8 = vld [vmem:[%s12481_s1 + $0x7e8] sm:$0xf0] }
 0x564   :  { %4843 = vmatmul.bf16.gmra.mxu1 %v12961_v6  ;;  %5214 = vmatpush.bf16.msra.mxu3 %v7303_v4 }
 0x565   :  { %4929 = vmatmul.bf16.vlgmr.msrb.gmra.mxu3 %v12962_v1 }
 0x566   :  { %v4590_v53 = vpop.f32.mrf.mxu2 }
 0x567   :  { %v4591_v51 = vadd.f32 %v4590_v53, %v11698_v5  ;;  %v7882_v5 = vld [vmem:[%s12481_s1 + $0x7e4] sm:$0xf]  ;;  %v12963_v53 = vld [vmem:[#allocation73_spill] sm:$0xff] }
 0x568   :  { %v4663_v42 = vpop.f32.mrf.mxu3  ;;  %v4733_v54 = vpop.f32.mrf.mxu0  ;;  %v7367_v29 = vor.u32 %v7882_v5, %v7364_v8 }
 0x569   :  { %v4664_v20 = vadd.f32 %v4663_v42, %v4591_v51  ;;  %v4734_v46 = vadd.f32 %v4733_v54, %v4661_v52  ;;  %v4806_v43 = vpop.f32.mrf.mxu1  ;;  %v12964_v51 = vld [vmem:[#allocation118_spill] sm:$0xff]  ;;  %v12965_v42 = vld [vmem:[#allocation120_spill] sm:$0xff] }
 0x56a   :  { %5287 = vmatpush.bf16.msra.mxu0 %v7367_v29 }
 0x56b   :  { %v12013_v7 = vadd.f32 %v4806_v43, %v4734_v46 }
 0x56e   :  { %v4592_v38 = vpop.f32.mrf.mxu2 }
 0x56f   :  { %v4593_v49 = vadd.f32 %v4592_v38, %v11706_v2 }
 0x570   :  { %v4665_v6 = vpop.f32.mrf.mxu3  ;;  %v4736_v1 = vpop.f32.mrf.mxu0 }
 0x571   :  { %v4666_v52 = vadd.f32 %v4665_v6, %v4593_v49  ;;  %v4737_v15 = vadd.f32 %v4736_v1, %v4664_v20  ;;  %v4809_v24 = vpop.f32.mrf.mxu1  ;;  %v7848_v49 = vld [vmem:[%s12481_s1 + $0x6d4] sm:$0xf]  ;;  %v7228_v6 = vld [vmem:[%s12481_s1 + $0x6d8] sm:$0xf0] }
 0x572   :  { %v7231_v1 = vor.u32 %v7848_v49, %v7228_v6  ;;  %v7880_v49 = vld [vmem:[%s12481_s1 + $0x7d4] sm:$0xf]  ;;  %v7356_v6 = vld [vmem:[%s12481_s1 + $0x7d8] sm:$0xf0] }
 0x573   :  { %v12022_v61 = vadd.f32 %v4809_v24, %v4737_v15  ;;  %4861 = vmatmul.bf16.gmra.mxu2 %v12963_v53  ;;  %5002 = vmatmul.bf16.vlgmr.msrb.gmra.mxu0 %v12964_v51  ;;  %v12967_v51 = vld [vmem:[#allocation77_spill] sm:$0xff] }
 0x574   :  { %5075 = vmatmul.bf16.vlgmr.msrb.gmra.mxu1 %v12965_v42  ;;  %5142 = vmatpush.bf16.msra.mxu2 %v7231_v1  ;;  %v7864_v42 = vld [vmem:[%s12481_s1 + $0x754] sm:$0xf]  ;;  %v7359_v1 = vor.u32 %v7880_v49, %v7356_v6 }
 0x575   :  { %4934 = vmatmul.bf16.gmra.mxu3 %v12966_v17  ;;  %v7292_v17 = vld [vmem:[%s12481_s1 + $0x758] sm:$0xf0] }
 0x576   :  { %v4595_v22 = vpop.f32.mrf.mxu2  ;;  %5288 = vmatpush.bf16.msra.mxu0 %v7359_v1 }
 0x577   :  { %v4596_v54 = vadd.f32 %v4595_v22, %v11716_v40  ;;  %v12969_v22 = vld [vmem:[#allocation124_spill] sm:$0xff] }
 0x578   :  { %v4668_v4 = vpop.f32.mrf.mxu3  ;;  %v4738_v2 = vpop.f32.mrf.mxu0 }
 0x579   :  { %v4669_v46 = vadd.f32 %v4668_v4, %v4596_v54  ;;  %v4739_v43 = vadd.f32 %v4738_v2, %v4666_v52  ;;  %v4811_v5 = vpop.f32.mrf.mxu1  ;;  %v12970_v54 = vld [vmem:[#allocation123_spill] sm:$0xff]  ;;  %v7295_v4 = vor.u32 %v7864_v42, %v7292_v17 }
 0x57b   :  { %v12029_v20 = vadd.f32 %v4811_v5, %v4739_v43  ;;  %5215 = vmatpush.bf16.msra.mxu3 %v7295_v4 }
 0x57e   :  { %v4597_v8 = vpop.f32.mrf.mxu2 }
 0x57f   :  { %v4598_v29 = vadd.f32 %v4597_v8, %v11742_v28  ;;  %v12968_v28 = vld [vmem:[#allocation122_spill] sm:$0xff] }
 0x580   :  { %v4670_v38 = vpop.f32.mrf.mxu3  ;;  %v4741_v40 = vpop.f32.mrf.mxu0 }
 0x581   :  { %v4671_v15 = vadd.f32 %v4670_v38, %v4598_v29  ;;  %v4742_v24 = vadd.f32 %v4741_v40, %v4669_v46  ;;  %v4814_v52 = vpop.f32.mrf.mxu1  ;;  %v7890_v40 = vld [vmem:[%s12481_s1 + $0x824] sm:$0xf] }
 0x583   :  { %v12038_v53 = vadd.f32 %v4814_v52, %v4742_v24  ;;  %4866 = vmatmul.bf16.gmra.mxu2 %v12967_v51  ;;  %5007 = vmatmul.bf16.gmra.mxu0 %v12968_v28 }
 0x584   :  { %5080 = vmatmul.bf16.gmra.mxu1 %v12969_v22 }
 0x585   :  { %4939 = vmatmul.bf16.gmra.mxu3 %v12970_v54 }
 0x586   :  { %v4600_v2 = vpop.f32.mrf.mxu2 }
 0x587   :  { %v4601_v46 = vadd.f32 %v4600_v2, %v11746_v58  ;;  %v7396_v58 = vld [vmem:[%s12481_s1 + $0x828] sm:$0xf0]  ;;  %v12971_v2 = vld [vmem:[#allocation81_spill] sm:$0xff] }
 0x588   :  { %v4673_v43 = vpop.f32.mrf.mxu3  ;;  %v4743_v5 = vpop.f32.mrf.mxu0 }
 0x589   :  { %v4674_v8 = vadd.f32 %v4673_v43, %v4601_v46  ;;  %v4744_v29 = vadd.f32 %v4743_v5, %v4671_v15  ;;  %v4816_v38 = vpop.f32.mrf.mxu1  ;;  %v7399_v15 = vor.u32 %v7890_v40, %v7396_v58  ;;  %v12972_v46 = vld [vmem:[#allocation126_spill] sm:$0xff]  ;;  %v12973_v43 = vld [vmem:[#allocation128_spill] sm:$0xff]  ;;  %v12974_v5 = vld [vmem:[#allocation127_spill] sm:$0xff] }
 0x58a   :  { %v7846_v58 = vld [vmem:[%s12481_s1 + $0x6c4] sm:$0xf] }
 0x58b   :  { %v12063_v24 = vadd.f32 %v4816_v38, %v4744_v29  ;;  %5364 = vmatpush.bf16.msra.mxu1 %v7399_v15  ;;  %v7220_v15 = vld [vmem:[%s12481_s1 + $0x6c8] sm:$0xf0] }
 0x58e   :  { %v4602_v52 = vpop.f32.mrf.mxu2 }
 0x58f   :  { %v4603_v51 = vadd.f32 %v4602_v52, %v11754_v50  ;;  %v7862_v52 = vld [vmem:[%s12481_s1 + $0x744] sm:$0xf] }
 0x590   :  { %v4675_v28 = vpop.f32.mrf.mxu3  ;;  %v4746_v42 = vpop.f32.mrf.mxu0 }
 0x591   :  { %v4676_v17 = vadd.f32 %v4675_v28, %v4603_v51  ;;  %v4747_v22 = vadd.f32 %v4746_v42, %v4674_v8  ;;  %v4819_v54 = vpop.f32.mrf.mxu1  ;;  %v7284_v51 = vld [vmem:[%s12481_s1 + $0x748] sm:$0xf0] }
 0x592   :  { %v7287_v28 = vor.u32 %v7862_v52, %v7284_v51 }
 0x593   :  { %v12066_v4 = vadd.f32 %v4819_v54, %v4747_v22  ;;  %4871 = vmatmul.bf16.gmra.mxu2 %v12971_v2  ;;  %5012 = vmatmul.bf16.gmra.mxu0 %v12972_v46 }
 0x594   :  { %5085 = vmatmul.bf16.gmra.mxu1 %v12973_v43  ;;  %5216 = vmatpush.bf16.msra.mxu3 %v7287_v28 }
 0x595   :  { %4944 = vmatmul.bf16.gmra.mxu3 %v12974_v5 }
 0x596   :  { %v4605_v29 = vpop.f32.mrf.mxu2 }
 0x597   :  { %v4606_v38 = vadd.f32 %v4605_v29, %v11770_v27  ;;  %v7223_v27 = vor.u32 %v7846_v58, %v7220_v15  ;;  %v12975_v29 = vld [vmem:[#allocation85_spill] sm:$0xff] }
 0x598   :  { %v4678_v49 = vpop.f32.mrf.mxu3  ;;  %v4748_v50 = vpop.f32.mrf.mxu0 }
 0x599   :  { %v4679_v6 = vadd.f32 %v4678_v49, %v4606_v38  ;;  %v4749_v40 = vadd.f32 %v4748_v50, %v4676_v17  ;;  %v4821_v1 = vpop.f32.mrf.mxu1  ;;  %5143 = vmatpush.bf16.msra.mxu2 %v7223_v27  ;;  %v12976_v38 = vld [vmem:[#allocation130_spill] sm:$0xff]  ;;  %v12977_v50 = vld [vmem:[#allocation132_spill] sm:$0xff] }
 0x59a   :  { %v7878_v49 = vld [vmem:[%s12481_s1 + $0x7c4] sm:$0xf] }
 0x59b   :  { %v12073_v8 = vadd.f32 %v4821_v1, %v4749_v40  ;;  %v12978_v40 = vld [vmem:[#allocation131_spill] sm:$0xff] }
 0x59e   :  { %v4607_v42 = vpop.f32.mrf.mxu2 }
 0x59f   :  { %v4608_v17 = vadd.f32 %v4607_v42, %v11790_v10  ;;  %v7348_v10 = vld [vmem:[%s12481_s1 + $0x7c8] sm:$0xf0] }
 0x5a0   :  { %v4680_v22 = vpop.f32.mrf.mxu3  ;;  %v4751_v54 = vpop.f32.mrf.mxu0 }
 0x5a1   :  { %v4681_v2 = vadd.f32 %v4680_v22, %v4608_v17  ;;  %v4752_v46 = vadd.f32 %v4751_v54, %v4679_v6  ;;  %v4824_v43 = vpop.f32.mrf.mxu1  ;;  %v7351_v6 = vor.u32 %v7878_v49, %v7348_v10  ;;  %v12979_v10 = vld [vmem:[#allocation89_spill] sm:$0xff] }
 0x5a3   :  { %v12088_v5 = vadd.f32 %v4824_v43, %v4752_v46  ;;  %4876 = vmatmul.bf16.gmra.mxu2 %v12975_v29  ;;  %5017 = vmatmul.bf16.gmra.mxu0 %v12976_v38 }
 0x5a4   :  { %5090 = vmatmul.bf16.gmra.mxu1 %v12977_v50  ;;  %5289 = vmatpush.bf16.msra.mxu0 %v7351_v6  ;;  %v7212_v50 = vld [vmem:[%s12481_s1 + $0x6b8] sm:$0xf0] }
 0x5a5   :  { %4949 = vmatmul.bf16.gmra.mxu3 %v12978_v40  ;;  %v12982_v40 = vld [vmem:[#allocation135_spill] sm:$0xff] }
 0x5a6   :  { %v4610_v1 = vpop.f32.mrf.mxu2 }
 0x5a7   :  { %v4611_v58 = vadd.f32 %v4610_v1, %v11794_v44  ;;  %v12980_v44 = vld [vmem:[#allocation134_spill] sm:$0xff]  ;;  %v7860_v1 = vld [vmem:[%s12481_s1 + $0x734] sm:$0xf] }
 0x5a8   :  { %v4683_v15 = vpop.f32.mrf.mxu3  ;;  %v4753_v52 = vpop.f32.mrf.mxu0 }
 0x5a9   :  { %v4684_v27 = vadd.f32 %v4683_v15, %v4611_v58  ;;  %v4754_v51 = vadd.f32 %v4753_v52, %v4681_v2  ;;  %v4826_v28 = vpop.f32.mrf.mxu1  ;;  %v7844_v2 = vld [vmem:[%s12481_s1 + $0x6b4] sm:$0xf]  ;;  %v7276_v58 = vld [vmem:[%s12481_s1 + $0x738] sm:$0xf0] }
 0x5aa   :  { %v7215_v6 = vor.u32 %v7844_v2, %v7212_v50  ;;  %v7279_v15 = vor.u32 %v7860_v1, %v7276_v58 }
 0x5ab   :  { %v12101_v42 = vadd.f32 %v4826_v28, %v4754_v51 }
 0x5ac   :  { %5144 = vmatpush.bf16.msra.mxu2 %v7215_v6  ;;  %5217 = vmatpush.bf16.msra.mxu3 %v7279_v15 }
 0x5ae   :  { %v4612_v17 = vpop.f32.mrf.mxu2 }
 0x5af   :  { %v4613_v22 = vadd.f32 %v4612_v17, %v11814_v45  ;;  %v12981_v45 = vld [vmem:[#allocation136_spill] sm:$0xff] }
 0x5b0   :  { %v4685_v54 = vpop.f32.mrf.mxu3  ;;  %v4756_v46 = vpop.f32.mrf.mxu0 }
 0x5b1   :  { %v4686_v43 = vadd.f32 %v4685_v54, %v4613_v22  ;;  %v4757_v29 = vadd.f32 %v4756_v46, %v4684_v27  ;;  %v4829_v38 = vpop.f32.mrf.mxu1 }
 0x5b3   :  { %v12104_v49 = vadd.f32 %v4829_v38, %v4757_v29  ;;  %4881 = vmatmul.bf16.gmra.mxu2 %v12979_v10  ;;  %5022 = vmatmul.bf16.gmra.mxu0 %v12980_v44  ;;  %v7876_v29 = vld [vmem:[%s12481_s1 + $0x7b4] sm:$0xf]  ;;  %v7340_v38 = vld [vmem:[%s12481_s1 + $0x7b8] sm:$0xf0] }
 0x5b4   :  { %5095 = vmatmul.bf16.gmra.mxu1 %v12981_v45  ;;  %v7343_v10 = vor.u32 %v7876_v29, %v7340_v38 }
 0x5b5   :  { %4954 = vmatmul.bf16.gmra.mxu3 %v12982_v40 }
 0x5b6   :  { %v4615_v52 = vpop.f32.mrf.mxu2  ;;  %5290 = vmatpush.bf16.msra.mxu0 %v7343_v10 }
 0x5b7   :  { %v4616_v27 = vadd.f32 %v4615_v52, %v11830_v36  ;;  %v7888_v36 = vld [vmem:[%s12481_s1 + $0x814] sm:$0xf]  ;;  %v12983_v52 = vld [vmem:[#allocation93_spill] sm:$0xff] }
 0x5b8   :  { %v4688_v51 = vpop.f32.mrf.mxu3  ;;  %v4758_v28 = vpop.f32.mrf.mxu0 }
 0x5b9   :  { %v4689_v17 = vadd.f32 %v4688_v51, %v4616_v27  ;;  %v4759_v22 = vadd.f32 %v4758_v28, %v4686_v43  ;;  %v4831_v54 = vpop.f32.mrf.mxu1  ;;  %v7388_v43 = vld [vmem:[%s12481_s1 + $0x818] sm:$0xf0]  ;;  %v12984_v27 = vld [vmem:[#allocation138_spill] sm:$0xff] }
 0x5ba   :  { %v7391_v44 = vor.u32 %v7888_v36, %v7388_v43  ;;  %v7204_v36 = vld [vmem:[%s12481_s1 + $0x6a8] sm:$0xf0] }
 0x5bb   :  { %v12123_v46 = vadd.f32 %v4831_v54, %v4759_v22 }
 0x5bc   :  { %5365 = vmatpush.bf16.msra.mxu1 %v7391_v44  ;;  %v7858_v44 = vld [vmem:[%s12481_s1 + $0x724] sm:$0xf] }
 0x5be   :  { %v4617_v2 = vpop.f32.mrf.mxu2 }
 0x5bf   :  { %v4618_v50 = vadd.f32 %v4617_v2, %v11844_v41  ;;  %v7268_v2 = vld [vmem:[%s12481_s1 + $0x728] sm:$0xf0] }
 0x5c0   :  { %v4690_v45 = vpop.f32.mrf.mxu3  ;;  %v4761_v40 = vpop.f32.mrf.mxu0 }
 0x5c1   :  { %v4691_v6 = vadd.f32 %v4690_v45, %v4618_v50  ;;  %v4762_v1 = vadd.f32 %v4761_v40, %v4689_v17  ;;  %v4834_v58 = vpop.f32.mrf.mxu1  ;;  %v7842_v17 = vld [vmem:[%s12481_s1 + $0x6a4] sm:$0xf]  ;;  %v7271_v45 = vor.u32 %v7858_v44, %v7268_v2 }
 0x5c2   :  { %v7207_v10 = vor.u32 %v7842_v17, %v7204_v36 }
 0x5c3   :  { %v12138_v15 = vadd.f32 %v4834_v58, %v4762_v1  ;;  %4886 = vmatmul.bf16.gmra.mxu2 %v12983_v52  ;;  %5027 = vmatmul.bf16.gmra.mxu0 %v12984_v27  ;;  %v12985_v52 = vld [vmem:[#allocation97_spill] sm:$0xff]  ;;  %v12987_v27 = vld [vmem:[#allocation142_spill] sm:$0xff] }
 0x5c4   :  { %5100 = vmatmul.bf16.gmra.mxu1 %v10274_v39  ;;  %5145 = vmatpush.bf16.msra.mxu2 %v7207_v10 }
 0x5c5   :  { %4959 = vmatmul.bf16.gmra.mxu3 %v10272_v25 }
 0x5c6   :  { %v4620_v51 = vpop.f32.mrf.mxu2  ;;  %5218 = vmatpush.bf16.msra.mxu3 %v7271_v45 }
 0x5c7   :  { %v4621_v28 = vadd.f32 %v4620_v51, %v11854_v14  ;;  %v12988_v51 = vld [vmem:[#allocation141_spill] sm:$0xff] }
 0x5c8   :  { %v4693_v41 = vpop.f32.mrf.mxu3  ;;  %v4763_v22 = vpop.f32.mrf.mxu0 }
 0x5c9   :  { %v4694_v54 = vadd.f32 %v4693_v41, %v4621_v28  ;;  %v4764_v29 = vadd.f32 %v4763_v22, %v4691_v6  ;;  %v4836_v38 = vpop.f32.mrf.mxu1  ;;  %v7874_v28 = vld [vmem:[%s12481_s1 + $0x7a4] sm:$0xf]  ;;  %v7332_v41 = vld [vmem:[%s12481_s1 + $0x7a8] sm:$0xf0] }
 0x5ca   :  { %v7335_v22 = vor.u32 %v7874_v28, %v7332_v41  ;;  %v7840_v28 = vld [vmem:[%s12481_s1 + $0x694] sm:$0xf]  ;;  %v7196_v41 = vld [vmem:[%s12481_s1 + $0x698] sm:$0xf0] }
 0x5cb   :  { %v12151_v39 = vadd.f32 %v4836_v38, %v4764_v29 }
 0x5cc   :  { %5291 = vmatpush.bf16.msra.mxu0 %v7335_v22 }
 0x5ce   :  { %v4622_v25 = vpop.f32.mrf.mxu2 }
 0x5cf   :  { %v4623_v14 = vadd.f32 %v4622_v25, %v11874_v30  ;;  %v12986_v30 = vld [vmem:[#allocation140_spill] sm:$0xff] }
 0x5d0   :  { %v4695_v43 = vpop.f32.mrf.mxu3  ;;  %v4766_v50 = vpop.f32.mrf.mxu0 }
 0x5d1   :  { %v4696_v40 = vadd.f32 %v4695_v43, %v4623_v14  ;;  %v4767_v6 = vadd.f32 %v4766_v50, %v4694_v54  ;;  %v4839_v1 = vpop.f32.mrf.mxu1 }
 0x5d3   :  { %v12160_v58 = vadd.f32 %v4839_v1, %v4767_v6  ;;  %4891 = vmatmul.bf16.gmra.mxu2 %v12985_v52  ;;  %5032 = vmatmul.bf16.gmra.mxu0 %v12986_v30  ;;  %v12989_v1 = vld [vmem:[#allocation101_spill] sm:$0xff]  ;;  %v12990_v52 = vld [vmem:[#allocation144_spill] sm:$0xff] }
 0x5d4   :  { %5105 = vmatmul.bf16.gmra.mxu1 %v12987_v27  ;;  %v12992_v30 = vld [vmem:[#allocation145_spill] sm:$0xff] }
 0x5d5   :  { %4964 = vmatmul.bf16.gmra.mxu3 %v12988_v51 }
 0x5d6   :  { %v4625_v54 = vpop.f32.mrf.mxu2 }
 0x5d7   :  { %v4626_v29 = vadd.f32 %v4625_v54, %v11876_v60  ;;  %v12991_v60 = vld [vmem:[#allocation146_spill] sm:$0xff]  ;;  %v7199_v54 = vor.u32 %v7840_v28, %v7196_v41 }
 0x5d8   :  { %v4698_v38 = vpop.f32.mrf.mxu3  ;;  %v4768_v17 = vpop.f32.mrf.mxu0  ;;  %v12995_v41 = vld [vmem:[#allocation150_spill] sm:$0xff] }
 0x5d9   :  { %v4699_v36 = vadd.f32 %v4698_v38, %v4626_v29  ;;  %v4769_v10 = vadd.f32 %v4768_v17, %v4696_v40  ;;  %v4841_v25 = vpop.f32.mrf.mxu1  ;;  %5146 = vmatpush.bf16.msra.mxu2 %v7199_v54  ;;  %v7856_v17 = vld [vmem:[%s12481_s1 + $0x714] sm:$0xf] }
 0x5db   :  { %v12173_v14 = vadd.f32 %v4841_v25, %v4769_v10 }
 0x5de   :  { %v4627_v43 = vpop.f32.mrf.mxu2 }
 0x5e0   :  { %v4700_v44 = vpop.f32.mrf.mxu3  ;;  %v4771_v2 = vpop.f32.mrf.mxu0 }
 0x5e1   :  { %v4772_v50 = vadd.f32 %v4771_v2, %v4699_v36  ;;  %v4844_v45 = vpop.f32.mrf.mxu1 }
 0x5e3   :  { %v12175_v6 = vadd.f32 %v4844_v45, %v4772_v50  ;;  %4896 = vmatmul.bf16.gmra.mxu2 %v12989_v1  ;;  %5037 = vmatmul.bf16.gmra.mxu0 %v12990_v52  ;;  %v7872_v1 = vld [vmem:[%s12481_s1 + $0x794] sm:$0xf]  ;;  %v7324_v52 = vld [vmem:[%s12481_s1 + $0x798] sm:$0xf0] }
 0x5e4   :  { %5110 = vmatmul.bf16.gmra.mxu1 %v12991_v60  ;;  %v7886_v60 = vld [vmem:[%s12481_s1 + $0x804] sm:$0xf] }
 0x5e5   :  { %4969 = vmatmul.bf16.gmra.mxu3 %v12992_v30  ;;  %v7327_v30 = vor.u32 %v7872_v1, %v7324_v52 }
 0x5e6   :  { %v4857_v27 = vpop.f32.mrf.mxu2 }
 0x5e7   :  { %v4858_v40 = vadd.f32 %v4857_v27, %v11908_v34  ;;  %v7260_v34 = vld [vmem:[%s12481_s1 + $0x718] sm:$0xf0]  ;;  %5292 = vmatpush.bf16.msra.mxu0 %v7327_v30 }
 0x5e8   :  { %v4930_v51 = vpop.f32.mrf.mxu3  ;;  %v4773_v22 = vpop.f32.mrf.mxu0  ;;  %v7263_v36 = vor.u32 %v7856_v17, %v7260_v34 }
 0x5e9   :  { %v4931_v29 = vadd.f32 %v4930_v51, %v4858_v40  ;;  %v4846_v38 = vpop.f32.mrf.mxu1  ;;  %v12993_v40 = vld [vmem:[#allocation105_spill] sm:$0xff]  ;;  %v12994_v51 = vld [vmem:[#allocation148_spill] sm:$0xff] }
 0x5ea   :  { %5219 = vmatpush.bf16.msra.mxu3 %v7263_v36  ;;  %v12996_v22 = vld [vmem:[#allocation149_spill] sm:$0xff] }
 0x5ee   :  { %v4859_v10 = vpop.f32.mrf.mxu2 }
 0x5ef   :  { %v4860_v25 = vadd.f32 %v4859_v10, %v11915_v48  ;;  %v7380_v48 = vld [vmem:[%s12481_s1 + $0x808] sm:$0xf0] }
 0x5f0   :  { %v4932_v43 = vpop.f32.mrf.mxu3  ;;  %v5003_v44 = vpop.f32.mrf.mxu0  ;;  %v7383_v28 = vor.u32 %v7886_v60, %v7380_v48  ;;  %v12997_v48 = vld [vmem:[#allocation109_spill] sm:$0xff] }
 0x5f1   :  { %v4933_v2 = vadd.f32 %v4932_v43, %v4860_v25  ;;  %v5004_v50 = vadd.f32 %v5003_v44, %v4931_v29  ;;  %v5076_v45 = vpop.f32.mrf.mxu1 }
 0x5f2   :  { %5366 = vmatpush.bf16.msra.mxu1 %v7383_v28  ;;  %v13000_v28 = vld [vmem:[#allocation153_spill] sm:$0xff] }
 0x5f3   :  { %v12207_v27 = vadd.f32 %v5076_v45, %v5004_v50  ;;  %4901 = vmatmul.bf16.gmra.mxu2 %v12993_v40  ;;  %5042 = vmatmul.bf16.gmra.mxu0 %v12994_v51  ;;  %v7188_v40 = vld [vmem:[%s12481_s1 + $0x688] sm:$0xf0]  ;;  %v12999_v51 = vld [vmem:[#allocation154_spill] sm:$0xff] }
 0x5f4   :  { %5115 = vmatmul.bf16.gmra.mxu1 %v12995_v41 }
 0x5f5   :  { %4974 = vmatmul.bf16.gmra.mxu3 %v12996_v22  ;;  %v7252_v22 = vld [vmem:[%s12481_s1 + $0x708] sm:$0xf0] }
 0x5f6   :  { %v4862_v54 = vpop.f32.mrf.mxu2 }
 0x5f7   :  { %v4863_v29 = vadd.f32 %v4862_v54, %v11918_v33  ;;  %v12998_v33 = vld [vmem:[#allocation152_spill] sm:$0xff] }
 0x5f8   :  { %v4935_v38 = vpop.f32.mrf.mxu3  ;;  %v5005_v17 = vpop.f32.mrf.mxu0 }
 0x5f9   :  { %v4936_v34 = vadd.f32 %v4935_v38, %v4863_v29  ;;  %v5006_v36 = vadd.f32 %v5005_v17, %v4933_v2  ;;  %v5078_v10 = vpop.f32.mrf.mxu1  ;;  %v7838_v2 = vld [vmem:[%s12481_s1 + $0x684] sm:$0xf] }
 0x5fa   :  { %v7191_v41 = vor.u32 %v7838_v2, %v7188_v40 }
 0x5fb   :  { %v12214_v25 = vadd.f32 %v5078_v10, %v5006_v36 }
 0x5fc   :  { %5147 = vmatpush.bf16.msra.mxu2 %v7191_v41  ;;  %v13003_v41 = vld [vmem:[#allocation158_spill] sm:$0xff] }
 0x5fe   :  { %v4864_v43 = vpop.f32.mrf.mxu2 }
 0x5ff   :  { %v4865_v44 = vadd.f32 %v4864_v43, %v11937_v18  ;;  %v7854_v18 = vld [vmem:[%s12481_s1 + $0x704] sm:$0xf] }
 0x600   :  { %v4937_v50 = vpop.f32.mrf.mxu3  ;;  %v5008_v45 = vpop.f32.mrf.mxu0  ;;  %v7255_v54 = vor.u32 %v7854_v18, %v7252_v22  ;;  %v13004_v22 = vld [vmem:[#allocation157_spill] sm:$0xff] }
 0x601   :  { %v4938_v1 = vadd.f32 %v4937_v50, %v4865_v44  ;;  %v5009_v52 = vadd.f32 %v5008_v45, %v4936_v34  ;;  %v5081_v60 = vpop.f32.mrf.mxu1  ;;  %v7870_v50 = vld [vmem:[%s12481_s1 + $0x784] sm:$0xf]  ;;  %v7316_v45 = vld [vmem:[%s12481_s1 + $0x788] sm:$0xf0] }
 0x602   :  { %5220 = vmatpush.bf16.msra.mxu3 %v7255_v54 }
 0x603   :  { %v12217_v30 = vadd.f32 %v5081_v60, %v5009_v52  ;;  %4906 = vmatmul.bf16.gmra.mxu2 %v12997_v48  ;;  %5047 = vmatmul.bf16.gmra.mxu0 %v12998_v33  ;;  %v7319_v52 = vor.u32 %v7870_v50, %v7316_v45 }
 0x604   :  { %5120 = vmatmul.bf16.gmra.mxu1 %v12999_v51  ;;  %v13001_v51 = vld [vmem:[#allocation113_spill] sm:$0xff] }
 0x605   :  { %4979 = vmatmul.bf16.gmra.mxu3 %v13000_v28  ;;  %5293 = vmatpush.bf16.msra.mxu0 %v7319_v52  ;;  %v13002_v28 = vld [vmem:[#allocation156_spill] sm:$0xff] }
 0x606   :  { %v4867_v29 = vpop.f32.mrf.mxu2 }
 0x607   :  { %v4868_v38 = vadd.f32 %v4867_v29, %v11952_v3 }
 0x608   :  { %v4940_v17 = vpop.f32.mrf.mxu3  ;;  %v5010_v34 = vpop.f32.mrf.mxu0 }
 0x609   :  { %v4941_v36 = vadd.f32 %v4940_v17, %v4868_v38  ;;  %v5011_v10 = vadd.f32 %v5010_v34, %v4938_v1  ;;  %v5083_v43 = vpop.f32.mrf.mxu1 }
 0x60b   :  { %v12236_v44 = vadd.f32 %v5083_v43, %v5011_v10 }
 0x60e   :  { %v4869_v60 = vpop.f32.mrf.mxu2 }
 0x60f   :  { %v4870_v3 = vadd.f32 %v4869_v60, %v11959_v59 }
 0x610   :  { %v4942_v48 = vpop.f32.mrf.mxu3  ;;  %v5013_v33 = vpop.f32.mrf.mxu0 }
 0x611   :  { %v4943_v2 = vadd.f32 %v4942_v48, %v4870_v3  ;;  %v5014_v1 = vadd.f32 %v5013_v33, %v4941_v36  ;;  %v5086_v40 = vpop.f32.mrf.mxu1 }
 0x613   :  { %v12245_v18 = vadd.f32 %v5086_v40, %v5014_v1  ;;  %4911 = vmatmul.bf16.gmra.mxu2 %v13001_v51  ;;  %5052 = vmatmul.bf16.gmra.mxu0 %v13002_v28  ;;  %v13005_v1 = vld [vmem:[#allocation117_spill] sm:$0xff] }
 0x614   :  { %5125 = vmatmul.bf16.gmra.mxu1 %v13003_v41 }
 0x615   :  { %4984 = vmatmul.bf16.gmra.mxu3 %v13004_v22 }
 0x616   :  { %v4872_v54 = vpop.f32.mrf.mxu2 }
 0x617   :  { %v4873_v29 = vadd.f32 %v4872_v54, %v11974_v23  ;;  %v13006_v23 = vld [vmem:[#allocation160_spill] sm:$0xff] }
 0x618   :  { %v4945_v38 = vpop.f32.mrf.mxu3  ;;  %v5015_v59 = vpop.f32.mrf.mxu0 }
 0x619   :  { %v4946_v17 = vadd.f32 %v4945_v38, %v4873_v29  ;;  %v5016_v34 = vadd.f32 %v5015_v59, %v4943_v2  ;;  %v5088_v10 = vpop.f32.mrf.mxu1  ;;  %v13007_v2 = vld [vmem:[#allocation161_spill] sm:$0xff] }
 0x61b   :  { %v12252_v36 = vadd.f32 %v5088_v10, %v5016_v34 }
 0x61e   :  { %v4874_v43 = vpop.f32.mrf.mxu2 }
 0x61f   :  { %v4875_v50 = vadd.f32 %v4874_v43, %v11991_v19 }
 0x620   :  { %v4947_v45 = vpop.f32.mrf.mxu3  ;;  %v5018_v52 = vpop.f32.mrf.mxu0 }
 0x621   :  { %v4948_v60 = vadd.f32 %v4947_v45, %v4875_v50  ;;  %v5019_v3 = vadd.f32 %v5018_v52, %v4946_v17  ;;  %v5091_v48 = vpop.f32.mrf.mxu1  ;;  %v13008_v45 = vld [vmem:[#allocation163_spill] sm:$0xff]  ;;  %v13010_v52 = vld [vmem:[#allocation164_spill] sm:$0xff] }
 0x623   :  { %v12255_v33 = vadd.f32 %v5091_v48, %v5019_v3  ;;  %4916 = vmatmul.bf16.gmra.mxu2 %v13005_v1  ;;  %5057 = vmatmul.bf16.gmra.mxu0 %v13006_v23 }
 0x624   :  { %5130 = vmatmul.bf16.gmra.mxu1 %v10586_v0 }
 0x625   :  { %4989 = vmatmul.bf16.gmra.mxu3 %v13007_v2 }
 0x626   :  { %v4877_v40 = vpop.f32.mrf.mxu2 }
 0x627   :  { %v4878_v51 = vadd.f32 %v4877_v40, %v11994_v31  ;;  %v13009_v31 = vld [vmem:[#allocation121_spill] sm:$0xff] }
 0x628   :  { %v4950_v28 = vpop.f32.mrf.mxu3  ;;  %v5020_v19 = vpop.f32.mrf.mxu0 }
 0x629   :  { %v4951_v41 = vadd.f32 %v4950_v28, %v4878_v51  ;;  %v5021_v22 = vadd.f32 %v5020_v19, %v4948_v60  ;;  %v5093_v54 = vpop.f32.mrf.mxu1  ;;  %v13011_v60 = vld [vmem:[#allocation165_spill] sm:$0xff] }
 0x62b   :  { %v12262_v29 = vadd.f32 %v5093_v54, %v5021_v22 }
 0x62e   :  { %v4879_v38 = vpop.f32.mrf.mxu2 }
 0x62f   :  { %v4880_v59 = vadd.f32 %v4879_v38, %v12013_v7 }
 0x630   :  { %v4952_v17 = vpop.f32.mrf.mxu3  ;;  %v5023_v34 = vpop.f32.mrf.mxu0 }
 0x631   :  { %v4953_v10 = vadd.f32 %v4952_v17, %v4880_v59  ;;  %v5024_v43 = vadd.f32 %v5023_v34, %v4951_v41  ;;  %v5096_v0 = vpop.f32.mrf.mxu1  ;;  %v13012_v34 = vld [vmem:[#allocation125_spill] sm:$0xff] }
 0x633   :  { %v12265_v50 = vadd.f32 %v5096_v0, %v5024_v43  ;;  %5062 = vmatmul.bf16.gmra.mxu0 %v13008_v45  ;;  %5148 = vmatmul.bf16.vlgmr.msra.gmra.mxu2 %v13009_v31 }
 0x634   :  { %5135 = vmatmul.bf16.gmra.mxu1 %v13010_v52 }
 0x635   :  { %5221 = vmatmul.bf16.vlgmr.msra.gmra.mxu3 %v13011_v60 }
 0x636   :  { %v4882_v3 = vpop.f32.mrf.mxu2 }
 0x637   :  { %v4883_v48 = vadd.f32 %v4882_v3, %v12022_v61  ;;  %v13013_v61 = vld [vmem:[#allocation167_spill] sm:$0xff] }
 0x638   :  { %v4955_v1 = vpop.f32.mrf.mxu3  ;;  %v5025_v7 = vpop.f32.mrf.mxu0 }
 0x639   :  { %v4956_v23 = vadd.f32 %v4955_v1, %v4883_v48  ;;  %v5026_v2 = vadd.f32 %v5025_v7, %v4953_v10  ;;  %v5098_v40 = vpop.f32.mrf.mxu1 }
 0x63b   :  { %v12272_v51 = vadd.f32 %v5098_v40, %v5026_v2 }
 0x63e   :  { %v4884_v28 = vpop.f32.mrf.mxu2 }
 0x63f   :  { %v4885_v19 = vadd.f32 %v4884_v28, %v12029_v20  ;;  %v13016_v28 = vld [vmem:[#allocation168_spill] sm:$0xff] }
 0x640   :  { %v4957_v41 = vpop.f32.mrf.mxu3  ;;  %v5028_v22 = vpop.f32.mrf.mxu0 }
 0x641   :  { %v4958_v54 = vadd.f32 %v4957_v41, %v4885_v19  ;;  %v5029_v38 = vadd.f32 %v5028_v22, %v4956_v23  ;;  %v5101_v59 = vpop.f32.mrf.mxu1 }
 0x643   :  { %v12275_v17 = vadd.f32 %v5101_v59, %v5029_v38  ;;  %5153 = vmatmul.bf16.gmra.mxu2 %v13012_v34  ;;  %5294 = vmatmul.bf16.vlgmr.msra.gmra.mxu0 %v13013_v61 }
 0x644   :  { %7413 = vmatmul.msk.bf16.vlgmr.msra.gmra.mxu1 %vm2903_vm1, %v10691_v21 }
 0x645   :  { %5226 = vmatmul.bf16.gmra.mxu3 %v10689_v35  ;;  %v13014_v35 = vld [vmem:[#allocation129_spill] sm:$0xff] }
 0x646   :  { %v4887_v10 = vpop.f32.mrf.mxu2 }
 0x647   :  { %v4888_v43 = vadd.f32 %v4887_v10, %v12038_v53  ;;  %v13015_v53 = vld [vmem:[#allocation169_spill] sm:$0xff] }
 0x648   :  { %v4960_v20 = vpop.f32.mrf.mxu3  ;;  %v5030_v0 = vpop.f32.mrf.mxu0 }
 0x649   :  { %v4961_v45 = vadd.f32 %v4960_v20, %v4888_v43  ;;  %v5031_v31 = vadd.f32 %v5030_v0, %v4958_v54  ;;  %v5103_v52 = vpop.f32.mrf.mxu1 }
 0x64b   :  { %v12283_v60 = vadd.f32 %v5103_v52, %v5031_v31  ;;  %v13017_v52 = vld [vmem:[#allocation133_spill] sm:$0xff] }
 0x64e   :  { %v4889_v3 = vpop.f32.mrf.mxu2 }
 0x64f   :  { %v4890_v48 = vadd.f32 %v4889_v3, %v12063_v24  ;;  %v13019_v3 = vld [vmem:[#allocation172_spill] sm:$0xff] }
 0x650   :  { %v4962_v1 = vpop.f32.mrf.mxu3  ;;  %v5033_v7 = vpop.f32.mrf.mxu0 }
 0x651   :  { %v4963_v23 = vadd.f32 %v4962_v1, %v4890_v48  ;;  %v5034_v2 = vadd.f32 %v5033_v7, %v4961_v45  ;;  %v5106_v21 = vpop.f32.mrf.mxu1  ;;  %v13020_v48 = vld [vmem:[#allocation171_spill] sm:$0xff] }
 0x653   :  { %v12286_v40 = vadd.f32 %v5106_v21, %v5034_v2  ;;  %5158 = vmatmul.bf16.gmra.mxu2 %v13014_v35  ;;  %5299 = vmatmul.bf16.gmra.mxu0 %v10693_v32 }
 0x654   :  { %7414 = vmatmul.msk.bf16.gmra.mxu1 %vm2903_vm1, %v13015_v53 }
 0x655   :  { %5231 = vmatmul.bf16.gmra.mxu3 %v13016_v28 }
 0x656   :  { %v4892_v19 = vpop.f32.mrf.mxu2 }
 0x657   :  { %v4893_v41 = vadd.f32 %v4892_v19, %v12066_v4  ;;  %v13018_v4 = vld [vmem:[#allocation170_spill] sm:$0xff] }
 0x658   :  { %v4965_v24 = vpop.f32.mrf.mxu3  ;;  %v5035_v22 = vpop.f32.mrf.mxu0 }
 0x659   :  { %v4966_v54 = vadd.f32 %v4965_v24, %v4893_v41  ;;  %v5036_v38 = vadd.f32 %v5035_v22, %v4963_v23  ;;  %v5108_v59 = vpop.f32.mrf.mxu1 }
 0x65b   :  { %v12294_v34 = vadd.f32 %v5108_v59, %v5036_v38 }
 0x65e   :  { %v4894_v61 = vpop.f32.mrf.mxu2 }
 0x65f   :  { %v4895_v10 = vadd.f32 %v4894_v61, %v12073_v8  ;;  %v13021_v61 = vld [vmem:[#allocation137_spill] sm:$0xff] }
 0x660   :  { %v4967_v43 = vpop.f32.mrf.mxu3  ;;  %v5038_v32 = vpop.f32.mrf.mxu0 }
 0x661   :  { %v4968_v20 = vadd.f32 %v4967_v43, %v4895_v10  ;;  %v5039_v0 = vadd.f32 %v5038_v32, %v4966_v54  ;;  %v5111_v45 = vpop.f32.mrf.mxu1 }
 0x663   :  { %v12297_v31 = vadd.f32 %v5111_v45, %v5039_v0  ;;  %5163 = vmatmul.bf16.gmra.mxu2 %v13017_v52  ;;  %5304 = vmatmul.bf16.gmra.mxu0 %v13018_v4 }
 0x664   :  { %7415 = vmatmul.msk.bf16.gmra.mxu1 %vm2903_vm1, %v13019_v3 }
 0x665   :  { %5236 = vmatmul.bf16.gmra.mxu3 %v13020_v48 }
 0x666   :  { %v4897_v1 = vpop.f32.mrf.mxu2 }
 0x667   :  { %v4898_v7 = vadd.f32 %v4897_v1, %v12088_v5  ;;  %v13022_v5 = vld [vmem:[#allocation173_spill] sm:$0xff] }
 0x668   :  { %v4970_v8 = vpop.f32.mrf.mxu3  ;;  %v5040_v23 = vpop.f32.mrf.mxu0 }
 0x669   :  { %v4971_v2 = vadd.f32 %v4970_v8, %v4898_v7  ;;  %v5041_v21 = vadd.f32 %v5040_v23, %v4968_v20  ;;  %v5113_v35 = vpop.f32.mrf.mxu1 }
 0x66b   :  { %v12305_v53 = vadd.f32 %v5113_v35, %v5041_v21  ;;  %v13026_v21 = vld [vmem:[#allocation175_spill] sm:$0xff] }
 0x66e   :  { %v4899_v28 = vpop.f32.mrf.mxu2 }
 0x66f   :  { %v4900_v19 = vadd.f32 %v4899_v28, %v12101_v42 }
 0x670   :  { %v4972_v41 = vpop.f32.mrf.mxu3  ;;  %v5043_v24 = vpop.f32.mrf.mxu0 }
 0x671   :  { %v4973_v22 = vadd.f32 %v4972_v41, %v4900_v19  ;;  %v5044_v54 = vadd.f32 %v5043_v24, %v4971_v2  ;;  %v5116_v38 = vpop.f32.mrf.mxu1  ;;  %v13025_v2 = vld [vmem:[#allocation176_spill] sm:$0xff] }
 0x673   :  { %v12308_v59 = vadd.f32 %v5116_v38, %v5044_v54  ;;  %5168 = vmatmul.bf16.gmra.mxu2 %v13021_v61  ;;  %5309 = vmatmul.bf16.gmra.mxu0 %v13022_v5 }
 0x674   :  { %7416 = vmatmul.msk.bf16.gmra.mxu1 %vm2903_vm1, %v10832_v16 }
 0x675   :  { %5241 = vmatmul.bf16.gmra.mxu3 %v10830_v57  ;;  %v13023_v57 = vld [vmem:[#allocation139_spill] sm:$0xff] }
 0x676   :  { %v4902_v10 = vpop.f32.mrf.mxu2 }
 0x677   :  { %v4903_v43 = vadd.f32 %v4902_v10, %v12104_v49  ;;  %v13024_v49 = vld [vmem:[#allocation174_spill] sm:$0xff] }
 0x678   :  { %v4975_v42 = vpop.f32.mrf.mxu3  ;;  %v5045_v32 = vpop.f32.mrf.mxu0 }
 0x679   :  { %v4976_v20 = vadd.f32 %v4975_v42, %v4903_v43  ;;  %v5046_v0 = vadd.f32 %v5045_v32, %v4973_v22  ;;  %v5118_v45 = vpop.f32.mrf.mxu1 }
 0x67b   :  { %v12316_v52 = vadd.f32 %v5118_v45, %v5046_v0  ;;  %v13027_v0 = vld [vmem:[#allocation143_spill] sm:$0xff] }
 0x67e   :  { %v4904_v4 = vpop.f32.mrf.mxu2 }
 0x67f   :  { %v4905_v3 = vadd.f32 %v4904_v4, %v12123_v46 }
 0x680   :  { %v4977_v48 = vpop.f32.mrf.mxu3  ;;  %v5048_v1 = vpop.f32.mrf.mxu0 }
 0x681   :  { %v4978_v7 = vadd.f32 %v4977_v48, %v4905_v3  ;;  %v5049_v8 = vadd.f32 %v5048_v1, %v4976_v20  ;;  %v5121_v16 = vpop.f32.mrf.mxu1 }
 0x683   :  { %v12319_v23 = vadd.f32 %v5121_v16, %v5049_v8  ;;  %5173 = vmatmul.bf16.gmra.mxu2 %v13023_v57  ;;  %5314 = vmatmul.bf16.gmra.mxu0 %v13024_v49 }
 0x684   :  { %7417 = vmatmul.msk.bf16.gmra.mxu1 %vm2903_vm1, %v13025_v2 }
 0x685   :  { %5246 = vmatmul.bf16.gmra.mxu3 %v13026_v21 }
 0x686   :  { %v4907_v35 = vpop.f32.mrf.mxu2 }
 0x687   :  { %v4908_v28 = vadd.f32 %v4907_v35, %v12138_v15  ;;  %v13028_v15 = vld [vmem:[#allocation177_spill] sm:$0xff] }
 0x688   :  { %v4980_v46 = vpop.f32.mrf.mxu3  ;;  %v5050_v19 = vpop.f32.mrf.mxu0 }
 0x689   :  { %v4981_v41 = vadd.f32 %v4980_v46, %v4908_v28  ;;  %v5051_v24 = vadd.f32 %v5050_v19, %v4978_v7  ;;  %v5123_v22 = vpop.f32.mrf.mxu1 }
 0x68b   :  { %v12327_v54 = vadd.f32 %v5123_v22, %v5051_v24 }
 0x68e   :  { %v4909_v38 = vpop.f32.mrf.mxu2 }
 0x68f   :  { %v4910_v61 = vadd.f32 %v4909_v38, %v12151_v39 }
 0x690   :  { %v4982_v5 = vpop.f32.mrf.mxu3  ;;  %v5053_v10 = vpop.f32.mrf.mxu0 }
 0x691   :  { %v4983_v43 = vadd.f32 %v4982_v5, %v4910_v61  ;;  %v5054_v42 = vadd.f32 %v5053_v10, %v4981_v41  ;;  %v5126_v32 = vpop.f32.mrf.mxu1 }
 0x693   :  { %v12330_v20 = vadd.f32 %v5126_v32, %v5054_v42  ;;  %5178 = vmatmul.bf16.gmra.mxu2 %v13027_v0  ;;  %5319 = vmatmul.bf16.gmra.mxu0 %v13028_v15  ;;  %v13032_v0 = vld [vmem:[#allocation179_spill] sm:$0xff]  ;;  %v13033_v15 = vld [vmem:[#allocation181_spill] sm:$0xff] }
 0x694   :  { %7418 = vmatmul.msk.bf16.gmra.mxu1 %vm2903_vm1, %v10938_v13 }
 0x695   :  { %5251 = vmatmul.bf16.gmra.mxu3 %v10936_v12  ;;  %v13029_v12 = vld [vmem:[#allocation147_spill] sm:$0xff] }
 0x696   :  { %v4912_v45 = vpop.f32.mrf.mxu2 }
 0x697   :  { %v4913_v4 = vadd.f32 %v4912_v45, %v12160_v58  ;;  %v13030_v58 = vld [vmem:[#allocation178_spill] sm:$0xff] }
 0x698   :  { %v4985_v39 = vpop.f32.mrf.mxu3  ;;  %v5055_v3 = vpop.f32.mrf.mxu0 }
 0x699   :  { %v4986_v48 = vadd.f32 %v4985_v39, %v4913_v4  ;;  %v5056_v1 = vadd.f32 %v5055_v3, %v4983_v43  ;;  %v5128_v7 = vpop.f32.mrf.mxu1 }
 0x69b   :  { %v12338_v8 = vadd.f32 %v5128_v7, %v5056_v1 }
 0x69e   :  { %v4914_v16 = vpop.f32.mrf.mxu2 }
 0x69f   :  { %v4915_v57 = vadd.f32 %v4914_v16, %v12173_v14 }
 0x6a0   :  { %v4987_v49 = vpop.f32.mrf.mxu3  ;;  %v5058_v2 = vpop.f32.mrf.mxu0 }
 0x6a1   :  { %v4988_v21 = vadd.f32 %v4987_v49, %v4915_v57  ;;  %v5059_v35 = vadd.f32 %v5058_v2, %v4986_v48  ;;  %v5131_v13 = vpop.f32.mrf.mxu1 }
 0x6a3   :  { %v12341_v28 = vadd.f32 %v5131_v13, %v5059_v35  ;;  %5183 = vmatmul.bf16.gmra.mxu2 %v13029_v12  ;;  %5324 = vmatmul.bf16.gmra.mxu0 %v10940_v26  ;;  %v13035_v13 = vld [vmem:[#allocation155_spill] sm:$0xff]  ;;  %v13036_v12 = vld [vmem:[#allocation182_spill] sm:$0xff] }
 0x6a4   :  { %7419 = vmatmul.msk.bf16.gmra.mxu1 %vm2903_vm1, %v10979_v9  ;;  %v13031_v9 = vld [vmem:[#allocation151_spill] sm:$0xff] }
 0x6a5   :  { %5256 = vmatmul.bf16.gmra.mxu3 %v13030_v58  ;;  %v13037_v58 = vld [vmem:[#allocation184_spill] sm:$0xff] }
 0x6a6   :  { %v4917_v46 = vpop.f32.mrf.mxu2 }
 0x6a7   :  { %v4918_v19 = vadd.f32 %v4917_v46, %v12175_v6  ;;  %v13034_v6 = vld [vmem:[#allocation180_spill] sm:$0xff]  ;;  %v13038_v46 = vld [vmem:[#allocation183_spill] sm:$0xff] }
 0x6a8   :  { %v4990_v14 = vpop.f32.mrf.mxu3  ;;  %v5060_v41 = vpop.f32.mrf.mxu0 }
 0x6a9   :  { %v4991_v24 = vadd.f32 %v4990_v14, %v4918_v19  ;;  %v5061_v22 = vadd.f32 %v5060_v41, %v4988_v21  ;;  %v5133_v38 = vpop.f32.mrf.mxu1 }
 0x6ab   :  { %v12349_v61 = vadd.f32 %v5133_v38, %v5061_v22 }
 0x6ae   :  { %v4919_v5 = vpop.f32.mrf.mxu2 }
 0x6b0   :  { %v4992_v10 = vpop.f32.mrf.mxu3  ;;  %v5063_v43 = vpop.f32.mrf.mxu0 }
 0x6b1   :  { %v5064_v42 = vadd.f32 %v5063_v43, %v4991_v24  ;;  %v5136_v26 = vpop.f32.mrf.mxu1 }
 0x6b3   :  { %v12351_v32 = vadd.f32 %v5136_v26, %v5064_v42  ;;  %5188 = vmatmul.bf16.gmra.mxu2 %v13031_v9  ;;  %5329 = vmatmul.bf16.gmra.mxu0 %v13032_v0 }
 0x6b4   :  { %7420 = vmatmul.msk.bf16.gmra.mxu1 %vm2903_vm1, %v13033_v15 }
 0x6b5   :  { %5261 = vmatmul.bf16.gmra.mxu3 %v13034_v6 }
 0x6b6   :  { %v5149_v45 = vpop.f32.mrf.mxu2 }
 0x6b7   :  { %v5150_v48 = vadd.f32 %v5149_v45, %v12207_v27 }
 0x6b8   :  { %v5222_v4 = vpop.f32.mrf.mxu3  ;;  %v5065_v39 = vpop.f32.mrf.mxu0 }
 0x6b9   :  { %v5138_v3 = vpop.f32.mrf.mxu1  ;;  %v5223_v7 = vadd.f32 %v5222_v4, %v5150_v48  ;;  %v13039_v4 = vld [vmem:[#allocation159_spill] sm:$0xff]  ;;  %v13040_v39 = vld [vmem:[#allocation185_spill] sm:$0xff] }
 0x6ba   :  { %v13042_v3 = vld [vmem:[#allocation186_spill] sm:$0xff] }
 0x6be   :  { %v5151_v1 = vpop.f32.mrf.mxu2 }
 0x6bf   :  { %v5152_v21 = vadd.f32 %v5151_v1, %v12214_v25 }
 0x6c0   :  { %v5224_v16 = vpop.f32.mrf.mxu3  ;;  %v5295_v57 = vpop.f32.mrf.mxu0 }
 0x6c1   :  { %v5296_v49 = vadd.f32 %v5295_v57, %v5223_v7  ;;  %v5368_v2 = vpop.f32.mrf.mxu1  ;;  %v5225_v14 = vadd.f32 %v5224_v16, %v5152_v21 }
 0x6c3   :  { %v5369_v35 = vadd.f32 %v5368_v2, %v5296_v49  ;;  %5193 = vmatmul.bf16.gmra.mxu2 %v13035_v13  ;;  %5334 = vmatmul.bf16.gmra.mxu0 %v13036_v12 }
 0x6c4   :  { %7421 = vmatmul.msk.bf16.gmra.mxu1 %vm2903_vm1, %v13037_v58 }
 0x6c5   :  { %5266 = vmatmul.bf16.gmra.mxu3 %v13038_v46  ;;  %v5433_v19 = vmax.f32 %v5369_v35, 0.0 }
 0x6c6   :  { %v5154_v27 = vpop.f32.mrf.mxu2 }
 0x6c7   :  { %5483 = vst [vmem:[%s12484_s3 + $0x8] sm:$0xff] %v5433_v19  ;;  %v5155_v38 = vadd.f32 %v5154_v27, %v12217_v30  ;;  %v13041_v30 = vld [vmem:[#allocation187_spill] sm:$0xff] }
 0x6c8   :  { %v5227_v41 = vpop.f32.mrf.mxu3  ;;  %v5297_v24 = vpop.f32.mrf.mxu0 }
 0x6c9   :  { %v5298_v25 = vadd.f32 %v5297_v24, %v5225_v14  ;;  %v5370_v22 = vpop.f32.mrf.mxu1  ;;  %v5228_v42 = vadd.f32 %v5227_v41, %v5155_v38  ;;  %v13043_v24 = vld [vmem:[#allocation162_spill] sm:$0xff] }
 0x6cb   :  { %v5371_v5 = vadd.f32 %v5370_v22, %v5298_v25  ;;  %v13044_v25 = vld [vmem:[#allocation188_spill] sm:$0xff] }
 0x6cd   :  { %v5435_v10 = vmax.f32 %v5371_v5, 0.0 }
 0x6ce   :  { %v5156_v43 = vpop.f32.mrf.mxu2 }
 0x6cf   :  { %5485 = vst [vmem:[%s12484_s3 + $0x18] sm:$0xff] %v5435_v10  ;;  %v5157_v6 = vadd.f32 %v5156_v43, %v12236_v44 }
 0x6d0   :  { %v5229_v26 = vpop.f32.mrf.mxu3  ;;  %v5300_v9 = vpop.f32.mrf.mxu0 }
 0x6d1   :  { %v5301_v0 = vadd.f32 %v5300_v9, %v5228_v42  ;;  %v5373_v15 = vpop.f32.mrf.mxu1  ;;  %v5230_v7 = vadd.f32 %v5229_v26, %v5157_v6 }
 0x6d3   :  { %v5374_v45 = vadd.f32 %v5373_v15, %v5301_v0  ;;  %5198 = vmatmul.bf16.gmra.mxu2 %v13039_v4  ;;  %5339 = vmatmul.bf16.gmra.mxu0 %v13040_v39 }
 0x6d4   :  { %7422 = vmatmul.msk.bf16.gmra.mxu1 %vm2903_vm1, %v13041_v30  ;;  %v13045_v30 = vld [vmem:[#allocation166_spill] sm:$0xff] }
 0x6d5   :  { %5271 = vmatmul.bf16.gmra.mxu3 %v13042_v3  ;;  %v5437_v48 = vmax.f32 %v5374_v45, 0.0 }
 0x6d6   :  { %v5159_v1 = vpop.f32.mrf.mxu2 }
 0x6d7   :  { %5487 = vst [vmem:[%s12484_s3 + $0x28] sm:$0xff] %v5437_v48  ;;  %v5160_v2 = vadd.f32 %v5159_v1, %v12245_v18 }
 0x6d8   :  { %v5232_v16 = vpop.f32.mrf.mxu3  ;;  %v5302_v57 = vpop.f32.mrf.mxu0 }
 0x6d9   :  { %v5303_v44 = vadd.f32 %v5302_v57, %v5230_v7  ;;  %v5375_v49 = vpop.f32.mrf.mxu1  ;;  %v5233_v12 = vadd.f32 %v5232_v16, %v5160_v2 }
 0x6db   :  { %v5376_v21 = vadd.f32 %v5375_v49, %v5303_v44 }
 0x6dd   :  { %v5439_v35 = vmax.f32 %v5376_v21, 0.0 }
 0x6de   :  { %v5161_v13 = vpop.f32.mrf.mxu2 }
 0x6df   :  { %5489 = vst [vmem:[%s12484_s3 + $0x38] sm:$0xff] %v5439_v35  ;;  %v5162_v14 = vadd.f32 %v5161_v13, %v12252_v36 }
 0x6e0   :  { %v5234_v58 = vpop.f32.mrf.mxu3  ;;  %v5305_v46 = vpop.f32.mrf.mxu0 }
 0x6e1   :  { %v5306_v19 = vadd.f32 %v5305_v46, %v5233_v12  ;;  %v5378_v27 = vpop.f32.mrf.mxu1  ;;  %v5235_v38 = vadd.f32 %v5234_v58, %v5162_v14 }
 0x6e3   :  { %v5379_v41 = vadd.f32 %v5378_v27, %v5306_v19  ;;  %5203 = vmatmul.bf16.gmra.mxu2 %v13043_v24  ;;  %5344 = vmatmul.bf16.gmra.mxu0 %v13044_v25 }
 0x6e4   :  { %7423 = vmatmul.msk.bf16.gmra.mxu1 %vm2903_vm1, %v11193_v37 }
 0x6e5   :  { %5276 = vmatmul.bf16.gmra.mxu3 %v11191_v62  ;;  %v5441_v18 = vmax.f32 %v5379_v41, 0.0 }
 0x6e6   :  { %v5164_v22 = vpop.f32.mrf.mxu2 }
 0x6e7   :  { %5491 = vst [vmem:[%s12484_s3 + $0x48] sm:$0xff] %v5441_v18  ;;  %v5165_v42 = vadd.f32 %v5164_v22, %v12255_v33 }
 0x6e8   :  { %v5237_v5 = vpop.f32.mrf.mxu3  ;;  %v5307_v10 = vpop.f32.mrf.mxu0 }
 0x6e9   :  { %v5308_v36 = vadd.f32 %v5307_v10, %v5235_v38  ;;  %v5380_v43 = vpop.f32.mrf.mxu1  ;;  %v5238_v15 = vadd.f32 %v5237_v5, %v5165_v42 }
 0x6eb   :  { %v5381_v26 = vadd.f32 %v5380_v43, %v5308_v36 }
 0x6ed   :  { %v5443_v9 = vmax.f32 %v5381_v26, 0.0 }
 0x6ee   :  { %v5166_v0 = vpop.f32.mrf.mxu2 }
 0x6ef   :  { %5493 = vst [vmem:[%s12484_s3 + $0x58] sm:$0xff] %v5443_v9  ;;  %v5167_v4 = vadd.f32 %v5166_v0, %v12262_v29 }
 0x6f0   :  { %v5239_v37 = vpop.f32.mrf.mxu3  ;;  %v5310_v62 = vpop.f32.mrf.mxu0 }
 0x6f1   :  { %v5311_v6 = vadd.f32 %v5310_v62, %v5238_v15  ;;  %v5383_v45 = vpop.f32.mrf.mxu1  ;;  %v5240_v48 = vadd.f32 %v5239_v37, %v5167_v4 }
 0x6f3   :  { %v5384_v39 = vadd.f32 %v5383_v45, %v5311_v6  ;;  %5208 = vmatmul.bf16.gmra.mxu2 %v13045_v30  ;;  %5349 = vmatmul.bf16.gmra.mxu0 %v11195_v63 }
 0x6f4   :  { %7424 = vmatmul.msk.bf16.gmra.mxu1 %vm2903_vm1, %v11237_v55 }
 0x6f5   :  { %5281 = vmatmul.bf16.gmra.mxu3 %v11235_v11  ;;  %v5445_v33 = vmax.f32 %v5384_v39, 0.0 }
 0x6f6   :  { %v5169_v3 = vpop.f32.mrf.mxu2 }
 0x6f7   :  { %5495 = vst [vmem:[%s12484_s3 + $0x68] sm:$0xff] %v5445_v33  ;;  %v5170_v57 = vadd.f32 %v5169_v3, %v12265_v50 }
 0x6f8   :  { %v5242_v1 = vpop.f32.mrf.mxu3  ;;  %v5312_v7 = vpop.f32.mrf.mxu0 }
 0x6f9   :  { %v5313_v29 = vadd.f32 %v5312_v7, %v5240_v48  ;;  %v5385_v16 = vpop.f32.mrf.mxu1  ;;  %v5243_v2 = vadd.f32 %v5242_v1, %v5170_v57 }
 0x6fb   :  { %v5386_v44 = vadd.f32 %v5385_v16, %v5313_v29 }
 0x6fd   :  { %v5447_v63 = vmax.f32 %v5386_v44, 0.0 }
 0x6fe   :  { %v5171_v49 = vpop.f32.mrf.mxu2 }
 0x6ff   :  { %5497 = vst [vmem:[%s12484_s3 + $0x78] sm:$0xff] %v5447_v63  ;;  %v5172_v13 = vadd.f32 %v5171_v49, %v12272_v51 }
 0x700   :  { %v5244_v11 = vpop.f32.mrf.mxu3  ;;  %v5315_v55 = vpop.f32.mrf.mxu0 }
 0x701   :  { %v5316_v21 = vadd.f32 %v5315_v55, %v5243_v2  ;;  %v5388_v35 = vpop.f32.mrf.mxu1  ;;  %v5245_v46 = vadd.f32 %v5244_v11, %v5172_v13 }
 0x703   :  { %v5389_v12 = vadd.f32 %v5388_v35, %v5316_v21  ;;  %5354 = vmatmul.bf16.gmra.mxu0 %v11239_v47 }
 0x704   :  { %7425 = vmatmul.msk.bf16.gmra.mxu1 %vm2903_vm1, %v11273_v56 }
 0x705   :  { %v5449_v50 = vmax.f32 %v5389_v12, 0.0 }
 0x706   :  { %v5174_v58 = vpop.f32.mrf.mxu2 }
 0x707   :  { %5499 = vst [vmem:[%s12484_s3 + $0x88] sm:$0xff] %v5449_v50  ;;  %v5175_v24 = vadd.f32 %v5174_v58, %v12275_v17 }
 0x708   :  { %v5247_v19 = vpop.f32.mrf.mxu3  ;;  %v5317_v27 = vpop.f32.mrf.mxu0 }
 0x709   :  { %v5318_v14 = vadd.f32 %v5317_v27, %v5245_v46  ;;  %v5390_v41 = vpop.f32.mrf.mxu1  ;;  %v5248_v47 = vadd.f32 %v5247_v19, %v5175_v24 }
 0x70b   :  { %v5391_v51 = vadd.f32 %v5390_v41, %v5318_v14 }
 0x70d   :  { %v5451_v25 = vmax.f32 %v5391_v51, 0.0 }
 0x70e   :  { %v5176_v18 = vpop.f32.mrf.mxu2 }
 0x70f   :  { %5501 = vst [vmem:[%s12484_s3 + $0x98] sm:$0xff] %v5451_v25  ;;  %v5177_v10 = vadd.f32 %v5176_v18, %v12283_v60 }
 0x710   :  { %v5249_v56 = vpop.f32.mrf.mxu3  ;;  %v5320_v22 = vpop.f32.mrf.mxu0 }
 0x711   :  { %v5321_v38 = vadd.f32 %v5320_v22, %v5248_v47  ;;  %v5393_v5 = vpop.f32.mrf.mxu1  ;;  %v5250_v26 = vadd.f32 %v5249_v56, %v5177_v10 }
 0x713   :  { %v5394_v36 = vadd.f32 %v5393_v5, %v5321_v38 }
 0x715   :  { %v5453_v43 = vmax.f32 %v5394_v36, 0.0 }
 0x716   :  { %v5179_v42 = vpop.f32.mrf.mxu2 }
 0x717   :  { %5503 = vst [vmem:[%s12484_s3 + $0xa8] sm:$0xff] %v5453_v43  ;;  %v5180_v37 = vadd.f32 %v5179_v42, %v12286_v40 }
 0x718   :  { %v5252_v17 = vpop.f32.mrf.mxu3  ;;  %v5322_v9 = vpop.f32.mrf.mxu0 }
 0x719   :  { %v5323_v0 = vadd.f32 %v5322_v9, %v5250_v26  ;;  %v5395_v15 = vpop.f32.mrf.mxu1  ;;  %v5253_v4 = vadd.f32 %v5252_v17, %v5180_v37 }
 0x71b   :  { %v5396_v62 = vadd.f32 %v5395_v15, %v5323_v0 }
 0x71d   :  { %v5455_v6 = vmax.f32 %v5396_v62, 0.0 }
 0x71e   :  { %v5181_v45 = vpop.f32.mrf.mxu2 }
 0x71f   :  { %5505 = vst [vmem:[%s12484_s3 + $0xb8] sm:$0xff] %v5455_v6  ;;  %v5182_v3 = vadd.f32 %v5181_v45, %v12294_v34 }
 0x720   :  { %v5254_v60 = vpop.f32.mrf.mxu3  ;;  %v5325_v39 = vpop.f32.mrf.mxu0 }
 0x721   :  { %v5326_v30 = vadd.f32 %v5325_v39, %v5253_v4  ;;  %v5398_v33 = vpop.f32.mrf.mxu1  ;;  %v5255_v29 = vadd.f32 %v5254_v60, %v5182_v3 }
 0x723   :  { %v5399_v48 = vadd.f32 %v5398_v33, %v5326_v30 }
 0x725   :  { %v5457_v1 = vmax.f32 %v5399_v48, 0.0 }
 0x726   :  { %v5184_v7 = vpop.f32.mrf.mxu2 }
 0x727   :  { %5507 = vst [vmem:[%s12484_s3 + $0xc8] sm:$0xff] %v5457_v1  ;;  %v5185_v63 = vadd.f32 %v5184_v7, %v12297_v31 }
 0x728   :  { %v5257_v40 = vpop.f32.mrf.mxu3  ;;  %v5327_v16 = vpop.f32.mrf.mxu0 }
 0x729   :  { %v5328_v57 = vadd.f32 %v5327_v16, %v5255_v29  ;;  %v5400_v44 = vpop.f32.mrf.mxu1  ;;  %v5258_v55 = vadd.f32 %v5257_v40, %v5185_v63 }
 0x72b   :  { %v5401_v49 = vadd.f32 %v5400_v44, %v5328_v57 }
 0x72d   :  { %v5459_v2 = vmax.f32 %v5401_v49, 0.0 }
 0x72e   :  { %v5186_v11 = vpop.f32.mrf.mxu2 }
 0x72f   :  { %5509 = vst [vmem:[%s12484_s3 + $0xd8] sm:$0xff] %v5459_v2  ;;  %v5187_v12 = vadd.f32 %v5186_v11, %v12305_v53 }
 0x730   :  { %v5259_v34 = vpop.f32.mrf.mxu3  ;;  %v5330_v21 = vpop.f32.mrf.mxu0 }
 0x731   :  { %v5331_v35 = vadd.f32 %v5330_v21, %v5258_v55  ;;  %v5403_v13 = vpop.f32.mrf.mxu1  ;;  %v5260_v19 = vadd.f32 %v5259_v34, %v5187_v12 }
 0x733   :  { %v5404_v50 = vadd.f32 %v5403_v13, %v5331_v35 }
 0x735   :  { %v5461_v58 = vmax.f32 %v5404_v50, 0.0 }
 0x736   :  { %v5189_v46 = vpop.f32.mrf.mxu2 }
 0x737   :  { %5511 = vst [vmem:[%s12484_s3 + $0xe8] sm:$0xff] %v5461_v58  ;;  %v5190_v24 = vadd.f32 %v5189_v46, %v12308_v59 }
 0x738   :  { %v5262_v31 = vpop.f32.mrf.mxu3  ;;  %v5332_v27 = vpop.f32.mrf.mxu0 }
 0x739   :  { %v5333_v14 = vadd.f32 %v5332_v27, %v5260_v19  ;;  %v5405_v41 = vpop.f32.mrf.mxu1  ;;  %v5263_v47 = vadd.f32 %v5262_v31, %v5190_v24 }
 0x73b   :  { %v5406_v51 = vadd.f32 %v5405_v41, %v5333_v14 }
 0x73d   :  { %v5463_v25 = vmax.f32 %v5406_v51, 0.0 }
 0x73e   :  { %v5191_v18 = vpop.f32.mrf.mxu2 }
 0x73f   :  { %5513 = vst [vmem:[%s12484_s3 + $0xf8] sm:$0xff] %v5463_v25  ;;  %v5192_v5 = vadd.f32 %v5191_v18, %v12316_v52 }
 0x740   :  { %v5264_v53 = vpop.f32.mrf.mxu3  ;;  %v5335_v56 = vpop.f32.mrf.mxu0 }
 0x741   :  { %v5336_v22 = vadd.f32 %v5335_v56, %v5263_v47  ;;  %v5408_v38 = vpop.f32.mrf.mxu1  ;;  %v5265_v42 = vadd.f32 %v5264_v53, %v5192_v5 }
 0x743   :  { %v5409_v10 = vadd.f32 %v5408_v38, %v5336_v22 }
 0x745   :  { %v5465_v36 = vmax.f32 %v5409_v10, 0.0 }
 0x746   :  { %v5194_v43 = vpop.f32.mrf.mxu2 }
 0x747   :  { %5515 = vst [vmem:[%s12484_s3 + $0x108] sm:$0xff] %v5465_v36  ;;  %v5195_v0 = vadd.f32 %v5194_v43, %v12319_v23 }
 0x748   :  { %v5267_v59 = vpop.f32.mrf.mxu3  ;;  %v5337_v26 = vpop.f32.mrf.mxu0 }
 0x749   :  { %v5338_v17 = vadd.f32 %v5337_v26, %v5265_v42  ;;  %v5410_v9 = vpop.f32.mrf.mxu1  ;;  %v5268_v6 = vadd.f32 %v5267_v59, %v5195_v0 }
 0x74b   :  { %v5411_v15 = vadd.f32 %v5410_v9, %v5338_v17 }
 0x74d   :  { %v5467_v37 = vmax.f32 %v5411_v15, 0.0 }
 0x74e   :  { %v5196_v62 = vpop.f32.mrf.mxu2 }
 0x74f   :  { %5517 = vst [vmem:[%s12484_s3 + $0x118] sm:$0xff] %v5467_v37  ;;  %v5197_v39 = vadd.f32 %v5196_v62, %v12327_v54 }
 0x750   :  { %v5269_v52 = vpop.f32.mrf.mxu3  ;;  %v5340_v45 = vpop.f32.mrf.mxu0 }
 0x751   :  { %v5341_v4 = vadd.f32 %v5340_v45, %v5268_v6  ;;  %v5413_v60 = vpop.f32.mrf.mxu1  ;;  %v5270_v48 = vadd.f32 %v5269_v52, %v5197_v39 }
 0x753   :  { %v5414_v30 = vadd.f32 %v5413_v60, %v5341_v4 }
 0x755   :  { %v5469_v33 = vmax.f32 %v5414_v30, 0.0 }
 0x756   :  { %v5199_v3 = vpop.f32.mrf.mxu2 }
 0x757   :  { %5519 = vst [vmem:[%s12484_s3 + $0x128] sm:$0xff] %v5469_v33  ;;  %v5200_v40 = vadd.f32 %v5199_v3, %v12330_v20 }
 0x758   :  { %v5272_v23 = vpop.f32.mrf.mxu3  ;;  %v5342_v1 = vpop.f32.mrf.mxu0 }
 0x759   :  { %v5343_v7 = vadd.f32 %v5342_v1, %v5270_v48  ;;  %v5415_v29 = vpop.f32.mrf.mxu1  ;;  %v5273_v63 = vadd.f32 %v5272_v23, %v5200_v40 }
 0x75b   :  { %v5416_v16 = vadd.f32 %v5415_v29, %v5343_v7 }
 0x75d   :  { %v5471_v57 = vmax.f32 %v5416_v16, 0.0 }
 0x75e   :  { %v5201_v44 = vpop.f32.mrf.mxu2 }
 0x75f   :  { %5521 = vst [vmem:[%s12484_s3 + $0x138] sm:$0xff] %v5471_v57  ;;  %v5202_v55 = vadd.f32 %v5201_v44, %v12338_v8 }
 0x760   :  { %v5274_v54 = vpop.f32.mrf.mxu3  ;;  %v5345_v49 = vpop.f32.mrf.mxu0 }
 0x761   :  { %v5346_v2 = vadd.f32 %v5345_v49, %v5273_v63  ;;  %v5418_v11 = vpop.f32.mrf.mxu1  ;;  %v5275_v13 = vadd.f32 %v5274_v54, %v5202_v55 }
 0x763   :  { %v5419_v34 = vadd.f32 %v5418_v11, %v5346_v2 }
 0x765   :  { %v5473_v21 = vmax.f32 %v5419_v34, 0.0 }
 0x766   :  { %v5204_v35 = vpop.f32.mrf.mxu2 }
 0x767   :  { %5523 = vst [vmem:[%s12484_s3 + $0x148] sm:$0xff] %v5473_v21  ;;  %v5205_v46 = vadd.f32 %v5204_v35, %v12341_v28 }
 0x768   :  { %v5277_v20 = vpop.f32.mrf.mxu3  ;;  %v5347_v12 = vpop.f32.mrf.mxu0 }
 0x769   :  { %v5348_v50 = vadd.f32 %v5347_v12, %v5275_v13  ;;  %v5420_v58 = vpop.f32.mrf.mxu1  ;;  %v5278_v14 = vadd.f32 %v5277_v20, %v5205_v46 }
 0x76b   :  { %v5421_v19 = vadd.f32 %v5420_v58, %v5348_v50 }
 0x76d   :  { %v5475_v31 = vmax.f32 %v5421_v19, 0.0 }
 0x76e   :  { %v5206_v27 = vpop.f32.mrf.mxu2 }
 0x76f   :  { %5525 = vst [vmem:[%s12484_s3 + $0x158] sm:$0xff] %v5475_v31  ;;  %v5207_v25 = vadd.f32 %v5206_v27, %v12349_v61 }
 0x770   :  { %v5279_v8 = vpop.f32.mrf.mxu3  ;;  %v5350_v41 = vpop.f32.mrf.mxu0 }
 0x771   :  { %v5351_v24 = vadd.f32 %v5350_v41, %v5278_v14  ;;  %v5423_v51 = vpop.f32.mrf.mxu1  ;;  %v5280_v56 = vadd.f32 %v5279_v8, %v5207_v25 }
 0x773   :  { %v5424_v18 = vadd.f32 %v5423_v51, %v5351_v24 }
 0x775   :  { %v5477_v47 = vmax.f32 %v5424_v18, 0.0 }
 0x776   :  { %v5209_v53 = vpop.f32.mrf.mxu2 }
 0x777   :  { %5527 = vst [vmem:[%s12484_s3 + $0x168] sm:$0xff] %v5477_v47  ;;  %v5210_v10 = vadd.f32 %v5209_v53, %v12351_v32 }
 0x778   :  { %v5282_v28 = vpop.f32.mrf.mxu3  ;;  %v5352_v22 = vpop.f32.mrf.mxu0 }
 0x779   :  { %v5353_v38 = vadd.f32 %v5352_v22, %v5280_v56  ;;  %v5425_v5 = vpop.f32.mrf.mxu1  ;;  %v5283_v59 = vadd.f32 %v5282_v28, %v5210_v10 }
 0x77b   :  { %v5426_v36 = vadd.f32 %v5425_v5, %v5353_v38 }
 0x77d   :  { %v5479_v43 = vmax.f32 %v5426_v36, 0.0 }
 0x77e   :  { %v5211_v42 = vpop.f32.mrf.mxu2 }
 0x77f   :  { %5529 = vst [vmem:[%s12484_s3 + $0x178] sm:$0xff] %v5479_v43 }
 0x780   :  { %v5284_v61 = vpop.f32.mrf.mxu3  ;;  %v5355_v26 = vpop.f32.mrf.mxu0 }
 0x781   :  { %v5356_v17 = vadd.f32 %v5355_v26, %v5283_v59  ;;  %v5428_v9 = vpop.f32.mrf.mxu1 }
 0x783   :  { %v5429_v0 = vadd.f32 %v5428_v9, %v5356_v17 }
 0x785   :  { %v5481_v15 = vmax.f32 %v5429_v0, 0.0 }
 0x787   :  { %5531 = vst [vmem:[%s12484_s3 + $0x188] sm:$0xff] %v5481_v15 }
 0x788   :  { %v5357_v37 = vpop.f32.mrf.mxu0 }
 0x789   :  { %v5430_v32 = vpop.f32.mrf.mxu1 }

</bundles_post_ra>
